<compile_context>
chip_gen: v7x
topology: tpu7x:2x2x1
jax: 0.10.0
libtpu: 0.0.40
codegen_flags: <defaults>
</compile_context>

<pallas_src>
import functools

import numpy as np
import jax
import jax.numpy as jnp
from jax import lax
from jax.experimental import pallas as pl
from jax.experimental.pallas import tpu as pltpu


def disc_block_kernel(x_ref, w1_ref, b1_ref, w2_ref, b2_ref, o_ref, pbuf_ref,
                      *, H, W):
    """Fused conv3x3+LReLU -> conv3x3+LReLU -> AvgPool2d(2), one batch element.

    x_ref   : (1, H*W, Cin)  f32   flat (h*W+w, c) image
    w*_ref  : (9, Cin_, C)   bf16  per-tap conv weights, tap index = ky*3+kx
    b*_ref  : (1, C)         f32   conv biases
    o_ref   : (1, Ho*Wo, C)  f32   flat pooled output
    pbuf_ref: (H*W, C)       f32   VMEM scratch holding conv2's output for the
                                   strided pooling reads
    """
    HW = H * W
    Ho, Wo = H // 2, W // 2
    C = o_ref.shape[-1]

    # Flat-index edge masks: which shifted taps fall outside the zero padding.
    idx = lax.broadcasted_iota(jnp.int32, (HW, 1), 0)
    col = idx % W
    top_edge = idx < W
    bottom_edge = idx >= HW - W
    left_edge = col == 0
    right_edge = col == W - 1

    def conv3x3_lrelu(img, w_ref, b_ref):
        # img: (HW, Cin') f32.  The nine taps are the flat image rotated by
        # {-W, 0, +W} x {-1, 0, +1} positions (XLU rolls), with wrapped-around
        # / out-of-image positions masked to the zero padding.  Each tap feeds
        # one (HW, Cin') @ (Cin', C) bf16 MXU matmul, accumulated in f32 --
        # no im2col patches slab is ever materialized.
        zi = jnp.zeros_like(img)
        up = jnp.where(top_edge, zi, pltpu.roll(img, W, axis=0))            # ky = 0
        down = jnp.where(bottom_edge, zi, pltpu.roll(img, HW - W, axis=0))  # ky = 2
        acc = jnp.zeros((HW, C), jnp.float32)
        for ky, r in enumerate((up, img, down)):
            zr = jnp.zeros_like(r)
            lft = jnp.where(left_edge, zr, pltpu.roll(r, 1, axis=0))        # kx = 0
            rgt = jnp.where(right_edge, zr, pltpu.roll(r, HW - 1, axis=0))  # kx = 2
            for kx, tap in enumerate((lft, r, rgt)):
                acc = acc + jnp.dot(tap.astype(jnp.bfloat16),
                                    w_ref[3 * ky + kx],
                                    preferred_element_type=jnp.float32)
        y = acc + b_ref[...]
        return jnp.where(y >= 0.0, y, 0.2 * y)          # LeakyReLU(0.2)

    y1 = conv3x3_lrelu(x_ref[0], w1_ref, b1_ref)         # (HW, C) f32
    y2 = conv3x3_lrelu(y1, w2_ref, b2_ref)               # (HW, C) f32

    # AvgPool2d(2) on the VPU in f32 (no pooling matrix, no MXU work):
    #   stage A: horizontal pair-sum via stride-2 sublane reads,
    #   stage B: vertical row-pair add per pooled row.
    pbuf_ref[...] = y2
    even = pbuf_ref[pl.ds(0, HW // 2, stride=2), :]      # y2[h, 2*wo]
    odd = pbuf_ref[pl.ds(1, HW // 2, stride=2), :]       # y2[h, 2*wo+1]
    hsum = even + odd                                    # (H*Wo, C), flat h*Wo+wo
    for ho in range(Ho):
        o_ref[0, ho * Wo:(ho + 1) * Wo, :] = 0.25 * (
            hsum[2 * ho * Wo:(2 * ho + 1) * Wo, :]
            + hsum[(2 * ho + 1) * Wo:(2 * ho + 2) * Wo, :])


def final_linear_kernel(x_ref, w_ref, b_ref, o_ref):
    o_ref[...] = jnp.dot(x_ref[...], w_ref[...],
                         preferred_element_type=jnp.float32) + b_ref[...]


def _disc_block(x_flat, bp, H, W):
    """One DiscriminatorBlock. x_flat: (N, H*W, Cin) -> (N, (H//2)*(W//2), Cout)."""
    N, HW, Cin = x_flat.shape
    C = bp["w1"].shape[-1]
    Ho, Wo = H // 2, W // 2
    HWo = Ho * Wo

    return pl.pallas_call(
        functools.partial(disc_block_kernel, H=H, W=W),
        out_shape=jax.ShapeDtypeStruct((N, HWo, C), jnp.float32),
        grid=(N,),
        in_specs=[
            pl.BlockSpec((1, HW, Cin), lambda n: (n, 0, 0)),
            pl.BlockSpec((9, Cin, C), lambda n: (0, 0, 0)),
            pl.BlockSpec((1, C), lambda n: (0, 0)),
            pl.BlockSpec((9, C, C), lambda n: (0, 0, 0)),
            pl.BlockSpec((1, C), lambda n: (0, 0)),
        ],
        out_specs=pl.BlockSpec((1, HWo, C), lambda n: (n, 0, 0)),
        scratch_shapes=[pltpu.VMEM((HW, C), jnp.float32)],
        compiler_params=pltpu.CompilerParams(
            dimension_semantics=("parallel",)),
    )(x_flat, bp["w1"], bp["b1"], bp["w2"], bp["b2"])


def prepare_params(params):
    """One-time (outside jit) conversion of PyTorch-layout params to kernel layout."""
    blocks = []
    for bp in params["blocks"]:
        cout, cin = bp["w1"].shape[0], bp["w1"].shape[1]
        # per-tap weight layout: (ky*3+kx, ci, cout), bf16 for the MXU
        w1 = jnp.transpose(bp["w1"], (2, 3, 1, 0)).reshape(9, cin, cout).astype(jnp.bfloat16)
        w2 = jnp.transpose(bp["w2"], (2, 3, 1, 0)).reshape(9, cout, cout).astype(jnp.bfloat16)
        blocks.append({
            "w1": w1, "b1": bp["b1"].reshape(1, cout).astype(jnp.float32),
            "w2": w2, "b2": bp["b2"].reshape(1, cout).astype(jnp.float32),
        })
    c_last = params["blocks"][-1]["w1"].shape[0]
    # Our flatten order is (h, w, c); PyTorch nn.Flatten on NCHW is (c, h, w),
    # so permute the fc weight once here instead of the activations.
    fc_w = params["fc_w"].reshape(1, c_last, 2, 2)
    fc_w = jnp.transpose(fc_w, (0, 2, 3, 1)).reshape(1, 4 * c_last)
    fc_w = jnp.transpose(fc_w, (1, 0)).astype(jnp.float32)       # (4*C_last, 1)
    fc_b = params["fc_b"].reshape(1, 1).astype(jnp.float32)
    return {"blocks": blocks, "fc_w": fc_w, "fc_b": fc_b}


def discriminator_forward(x_nchw, params):
    """Pallas forward of Discriminator.  x_nchw: (N, C0, H, W) f32 -> (N, 1)."""
    N, C0, H, W = x_nchw.shape
    # flat spatial-major / channel-minor activation layout: (N, H*W, C)
    x = jnp.transpose(x_nchw, (0, 2, 3, 1)).reshape(N, H * W, C0)
    for bp in params["blocks"]:
        x = _disc_block(x, bp, H, W)
        H, W = H // 2, W // 2

    C_last = params["blocks"][-1]["w1"].shape[-1]
    flat = x.reshape(N, H * W * C_last)                   # (N, 4*C_last)

    return pl.pallas_call(
        final_linear_kernel,
        out_shape=jax.ShapeDtypeStruct((N, 1), jnp.float32),
        in_specs=[pl.BlockSpec(memory_space=pltpu.MemorySpace.VMEM)] * 3,
        out_specs=pl.BlockSpec(memory_space=pltpu.MemorySpace.VMEM),
    )(flat, params["fc_w"], params["fc_b"])


def init_params(key, channels):
    blocks = []
    for i in range(len(channels) - 1):
        cin, cout = channels[i], channels[i + 1]
        key, k1, k2, k3, k4 = jax.random.split(key, 5)
        blocks.append({
            "w1": jax.random.normal(k1, (cout, cin, 3, 3), jnp.float32) / np.sqrt(9 * cin),
            "b1": 0.1 * jax.random.normal(k2, (cout,), jnp.float32),
            "w2": jax.random.normal(k3, (cout, cout, 3, 3), jnp.float32) / np.sqrt(9 * cout),
            "b2": 0.1 * jax.random.normal(k4, (cout,), jnp.float32),
        })
    key, kw, kb = jax.random.split(key, 3)
    fc_in = channels[-1] * 2 * 2
    fc_w = jax.random.normal(kw, (1, fc_in), jnp.float32) / np.sqrt(fc_in)
    fc_b = 0.1 * jax.random.normal(kb, (1,), jnp.float32)
    return {"blocks": blocks, "fc_w": fc_w, "fc_b": fc_b}


def reference(x, params):
    """Pure-JAX f32 reference of the PyTorch Discriminator forward."""
    y = x
    for bp in params["blocks"]:
        for w, b in ((bp["w1"], bp["b1"]), (bp["w2"], bp["b2"])):
            y = lax.conv_general_dilated(
                y, w, (1, 1), [(1, 1), (1, 1)],
                dimension_numbers=("NCHW", "OIHW", "NCHW"),
                precision=lax.Precision.HIGHEST)
            y = y + b.reshape(1, -1, 1, 1)
            y = jnp.where(y >= 0, y, 0.2 * y)
        n, c, h, w_ = y.shape
        y = y.reshape(n, c, h // 2, 2, w_ // 2, 2).mean(axis=(3, 5))   # AvgPool2d(2)
    n = y.shape[0]
    flat = y.reshape(n, -1)                                            # NCHW flatten
    return jnp.dot(flat, params["fc_w"].T,
                   precision=lax.Precision.HIGHEST) + params["fc_b"]


if __name__ == "__main__":
    channels = [4, 8, 16, 32]          # 3 blocks: 16x16 -> 8x8 -> 4x4 -> 2x2
    key = jax.random.PRNGKey(0)
    kp, kx = jax.random.split(key)
    params = init_params(kp, channels)
    x = jax.random.normal(kx, (2, channels[0], 16, 16), jnp.float32)

    prepped = prepare_params(params)   # weight relayout/cast once, outside jit
    fwd = jax.jit(discriminator_forward)
    out = jax.block_until_ready(fwd(x, prepped))

    ref = reference(x, params)
    np.testing.assert_allclose(np.asarray(out), np.asarray(ref),
                               rtol=5e-2, atol=5e-2)
    print("KERNEL_OK")
</pallas_src>

<mosaic_0001>
module attributes {stable_mosaic.version = 11 : i64} {
  func.func @disc_block_kernel(%arg0: i32, %arg1: memref<1x256x4xf32, #tpu.memory_space<vmem>>, %arg2: memref<9x4x8xbf16, #tpu.memory_space<vmem>>, %arg3: memref<1x8xf32, #tpu.memory_space<vmem>>, %arg4: memref<9x8x8xbf16, #tpu.memory_space<vmem>>, %arg5: memref<1x8xf32, #tpu.memory_space<vmem>>, %arg6: memref<1x64x8xf32, #tpu.memory_space<vmem>>, %arg7: memref<256x8xf32, #tpu.memory_space<vmem>>) attributes {dimension_semantics = [#tpu.dimension_semantics<parallel>], iteration_bounds = array<i64: 2>, scalar_prefetch = 0 : i64, scratch_operands = 1 : i64, tpu.core_type = #tpu.core_type<tc>, window_params = [{transform_indices = @transform_0, window_bounds = array<i64: 1, 256, 4>}, {pipeline_mode = #tpu.pipeline_mode<synchronous>, transform_indices = @transform_1, window_bounds = array<i64: 9, 4, 8>}, {pipeline_mode = #tpu.pipeline_mode<synchronous>, transform_indices = @transform_2, window_bounds = array<i64: 1, 8>}, {pipeline_mode = #tpu.pipeline_mode<synchronous>, transform_indices = @transform_3, window_bounds = array<i64: 9, 8, 8>}, {pipeline_mode = #tpu.pipeline_mode<synchronous>, transform_indices = @transform_4, window_bounds = array<i64: 1, 8>}, {transform_indices = @transform_5, window_bounds = array<i64: 1, 64, 8>}]} {
    %0 = tpu.iota {dimensions = array<i32: 0>} : vector<256x1xi32>
    %c16_i32 = arith.constant 16 : i32
    %c0_i32 = arith.constant 0 : i32
    %1 = arith.cmpi eq, %c16_i32, %c0_i32 : i32
    %c1_i32 = arith.constant 1 : i32
    %2 = arith.select %1, %c1_i32, %c16_i32 : i32
    %3 = vector.broadcast %2 : i32 to vector<256x1xi32>
    %4 = arith.remsi %0, %3 : vector<256x1xi32>
    %c0_i32_0 = arith.constant 0 : i32
    %5 = vector.broadcast %c0_i32_0 : i32 to vector<256x1xi32>
    %6 = arith.cmpi ne, %4, %5 : vector<256x1xi32>
    %c0_i32_1 = arith.constant 0 : i32
    %7 = vector.broadcast %c0_i32_1 : i32 to vector<256x1xi32>
    %8 = arith.cmpi slt, %4, %7 : vector<256x1xi32>
    %c0_i32_2 = arith.constant 0 : i32
    %9 = arith.cmpi slt, %2, %c0_i32_2 : i32
    %10 = vector.broadcast %9 : i1 to vector<256x1xi1>
    %11 = vector.broadcast %10 : vector<256x1xi1> to vector<256x1xi1>
    %12 = arith.xori %8, %11 : vector<256x1xi1>
    %13 = arith.andi %12, %6 : vector<256x1xi1>
    %14 = vector.broadcast %2 : i32 to vector<256x1xi32>
    %15 = arith.addi %4, %14 : vector<256x1xi32>
    %16 = arith.select %13, %15, %4 : vector<256x1xi1>, vector<256x1xi32>
    %c16_i32_3 = arith.constant 16 : i32
    %17 = vector.broadcast %c16_i32_3 : i32 to vector<256x1xi32>
    %18 = arith.cmpi slt, %0, %17 : vector<256x1xi32>
    %c240_i32 = arith.constant 240 : i32
    %19 = vector.broadcast %c240_i32 : i32 to vector<256x1xi32>
    %20 = arith.cmpi sge, %0, %19 : vector<256x1xi32>
    %c0_i32_4 = arith.constant 0 : i32
    %21 = vector.broadcast %c0_i32_4 : i32 to vector<256x1xi32>
    %22 = arith.cmpi eq, %16, %21 : vector<256x1xi32>
    %c15_i32 = arith.constant 15 : i32
    %23 = vector.broadcast %c15_i32 : i32 to vector<256x1xi32>
    %24 = arith.cmpi eq, %16, %23 : vector<256x1xi32>
    %c0 = arith.constant 0 : index
    %c0_5 = arith.constant 0 : index
    %c0_6 = arith.constant 0 : index
    %25 = vector.load %arg1[%c0, %c0_5, %c0_6] : memref<1x256x4xf32, #tpu.memory_space<vmem>>, vector<1x256x4xf32>
    %26 = vector.shape_cast %25 : vector<1x256x4xf32> to vector<256x4xf32>
    %cst = arith.constant 0.000000e+00 : f32
    %27 = vector.broadcast %cst : f32 to vector<256x4xf32>
    %c16_i32_7 = arith.constant 16 : i32
    %28 = tpu.dynamic_rotate %26 by %c16_i32_7 dim 0 : vector<256x4xf32>, i32 -> vector<256x4xf32>
    %29 = vector.shape_cast %18 : vector<256x1xi1> to vector<256x1xi1>
    %30 = vector.broadcast %29 : vector<256x1xi1> to vector<256x4xi1>
    %31 = arith.select %30, %27, %28 : vector<256x4xi1>, vector<256x4xf32>
    %c240_i32_8 = arith.constant 240 : i32
    %32 = tpu.dynamic_rotate %26 by %c240_i32_8 dim 0 : vector<256x4xf32>, i32 -> vector<256x4xf32>
    %33 = vector.shape_cast %20 : vector<256x1xi1> to vector<256x1xi1>
    %34 = vector.broadcast %33 : vector<256x1xi1> to vector<256x4xi1>
    %35 = arith.select %34, %27, %32 : vector<256x4xi1>, vector<256x4xf32>
    %cst_9 = arith.constant 0.000000e+00 : f32
    %36 = vector.broadcast %cst_9 : f32 to vector<256x8xf32>
    %cst_10 = arith.constant 0.000000e+00 : f32
    %37 = vector.broadcast %cst_10 : f32 to vector<256x4xf32>
    %c1_i32_11 = arith.constant 1 : i32
    %38 = tpu.dynamic_rotate %31 by %c1_i32_11 dim 0 : vector<256x4xf32>, i32 -> vector<256x4xf32>
    %39 = vector.shape_cast %22 : vector<256x1xi1> to vector<256x1xi1>
    %40 = vector.broadcast %39 : vector<256x1xi1> to vector<256x4xi1>
    %41 = arith.select %40, %37, %38 : vector<256x4xi1>, vector<256x4xf32>
    %c255_i32 = arith.constant 255 : i32
    %42 = tpu.dynamic_rotate %31 by %c255_i32 dim 0 : vector<256x4xf32>, i32 -> vector<256x4xf32>
    %43 = vector.shape_cast %24 : vector<256x1xi1> to vector<256x1xi1>
    %44 = vector.broadcast %43 : vector<256x1xi1> to vector<256x4xi1>
    %45 = arith.select %44, %37, %42 : vector<256x4xi1>, vector<256x4xf32>
    %46 = arith.truncf %41 : vector<256x4xf32> to vector<256x4xbf16>
    %c0_12 = arith.constant 0 : index
    %c0_13 = arith.constant 0 : index
    %c0_14 = arith.constant 0 : index
    %47 = vector.load %arg2[%c0_12, %c0_13, %c0_14] : memref<9x4x8xbf16, #tpu.memory_space<vmem>>, vector<1x4x8xbf16>
    %48 = vector.shape_cast %47 : vector<1x4x8xbf16> to vector<4x8xbf16>
    %cst_15 = arith.constant dense<0.000000e+00> : vector<256x8xf32>
    %49 = tpu.matmul %46, %48, %cst_15 {dimension_numbers = #tpu.dot_dimension_numbers<[1], [0], [0], [1], [0, 0, 1, 1], [], []>} : vector<256x4xbf16>, vector<4x8xbf16>, vector<256x8xf32> -> vector<256x8xf32>
    %50 = arith.addf %36, %49 : vector<256x8xf32>
    %51 = arith.truncf %31 : vector<256x4xf32> to vector<256x4xbf16>
    %c1 = arith.constant 1 : index
    %c0_16 = arith.constant 0 : index
    %c0_17 = arith.constant 0 : index
    %52 = vector.load %arg2[%c1, %c0_16, %c0_17] : memref<9x4x8xbf16, #tpu.memory_space<vmem>>, vector<1x4x8xbf16>
    %53 = vector.shape_cast %52 : vector<1x4x8xbf16> to vector<4x8xbf16>
    %cst_18 = arith.constant dense<0.000000e+00> : vector<256x8xf32>
    %54 = tpu.matmul %51, %53, %cst_18 {dimension_numbers = #tpu.dot_dimension_numbers<[1], [0], [0], [1], [0, 0, 1, 1], [], []>} : vector<256x4xbf16>, vector<4x8xbf16>, vector<256x8xf32> -> vector<256x8xf32>
    %55 = arith.addf %50, %54 : vector<256x8xf32>
    %56 = arith.truncf %45 : vector<256x4xf32> to vector<256x4xbf16>
    %c2 = arith.constant 2 : index
    %c0_19 = arith.constant 0 : index
    %c0_20 = arith.constant 0 : index
    %57 = vector.load %arg2[%c2, %c0_19, %c0_20] : memref<9x4x8xbf16, #tpu.memory_space<vmem>>, vector<1x4x8xbf16>
    %58 = vector.shape_cast %57 : vector<1x4x8xbf16> to vector<4x8xbf16>
    %cst_21 = arith.constant dense<0.000000e+00> : vector<256x8xf32>
    %59 = tpu.matmul %56, %58, %cst_21 {dimension_numbers = #tpu.dot_dimension_numbers<[1], [0], [0], [1], [0, 0, 1, 1], [], []>} : vector<256x4xbf16>, vector<4x8xbf16>, vector<256x8xf32> -> vector<256x8xf32>
    %60 = arith.addf %55, %59 : vector<256x8xf32>
    %cst_22 = arith.constant 0.000000e+00 : f32
    %61 = vector.broadcast %cst_22 : f32 to vector<256x4xf32>
    %c1_i32_23 = arith.constant 1 : i32
    %62 = tpu.dynamic_rotate %26 by %c1_i32_23 dim 0 : vector<256x4xf32>, i32 -> vector<256x4xf32>
    %63 = vector.shape_cast %22 : vector<256x1xi1> to vector<256x1xi1>
    %64 = vector.broadcast %63 : vector<256x1xi1> to vector<256x4xi1>
    %65 = arith.select %64, %61, %62 : vector<256x4xi1>, vector<256x4xf32>
    %c255_i32_24 = arith.constant 255 : i32
    %66 = tpu.dynamic_rotate %26 by %c255_i32_24 dim 0 : vector<256x4xf32>, i32 -> vector<256x4xf32>
    %67 = vector.shape_cast %24 : vector<256x1xi1> to vector<256x1xi1>
    %68 = vector.broadcast %67 : vector<256x1xi1> to vector<256x4xi1>
    %69 = arith.select %68, %61, %66 : vector<256x4xi1>, vector<256x4xf32>
    %70 = arith.truncf %65 : vector<256x4xf32> to vector<256x4xbf16>
    %c3 = arith.constant 3 : index
    %c0_25 = arith.constant 0 : index
    %c0_26 = arith.constant 0 : index
    %71 = vector.load %arg2[%c3, %c0_25, %c0_26] : memref<9x4x8xbf16, #tpu.memory_space<vmem>>, vector<1x4x8xbf16>
    %72 = vector.shape_cast %71 : vector<1x4x8xbf16> to vector<4x8xbf16>
    %cst_27 = arith.constant dense<0.000000e+00> : vector<256x8xf32>
    %73 = tpu.matmul %70, %72, %cst_27 {dimension_numbers = #tpu.dot_dimension_numbers<[1], [0], [0], [1], [0, 0, 1, 1], [], []>} : vector<256x4xbf16>, vector<4x8xbf16>, vector<256x8xf32> -> vector<256x8xf32>
    %74 = arith.addf %60, %73 : vector<256x8xf32>
    %75 = arith.truncf %26 : vector<256x4xf32> to vector<256x4xbf16>
    %c4 = arith.constant 4 : index
    %c0_28 = arith.constant 0 : index
    %c0_29 = arith.constant 0 : index
    %76 = vector.load %arg2[%c4, %c0_28, %c0_29] : memref<9x4x8xbf16, #tpu.memory_space<vmem>>, vector<1x4x8xbf16>
    %77 = vector.shape_cast %76 : vector<1x4x8xbf16> to vector<4x8xbf16>
    %cst_30 = arith.constant dense<0.000000e+00> : vector<256x8xf32>
    %78 = tpu.matmul %75, %77, %cst_30 {dimension_numbers = #tpu.dot_dimension_numbers<[1], [0], [0], [1], [0, 0, 1, 1], [], []>} : vector<256x4xbf16>, vector<4x8xbf16>, vector<256x8xf32> -> vector<256x8xf32>
    %79 = arith.addf %74, %78 : vector<256x8xf32>
    %80 = arith.truncf %69 : vector<256x4xf32> to vector<256x4xbf16>
    %c5 = arith.constant 5 : index
    %c0_31 = arith.constant 0 : index
    %c0_32 = arith.constant 0 : index
    %81 = vector.load %arg2[%c5, %c0_31, %c0_32] : memref<9x4x8xbf16, #tpu.memory_space<vmem>>, vector<1x4x8xbf16>
    %82 = vector.shape_cast %81 : vector<1x4x8xbf16> to vector<4x8xbf16>
    %cst_33 = arith.constant dense<0.000000e+00> : vector<256x8xf32>
    %83 = tpu.matmul %80, %82, %cst_33 {dimension_numbers = #tpu.dot_dimension_numbers<[1], [0], [0], [1], [0, 0, 1, 1], [], []>} : vector<256x4xbf16>, vector<4x8xbf16>, vector<256x8xf32> -> vector<256x8xf32>
    %84 = arith.addf %79, %83 : vector<256x8xf32>
    %cst_34 = arith.constant 0.000000e+00 : f32
    %85 = vector.broadcast %cst_34 : f32 to vector<256x4xf32>
    %c1_i32_35 = arith.constant 1 : i32
    %86 = tpu.dynamic_rotate %35 by %c1_i32_35 dim 0 : vector<256x4xf32>, i32 -> vector<256x4xf32>
    %87 = vector.shape_cast %22 : vector<256x1xi1> to vector<256x1xi1>
    %88 = vector.broadcast %87 : vector<256x1xi1> to vector<256x4xi1>
    %89 = arith.select %88, %85, %86 : vector<256x4xi1>, vector<256x4xf32>
    %c255_i32_36 = arith.constant 255 : i32
    %90 = tpu.dynamic_rotate %35 by %c255_i32_36 dim 0 : vector<256x4xf32>, i32 -> vector<256x4xf32>
    %91 = vector.shape_cast %24 : vector<256x1xi1> to vector<256x1xi1>
    %92 = vector.broadcast %91 : vector<256x1xi1> to vector<256x4xi1>
    %93 = arith.select %92, %85, %90 : vector<256x4xi1>, vector<256x4xf32>
    %94 = arith.truncf %89 : vector<256x4xf32> to vector<256x4xbf16>
    %c6 = arith.constant 6 : index
    %c0_37 = arith.constant 0 : index
    %c0_38 = arith.constant 0 : index
    %95 = vector.load %arg2[%c6, %c0_37, %c0_38] : memref<9x4x8xbf16, #tpu.memory_space<vmem>>, vector<1x4x8xbf16>
    %96 = vector.shape_cast %95 : vector<1x4x8xbf16> to vector<4x8xbf16>
    %cst_39 = arith.constant dense<0.000000e+00> : vector<256x8xf32>
    %97 = tpu.matmul %94, %96, %cst_39 {dimension_numbers = #tpu.dot_dimension_numbers<[1], [0], [0], [1], [0, 0, 1, 1], [], []>} : vector<256x4xbf16>, vector<4x8xbf16>, vector<256x8xf32> -> vector<256x8xf32>
    %98 = arith.addf %84, %97 : vector<256x8xf32>
    %99 = arith.truncf %35 : vector<256x4xf32> to vector<256x4xbf16>
    %c7 = arith.constant 7 : index
    %c0_40 = arith.constant 0 : index
    %c0_41 = arith.constant 0 : index
    %100 = vector.load %arg2[%c7, %c0_40, %c0_41] : memref<9x4x8xbf16, #tpu.memory_space<vmem>>, vector<1x4x8xbf16>
    %101 = vector.shape_cast %100 : vector<1x4x8xbf16> to vector<4x8xbf16>
    %cst_42 = arith.constant dense<0.000000e+00> : vector<256x8xf32>
    %102 = tpu.matmul %99, %101, %cst_42 {dimension_numbers = #tpu.dot_dimension_numbers<[1], [0], [0], [1], [0, 0, 1, 1], [], []>} : vector<256x4xbf16>, vector<4x8xbf16>, vector<256x8xf32> -> vector<256x8xf32>
    %103 = arith.addf %98, %102 : vector<256x8xf32>
    %104 = arith.truncf %93 : vector<256x4xf32> to vector<256x4xbf16>
    %c8 = arith.constant 8 : index
    %c0_43 = arith.constant 0 : index
    %c0_44 = arith.constant 0 : index
    %105 = vector.load %arg2[%c8, %c0_43, %c0_44] : memref<9x4x8xbf16, #tpu.memory_space<vmem>>, vector<1x4x8xbf16>
    %106 = vector.shape_cast %105 : vector<1x4x8xbf16> to vector<4x8xbf16>
    %cst_45 = arith.constant dense<0.000000e+00> : vector<256x8xf32>
    %107 = tpu.matmul %104, %106, %cst_45 {dimension_numbers = #tpu.dot_dimension_numbers<[1], [0], [0], [1], [0, 0, 1, 1], [], []>} : vector<256x4xbf16>, vector<4x8xbf16>, vector<256x8xf32> -> vector<256x8xf32>
    %108 = arith.addf %103, %107 : vector<256x8xf32>
    %c0_46 = arith.constant 0 : index
    %c0_47 = arith.constant 0 : index
    %109 = vector.load %arg3[%c0_46, %c0_47] : memref<1x8xf32, #tpu.memory_space<vmem>>, vector<1x8xf32>
    %110 = vector.broadcast %109 : vector<1x8xf32> to vector<256x8xf32>
    %111 = arith.addf %108, %110 : vector<256x8xf32>
    %cst_48 = arith.constant 0.000000e+00 : f32
    %112 = vector.broadcast %cst_48 : f32 to vector<256x8xf32>
    %113 = arith.cmpf oge, %111, %112 : vector<256x8xf32>
    %cst_49 = arith.constant 2.000000e-01 : f32
    %114 = vector.broadcast %cst_49 : f32 to vector<256x8xf32>
    %115 = arith.mulf %114, %111 : vector<256x8xf32>
    %116 = arith.select %113, %111, %115 : vector<256x8xi1>, vector<256x8xf32>
    %cst_50 = arith.constant 0.000000e+00 : f32
    %117 = vector.broadcast %cst_50 : f32 to vector<256x8xf32>
    %c16_i32_51 = arith.constant 16 : i32
    %118 = tpu.dynamic_rotate %116 by %c16_i32_51 dim 0 : vector<256x8xf32>, i32 -> vector<256x8xf32>
    %119 = vector.shape_cast %18 : vector<256x1xi1> to vector<256x1xi1>
    %120 = vector.broadcast %119 : vector<256x1xi1> to vector<256x8xi1>
    %121 = arith.select %120, %117, %118 : vector<256x8xi1>, vector<256x8xf32>
    %c240_i32_52 = arith.constant 240 : i32
    %122 = tpu.dynamic_rotate %116 by %c240_i32_52 dim 0 : vector<256x8xf32>, i32 -> vector<256x8xf32>
    %123 = vector.shape_cast %20 : vector<256x1xi1> to vector<256x1xi1>
    %124 = vector.broadcast %123 : vector<256x1xi1> to vector<256x8xi1>
    %125 = arith.select %124, %117, %122 : vector<256x8xi1>, vector<256x8xf32>
    %cst_53 = arith.constant 0.000000e+00 : f32
    %126 = vector.broadcast %cst_53 : f32 to vector<256x8xf32>
    %cst_54 = arith.constant 0.000000e+00 : f32
    %127 = vector.broadcast %cst_54 : f32 to vector<256x8xf32>
    %c1_i32_55 = arith.constant 1 : i32
    %128 = tpu.dynamic_rotate %121 by %c1_i32_55 dim 0 : vector<256x8xf32>, i32 -> vector<256x8xf32>
    %129 = vector.shape_cast %22 : vector<256x1xi1> to vector<256x1xi1>
    %130 = vector.broadcast %129 : vector<256x1xi1> to vector<256x8xi1>
    %131 = arith.select %130, %127, %128 : vector<256x8xi1>, vector<256x8xf32>
    %c255_i32_56 = arith.constant 255 : i32
    %132 = tpu.dynamic_rotate %121 by %c255_i32_56 dim 0 : vector<256x8xf32>, i32 -> vector<256x8xf32>
    %133 = vector.shape_cast %24 : vector<256x1xi1> to vector<256x1xi1>
    %134 = vector.broadcast %133 : vector<256x1xi1> to vector<256x8xi1>
    %135 = arith.select %134, %127, %132 : vector<256x8xi1>, vector<256x8xf32>
    %136 = arith.truncf %131 : vector<256x8xf32> to vector<256x8xbf16>
    %c0_57 = arith.constant 0 : index
    %c0_58 = arith.constant 0 : index
    %c0_59 = arith.constant 0 : index
    %137 = vector.load %arg4[%c0_57, %c0_58, %c0_59] : memref<9x8x8xbf16, #tpu.memory_space<vmem>>, vector<1x8x8xbf16>
    %138 = vector.shape_cast %137 : vector<1x8x8xbf16> to vector<8x8xbf16>
    %cst_60 = arith.constant dense<0.000000e+00> : vector<256x8xf32>
    %139 = tpu.matmul %136, %138, %cst_60 {dimension_numbers = #tpu.dot_dimension_numbers<[1], [0], [0], [1], [0, 0, 1, 1], [], []>} : vector<256x8xbf16>, vector<8x8xbf16>, vector<256x8xf32> -> vector<256x8xf32>
    %140 = arith.addf %126, %139 : vector<256x8xf32>
    %141 = arith.truncf %121 : vector<256x8xf32> to vector<256x8xbf16>
    %c1_61 = arith.constant 1 : index
    %c0_62 = arith.constant 0 : index
    %c0_63 = arith.constant 0 : index
    %142 = vector.load %arg4[%c1_61, %c0_62, %c0_63] : memref<9x8x8xbf16, #tpu.memory_space<vmem>>, vector<1x8x8xbf16>
    %143 = vector.shape_cast %142 : vector<1x8x8xbf16> to vector<8x8xbf16>
    %cst_64 = arith.constant dense<0.000000e+00> : vector<256x8xf32>
    %144 = tpu.matmul %141, %143, %cst_64 {dimension_numbers = #tpu.dot_dimension_numbers<[1], [0], [0], [1], [0, 0, 1, 1], [], []>} : vector<256x8xbf16>, vector<8x8xbf16>, vector<256x8xf32> -> vector<256x8xf32>
    %145 = arith.addf %140, %144 : vector<256x8xf32>
    %146 = arith.truncf %135 : vector<256x8xf32> to vector<256x8xbf16>
    %c2_65 = arith.constant 2 : index
    %c0_66 = arith.constant 0 : index
    %c0_67 = arith.constant 0 : index
    %147 = vector.load %arg4[%c2_65, %c0_66, %c0_67] : memref<9x8x8xbf16, #tpu.memory_space<vmem>>, vector<1x8x8xbf16>
    %148 = vector.shape_cast %147 : vector<1x8x8xbf16> to vector<8x8xbf16>
    %cst_68 = arith.constant dense<0.000000e+00> : vector<256x8xf32>
    %149 = tpu.matmul %146, %148, %cst_68 {dimension_numbers = #tpu.dot_dimension_numbers<[1], [0], [0], [1], [0, 0, 1, 1], [], []>} : vector<256x8xbf16>, vector<8x8xbf16>, vector<256x8xf32> -> vector<256x8xf32>
    %150 = arith.addf %145, %149 : vector<256x8xf32>
    %cst_69 = arith.constant 0.000000e+00 : f32
    %151 = vector.broadcast %cst_69 : f32 to vector<256x8xf32>
    %c1_i32_70 = arith.constant 1 : i32
    %152 = tpu.dynamic_rotate %116 by %c1_i32_70 dim 0 : vector<256x8xf32>, i32 -> vector<256x8xf32>
    %153 = vector.shape_cast %22 : vector<256x1xi1> to vector<256x1xi1>
    %154 = vector.broadcast %153 : vector<256x1xi1> to vector<256x8xi1>
    %155 = arith.select %154, %151, %152 : vector<256x8xi1>, vector<256x8xf32>
    %c255_i32_71 = arith.constant 255 : i32
    %156 = tpu.dynamic_rotate %116 by %c255_i32_71 dim 0 : vector<256x8xf32>, i32 -> vector<256x8xf32>
    %157 = vector.shape_cast %24 : vector<256x1xi1> to vector<256x1xi1>
    %158 = vector.broadcast %157 : vector<256x1xi1> to vector<256x8xi1>
    %159 = arith.select %158, %151, %156 : vector<256x8xi1>, vector<256x8xf32>
    %160 = arith.truncf %155 : vector<256x8xf32> to vector<256x8xbf16>
    %c3_72 = arith.constant 3 : index
    %c0_73 = arith.constant 0 : index
    %c0_74 = arith.constant 0 : index
    %161 = vector.load %arg4[%c3_72, %c0_73, %c0_74] : memref<9x8x8xbf16, #tpu.memory_space<vmem>>, vector<1x8x8xbf16>
    %162 = vector.shape_cast %161 : vector<1x8x8xbf16> to vector<8x8xbf16>
    %cst_75 = arith.constant dense<0.000000e+00> : vector<256x8xf32>
    %163 = tpu.matmul %160, %162, %cst_75 {dimension_numbers = #tpu.dot_dimension_numbers<[1], [0], [0], [1], [0, 0, 1, 1], [], []>} : vector<256x8xbf16>, vector<8x8xbf16>, vector<256x8xf32> -> vector<256x8xf32>
    %164 = arith.addf %150, %163 : vector<256x8xf32>
    %165 = arith.truncf %116 : vector<256x8xf32> to vector<256x8xbf16>
    %c4_76 = arith.constant 4 : index
    %c0_77 = arith.constant 0 : index
    %c0_78 = arith.constant 0 : index
    %166 = vector.load %arg4[%c4_76, %c0_77, %c0_78] : memref<9x8x8xbf16, #tpu.memory_space<vmem>>, vector<1x8x8xbf16>
    %167 = vector.shape_cast %166 : vector<1x8x8xbf16> to vector<8x8xbf16>
    %cst_79 = arith.constant dense<0.000000e+00> : vector<256x8xf32>
    %168 = tpu.matmul %165, %167, %cst_79 {dimension_numbers = #tpu.dot_dimension_numbers<[1], [0], [0], [1], [0, 0, 1, 1], [], []>} : vector<256x8xbf16>, vector<8x8xbf16>, vector<256x8xf32> -> vector<256x8xf32>
    %169 = arith.addf %164, %168 : vector<256x8xf32>
    %170 = arith.truncf %159 : vector<256x8xf32> to vector<256x8xbf16>
    %c5_80 = arith.constant 5 : index
    %c0_81 = arith.constant 0 : index
    %c0_82 = arith.constant 0 : index
    %171 = vector.load %arg4[%c5_80, %c0_81, %c0_82] : memref<9x8x8xbf16, #tpu.memory_space<vmem>>, vector<1x8x8xbf16>
    %172 = vector.shape_cast %171 : vector<1x8x8xbf16> to vector<8x8xbf16>
    %cst_83 = arith.constant dense<0.000000e+00> : vector<256x8xf32>
    %173 = tpu.matmul %170, %172, %cst_83 {dimension_numbers = #tpu.dot_dimension_numbers<[1], [0], [0], [1], [0, 0, 1, 1], [], []>} : vector<256x8xbf16>, vector<8x8xbf16>, vector<256x8xf32> -> vector<256x8xf32>
    %174 = arith.addf %169, %173 : vector<256x8xf32>
    %cst_84 = arith.constant 0.000000e+00 : f32
    %175 = vector.broadcast %cst_84 : f32 to vector<256x8xf32>
    %c1_i32_85 = arith.constant 1 : i32
    %176 = tpu.dynamic_rotate %125 by %c1_i32_85 dim 0 : vector<256x8xf32>, i32 -> vector<256x8xf32>
    %177 = vector.shape_cast %22 : vector<256x1xi1> to vector<256x1xi1>
    %178 = vector.broadcast %177 : vector<256x1xi1> to vector<256x8xi1>
    %179 = arith.select %178, %175, %176 : vector<256x8xi1>, vector<256x8xf32>
    %c255_i32_86 = arith.constant 255 : i32
    %180 = tpu.dynamic_rotate %125 by %c255_i32_86 dim 0 : vector<256x8xf32>, i32 -> vector<256x8xf32>
    %181 = vector.shape_cast %24 : vector<256x1xi1> to vector<256x1xi1>
    %182 = vector.broadcast %181 : vector<256x1xi1> to vector<256x8xi1>
    %183 = arith.select %182, %175, %180 : vector<256x8xi1>, vector<256x8xf32>
    %184 = arith.truncf %179 : vector<256x8xf32> to vector<256x8xbf16>
    %c6_87 = arith.constant 6 : index
    %c0_88 = arith.constant 0 : index
    %c0_89 = arith.constant 0 : index
    %185 = vector.load %arg4[%c6_87, %c0_88, %c0_89] : memref<9x8x8xbf16, #tpu.memory_space<vmem>>, vector<1x8x8xbf16>
    %186 = vector.shape_cast %185 : vector<1x8x8xbf16> to vector<8x8xbf16>
    %cst_90 = arith.constant dense<0.000000e+00> : vector<256x8xf32>
    %187 = tpu.matmul %184, %186, %cst_90 {dimension_numbers = #tpu.dot_dimension_numbers<[1], [0], [0], [1], [0, 0, 1, 1], [], []>} : vector<256x8xbf16>, vector<8x8xbf16>, vector<256x8xf32> -> vector<256x8xf32>
    %188 = arith.addf %174, %187 : vector<256x8xf32>
    %189 = arith.truncf %125 : vector<256x8xf32> to vector<256x8xbf16>
    %c7_91 = arith.constant 7 : index
    %c0_92 = arith.constant 0 : index
    %c0_93 = arith.constant 0 : index
    %190 = vector.load %arg4[%c7_91, %c0_92, %c0_93] : memref<9x8x8xbf16, #tpu.memory_space<vmem>>, vector<1x8x8xbf16>
    %191 = vector.shape_cast %190 : vector<1x8x8xbf16> to vector<8x8xbf16>
    %cst_94 = arith.constant dense<0.000000e+00> : vector<256x8xf32>
    %192 = tpu.matmul %189, %191, %cst_94 {dimension_numbers = #tpu.dot_dimension_numbers<[1], [0], [0], [1], [0, 0, 1, 1], [], []>} : vector<256x8xbf16>, vector<8x8xbf16>, vector<256x8xf32> -> vector<256x8xf32>
    %193 = arith.addf %188, %192 : vector<256x8xf32>
    %194 = arith.truncf %183 : vector<256x8xf32> to vector<256x8xbf16>
    %c8_95 = arith.constant 8 : index
    %c0_96 = arith.constant 0 : index
    %c0_97 = arith.constant 0 : index
    %195 = vector.load %arg4[%c8_95, %c0_96, %c0_97] : memref<9x8x8xbf16, #tpu.memory_space<vmem>>, vector<1x8x8xbf16>
    %196 = vector.shape_cast %195 : vector<1x8x8xbf16> to vector<8x8xbf16>
    %cst_98 = arith.constant dense<0.000000e+00> : vector<256x8xf32>
    %197 = tpu.matmul %194, %196, %cst_98 {dimension_numbers = #tpu.dot_dimension_numbers<[1], [0], [0], [1], [0, 0, 1, 1], [], []>} : vector<256x8xbf16>, vector<8x8xbf16>, vector<256x8xf32> -> vector<256x8xf32>
    %198 = arith.addf %193, %197 : vector<256x8xf32>
    %c0_99 = arith.constant 0 : index
    %c0_100 = arith.constant 0 : index
    %199 = vector.load %arg5[%c0_99, %c0_100] : memref<1x8xf32, #tpu.memory_space<vmem>>, vector<1x8xf32>
    %200 = vector.broadcast %199 : vector<1x8xf32> to vector<256x8xf32>
    %201 = arith.addf %198, %200 : vector<256x8xf32>
    %cst_101 = arith.constant 0.000000e+00 : f32
    %202 = vector.broadcast %cst_101 : f32 to vector<256x8xf32>
    %203 = arith.cmpf oge, %201, %202 : vector<256x8xf32>
    %cst_102 = arith.constant 2.000000e-01 : f32
    %204 = vector.broadcast %cst_102 : f32 to vector<256x8xf32>
    %205 = arith.mulf %204, %201 : vector<256x8xf32>
    %206 = arith.select %203, %201, %205 : vector<256x8xi1>, vector<256x8xf32>
    %c0_103 = arith.constant 0 : index
    %c0_104 = arith.constant 0 : index
    %207 = vector.load %arg7[%c0_103, %c0_104] : memref<256x8xf32, #tpu.memory_space<vmem>>, vector<256x8xf32>
    tpu.vector_store %arg7[%c0_103, %c0_104], %206 {strides = array<i32>} : memref<256x8xf32, #tpu.memory_space<vmem>>, vector<256x8xf32>,
    %c0_105 = arith.constant 0 : index
    %c0_106 = arith.constant 0 : index
    %208 = tpu.strided_load %arg7[%c0_105, %c0_106] {strides = array<i32: 2, 1>} : memref<256x8xf32, #tpu.memory_space<vmem>>, vector<128x8xf32>
    %c1_107 = arith.constant 1 : index
    %c0_108 = arith.constant 0 : index
    %209 = tpu.strided_load %arg7[%c1_107, %c0_108] {strides = array<i32: 2, 1>} : memref<256x8xf32, #tpu.memory_space<vmem>>, vector<128x8xf32>
    %210 = arith.addf %208, %209 : vector<128x8xf32>
    %211 = vector.extract_strided_slice %210 {offsets = [0, 0], sizes = [8, 8], strides = [1, 1]} : vector<128x8xf32> to vector<8x8xf32>
    %212 = vector.extract_strided_slice %210 {offsets = [8, 0], sizes = [8, 8], strides = [1, 1]} : vector<128x8xf32> to vector<8x8xf32>
    %213 = arith.addf %211, %212 : vector<8x8xf32>
    %cst_109 = arith.constant 2.500000e-01 : f32
    %214 = vector.broadcast %cst_109 : f32 to vector<8x8xf32>
    %215 = arith.mulf %214, %213 : vector<8x8xf32>
    %c0_110 = arith.constant 0 : index
    %c0_111 = arith.constant 0 : index
    %c0_112 = arith.constant 0 : index
    %216 = vector.load %arg6[%c0_110, %c0_111, %c0_112] : memref<1x64x8xf32, #tpu.memory_space<vmem>>, vector<1x8x8xf32>
    %217 = vector.shape_cast %216 : vector<1x8x8xf32> to vector<8x8xf32>
    %218 = vector.shape_cast %215 : vector<8x8xf32> to vector<1x8x8xf32>
    tpu.vector_store %arg6[%c0_110, %c0_111, %c0_112], %218 {strides = array<i32>} : memref<1x64x8xf32, #tpu.memory_space<vmem>>, vector<1x8x8xf32>,
    %219 = vector.extract_strided_slice %210 {offsets = [16, 0], sizes = [8, 8], strides = [1, 1]} : vector<128x8xf32> to vector<8x8xf32>
    %220 = vector.extract_strided_slice %210 {offsets = [24, 0], sizes = [8, 8], strides = [1, 1]} : vector<128x8xf32> to vector<8x8xf32>
    %221 = arith.addf %219, %220 : vector<8x8xf32>
    %cst_113 = arith.constant 2.500000e-01 : f32
    %222 = vector.broadcast %cst_113 : f32 to vector<8x8xf32>
    %223 = arith.mulf %222, %221 : vector<8x8xf32>
    %c0_114 = arith.constant 0 : index
    %c8_115 = arith.constant 8 : index
    %c0_116 = arith.constant 0 : index
    %224 = vector.load %arg6[%c0_114, %c8_115, %c0_116] : memref<1x64x8xf32, #tpu.memory_space<vmem>>, vector<1x8x8xf32>
    %225 = vector.shape_cast %224 : vector<1x8x8xf32> to vector<8x8xf32>
    %226 = vector.shape_cast %223 : vector<8x8xf32> to vector<1x8x8xf32>
    tpu.vector_store %arg6[%c0_114, %c8_115, %c0_116], %226 {strides = array<i32>} : memref<1x64x8xf32, #tpu.memory_space<vmem>>, vector<1x8x8xf32>,
    %227 = vector.extract_strided_slice %210 {offsets = [32, 0], sizes = [8, 8], strides = [1, 1]} : vector<128x8xf32> to vector<8x8xf32>
    %228 = vector.extract_strided_slice %210 {offsets = [40, 0], sizes = [8, 8], strides = [1, 1]} : vector<128x8xf32> to vector<8x8xf32>
    %229 = arith.addf %227, %228 : vector<8x8xf32>
    %cst_117 = arith.constant 2.500000e-01 : f32
    %230 = vector.broadcast %cst_117 : f32 to vector<8x8xf32>
    %231 = arith.mulf %230, %229 : vector<8x8xf32>
    %c0_118 = arith.constant 0 : index
    %c16 = arith.constant 16 : index
    %c0_119 = arith.constant 0 : index
    %232 = vector.load %arg6[%c0_118, %c16, %c0_119] : memref<1x64x8xf32, #tpu.memory_space<vmem>>, vector<1x8x8xf32>
    %233 = vector.shape_cast %232 : vector<1x8x8xf32> to vector<8x8xf32>
    %234 = vector.shape_cast %231 : vector<8x8xf32> to vector<1x8x8xf32>
    tpu.vector_store %arg6[%c0_118, %c16, %c0_119], %234 {strides = array<i32>} : memref<1x64x8xf32, #tpu.memory_space<vmem>>, vector<1x8x8xf32>,
    %235 = vector.extract_strided_slice %210 {offsets = [48, 0], sizes = [8, 8], strides = [1, 1]} : vector<128x8xf32> to vector<8x8xf32>
    %236 = vector.extract_strided_slice %210 {offsets = [56, 0], sizes = [8, 8], strides = [1, 1]} : vector<128x8xf32> to vector<8x8xf32>
    %237 = arith.addf %235, %236 : vector<8x8xf32>
    %cst_120 = arith.constant 2.500000e-01 : f32
    %238 = vector.broadcast %cst_120 : f32 to vector<8x8xf32>
    %239 = arith.mulf %238, %237 : vector<8x8xf32>
    %c0_121 = arith.constant 0 : index
    %c24 = arith.constant 24 : index
    %c0_122 = arith.constant 0 : index
    %240 = vector.load %arg6[%c0_121, %c24, %c0_122] : memref<1x64x8xf32, #tpu.memory_space<vmem>>, vector<1x8x8xf32>
    %241 = vector.shape_cast %240 : vector<1x8x8xf32> to vector<8x8xf32>
    %242 = vector.shape_cast %239 : vector<8x8xf32> to vector<1x8x8xf32>
    tpu.vector_store %arg6[%c0_121, %c24, %c0_122], %242 {strides = array<i32>} : memref<1x64x8xf32, #tpu.memory_space<vmem>>, vector<1x8x8xf32>,
    %243 = vector.extract_strided_slice %210 {offsets = [64, 0], sizes = [8, 8], strides = [1, 1]} : vector<128x8xf32> to vector<8x8xf32>
    %244 = vector.extract_strided_slice %210 {offsets = [72, 0], sizes = [8, 8], strides = [1, 1]} : vector<128x8xf32> to vector<8x8xf32>
    %245 = arith.addf %243, %244 : vector<8x8xf32>
    %cst_123 = arith.constant 2.500000e-01 : f32
    %246 = vector.broadcast %cst_123 : f32 to vector<8x8xf32>
    %247 = arith.mulf %246, %245 : vector<8x8xf32>
    %c0_124 = arith.constant 0 : index
    %c32 = arith.constant 32 : index
    %c0_125 = arith.constant 0 : index
    %248 = vector.load %arg6[%c0_124, %c32, %c0_125] : memref<1x64x8xf32, #tpu.memory_space<vmem>>, vector<1x8x8xf32>
    %249 = vector.shape_cast %248 : vector<1x8x8xf32> to vector<8x8xf32>
    %250 = vector.shape_cast %247 : vector<8x8xf32> to vector<1x8x8xf32>
    tpu.vector_store %arg6[%c0_124, %c32, %c0_125], %250 {strides = array<i32>} : memref<1x64x8xf32, #tpu.memory_space<vmem>>, vector<1x8x8xf32>,
    %251 = vector.extract_strided_slice %210 {offsets = [80, 0], sizes = [8, 8], strides = [1, 1]} : vector<128x8xf32> to vector<8x8xf32>
    %252 = vector.extract_strided_slice %210 {offsets = [88, 0], sizes = [8, 8], strides = [1, 1]} : vector<128x8xf32> to vector<8x8xf32>
    %253 = arith.addf %251, %252 : vector<8x8xf32>
    %cst_126 = arith.constant 2.500000e-01 : f32
    %254 = vector.broadcast %cst_126 : f32 to vector<8x8xf32>
    %255 = arith.mulf %254, %253 : vector<8x8xf32>
    %c0_127 = arith.constant 0 : index
    %c40 = arith.constant 40 : index
    %c0_128 = arith.constant 0 : index
    %256 = vector.load %arg6[%c0_127, %c40, %c0_128] : memref<1x64x8xf32, #tpu.memory_space<vmem>>, vector<1x8x8xf32>
    %257 = vector.shape_cast %256 : vector<1x8x8xf32> to vector<8x8xf32>
    %258 = vector.shape_cast %255 : vector<8x8xf32> to vector<1x8x8xf32>
    tpu.vector_store %arg6[%c0_127, %c40, %c0_128], %258 {strides = array<i32>} : memref<1x64x8xf32, #tpu.memory_space<vmem>>, vector<1x8x8xf32>,
    %259 = vector.extract_strided_slice %210 {offsets = [96, 0], sizes = [8, 8], strides = [1, 1]} : vector<128x8xf32> to vector<8x8xf32>
    %260 = vector.extract_strided_slice %210 {offsets = [104, 0], sizes = [8, 8], strides = [1, 1]} : vector<128x8xf32> to vector<8x8xf32>
    %261 = arith.addf %259, %260 : vector<8x8xf32>
    %cst_129 = arith.constant 2.500000e-01 : f32
    %262 = vector.broadcast %cst_129 : f32 to vector<8x8xf32>
    %263 = arith.mulf %262, %261 : vector<8x8xf32>
    %c0_130 = arith.constant 0 : index
    %c48 = arith.constant 48 : index
    %c0_131 = arith.constant 0 : index
    %264 = vector.load %arg6[%c0_130, %c48, %c0_131] : memref<1x64x8xf32, #tpu.memory_space<vmem>>, vector<1x8x8xf32>
    %265 = vector.shape_cast %264 : vector<1x8x8xf32> to vector<8x8xf32>
    %266 = vector.shape_cast %263 : vector<8x8xf32> to vector<1x8x8xf32>
    tpu.vector_store %arg6[%c0_130, %c48, %c0_131], %266 {strides = array<i32>} : memref<1x64x8xf32, #tpu.memory_space<vmem>>, vector<1x8x8xf32>,
    %267 = vector.extract_strided_slice %210 {offsets = [112, 0], sizes = [8, 8], strides = [1, 1]} : vector<128x8xf32> to vector<8x8xf32>
    %268 = vector.extract_strided_slice %210 {offsets = [120, 0], sizes = [8, 8], strides = [1, 1]} : vector<128x8xf32> to vector<8x8xf32>
    %269 = arith.addf %267, %268 : vector<8x8xf32>
    %cst_132 = arith.constant 2.500000e-01 : f32
    %270 = vector.broadcast %cst_132 : f32 to vector<8x8xf32>
    %271 = arith.mulf %270, %269 : vector<8x8xf32>
    %c0_133 = arith.constant 0 : index
    %c56 = arith.constant 56 : index
    %c0_134 = arith.constant 0 : index
    %272 = vector.load %arg6[%c0_133, %c56, %c0_134] : memref<1x64x8xf32, #tpu.memory_space<vmem>>, vector<1x8x8xf32>
    %273 = vector.shape_cast %272 : vector<1x8x8xf32> to vector<8x8xf32>
    %274 = vector.shape_cast %271 : vector<8x8xf32> to vector<1x8x8xf32>
    tpu.vector_store %arg6[%c0_133, %c56, %c0_134], %274 {strides = array<i32>} : memref<1x64x8xf32, #tpu.memory_space<vmem>>, vector<1x8x8xf32>,
    return
  }
  func.func @transform_0(%arg0: i32) -> (i32, i32, i32) {
    %c0_i32 = arith.constant 0 : i32
    %c0_i32_0 = arith.constant 0 : i32
    %c0_i32_1 = arith.constant 0 : i32
    return %arg0, %c0_i32, %c0_i32_0 : i32, i32, i32
  }
  func.func @transform_1(%arg0: i32) -> (i32, i32, i32) {
    %c0_i32 = arith.constant 0 : i32
    %c0_i32_0 = arith.constant 0 : i32
    %c0_i32_1 = arith.constant 0 : i32
    %c0_i32_2 = arith.constant 0 : i32
    return %c0_i32, %c0_i32_0, %c0_i32_1 : i32, i32, i32
  }
  func.func @transform_2(%arg0: i32) -> (i32, i32) {
    %c0_i32 = arith.constant 0 : i32
    %c0_i32_0 = arith.constant 0 : i32
    %c0_i32_1 = arith.constant 0 : i32
    return %c0_i32, %c0_i32_0 : i32, i32
  }
  func.func @transform_3(%arg0: i32) -> (i32, i32, i32) {
    %c0_i32 = arith.constant 0 : i32
    %c0_i32_0 = arith.constant 0 : i32
    %c0_i32_1 = arith.constant 0 : i32
    %c0_i32_2 = arith.constant 0 : i32
    return %c0_i32, %c0_i32_0, %c0_i32_1 : i32, i32, i32
  }
  func.func @transform_4(%arg0: i32) -> (i32, i32) {
    %c0_i32 = arith.constant 0 : i32
    %c0_i32_0 = arith.constant 0 : i32
    %c0_i32_1 = arith.constant 0 : i32
    return %c0_i32, %c0_i32_0 : i32, i32
  }
  func.func @transform_5(%arg0: i32) -> (i32, i32, i32) {
    %c0_i32 = arith.constant 0 : i32
    %c0_i32_0 = arith.constant 0 : i32
    %c0_i32_1 = arith.constant 0 : i32
    return %arg0, %c0_i32, %c0_i32_0 : i32, i32, i32
  }
}

module attributes {stable_mosaic.version = 11 : i64} {
  func.func @disc_block_kernel(%arg0: i32, %arg1: memref<1x64x8xf32, #tpu.memory_space<vmem>>, %arg2: memref<9x8x16xbf16, #tpu.memory_space<vmem>>, %arg3: memref<1x16xf32, #tpu.memory_space<vmem>>, %arg4: memref<9x16x16xbf16, #tpu.memory_space<vmem>>, %arg5: memref<1x16xf32, #tpu.memory_space<vmem>>, %arg6: memref<1x16x16xf32, #tpu.memory_space<vmem>>, %arg7: memref<64x16xf32, #tpu.memory_space<vmem>>) attributes {dimension_semantics = [#tpu.dimension_semantics<parallel>], iteration_bounds = array<i64: 2>, scalar_prefetch = 0 : i64, scratch_operands = 1 : i64, tpu.core_type = #tpu.core_type<tc>, window_params = [{transform_indices = @transform_0, window_bounds = array<i64: 1, 64, 8>}, {pipeline_mode = #tpu.pipeline_mode<synchronous>, transform_indices = @transform_1, window_bounds = array<i64: 9, 8, 16>}, {pipeline_mode = #tpu.pipeline_mode<synchronous>, transform_indices = @transform_2, window_bounds = array<i64: 1, 16>}, {pipeline_mode = #tpu.pipeline_mode<synchronous>, transform_indices = @transform_3, window_bounds = array<i64: 9, 16, 16>}, {pipeline_mode = #tpu.pipeline_mode<synchronous>, transform_indices = @transform_4, window_bounds = array<i64: 1, 16>}, {transform_indices = @transform_5, window_bounds = array<i64: 1, 16, 16>}]} {
    %0 = tpu.iota {dimensions = array<i32: 0>} : vector<64x1xi32>
    %c8_i32 = arith.constant 8 : i32
    %c0_i32 = arith.constant 0 : i32
    %1 = arith.cmpi eq, %c8_i32, %c0_i32 : i32
    %c1_i32 = arith.constant 1 : i32
    %2 = arith.select %1, %c1_i32, %c8_i32 : i32
    %3 = vector.broadcast %2 : i32 to vector<64x1xi32>
    %4 = arith.remsi %0, %3 : vector<64x1xi32>
    %c0_i32_0 = arith.constant 0 : i32
    %5 = vector.broadcast %c0_i32_0 : i32 to vector<64x1xi32>
    %6 = arith.cmpi ne, %4, %5 : vector<64x1xi32>
    %c0_i32_1 = arith.constant 0 : i32
    %7 = vector.broadcast %c0_i32_1 : i32 to vector<64x1xi32>
    %8 = arith.cmpi slt, %4, %7 : vector<64x1xi32>
    %c0_i32_2 = arith.constant 0 : i32
    %9 = arith.cmpi slt, %2, %c0_i32_2 : i32
    %10 = vector.broadcast %9 : i1 to vector<64x1xi1>
    %11 = vector.broadcast %10 : vector<64x1xi1> to vector<64x1xi1>
    %12 = arith.xori %8, %11 : vector<64x1xi1>
    %13 = arith.andi %12, %6 : vector<64x1xi1>
    %14 = vector.broadcast %2 : i32 to vector<64x1xi32>
    %15 = arith.addi %4, %14 : vector<64x1xi32>
    %16 = arith.select %13, %15, %4 : vector<64x1xi1>, vector<64x1xi32>
    %c8_i32_3 = arith.constant 8 : i32
    %17 = vector.broadcast %c8_i32_3 : i32 to vector<64x1xi32>
    %18 = arith.cmpi slt, %0, %17 : vector<64x1xi32>
    %c56_i32 = arith.constant 56 : i32
    %19 = vector.broadcast %c56_i32 : i32 to vector<64x1xi32>
    %20 = arith.cmpi sge, %0, %19 : vector<64x1xi32>
    %c0_i32_4 = arith.constant 0 : i32
    %21 = vector.broadcast %c0_i32_4 : i32 to vector<64x1xi32>
    %22 = arith.cmpi eq, %16, %21 : vector<64x1xi32>
    %c7_i32 = arith.constant 7 : i32
    %23 = vector.broadcast %c7_i32 : i32 to vector<64x1xi32>
    %24 = arith.cmpi eq, %16, %23 : vector<64x1xi32>
    %c0 = arith.constant 0 : index
    %c0_5 = arith.constant 0 : index
    %c0_6 = arith.constant 0 : index
    %25 = vector.load %arg1[%c0, %c0_5, %c0_6] : memref<1x64x8xf32, #tpu.memory_space<vmem>>, vector<1x64x8xf32>
    %26 = vector.shape_cast %25 : vector<1x64x8xf32> to vector<64x8xf32>
    %cst = arith.constant 0.000000e+00 : f32
    %27 = vector.broadcast %cst : f32 to vector<64x8xf32>
    %c8_i32_7 = arith.constant 8 : i32
    %28 = tpu.dynamic_rotate %26 by %c8_i32_7 dim 0 : vector<64x8xf32>, i32 -> vector<64x8xf32>
    %29 = vector.shape_cast %18 : vector<64x1xi1> to vector<64x1xi1>
    %30 = vector.broadcast %29 : vector<64x1xi1> to vector<64x8xi1>
    %31 = arith.select %30, %27, %28 : vector<64x8xi1>, vector<64x8xf32>
    %c56_i32_8 = arith.constant 56 : i32
    %32 = tpu.dynamic_rotate %26 by %c56_i32_8 dim 0 : vector<64x8xf32>, i32 -> vector<64x8xf32>
    %33 = vector.shape_cast %20 : vector<64x1xi1> to vector<64x1xi1>
    %34 = vector.broadcast %33 : vector<64x1xi1> to vector<64x8xi1>
    %35 = arith.select %34, %27, %32 : vector<64x8xi1>, vector<64x8xf32>
    %cst_9 = arith.constant 0.000000e+00 : f32
    %36 = vector.broadcast %cst_9 : f32 to vector<64x16xf32>
    %cst_10 = arith.constant 0.000000e+00 : f32
    %37 = vector.broadcast %cst_10 : f32 to vector<64x8xf32>
    %c1_i32_11 = arith.constant 1 : i32
    %38 = tpu.dynamic_rotate %31 by %c1_i32_11 dim 0 : vector<64x8xf32>, i32 -> vector<64x8xf32>
    %39 = vector.shape_cast %22 : vector<64x1xi1> to vector<64x1xi1>
    %40 = vector.broadcast %39 : vector<64x1xi1> to vector<64x8xi1>
    %41 = arith.select %40, %37, %38 : vector<64x8xi1>, vector<64x8xf32>
    %c63_i32 = arith.constant 63 : i32
    %42 = tpu.dynamic_rotate %31 by %c63_i32 dim 0 : vector<64x8xf32>, i32 -> vector<64x8xf32>
    %43 = vector.shape_cast %24 : vector<64x1xi1> to vector<64x1xi1>
    %44 = vector.broadcast %43 : vector<64x1xi1> to vector<64x8xi1>
    %45 = arith.select %44, %37, %42 : vector<64x8xi1>, vector<64x8xf32>
    %46 = arith.truncf %41 : vector<64x8xf32> to vector<64x8xbf16>
    %c0_12 = arith.constant 0 : index
    %c0_13 = arith.constant 0 : index
    %c0_14 = arith.constant 0 : index
    %47 = vector.load %arg2[%c0_12, %c0_13, %c0_14] : memref<9x8x16xbf16, #tpu.memory_space<vmem>>, vector<1x8x16xbf16>
    %48 = vector.shape_cast %47 : vector<1x8x16xbf16> to vector<8x16xbf16>
    %cst_15 = arith.constant dense<0.000000e+00> : vector<64x16xf32>
    %49 = tpu.matmul %46, %48, %cst_15 {dimension_numbers = #tpu.dot_dimension_numbers<[1], [0], [0], [1], [0, 0, 1, 1], [], []>} : vector<64x8xbf16>, vector<8x16xbf16>, vector<64x16xf32> -> vector<64x16xf32>
    %50 = arith.addf %36, %49 : vector<64x16xf32>
    %51 = arith.truncf %31 : vector<64x8xf32> to vector<64x8xbf16>
    %c1 = arith.constant 1 : index
    %c0_16 = arith.constant 0 : index
    %c0_17 = arith.constant 0 : index
    %52 = vector.load %arg2[%c1, %c0_16, %c0_17] : memref<9x8x16xbf16, #tpu.memory_space<vmem>>, vector<1x8x16xbf16>
    %53 = vector.shape_cast %52 : vector<1x8x16xbf16> to vector<8x16xbf16>
    %cst_18 = arith.constant dense<0.000000e+00> : vector<64x16xf32>
    %54 = tpu.matmul %51, %53, %cst_18 {dimension_numbers = #tpu.dot_dimension_numbers<[1], [0], [0], [1], [0, 0, 1, 1], [], []>} : vector<64x8xbf16>, vector<8x16xbf16>, vector<64x16xf32> -> vector<64x16xf32>
    %55 = arith.addf %50, %54 : vector<64x16xf32>
    %56 = arith.truncf %45 : vector<64x8xf32> to vector<64x8xbf16>
    %c2 = arith.constant 2 : index
    %c0_19 = arith.constant 0 : index
    %c0_20 = arith.constant 0 : index
    %57 = vector.load %arg2[%c2, %c0_19, %c0_20] : memref<9x8x16xbf16, #tpu.memory_space<vmem>>, vector<1x8x16xbf16>
    %58 = vector.shape_cast %57 : vector<1x8x16xbf16> to vector<8x16xbf16>
    %cst_21 = arith.constant dense<0.000000e+00> : vector<64x16xf32>
    %59 = tpu.matmul %56, %58, %cst_21 {dimension_numbers = #tpu.dot_dimension_numbers<[1], [0], [0], [1], [0, 0, 1, 1], [], []>} : vector<64x8xbf16>, vector<8x16xbf16>, vector<64x16xf32> -> vector<64x16xf32>
    %60 = arith.addf %55, %59 : vector<64x16xf32>
    %cst_22 = arith.constant 0.000000e+00 : f32
    %61 = vector.broadcast %cst_22 : f32 to vector<64x8xf32>
    %c1_i32_23 = arith.constant 1 : i32
    %62 = tpu.dynamic_rotate %26 by %c1_i32_23 dim 0 : vector<64x8xf32>, i32 -> vector<64x8xf32>
    %63 = vector.shape_cast %22 : vector<64x1xi1> to vector<64x1xi1>
    %64 = vector.broadcast %63 : vector<64x1xi1> to vector<64x8xi1>
    %65 = arith.select %64, %61, %62 : vector<64x8xi1>, vector<64x8xf32>
    %c63_i32_24 = arith.constant 63 : i32
    %66 = tpu.dynamic_rotate %26 by %c63_i32_24 dim 0 : vector<64x8xf32>, i32 -> vector<64x8xf32>
    %67 = vector.shape_cast %24 : vector<64x1xi1> to vector<64x1xi1>
    %68 = vector.broadcast %67 : vector<64x1xi1> to vector<64x8xi1>
    %69 = arith.select %68, %61, %66 : vector<64x8xi1>, vector<64x8xf32>
    %70 = arith.truncf %65 : vector<64x8xf32> to vector<64x8xbf16>
    %c3 = arith.constant 3 : index
    %c0_25 = arith.constant 0 : index
    %c0_26 = arith.constant 0 : index
    %71 = vector.load %arg2[%c3, %c0_25, %c0_26] : memref<9x8x16xbf16, #tpu.memory_space<vmem>>, vector<1x8x16xbf16>
    %72 = vector.shape_cast %71 : vector<1x8x16xbf16> to vector<8x16xbf16>
    %cst_27 = arith.constant dense<0.000000e+00> : vector<64x16xf32>
    %73 = tpu.matmul %70, %72, %cst_27 {dimension_numbers = #tpu.dot_dimension_numbers<[1], [0], [0], [1], [0, 0, 1, 1], [], []>} : vector<64x8xbf16>, vector<8x16xbf16>, vector<64x16xf32> -> vector<64x16xf32>
    %74 = arith.addf %60, %73 : vector<64x16xf32>
    %75 = arith.truncf %26 : vector<64x8xf32> to vector<64x8xbf16>
    %c4 = arith.constant 4 : index
    %c0_28 = arith.constant 0 : index
    %c0_29 = arith.constant 0 : index
    %76 = vector.load %arg2[%c4, %c0_28, %c0_29] : memref<9x8x16xbf16, #tpu.memory_space<vmem>>, vector<1x8x16xbf16>
    %77 = vector.shape_cast %76 : vector<1x8x16xbf16> to vector<8x16xbf16>
    %cst_30 = arith.constant dense<0.000000e+00> : vector<64x16xf32>
    %78 = tpu.matmul %75, %77, %cst_30 {dimension_numbers = #tpu.dot_dimension_numbers<[1], [0], [0], [1], [0, 0, 1, 1], [], []>} : vector<64x8xbf16>, vector<8x16xbf16>, vector<64x16xf32> -> vector<64x16xf32>
    %79 = arith.addf %74, %78 : vector<64x16xf32>
    %80 = arith.truncf %69 : vector<64x8xf32> to vector<64x8xbf16>
    %c5 = arith.constant 5 : index
    %c0_31 = arith.constant 0 : index
    %c0_32 = arith.constant 0 : index
    %81 = vector.load %arg2[%c5, %c0_31, %c0_32] : memref<9x8x16xbf16, #tpu.memory_space<vmem>>, vector<1x8x16xbf16>
    %82 = vector.shape_cast %81 : vector<1x8x16xbf16> to vector<8x16xbf16>
    %cst_33 = arith.constant dense<0.000000e+00> : vector<64x16xf32>
    %83 = tpu.matmul %80, %82, %cst_33 {dimension_numbers = #tpu.dot_dimension_numbers<[1], [0], [0], [1], [0, 0, 1, 1], [], []>} : vector<64x8xbf16>, vector<8x16xbf16>, vector<64x16xf32> -> vector<64x16xf32>
    %84 = arith.addf %79, %83 : vector<64x16xf32>
    %cst_34 = arith.constant 0.000000e+00 : f32
    %85 = vector.broadcast %cst_34 : f32 to vector<64x8xf32>
    %c1_i32_35 = arith.constant 1 : i32
    %86 = tpu.dynamic_rotate %35 by %c1_i32_35 dim 0 : vector<64x8xf32>, i32 -> vector<64x8xf32>
    %87 = vector.shape_cast %22 : vector<64x1xi1> to vector<64x1xi1>
    %88 = vector.broadcast %87 : vector<64x1xi1> to vector<64x8xi1>
    %89 = arith.select %88, %85, %86 : vector<64x8xi1>, vector<64x8xf32>
    %c63_i32_36 = arith.constant 63 : i32
    %90 = tpu.dynamic_rotate %35 by %c63_i32_36 dim 0 : vector<64x8xf32>, i32 -> vector<64x8xf32>
    %91 = vector.shape_cast %24 : vector<64x1xi1> to vector<64x1xi1>
    %92 = vector.broadcast %91 : vector<64x1xi1> to vector<64x8xi1>
    %93 = arith.select %92, %85, %90 : vector<64x8xi1>, vector<64x8xf32>
    %94 = arith.truncf %89 : vector<64x8xf32> to vector<64x8xbf16>
    %c6 = arith.constant 6 : index
    %c0_37 = arith.constant 0 : index
    %c0_38 = arith.constant 0 : index
    %95 = vector.load %arg2[%c6, %c0_37, %c0_38] : memref<9x8x16xbf16, #tpu.memory_space<vmem>>, vector<1x8x16xbf16>
    %96 = vector.shape_cast %95 : vector<1x8x16xbf16> to vector<8x16xbf16>
    %cst_39 = arith.constant dense<0.000000e+00> : vector<64x16xf32>
    %97 = tpu.matmul %94, %96, %cst_39 {dimension_numbers = #tpu.dot_dimension_numbers<[1], [0], [0], [1], [0, 0, 1, 1], [], []>} : vector<64x8xbf16>, vector<8x16xbf16>, vector<64x16xf32> -> vector<64x16xf32>
    %98 = arith.addf %84, %97 : vector<64x16xf32>
    %99 = arith.truncf %35 : vector<64x8xf32> to vector<64x8xbf16>
    %c7 = arith.constant 7 : index
    %c0_40 = arith.constant 0 : index
    %c0_41 = arith.constant 0 : index
    %100 = vector.load %arg2[%c7, %c0_40, %c0_41] : memref<9x8x16xbf16, #tpu.memory_space<vmem>>, vector<1x8x16xbf16>
    %101 = vector.shape_cast %100 : vector<1x8x16xbf16> to vector<8x16xbf16>
    %cst_42 = arith.constant dense<0.000000e+00> : vector<64x16xf32>
    %102 = tpu.matmul %99, %101, %cst_42 {dimension_numbers = #tpu.dot_dimension_numbers<[1], [0], [0], [1], [0, 0, 1, 1], [], []>} : vector<64x8xbf16>, vector<8x16xbf16>, vector<64x16xf32> -> vector<64x16xf32>
    %103 = arith.addf %98, %102 : vector<64x16xf32>
    %104 = arith.truncf %93 : vector<64x8xf32> to vector<64x8xbf16>
    %c8 = arith.constant 8 : index
    %c0_43 = arith.constant 0 : index
    %c0_44 = arith.constant 0 : index
    %105 = vector.load %arg2[%c8, %c0_43, %c0_44] : memref<9x8x16xbf16, #tpu.memory_space<vmem>>, vector<1x8x16xbf16>
    %106 = vector.shape_cast %105 : vector<1x8x16xbf16> to vector<8x16xbf16>
    %cst_45 = arith.constant dense<0.000000e+00> : vector<64x16xf32>
    %107 = tpu.matmul %104, %106, %cst_45 {dimension_numbers = #tpu.dot_dimension_numbers<[1], [0], [0], [1], [0, 0, 1, 1], [], []>} : vector<64x8xbf16>, vector<8x16xbf16>, vector<64x16xf32> -> vector<64x16xf32>
    %108 = arith.addf %103, %107 : vector<64x16xf32>
    %c0_46 = arith.constant 0 : index
    %c0_47 = arith.constant 0 : index
    %109 = vector.load %arg3[%c0_46, %c0_47] : memref<1x16xf32, #tpu.memory_space<vmem>>, vector<1x16xf32>
    %110 = vector.broadcast %109 : vector<1x16xf32> to vector<64x16xf32>
    %111 = arith.addf %108, %110 : vector<64x16xf32>
    %cst_48 = arith.constant 0.000000e+00 : f32
    %112 = vector.broadcast %cst_48 : f32 to vector<64x16xf32>
    %113 = arith.cmpf oge, %111, %112 : vector<64x16xf32>
    %cst_49 = arith.constant 2.000000e-01 : f32
    %114 = vector.broadcast %cst_49 : f32 to vector<64x16xf32>
    %115 = arith.mulf %114, %111 : vector<64x16xf32>
    %116 = arith.select %113, %111, %115 : vector<64x16xi1>, vector<64x16xf32>
    %cst_50 = arith.constant 0.000000e+00 : f32
    %117 = vector.broadcast %cst_50 : f32 to vector<64x16xf32>
    %c8_i32_51 = arith.constant 8 : i32
    %118 = tpu.dynamic_rotate %116 by %c8_i32_51 dim 0 : vector<64x16xf32>, i32 -> vector<64x16xf32>
    %119 = vector.shape_cast %18 : vector<64x1xi1> to vector<64x1xi1>
    %120 = vector.broadcast %119 : vector<64x1xi1> to vector<64x16xi1>
    %121 = arith.select %120, %117, %118 : vector<64x16xi1>, vector<64x16xf32>
    %c56_i32_52 = arith.constant 56 : i32
    %122 = tpu.dynamic_rotate %116 by %c56_i32_52 dim 0 : vector<64x16xf32>, i32 -> vector<64x16xf32>
    %123 = vector.shape_cast %20 : vector<64x1xi1> to vector<64x1xi1>
    %124 = vector.broadcast %123 : vector<64x1xi1> to vector<64x16xi1>
    %125 = arith.select %124, %117, %122 : vector<64x16xi1>, vector<64x16xf32>
    %cst_53 = arith.constant 0.000000e+00 : f32
    %126 = vector.broadcast %cst_53 : f32 to vector<64x16xf32>
    %cst_54 = arith.constant 0.000000e+00 : f32
    %127 = vector.broadcast %cst_54 : f32 to vector<64x16xf32>
    %c1_i32_55 = arith.constant 1 : i32
    %128 = tpu.dynamic_rotate %121 by %c1_i32_55 dim 0 : vector<64x16xf32>, i32 -> vector<64x16xf32>
    %129 = vector.shape_cast %22 : vector<64x1xi1> to vector<64x1xi1>
    %130 = vector.broadcast %129 : vector<64x1xi1> to vector<64x16xi1>
    %131 = arith.select %130, %127, %128 : vector<64x16xi1>, vector<64x16xf32>
    %c63_i32_56 = arith.constant 63 : i32
    %132 = tpu.dynamic_rotate %121 by %c63_i32_56 dim 0 : vector<64x16xf32>, i32 -> vector<64x16xf32>
    %133 = vector.shape_cast %24 : vector<64x1xi1> to vector<64x1xi1>
    %134 = vector.broadcast %133 : vector<64x1xi1> to vector<64x16xi1>
    %135 = arith.select %134, %127, %132 : vector<64x16xi1>, vector<64x16xf32>
    %136 = arith.truncf %131 : vector<64x16xf32> to vector<64x16xbf16>
    %c0_57 = arith.constant 0 : index
    %c0_58 = arith.constant 0 : index
    %c0_59 = arith.constant 0 : index
    %137 = vector.load %arg4[%c0_57, %c0_58, %c0_59] : memref<9x16x16xbf16, #tpu.memory_space<vmem>>, vector<1x16x16xbf16>
    %138 = vector.shape_cast %137 : vector<1x16x16xbf16> to vector<16x16xbf16>
    %cst_60 = arith.constant dense<0.000000e+00> : vector<64x16xf32>
    %139 = tpu.matmul %136, %138, %cst_60 {dimension_numbers = #tpu.dot_dimension_numbers<[1], [0], [0], [1], [0, 0, 1, 1], [], []>} : vector<64x16xbf16>, vector<16x16xbf16>, vector<64x16xf32> -> vector<64x16xf32>
    %140 = arith.addf %126, %139 : vector<64x16xf32>
    %141 = arith.truncf %121 : vector<64x16xf32> to vector<64x16xbf16>
    %c1_61 = arith.constant 1 : index
    %c0_62 = arith.constant 0 : index
    %c0_63 = arith.constant 0 : index
    %142 = vector.load %arg4[%c1_61, %c0_62, %c0_63] : memref<9x16x16xbf16, #tpu.memory_space<vmem>>, vector<1x16x16xbf16>
    %143 = vector.shape_cast %142 : vector<1x16x16xbf16> to vector<16x16xbf16>
    %cst_64 = arith.constant dense<0.000000e+00> : vector<64x16xf32>
    %144 = tpu.matmul %141, %143, %cst_64 {dimension_numbers = #tpu.dot_dimension_numbers<[1], [0], [0], [1], [0, 0, 1, 1], [], []>} : vector<64x16xbf16>, vector<16x16xbf16>, vector<64x16xf32> -> vector<64x16xf32>
    %145 = arith.addf %140, %144 : vector<64x16xf32>
    %146 = arith.truncf %135 : vector<64x16xf32> to vector<64x16xbf16>
    %c2_65 = arith.constant 2 : index
    %c0_66 = arith.constant 0 : index
    %c0_67 = arith.constant 0 : index
    %147 = vector.load %arg4[%c2_65, %c0_66, %c0_67] : memref<9x16x16xbf16, #tpu.memory_space<vmem>>, vector<1x16x16xbf16>
    %148 = vector.shape_cast %147 : vector<1x16x16xbf16> to vector<16x16xbf16>
    %cst_68 = arith.constant dense<0.000000e+00> : vector<64x16xf32>
    %149 = tpu.matmul %146, %148, %cst_68 {dimension_numbers = #tpu.dot_dimension_numbers<[1], [0], [0], [1], [0, 0, 1, 1], [], []>} : vector<64x16xbf16>, vector<16x16xbf16>, vector<64x16xf32> -> vector<64x16xf32>
    %150 = arith.addf %145, %149 : vector<64x16xf32>
    %cst_69 = arith.constant 0.000000e+00 : f32
    %151 = vector.broadcast %cst_69 : f32 to vector<64x16xf32>
    %c1_i32_70 = arith.constant 1 : i32
    %152 = tpu.dynamic_rotate %116 by %c1_i32_70 dim 0 : vector<64x16xf32>, i32 -> vector<64x16xf32>
    %153 = vector.shape_cast %22 : vector<64x1xi1> to vector<64x1xi1>
    %154 = vector.broadcast %153 : vector<64x1xi1> to vector<64x16xi1>
    %155 = arith.select %154, %151, %152 : vector<64x16xi1>, vector<64x16xf32>
    %c63_i32_71 = arith.constant 63 : i32
    %156 = tpu.dynamic_rotate %116 by %c63_i32_71 dim 0 : vector<64x16xf32>, i32 -> vector<64x16xf32>
    %157 = vector.shape_cast %24 : vector<64x1xi1> to vector<64x1xi1>
    %158 = vector.broadcast %157 : vector<64x1xi1> to vector<64x16xi1>
    %159 = arith.select %158, %151, %156 : vector<64x16xi1>, vector<64x16xf32>
    %160 = arith.truncf %155 : vector<64x16xf32> to vector<64x16xbf16>
    %c3_72 = arith.constant 3 : index
    %c0_73 = arith.constant 0 : index
    %c0_74 = arith.constant 0 : index
    %161 = vector.load %arg4[%c3_72, %c0_73, %c0_74] : memref<9x16x16xbf16, #tpu.memory_space<vmem>>, vector<1x16x16xbf16>
    %162 = vector.shape_cast %161 : vector<1x16x16xbf16> to vector<16x16xbf16>
    %cst_75 = arith.constant dense<0.000000e+00> : vector<64x16xf32>
    %163 = tpu.matmul %160, %162, %cst_75 {dimension_numbers = #tpu.dot_dimension_numbers<[1], [0], [0], [1], [0, 0, 1, 1], [], []>} : vector<64x16xbf16>, vector<16x16xbf16>, vector<64x16xf32> -> vector<64x16xf32>
    %164 = arith.addf %150, %163 : vector<64x16xf32>
    %165 = arith.truncf %116 : vector<64x16xf32> to vector<64x16xbf16>
    %c4_76 = arith.constant 4 : index
    %c0_77 = arith.constant 0 : index
    %c0_78 = arith.constant 0 : index
    %166 = vector.load %arg4[%c4_76, %c0_77, %c0_78] : memref<9x16x16xbf16, #tpu.memory_space<vmem>>, vector<1x16x16xbf16>
    %167 = vector.shape_cast %166 : vector<1x16x16xbf16> to vector<16x16xbf16>
    %cst_79 = arith.constant dense<0.000000e+00> : vector<64x16xf32>
    %168 = tpu.matmul %165, %167, %cst_79 {dimension_numbers = #tpu.dot_dimension_numbers<[1], [0], [0], [1], [0, 0, 1, 1], [], []>} : vector<64x16xbf16>, vector<16x16xbf16>, vector<64x16xf32> -> vector<64x16xf32>
    %169 = arith.addf %164, %168 : vector<64x16xf32>
    %170 = arith.truncf %159 : vector<64x16xf32> to vector<64x16xbf16>
    %c5_80 = arith.constant 5 : index
    %c0_81 = arith.constant 0 : index
    %c0_82 = arith.constant 0 : index
    %171 = vector.load %arg4[%c5_80, %c0_81, %c0_82] : memref<9x16x16xbf16, #tpu.memory_space<vmem>>, vector<1x16x16xbf16>
    %172 = vector.shape_cast %171 : vector<1x16x16xbf16> to vector<16x16xbf16>
    %cst_83 = arith.constant dense<0.000000e+00> : vector<64x16xf32>
    %173 = tpu.matmul %170, %172, %cst_83 {dimension_numbers = #tpu.dot_dimension_numbers<[1], [0], [0], [1], [0, 0, 1, 1], [], []>} : vector<64x16xbf16>, vector<16x16xbf16>, vector<64x16xf32> -> vector<64x16xf32>
    %174 = arith.addf %169, %173 : vector<64x16xf32>
    %cst_84 = arith.constant 0.000000e+00 : f32
    %175 = vector.broadcast %cst_84 : f32 to vector<64x16xf32>
    %c1_i32_85 = arith.constant 1 : i32
    %176 = tpu.dynamic_rotate %125 by %c1_i32_85 dim 0 : vector<64x16xf32>, i32 -> vector<64x16xf32>
    %177 = vector.shape_cast %22 : vector<64x1xi1> to vector<64x1xi1>
    %178 = vector.broadcast %177 : vector<64x1xi1> to vector<64x16xi1>
    %179 = arith.select %178, %175, %176 : vector<64x16xi1>, vector<64x16xf32>
    %c63_i32_86 = arith.constant 63 : i32
    %180 = tpu.dynamic_rotate %125 by %c63_i32_86 dim 0 : vector<64x16xf32>, i32 -> vector<64x16xf32>
    %181 = vector.shape_cast %24 : vector<64x1xi1> to vector<64x1xi1>
    %182 = vector.broadcast %181 : vector<64x1xi1> to vector<64x16xi1>
    %183 = arith.select %182, %175, %180 : vector<64x16xi1>, vector<64x16xf32>
    %184 = arith.truncf %179 : vector<64x16xf32> to vector<64x16xbf16>
    %c6_87 = arith.constant 6 : index
    %c0_88 = arith.constant 0 : index
    %c0_89 = arith.constant 0 : index
    %185 = vector.load %arg4[%c6_87, %c0_88, %c0_89] : memref<9x16x16xbf16, #tpu.memory_space<vmem>>, vector<1x16x16xbf16>
    %186 = vector.shape_cast %185 : vector<1x16x16xbf16> to vector<16x16xbf16>
    %cst_90 = arith.constant dense<0.000000e+00> : vector<64x16xf32>
    %187 = tpu.matmul %184, %186, %cst_90 {dimension_numbers = #tpu.dot_dimension_numbers<[1], [0], [0], [1], [0, 0, 1, 1], [], []>} : vector<64x16xbf16>, vector<16x16xbf16>, vector<64x16xf32> -> vector<64x16xf32>
    %188 = arith.addf %174, %187 : vector<64x16xf32>
    %189 = arith.truncf %125 : vector<64x16xf32> to vector<64x16xbf16>
    %c7_91 = arith.constant 7 : index
    %c0_92 = arith.constant 0 : index
    %c0_93 = arith.constant 0 : index
    %190 = vector.load %arg4[%c7_91, %c0_92, %c0_93] : memref<9x16x16xbf16, #tpu.memory_space<vmem>>, vector<1x16x16xbf16>
    %191 = vector.shape_cast %190 : vector<1x16x16xbf16> to vector<16x16xbf16>
    %cst_94 = arith.constant dense<0.000000e+00> : vector<64x16xf32>
    %192 = tpu.matmul %189, %191, %cst_94 {dimension_numbers = #tpu.dot_dimension_numbers<[1], [0], [0], [1], [0, 0, 1, 1], [], []>} : vector<64x16xbf16>, vector<16x16xbf16>, vector<64x16xf32> -> vector<64x16xf32>
    %193 = arith.addf %188, %192 : vector<64x16xf32>
    %194 = arith.truncf %183 : vector<64x16xf32> to vector<64x16xbf16>
    %c8_95 = arith.constant 8 : index
    %c0_96 = arith.constant 0 : index
    %c0_97 = arith.constant 0 : index
    %195 = vector.load %arg4[%c8_95, %c0_96, %c0_97] : memref<9x16x16xbf16, #tpu.memory_space<vmem>>, vector<1x16x16xbf16>
    %196 = vector.shape_cast %195 : vector<1x16x16xbf16> to vector<16x16xbf16>
    %cst_98 = arith.constant dense<0.000000e+00> : vector<64x16xf32>
    %197 = tpu.matmul %194, %196, %cst_98 {dimension_numbers = #tpu.dot_dimension_numbers<[1], [0], [0], [1], [0, 0, 1, 1], [], []>} : vector<64x16xbf16>, vector<16x16xbf16>, vector<64x16xf32> -> vector<64x16xf32>
    %198 = arith.addf %193, %197 : vector<64x16xf32>
    %c0_99 = arith.constant 0 : index
    %c0_100 = arith.constant 0 : index
    %199 = vector.load %arg5[%c0_99, %c0_100] : memref<1x16xf32, #tpu.memory_space<vmem>>, vector<1x16xf32>
    %200 = vector.broadcast %199 : vector<1x16xf32> to vector<64x16xf32>
    %201 = arith.addf %198, %200 : vector<64x16xf32>
    %cst_101 = arith.constant 0.000000e+00 : f32
    %202 = vector.broadcast %cst_101 : f32 to vector<64x16xf32>
    %203 = arith.cmpf oge, %201, %202 : vector<64x16xf32>
    %cst_102 = arith.constant 2.000000e-01 : f32
    %204 = vector.broadcast %cst_102 : f32 to vector<64x16xf32>
    %205 = arith.mulf %204, %201 : vector<64x16xf32>
    %206 = arith.select %203, %201, %205 : vector<64x16xi1>, vector<64x16xf32>
    %c0_103 = arith.constant 0 : index
    %c0_104 = arith.constant 0 : index
    %207 = vector.load %arg7[%c0_103, %c0_104] : memref<64x16xf32, #tpu.memory_space<vmem>>, vector<64x16xf32>
    tpu.vector_store %arg7[%c0_103, %c0_104], %206 {strides = array<i32>} : memref<64x16xf32, #tpu.memory_space<vmem>>, vector<64x16xf32>,
    %c0_105 = arith.constant 0 : index
    %c0_106 = arith.constant 0 : index
    %208 = tpu.strided_load %arg7[%c0_105, %c0_106] {strides = array<i32: 2, 1>} : memref<64x16xf32, #tpu.memory_space<vmem>>, vector<32x16xf32>
    %c1_107 = arith.constant 1 : index
    %c0_108 = arith.constant 0 : index
    %209 = tpu.strided_load %arg7[%c1_107, %c0_108] {strides = array<i32: 2, 1>} : memref<64x16xf32, #tpu.memory_space<vmem>>, vector<32x16xf32>
    %210 = arith.addf %208, %209 : vector<32x16xf32>
    %211 = vector.extract_strided_slice %210 {offsets = [0, 0], sizes = [4, 16], strides = [1, 1]} : vector<32x16xf32> to vector<4x16xf32>
    %212 = vector.extract_strided_slice %210 {offsets = [4, 0], sizes = [4, 16], strides = [1, 1]} : vector<32x16xf32> to vector<4x16xf32>
    %213 = arith.addf %211, %212 : vector<4x16xf32>
    %cst_109 = arith.constant 2.500000e-01 : f32
    %214 = vector.broadcast %cst_109 : f32 to vector<4x16xf32>
    %215 = arith.mulf %214, %213 : vector<4x16xf32>
    %c0_110 = arith.constant 0 : index
    %c0_111 = arith.constant 0 : index
    %c0_112 = arith.constant 0 : index
    %216 = vector.load %arg6[%c0_110, %c0_111, %c0_112] : memref<1x16x16xf32, #tpu.memory_space<vmem>>, vector<1x4x16xf32>
    %217 = vector.shape_cast %216 : vector<1x4x16xf32> to vector<4x16xf32>
    %218 = vector.shape_cast %215 : vector<4x16xf32> to vector<1x4x16xf32>
    tpu.vector_store %arg6[%c0_110, %c0_111, %c0_112], %218 {strides = array<i32>} : memref<1x16x16xf32, #tpu.memory_space<vmem>>, vector<1x4x16xf32>,
    %219 = vector.extract_strided_slice %210 {offsets = [8, 0], sizes = [4, 16], strides = [1, 1]} : vector<32x16xf32> to vector<4x16xf32>
    %220 = vector.extract_strided_slice %210 {offsets = [12, 0], sizes = [4, 16], strides = [1, 1]} : vector<32x16xf32> to vector<4x16xf32>
    %221 = arith.addf %219, %220 : vector<4x16xf32>
    %cst_113 = arith.constant 2.500000e-01 : f32
    %222 = vector.broadcast %cst_113 : f32 to vector<4x16xf32>
    %223 = arith.mulf %222, %221 : vector<4x16xf32>
    %c0_114 = arith.constant 0 : index
    %c4_115 = arith.constant 4 : index
    %c0_116 = arith.constant 0 : index
    %224 = vector.load %arg6[%c0_114, %c4_115, %c0_116] : memref<1x16x16xf32, #tpu.memory_space<vmem>>, vector<1x4x16xf32>
    %225 = vector.shape_cast %224 : vector<1x4x16xf32> to vector<4x16xf32>
    %226 = vector.shape_cast %223 : vector<4x16xf32> to vector<1x4x16xf32>
    tpu.vector_store %arg6[%c0_114, %c4_115, %c0_116], %226 {strides = array<i32>} : memref<1x16x16xf32, #tpu.memory_space<vmem>>, vector<1x4x16xf32>,
    %227 = vector.extract_strided_slice %210 {offsets = [16, 0], sizes = [4, 16], strides = [1, 1]} : vector<32x16xf32> to vector<4x16xf32>
    %228 = vector.extract_strided_slice %210 {offsets = [20, 0], sizes = [4, 16], strides = [1, 1]} : vector<32x16xf32> to vector<4x16xf32>
    %229 = arith.addf %227, %228 : vector<4x16xf32>
    %cst_117 = arith.constant 2.500000e-01 : f32
    %230 = vector.broadcast %cst_117 : f32 to vector<4x16xf32>
    %231 = arith.mulf %230, %229 : vector<4x16xf32>
    %c0_118 = arith.constant 0 : index
    %c8_119 = arith.constant 8 : index
    %c0_120 = arith.constant 0 : index
    %232 = vector.load %arg6[%c0_118, %c8_119, %c0_120] : memref<1x16x16xf32, #tpu.memory_space<vmem>>, vector<1x4x16xf32>
    %233 = vector.shape_cast %232 : vector<1x4x16xf32> to vector<4x16xf32>
    %234 = vector.shape_cast %231 : vector<4x16xf32> to vector<1x4x16xf32>
    tpu.vector_store %arg6[%c0_118, %c8_119, %c0_120], %234 {strides = array<i32>} : memref<1x16x16xf32, #tpu.memory_space<vmem>>, vector<1x4x16xf32>,
    %235 = vector.extract_strided_slice %210 {offsets = [24, 0], sizes = [4, 16], strides = [1, 1]} : vector<32x16xf32> to vector<4x16xf32>
    %236 = vector.extract_strided_slice %210 {offsets = [28, 0], sizes = [4, 16], strides = [1, 1]} : vector<32x16xf32> to vector<4x16xf32>
    %237 = arith.addf %235, %236 : vector<4x16xf32>
    %cst_121 = arith.constant 2.500000e-01 : f32
    %238 = vector.broadcast %cst_121 : f32 to vector<4x16xf32>
    %239 = arith.mulf %238, %237 : vector<4x16xf32>
    %c0_122 = arith.constant 0 : index
    %c12 = arith.constant 12 : index
    %c0_123 = arith.constant 0 : index
    %240 = vector.load %arg6[%c0_122, %c12, %c0_123] : memref<1x16x16xf32, #tpu.memory_space<vmem>>, vector<1x4x16xf32>
    %241 = vector.shape_cast %240 : vector<1x4x16xf32> to vector<4x16xf32>
    %242 = vector.shape_cast %239 : vector<4x16xf32> to vector<1x4x16xf32>
    tpu.vector_store %arg6[%c0_122, %c12, %c0_123], %242 {strides = array<i32>} : memref<1x16x16xf32, #tpu.memory_space<vmem>>, vector<1x4x16xf32>,
    return
  }
  func.func @transform_0(%arg0: i32) -> (i32, i32, i32) {
    %c0_i32 = arith.constant 0 : i32
    %c0_i32_0 = arith.constant 0 : i32
    %c0_i32_1 = arith.constant 0 : i32
    return %arg0, %c0_i32, %c0_i32_0 : i32, i32, i32
  }
  func.func @transform_1(%arg0: i32) -> (i32, i32, i32) {
    %c0_i32 = arith.constant 0 : i32
    %c0_i32_0 = arith.constant 0 : i32
    %c0_i32_1 = arith.constant 0 : i32
    %c0_i32_2 = arith.constant 0 : i32
    return %c0_i32, %c0_i32_0, %c0_i32_1 : i32, i32, i32
  }
  func.func @transform_2(%arg0: i32) -> (i32, i32) {
    %c0_i32 = arith.constant 0 : i32
    %c0_i32_0 = arith.constant 0 : i32
    %c0_i32_1 = arith.constant 0 : i32
    return %c0_i32, %c0_i32_0 : i32, i32
  }
  func.func @transform_3(%arg0: i32) -> (i32, i32, i32) {
    %c0_i32 = arith.constant 0 : i32
    %c0_i32_0 = arith.constant 0 : i32
    %c0_i32_1 = arith.constant 0 : i32
    %c0_i32_2 = arith.constant 0 : i32
    return %c0_i32, %c0_i32_0, %c0_i32_1 : i32, i32, i32
  }
  func.func @transform_4(%arg0: i32) -> (i32, i32) {
    %c0_i32 = arith.constant 0 : i32
    %c0_i32_0 = arith.constant 0 : i32
    %c0_i32_1 = arith.constant 0 : i32
    return %c0_i32, %c0_i32_0 : i32, i32
  }
  func.func @transform_5(%arg0: i32) -> (i32, i32, i32) {
    %c0_i32 = arith.constant 0 : i32
    %c0_i32_0 = arith.constant 0 : i32
    %c0_i32_1 = arith.constant 0 : i32
    return %arg0, %c0_i32, %c0_i32_0 : i32, i32, i32
  }
}

module attributes {stable_mosaic.version = 11 : i64} {
  func.func @disc_block_kernel(%arg0: i32, %arg1: memref<1x16x16xf32, #tpu.memory_space<vmem>>, %arg2: memref<9x16x32xbf16, #tpu.memory_space<vmem>>, %arg3: memref<1x32xf32, #tpu.memory_space<vmem>>, %arg4: memref<9x32x32xbf16, #tpu.memory_space<vmem>>, %arg5: memref<1x32xf32, #tpu.memory_space<vmem>>, %arg6: memref<1x4x32xf32, #tpu.memory_space<vmem>>, %arg7: memref<16x32xf32, #tpu.memory_space<vmem>>) attributes {dimension_semantics = [#tpu.dimension_semantics<parallel>], iteration_bounds = array<i64: 2>, scalar_prefetch = 0 : i64, scratch_operands = 1 : i64, tpu.core_type = #tpu.core_type<tc>, window_params = [{transform_indices = @transform_0, window_bounds = array<i64: 1, 16, 16>}, {pipeline_mode = #tpu.pipeline_mode<synchronous>, transform_indices = @transform_1, window_bounds = array<i64: 9, 16, 32>}, {pipeline_mode = #tpu.pipeline_mode<synchronous>, transform_indices = @transform_2, window_bounds = array<i64: 1, 32>}, {pipeline_mode = #tpu.pipeline_mode<synchronous>, transform_indices = @transform_3, window_bounds = array<i64: 9, 32, 32>}, {pipeline_mode = #tpu.pipeline_mode<synchronous>, transform_indices = @transform_4, window_bounds = array<i64: 1, 32>}, {transform_indices = @transform_5, window_bounds = array<i64: 1, 4, 32>}]} {
    %0 = tpu.iota {dimensions = array<i32: 0>} : vector<16x1xi32>
    %c4_i32 = arith.constant 4 : i32
    %c0_i32 = arith.constant 0 : i32
    %1 = arith.cmpi eq, %c4_i32, %c0_i32 : i32
    %c1_i32 = arith.constant 1 : i32
    %2 = arith.select %1, %c1_i32, %c4_i32 : i32
    %3 = vector.broadcast %2 : i32 to vector<16x1xi32>
    %4 = arith.remsi %0, %3 : vector<16x1xi32>
    %c0_i32_0 = arith.constant 0 : i32
    %5 = vector.broadcast %c0_i32_0 : i32 to vector<16x1xi32>
    %6 = arith.cmpi ne, %4, %5 : vector<16x1xi32>
    %c0_i32_1 = arith.constant 0 : i32
    %7 = vector.broadcast %c0_i32_1 : i32 to vector<16x1xi32>
    %8 = arith.cmpi slt, %4, %7 : vector<16x1xi32>
    %c0_i32_2 = arith.constant 0 : i32
    %9 = arith.cmpi slt, %2, %c0_i32_2 : i32
    %10 = vector.broadcast %9 : i1 to vector<16x1xi1>
    %11 = vector.broadcast %10 : vector<16x1xi1> to vector<16x1xi1>
    %12 = arith.xori %8, %11 : vector<16x1xi1>
    %13 = arith.andi %12, %6 : vector<16x1xi1>
    %14 = vector.broadcast %2 : i32 to vector<16x1xi32>
    %15 = arith.addi %4, %14 : vector<16x1xi32>
    %16 = arith.select %13, %15, %4 : vector<16x1xi1>, vector<16x1xi32>
    %c4_i32_3 = arith.constant 4 : i32
    %17 = vector.broadcast %c4_i32_3 : i32 to vector<16x1xi32>
    %18 = arith.cmpi slt, %0, %17 : vector<16x1xi32>
    %c12_i32 = arith.constant 12 : i32
    %19 = vector.broadcast %c12_i32 : i32 to vector<16x1xi32>
    %20 = arith.cmpi sge, %0, %19 : vector<16x1xi32>
    %c0_i32_4 = arith.constant 0 : i32
    %21 = vector.broadcast %c0_i32_4 : i32 to vector<16x1xi32>
    %22 = arith.cmpi eq, %16, %21 : vector<16x1xi32>
    %c3_i32 = arith.constant 3 : i32
    %23 = vector.broadcast %c3_i32 : i32 to vector<16x1xi32>
    %24 = arith.cmpi eq, %16, %23 : vector<16x1xi32>
    %c0 = arith.constant 0 : index
    %c0_5 = arith.constant 0 : index
    %c0_6 = arith.constant 0 : index
    %25 = vector.load %arg1[%c0, %c0_5, %c0_6] : memref<1x16x16xf32, #tpu.memory_space<vmem>>, vector<1x16x16xf32>
    %26 = vector.shape_cast %25 : vector<1x16x16xf32> to vector<16x16xf32>
    %cst = arith.constant 0.000000e+00 : f32
    %27 = vector.broadcast %cst : f32 to vector<16x16xf32>
    %c4_i32_7 = arith.constant 4 : i32
    %28 = tpu.dynamic_rotate %26 by %c4_i32_7 dim 0 : vector<16x16xf32>, i32 -> vector<16x16xf32>
    %29 = vector.shape_cast %18 : vector<16x1xi1> to vector<16x1xi1>
    %30 = vector.broadcast %29 : vector<16x1xi1> to vector<16x16xi1>
    %31 = arith.select %30, %27, %28 : vector<16x16xi1>, vector<16x16xf32>
    %c12_i32_8 = arith.constant 12 : i32
    %32 = tpu.dynamic_rotate %26 by %c12_i32_8 dim 0 : vector<16x16xf32>, i32 -> vector<16x16xf32>
    %33 = vector.shape_cast %20 : vector<16x1xi1> to vector<16x1xi1>
    %34 = vector.broadcast %33 : vector<16x1xi1> to vector<16x16xi1>
    %35 = arith.select %34, %27, %32 : vector<16x16xi1>, vector<16x16xf32>
    %cst_9 = arith.constant 0.000000e+00 : f32
    %36 = vector.broadcast %cst_9 : f32 to vector<16x32xf32>
    %cst_10 = arith.constant 0.000000e+00 : f32
    %37 = vector.broadcast %cst_10 : f32 to vector<16x16xf32>
    %c1_i32_11 = arith.constant 1 : i32
    %38 = tpu.dynamic_rotate %31 by %c1_i32_11 dim 0 : vector<16x16xf32>, i32 -> vector<16x16xf32>
    %39 = vector.shape_cast %22 : vector<16x1xi1> to vector<16x1xi1>
    %40 = vector.broadcast %39 : vector<16x1xi1> to vector<16x16xi1>
    %41 = arith.select %40, %37, %38 : vector<16x16xi1>, vector<16x16xf32>
    %c15_i32 = arith.constant 15 : i32
    %42 = tpu.dynamic_rotate %31 by %c15_i32 dim 0 : vector<16x16xf32>, i32 -> vector<16x16xf32>
    %43 = vector.shape_cast %24 : vector<16x1xi1> to vector<16x1xi1>
    %44 = vector.broadcast %43 : vector<16x1xi1> to vector<16x16xi1>
    %45 = arith.select %44, %37, %42 : vector<16x16xi1>, vector<16x16xf32>
    %46 = arith.truncf %41 : vector<16x16xf32> to vector<16x16xbf16>
    %c0_12 = arith.constant 0 : index
    %c0_13 = arith.constant 0 : index
    %c0_14 = arith.constant 0 : index
    %47 = vector.load %arg2[%c0_12, %c0_13, %c0_14] : memref<9x16x32xbf16, #tpu.memory_space<vmem>>, vector<1x16x32xbf16>
    %48 = vector.shape_cast %47 : vector<1x16x32xbf16> to vector<16x32xbf16>
    %cst_15 = arith.constant dense<0.000000e+00> : vector<16x32xf32>
    %49 = tpu.matmul %46, %48, %cst_15 {dimension_numbers = #tpu.dot_dimension_numbers<[1], [0], [0], [1], [0, 0, 1, 1], [], []>} : vector<16x16xbf16>, vector<16x32xbf16>, vector<16x32xf32> -> vector<16x32xf32>
    %50 = arith.addf %36, %49 : vector<16x32xf32>
    %51 = arith.truncf %31 : vector<16x16xf32> to vector<16x16xbf16>
    %c1 = arith.constant 1 : index
    %c0_16 = arith.constant 0 : index
    %c0_17 = arith.constant 0 : index
    %52 = vector.load %arg2[%c1, %c0_16, %c0_17] : memref<9x16x32xbf16, #tpu.memory_space<vmem>>, vector<1x16x32xbf16>
    %53 = vector.shape_cast %52 : vector<1x16x32xbf16> to vector<16x32xbf16>
    %cst_18 = arith.constant dense<0.000000e+00> : vector<16x32xf32>
    %54 = tpu.matmul %51, %53, %cst_18 {dimension_numbers = #tpu.dot_dimension_numbers<[1], [0], [0], [1], [0, 0, 1, 1], [], []>} : vector<16x16xbf16>, vector<16x32xbf16>, vector<16x32xf32> -> vector<16x32xf32>
    %55 = arith.addf %50, %54 : vector<16x32xf32>
    %56 = arith.truncf %45 : vector<16x16xf32> to vector<16x16xbf16>
    %c2 = arith.constant 2 : index
    %c0_19 = arith.constant 0 : index
    %c0_20 = arith.constant 0 : index
    %57 = vector.load %arg2[%c2, %c0_19, %c0_20] : memref<9x16x32xbf16, #tpu.memory_space<vmem>>, vector<1x16x32xbf16>
    %58 = vector.shape_cast %57 : vector<1x16x32xbf16> to vector<16x32xbf16>
    %cst_21 = arith.constant dense<0.000000e+00> : vector<16x32xf32>
    %59 = tpu.matmul %56, %58, %cst_21 {dimension_numbers = #tpu.dot_dimension_numbers<[1], [0], [0], [1], [0, 0, 1, 1], [], []>} : vector<16x16xbf16>, vector<16x32xbf16>, vector<16x32xf32> -> vector<16x32xf32>
    %60 = arith.addf %55, %59 : vector<16x32xf32>
    %cst_22 = arith.constant 0.000000e+00 : f32
    %61 = vector.broadcast %cst_22 : f32 to vector<16x16xf32>
    %c1_i32_23 = arith.constant 1 : i32
    %62 = tpu.dynamic_rotate %26 by %c1_i32_23 dim 0 : vector<16x16xf32>, i32 -> vector<16x16xf32>
    %63 = vector.shape_cast %22 : vector<16x1xi1> to vector<16x1xi1>
    %64 = vector.broadcast %63 : vector<16x1xi1> to vector<16x16xi1>
    %65 = arith.select %64, %61, %62 : vector<16x16xi1>, vector<16x16xf32>
    %c15_i32_24 = arith.constant 15 : i32
    %66 = tpu.dynamic_rotate %26 by %c15_i32_24 dim 0 : vector<16x16xf32>, i32 -> vector<16x16xf32>
    %67 = vector.shape_cast %24 : vector<16x1xi1> to vector<16x1xi1>
    %68 = vector.broadcast %67 : vector<16x1xi1> to vector<16x16xi1>
    %69 = arith.select %68, %61, %66 : vector<16x16xi1>, vector<16x16xf32>
    %70 = arith.truncf %65 : vector<16x16xf32> to vector<16x16xbf16>
    %c3 = arith.constant 3 : index
    %c0_25 = arith.constant 0 : index
    %c0_26 = arith.constant 0 : index
    %71 = vector.load %arg2[%c3, %c0_25, %c0_26] : memref<9x16x32xbf16, #tpu.memory_space<vmem>>, vector<1x16x32xbf16>
    %72 = vector.shape_cast %71 : vector<1x16x32xbf16> to vector<16x32xbf16>
    %cst_27 = arith.constant dense<0.000000e+00> : vector<16x32xf32>
    %73 = tpu.matmul %70, %72, %cst_27 {dimension_numbers = #tpu.dot_dimension_numbers<[1], [0], [0], [1], [0, 0, 1, 1], [], []>} : vector<16x16xbf16>, vector<16x32xbf16>, vector<16x32xf32> -> vector<16x32xf32>
    %74 = arith.addf %60, %73 : vector<16x32xf32>
    %75 = arith.truncf %26 : vector<16x16xf32> to vector<16x16xbf16>
    %c4 = arith.constant 4 : index
    %c0_28 = arith.constant 0 : index
    %c0_29 = arith.constant 0 : index
    %76 = vector.load %arg2[%c4, %c0_28, %c0_29] : memref<9x16x32xbf16, #tpu.memory_space<vmem>>, vector<1x16x32xbf16>
    %77 = vector.shape_cast %76 : vector<1x16x32xbf16> to vector<16x32xbf16>
    %cst_30 = arith.constant dense<0.000000e+00> : vector<16x32xf32>
    %78 = tpu.matmul %75, %77, %cst_30 {dimension_numbers = #tpu.dot_dimension_numbers<[1], [0], [0], [1], [0, 0, 1, 1], [], []>} : vector<16x16xbf16>, vector<16x32xbf16>, vector<16x32xf32> -> vector<16x32xf32>
    %79 = arith.addf %74, %78 : vector<16x32xf32>
    %80 = arith.truncf %69 : vector<16x16xf32> to vector<16x16xbf16>
    %c5 = arith.constant 5 : index
    %c0_31 = arith.constant 0 : index
    %c0_32 = arith.constant 0 : index
    %81 = vector.load %arg2[%c5, %c0_31, %c0_32] : memref<9x16x32xbf16, #tpu.memory_space<vmem>>, vector<1x16x32xbf16>
    %82 = vector.shape_cast %81 : vector<1x16x32xbf16> to vector<16x32xbf16>
    %cst_33 = arith.constant dense<0.000000e+00> : vector<16x32xf32>
    %83 = tpu.matmul %80, %82, %cst_33 {dimension_numbers = #tpu.dot_dimension_numbers<[1], [0], [0], [1], [0, 0, 1, 1], [], []>} : vector<16x16xbf16>, vector<16x32xbf16>, vector<16x32xf32> -> vector<16x32xf32>
    %84 = arith.addf %79, %83 : vector<16x32xf32>
    %cst_34 = arith.constant 0.000000e+00 : f32
    %85 = vector.broadcast %cst_34 : f32 to vector<16x16xf32>
    %c1_i32_35 = arith.constant 1 : i32
    %86 = tpu.dynamic_rotate %35 by %c1_i32_35 dim 0 : vector<16x16xf32>, i32 -> vector<16x16xf32>
    %87 = vector.shape_cast %22 : vector<16x1xi1> to vector<16x1xi1>
    %88 = vector.broadcast %87 : vector<16x1xi1> to vector<16x16xi1>
    %89 = arith.select %88, %85, %86 : vector<16x16xi1>, vector<16x16xf32>
    %c15_i32_36 = arith.constant 15 : i32
    %90 = tpu.dynamic_rotate %35 by %c15_i32_36 dim 0 : vector<16x16xf32>, i32 -> vector<16x16xf32>
    %91 = vector.shape_cast %24 : vector<16x1xi1> to vector<16x1xi1>
    %92 = vector.broadcast %91 : vector<16x1xi1> to vector<16x16xi1>
    %93 = arith.select %92, %85, %90 : vector<16x16xi1>, vector<16x16xf32>
    %94 = arith.truncf %89 : vector<16x16xf32> to vector<16x16xbf16>
    %c6 = arith.constant 6 : index
    %c0_37 = arith.constant 0 : index
    %c0_38 = arith.constant 0 : index
    %95 = vector.load %arg2[%c6, %c0_37, %c0_38] : memref<9x16x32xbf16, #tpu.memory_space<vmem>>, vector<1x16x32xbf16>
    %96 = vector.shape_cast %95 : vector<1x16x32xbf16> to vector<16x32xbf16>
    %cst_39 = arith.constant dense<0.000000e+00> : vector<16x32xf32>
    %97 = tpu.matmul %94, %96, %cst_39 {dimension_numbers = #tpu.dot_dimension_numbers<[1], [0], [0], [1], [0, 0, 1, 1], [], []>} : vector<16x16xbf16>, vector<16x32xbf16>, vector<16x32xf32> -> vector<16x32xf32>
    %98 = arith.addf %84, %97 : vector<16x32xf32>
    %99 = arith.truncf %35 : vector<16x16xf32> to vector<16x16xbf16>
    %c7 = arith.constant 7 : index
    %c0_40 = arith.constant 0 : index
    %c0_41 = arith.constant 0 : index
    %100 = vector.load %arg2[%c7, %c0_40, %c0_41] : memref<9x16x32xbf16, #tpu.memory_space<vmem>>, vector<1x16x32xbf16>
    %101 = vector.shape_cast %100 : vector<1x16x32xbf16> to vector<16x32xbf16>
    %cst_42 = arith.constant dense<0.000000e+00> : vector<16x32xf32>
    %102 = tpu.matmul %99, %101, %cst_42 {dimension_numbers = #tpu.dot_dimension_numbers<[1], [0], [0], [1], [0, 0, 1, 1], [], []>} : vector<16x16xbf16>, vector<16x32xbf16>, vector<16x32xf32> -> vector<16x32xf32>
    %103 = arith.addf %98, %102 : vector<16x32xf32>
    %104 = arith.truncf %93 : vector<16x16xf32> to vector<16x16xbf16>
    %c8 = arith.constant 8 : index
    %c0_43 = arith.constant 0 : index
    %c0_44 = arith.constant 0 : index
    %105 = vector.load %arg2[%c8, %c0_43, %c0_44] : memref<9x16x32xbf16, #tpu.memory_space<vmem>>, vector<1x16x32xbf16>
    %106 = vector.shape_cast %105 : vector<1x16x32xbf16> to vector<16x32xbf16>
    %cst_45 = arith.constant dense<0.000000e+00> : vector<16x32xf32>
    %107 = tpu.matmul %104, %106, %cst_45 {dimension_numbers = #tpu.dot_dimension_numbers<[1], [0], [0], [1], [0, 0, 1, 1], [], []>} : vector<16x16xbf16>, vector<16x32xbf16>, vector<16x32xf32> -> vector<16x32xf32>
    %108 = arith.addf %103, %107 : vector<16x32xf32>
    %c0_46 = arith.constant 0 : index
    %c0_47 = arith.constant 0 : index
    %109 = vector.load %arg3[%c0_46, %c0_47] : memref<1x32xf32, #tpu.memory_space<vmem>>, vector<1x32xf32>
    %110 = vector.broadcast %109 : vector<1x32xf32> to vector<16x32xf32>
    %111 = arith.addf %108, %110 : vector<16x32xf32>
    %cst_48 = arith.constant 0.000000e+00 : f32
    %112 = vector.broadcast %cst_48 : f32 to vector<16x32xf32>
    %113 = arith.cmpf oge, %111, %112 : vector<16x32xf32>
    %cst_49 = arith.constant 2.000000e-01 : f32
    %114 = vector.broadcast %cst_49 : f32 to vector<16x32xf32>
    %115 = arith.mulf %114, %111 : vector<16x32xf32>
    %116 = arith.select %113, %111, %115 : vector<16x32xi1>, vector<16x32xf32>
    %cst_50 = arith.constant 0.000000e+00 : f32
    %117 = vector.broadcast %cst_50 : f32 to vector<16x32xf32>
    %c4_i32_51 = arith.constant 4 : i32
    %118 = tpu.dynamic_rotate %116 by %c4_i32_51 dim 0 : vector<16x32xf32>, i32 -> vector<16x32xf32>
    %119 = vector.shape_cast %18 : vector<16x1xi1> to vector<16x1xi1>
    %120 = vector.broadcast %119 : vector<16x1xi1> to vector<16x32xi1>
    %121 = arith.select %120, %117, %118 : vector<16x32xi1>, vector<16x32xf32>
    %c12_i32_52 = arith.constant 12 : i32
    %122 = tpu.dynamic_rotate %116 by %c12_i32_52 dim 0 : vector<16x32xf32>, i32 -> vector<16x32xf32>
    %123 = vector.shape_cast %20 : vector<16x1xi1> to vector<16x1xi1>
    %124 = vector.broadcast %123 : vector<16x1xi1> to vector<16x32xi1>
    %125 = arith.select %124, %117, %122 : vector<16x32xi1>, vector<16x32xf32>
    %cst_53 = arith.constant 0.000000e+00 : f32
    %126 = vector.broadcast %cst_53 : f32 to vector<16x32xf32>
    %cst_54 = arith.constant 0.000000e+00 : f32
    %127 = vector.broadcast %cst_54 : f32 to vector<16x32xf32>
    %c1_i32_55 = arith.constant 1 : i32
    %128 = tpu.dynamic_rotate %121 by %c1_i32_55 dim 0 : vector<16x32xf32>, i32 -> vector<16x32xf32>
    %129 = vector.shape_cast %22 : vector<16x1xi1> to vector<16x1xi1>
    %130 = vector.broadcast %129 : vector<16x1xi1> to vector<16x32xi1>
    %131 = arith.select %130, %127, %128 : vector<16x32xi1>, vector<16x32xf32>
    %c15_i32_56 = arith.constant 15 : i32
    %132 = tpu.dynamic_rotate %121 by %c15_i32_56 dim 0 : vector<16x32xf32>, i32 -> vector<16x32xf32>
    %133 = vector.shape_cast %24 : vector<16x1xi1> to vector<16x1xi1>
    %134 = vector.broadcast %133 : vector<16x1xi1> to vector<16x32xi1>
    %135 = arith.select %134, %127, %132 : vector<16x32xi1>, vector<16x32xf32>
    %136 = arith.truncf %131 : vector<16x32xf32> to vector<16x32xbf16>
    %c0_57 = arith.constant 0 : index
    %c0_58 = arith.constant 0 : index
    %c0_59 = arith.constant 0 : index
    %137 = vector.load %arg4[%c0_57, %c0_58, %c0_59] : memref<9x32x32xbf16, #tpu.memory_space<vmem>>, vector<1x32x32xbf16>
    %138 = vector.shape_cast %137 : vector<1x32x32xbf16> to vector<32x32xbf16>
    %cst_60 = arith.constant dense<0.000000e+00> : vector<16x32xf32>
    %139 = tpu.matmul %136, %138, %cst_60 {dimension_numbers = #tpu.dot_dimension_numbers<[1], [0], [0], [1], [0, 0, 1, 1], [], []>} : vector<16x32xbf16>, vector<32x32xbf16>, vector<16x32xf32> -> vector<16x32xf32>
    %140 = arith.addf %126, %139 : vector<16x32xf32>
    %141 = arith.truncf %121 : vector<16x32xf32> to vector<16x32xbf16>
    %c1_61 = arith.constant 1 : index
    %c0_62 = arith.constant 0 : index
    %c0_63 = arith.constant 0 : index
    %142 = vector.load %arg4[%c1_61, %c0_62, %c0_63] : memref<9x32x32xbf16, #tpu.memory_space<vmem>>, vector<1x32x32xbf16>
    %143 = vector.shape_cast %142 : vector<1x32x32xbf16> to vector<32x32xbf16>
    %cst_64 = arith.constant dense<0.000000e+00> : vector<16x32xf32>
    %144 = tpu.matmul %141, %143, %cst_64 {dimension_numbers = #tpu.dot_dimension_numbers<[1], [0], [0], [1], [0, 0, 1, 1], [], []>} : vector<16x32xbf16>, vector<32x32xbf16>, vector<16x32xf32> -> vector<16x32xf32>
    %145 = arith.addf %140, %144 : vector<16x32xf32>
    %146 = arith.truncf %135 : vector<16x32xf32> to vector<16x32xbf16>
    %c2_65 = arith.constant 2 : index
    %c0_66 = arith.constant 0 : index
    %c0_67 = arith.constant 0 : index
    %147 = vector.load %arg4[%c2_65, %c0_66, %c0_67] : memref<9x32x32xbf16, #tpu.memory_space<vmem>>, vector<1x32x32xbf16>
    %148 = vector.shape_cast %147 : vector<1x32x32xbf16> to vector<32x32xbf16>
    %cst_68 = arith.constant dense<0.000000e+00> : vector<16x32xf32>
    %149 = tpu.matmul %146, %148, %cst_68 {dimension_numbers = #tpu.dot_dimension_numbers<[1], [0], [0], [1], [0, 0, 1, 1], [], []>} : vector<16x32xbf16>, vector<32x32xbf16>, vector<16x32xf32> -> vector<16x32xf32>
    %150 = arith.addf %145, %149 : vector<16x32xf32>
    %cst_69 = arith.constant 0.000000e+00 : f32
    %151 = vector.broadcast %cst_69 : f32 to vector<16x32xf32>
    %c1_i32_70 = arith.constant 1 : i32
    %152 = tpu.dynamic_rotate %116 by %c1_i32_70 dim 0 : vector<16x32xf32>, i32 -> vector<16x32xf32>
    %153 = vector.shape_cast %22 : vector<16x1xi1> to vector<16x1xi1>
    %154 = vector.broadcast %153 : vector<16x1xi1> to vector<16x32xi1>
    %155 = arith.select %154, %151, %152 : vector<16x32xi1>, vector<16x32xf32>
    %c15_i32_71 = arith.constant 15 : i32
    %156 = tpu.dynamic_rotate %116 by %c15_i32_71 dim 0 : vector<16x32xf32>, i32 -> vector<16x32xf32>
    %157 = vector.shape_cast %24 : vector<16x1xi1> to vector<16x1xi1>
    %158 = vector.broadcast %157 : vector<16x1xi1> to vector<16x32xi1>
    %159 = arith.select %158, %151, %156 : vector<16x32xi1>, vector<16x32xf32>
    %160 = arith.truncf %155 : vector<16x32xf32> to vector<16x32xbf16>
    %c3_72 = arith.constant 3 : index
    %c0_73 = arith.constant 0 : index
    %c0_74 = arith.constant 0 : index
    %161 = vector.load %arg4[%c3_72, %c0_73, %c0_74] : memref<9x32x32xbf16, #tpu.memory_space<vmem>>, vector<1x32x32xbf16>
    %162 = vector.shape_cast %161 : vector<1x32x32xbf16> to vector<32x32xbf16>
    %cst_75 = arith.constant dense<0.000000e+00> : vector<16x32xf32>
    %163 = tpu.matmul %160, %162, %cst_75 {dimension_numbers = #tpu.dot_dimension_numbers<[1], [0], [0], [1], [0, 0, 1, 1], [], []>} : vector<16x32xbf16>, vector<32x32xbf16>, vector<16x32xf32> -> vector<16x32xf32>
    %164 = arith.addf %150, %163 : vector<16x32xf32>
    %165 = arith.truncf %116 : vector<16x32xf32> to vector<16x32xbf16>
    %c4_76 = arith.constant 4 : index
    %c0_77 = arith.constant 0 : index
    %c0_78 = arith.constant 0 : index
    %166 = vector.load %arg4[%c4_76, %c0_77, %c0_78] : memref<9x32x32xbf16, #tpu.memory_space<vmem>>, vector<1x32x32xbf16>
    %167 = vector.shape_cast %166 : vector<1x32x32xbf16> to vector<32x32xbf16>
    %cst_79 = arith.constant dense<0.000000e+00> : vector<16x32xf32>
    %168 = tpu.matmul %165, %167, %cst_79 {dimension_numbers = #tpu.dot_dimension_numbers<[1], [0], [0], [1], [0, 0, 1, 1], [], []>} : vector<16x32xbf16>, vector<32x32xbf16>, vector<16x32xf32> -> vector<16x32xf32>
    %169 = arith.addf %164, %168 : vector<16x32xf32>
    %170 = arith.truncf %159 : vector<16x32xf32> to vector<16x32xbf16>
    %c5_80 = arith.constant 5 : index
    %c0_81 = arith.constant 0 : index
    %c0_82 = arith.constant 0 : index
    %171 = vector.load %arg4[%c5_80, %c0_81, %c0_82] : memref<9x32x32xbf16, #tpu.memory_space<vmem>>, vector<1x32x32xbf16>
    %172 = vector.shape_cast %171 : vector<1x32x32xbf16> to vector<32x32xbf16>
    %cst_83 = arith.constant dense<0.000000e+00> : vector<16x32xf32>
    %173 = tpu.matmul %170, %172, %cst_83 {dimension_numbers = #tpu.dot_dimension_numbers<[1], [0], [0], [1], [0, 0, 1, 1], [], []>} : vector<16x32xbf16>, vector<32x32xbf16>, vector<16x32xf32> -> vector<16x32xf32>
    %174 = arith.addf %169, %173 : vector<16x32xf32>
    %cst_84 = arith.constant 0.000000e+00 : f32
    %175 = vector.broadcast %cst_84 : f32 to vector<16x32xf32>
    %c1_i32_85 = arith.constant 1 : i32
    %176 = tpu.dynamic_rotate %125 by %c1_i32_85 dim 0 : vector<16x32xf32>, i32 -> vector<16x32xf32>
    %177 = vector.shape_cast %22 : vector<16x1xi1> to vector<16x1xi1>
    %178 = vector.broadcast %177 : vector<16x1xi1> to vector<16x32xi1>
    %179 = arith.select %178, %175, %176 : vector<16x32xi1>, vector<16x32xf32>
    %c15_i32_86 = arith.constant 15 : i32
    %180 = tpu.dynamic_rotate %125 by %c15_i32_86 dim 0 : vector<16x32xf32>, i32 -> vector<16x32xf32>
    %181 = vector.shape_cast %24 : vector<16x1xi1> to vector<16x1xi1>
    %182 = vector.broadcast %181 : vector<16x1xi1> to vector<16x32xi1>
    %183 = arith.select %182, %175, %180 : vector<16x32xi1>, vector<16x32xf32>
    %184 = arith.truncf %179 : vector<16x32xf32> to vector<16x32xbf16>
    %c6_87 = arith.constant 6 : index
    %c0_88 = arith.constant 0 : index
    %c0_89 = arith.constant 0 : index
    %185 = vector.load %arg4[%c6_87, %c0_88, %c0_89] : memref<9x32x32xbf16, #tpu.memory_space<vmem>>, vector<1x32x32xbf16>
    %186 = vector.shape_cast %185 : vector<1x32x32xbf16> to vector<32x32xbf16>
    %cst_90 = arith.constant dense<0.000000e+00> : vector<16x32xf32>
    %187 = tpu.matmul %184, %186, %cst_90 {dimension_numbers = #tpu.dot_dimension_numbers<[1], [0], [0], [1], [0, 0, 1, 1], [], []>} : vector<16x32xbf16>, vector<32x32xbf16>, vector<16x32xf32> -> vector<16x32xf32>
    %188 = arith.addf %174, %187 : vector<16x32xf32>
    %189 = arith.truncf %125 : vector<16x32xf32> to vector<16x32xbf16>
    %c7_91 = arith.constant 7 : index
    %c0_92 = arith.constant 0 : index
    %c0_93 = arith.constant 0 : index
    %190 = vector.load %arg4[%c7_91, %c0_92, %c0_93] : memref<9x32x32xbf16, #tpu.memory_space<vmem>>, vector<1x32x32xbf16>
    %191 = vector.shape_cast %190 : vector<1x32x32xbf16> to vector<32x32xbf16>
    %cst_94 = arith.constant dense<0.000000e+00> : vector<16x32xf32>
    %192 = tpu.matmul %189, %191, %cst_94 {dimension_numbers = #tpu.dot_dimension_numbers<[1], [0], [0], [1], [0, 0, 1, 1], [], []>} : vector<16x32xbf16>, vector<32x32xbf16>, vector<16x32xf32> -> vector<16x32xf32>
    %193 = arith.addf %188, %192 : vector<16x32xf32>
    %194 = arith.truncf %183 : vector<16x32xf32> to vector<16x32xbf16>
    %c8_95 = arith.constant 8 : index
    %c0_96 = arith.constant 0 : index
    %c0_97 = arith.constant 0 : index
    %195 = vector.load %arg4[%c8_95, %c0_96, %c0_97] : memref<9x32x32xbf16, #tpu.memory_space<vmem>>, vector<1x32x32xbf16>
    %196 = vector.shape_cast %195 : vector<1x32x32xbf16> to vector<32x32xbf16>
    %cst_98 = arith.constant dense<0.000000e+00> : vector<16x32xf32>
    %197 = tpu.matmul %194, %196, %cst_98 {dimension_numbers = #tpu.dot_dimension_numbers<[1], [0], [0], [1], [0, 0, 1, 1], [], []>} : vector<16x32xbf16>, vector<32x32xbf16>, vector<16x32xf32> -> vector<16x32xf32>
    %198 = arith.addf %193, %197 : vector<16x32xf32>
    %c0_99 = arith.constant 0 : index
    %c0_100 = arith.constant 0 : index
    %199 = vector.load %arg5[%c0_99, %c0_100] : memref<1x32xf32, #tpu.memory_space<vmem>>, vector<1x32xf32>
    %200 = vector.broadcast %199 : vector<1x32xf32> to vector<16x32xf32>
    %201 = arith.addf %198, %200 : vector<16x32xf32>
    %cst_101 = arith.constant 0.000000e+00 : f32
    %202 = vector.broadcast %cst_101 : f32 to vector<16x32xf32>
    %203 = arith.cmpf oge, %201, %202 : vector<16x32xf32>
    %cst_102 = arith.constant 2.000000e-01 : f32
    %204 = vector.broadcast %cst_102 : f32 to vector<16x32xf32>
    %205 = arith.mulf %204, %201 : vector<16x32xf32>
    %206 = arith.select %203, %201, %205 : vector<16x32xi1>, vector<16x32xf32>
    %c0_103 = arith.constant 0 : index
    %c0_104 = arith.constant 0 : index
    %207 = vector.load %arg7[%c0_103, %c0_104] : memref<16x32xf32, #tpu.memory_space<vmem>>, vector<16x32xf32>
    tpu.vector_store %arg7[%c0_103, %c0_104], %206 {strides = array<i32>} : memref<16x32xf32, #tpu.memory_space<vmem>>, vector<16x32xf32>,
    %c0_105 = arith.constant 0 : index
    %c0_106 = arith.constant 0 : index
    %208 = tpu.strided_load %arg7[%c0_105, %c0_106] {strides = array<i32: 2, 1>} : memref<16x32xf32, #tpu.memory_space<vmem>>, vector<8x32xf32>
    %c1_107 = arith.constant 1 : index
    %c0_108 = arith.constant 0 : index
    %209 = tpu.strided_load %arg7[%c1_107, %c0_108] {strides = array<i32: 2, 1>} : memref<16x32xf32, #tpu.memory_space<vmem>>, vector<8x32xf32>
    %210 = arith.addf %208, %209 : vector<8x32xf32>
    %211 = vector.extract_strided_slice %210 {offsets = [0, 0], sizes = [2, 32], strides = [1, 1]} : vector<8x32xf32> to vector<2x32xf32>
    %212 = vector.extract_strided_slice %210 {offsets = [2, 0], sizes = [2, 32], strides = [1, 1]} : vector<8x32xf32> to vector<2x32xf32>
    %213 = arith.addf %211, %212 : vector<2x32xf32>
    %cst_109 = arith.constant 2.500000e-01 : f32
    %214 = vector.broadcast %cst_109 : f32 to vector<2x32xf32>
    %215 = arith.mulf %214, %213 : vector<2x32xf32>
    %c0_110 = arith.constant 0 : index
    %c0_111 = arith.constant 0 : index
    %c0_112 = arith.constant 0 : index
    %216 = vector.load %arg6[%c0_110, %c0_111, %c0_112] : memref<1x4x32xf32, #tpu.memory_space<vmem>>, vector<1x2x32xf32>
    %217 = vector.shape_cast %216 : vector<1x2x32xf32> to vector<2x32xf32>
    %218 = vector.shape_cast %215 : vector<2x32xf32> to vector<1x2x32xf32>
    tpu.vector_store %arg6[%c0_110, %c0_111, %c0_112], %218 {strides = array<i32>} : memref<1x4x32xf32, #tpu.memory_space<vmem>>, vector<1x2x32xf32>,
    %219 = vector.extract_strided_slice %210 {offsets = [4, 0], sizes = [2, 32], strides = [1, 1]} : vector<8x32xf32> to vector<2x32xf32>
    %220 = vector.extract_strided_slice %210 {offsets = [6, 0], sizes = [2, 32], strides = [1, 1]} : vector<8x32xf32> to vector<2x32xf32>
    %221 = arith.addf %219, %220 : vector<2x32xf32>
    %cst_113 = arith.constant 2.500000e-01 : f32
    %222 = vector.broadcast %cst_113 : f32 to vector<2x32xf32>
    %223 = arith.mulf %222, %221 : vector<2x32xf32>
    %c0_114 = arith.constant 0 : index
    %c2_115 = arith.constant 2 : index
    %c0_116 = arith.constant 0 : index
    %224 = vector.load %arg6[%c0_114, %c2_115, %c0_116] : memref<1x4x32xf32, #tpu.memory_space<vmem>>, vector<1x2x32xf32>
    %225 = vector.shape_cast %224 : vector<1x2x32xf32> to vector<2x32xf32>
    %226 = vector.shape_cast %223 : vector<2x32xf32> to vector<1x2x32xf32>
    tpu.vector_store %arg6[%c0_114, %c2_115, %c0_116], %226 {strides = array<i32>} : memref<1x4x32xf32, #tpu.memory_space<vmem>>, vector<1x2x32xf32>,
    return
  }
  func.func @transform_0(%arg0: i32) -> (i32, i32, i32) {
    %c0_i32 = arith.constant 0 : i32
    %c0_i32_0 = arith.constant 0 : i32
    %c0_i32_1 = arith.constant 0 : i32
    return %arg0, %c0_i32, %c0_i32_0 : i32, i32, i32
  }
  func.func @transform_1(%arg0: i32) -> (i32, i32, i32) {
    %c0_i32 = arith.constant 0 : i32
    %c0_i32_0 = arith.constant 0 : i32
    %c0_i32_1 = arith.constant 0 : i32
    %c0_i32_2 = arith.constant 0 : i32
    return %c0_i32, %c0_i32_0, %c0_i32_1 : i32, i32, i32
  }
  func.func @transform_2(%arg0: i32) -> (i32, i32) {
    %c0_i32 = arith.constant 0 : i32
    %c0_i32_0 = arith.constant 0 : i32
    %c0_i32_1 = arith.constant 0 : i32
    return %c0_i32, %c0_i32_0 : i32, i32
  }
  func.func @transform_3(%arg0: i32) -> (i32, i32, i32) {
    %c0_i32 = arith.constant 0 : i32
    %c0_i32_0 = arith.constant 0 : i32
    %c0_i32_1 = arith.constant 0 : i32
    %c0_i32_2 = arith.constant 0 : i32
    return %c0_i32, %c0_i32_0, %c0_i32_1 : i32, i32, i32
  }
  func.func @transform_4(%arg0: i32) -> (i32, i32) {
    %c0_i32 = arith.constant 0 : i32
    %c0_i32_0 = arith.constant 0 : i32
    %c0_i32_1 = arith.constant 0 : i32
    return %c0_i32, %c0_i32_0 : i32, i32
  }
  func.func @transform_5(%arg0: i32) -> (i32, i32, i32) {
    %c0_i32 = arith.constant 0 : i32
    %c0_i32_0 = arith.constant 0 : i32
    %c0_i32_1 = arith.constant 0 : i32
    return %arg0, %c0_i32, %c0_i32_0 : i32, i32, i32
  }
}

module attributes {stable_mosaic.version = 11 : i64} {
  func.func @final_linear_kernel(%arg0: memref<2x128xf32, #tpu.memory_space<vmem>>, %arg1: memref<128x1xf32, #tpu.memory_space<vmem>>, %arg2: memref<1x1xf32, #tpu.memory_space<vmem>>, %arg3: memref<2x1xf32, #tpu.memory_space<vmem>>) attributes {dimension_semantics = [], scalar_prefetch = 0 : i64, scratch_operands = 0 : i64, tpu.core_type = #tpu.core_type<tc>} {
    %c0 = arith.constant 0 : index
    %c0_0 = arith.constant 0 : index
    %0 = vector.load %arg0[%c0, %c0_0] : memref<2x128xf32, #tpu.memory_space<vmem>>, vector<2x128xf32>
    %c0_1 = arith.constant 0 : index
    %c0_2 = arith.constant 0 : index
    %1 = vector.load %arg1[%c0_1, %c0_2] : memref<128x1xf32, #tpu.memory_space<vmem>>, vector<128x1xf32>
    %cst = arith.constant dense<0.000000e+00> : vector<2x1xf32>
    %2 = tpu.matmul %0, %1, %cst {dimension_numbers = #tpu.dot_dimension_numbers<[1], [0], [0], [1], [0, 0, 1, 1], [], []>} : vector<2x128xf32>, vector<128x1xf32>, vector<2x1xf32> -> vector<2x1xf32>
    %c0_3 = arith.constant 0 : index
    %c0_4 = arith.constant 0 : index
    %3 = vector.load %arg2[%c0_3, %c0_4] : memref<1x1xf32, #tpu.memory_space<vmem>>, vector<1x1xf32>
    %4 = vector.broadcast %3 : vector<1x1xf32> to vector<2x1xf32>
    %5 = arith.addf %2, %4 : vector<2x1xf32>
    %c0_5 = arith.constant 0 : index
    %c0_6 = arith.constant 0 : index
    %6 = vector.load %arg3[%c0_5, %c0_6] : memref<2x1xf32, #tpu.memory_space<vmem>>, vector<2x1xf32>
    tpu.vector_store %arg3[%c0_5, %c0_6], %5 {strides = array<i32>} : memref<2x1xf32, #tpu.memory_space<vmem>>, vector<2x1xf32>,
    return
  }
}

</mosaic_0001>

<bundles_post_ra>
// kernel: discriminator_forward.7
= control target key start
LH: loop header
LB: loop body
LE: loop exit
PB: predicated region body
PF: predicated region fallthrough
CT: control target
= control target key end

     0   :  { %v196_v0 = vmov 0.0|0.0   ;;  %vm197_vm0 = vmmov 0   ;;  %v198_v4 = vmov 0.0   ;;  %vm110_vm1 = vcmask 1024   ;;  %s276_s1 = inlined_call_operand.vmem [shape: f32[128,1], index: 1, kind: input, shape index: {}]   ;;  %s277_s2 = inlined_call_operand.<no memory space> [shape: f32[1,1], index: 2, kind: input, shape index: {}]   ;;  %s278_s0 = inlined_call_operand.vmem [shape: f32[2,128], index: 0, kind: input, shape index: {}]   ;;  %s279_s3 = inlined_call_operand.vmem [shape: f32[2,1], index: 3, kind: output, shape index: {}]  }
   0x1   :  { %169 = vmatprep.subr.bf16.mxu0 %v196_v0  ;;  %v17_v1 = vld [vmem:[%s276_s1] sm:$0xff]  ;;  %v18_v2 = vld [vmem:[%s276_s1 + $0x8] sm:$0xff]  ;;  %v19_v3 = vld [vmem:[%s276_s1 + $0x10] sm:$0xff]  ;;  %166 = vmatprep.mubr.msk.f32.mxu0 %vm197_vm0, %v198_v4  ;;  %v8_v5 = vstv %s277_s2 }
   0x2   :  { %v170_v6 = vpack.c.bf16 %v18_v2, %v17_v1  ;;  %v20_v7 = vld [vmem:[%s276_s1 + $0x18] sm:$0xff]  ;;  %9 = vst [vmem:[#allocation2] sm:$0x1] %v8_v5  ;;  %v21_v9 = vld [vmem:[%s276_s1 + $0x20] sm:$0xff]  ;;  %v22_v10 = vld [vmem:[%s276_s1 + $0x28] sm:$0xff] }
   0x3   :  { %v173_v8 = vpack.c.bf16 %v20_v7, %v19_v3  ;;  %v176_v11 = vpack.c.bf16 %v22_v10, %v21_v9  ;;  %v23_v12 = vld [vmem:[%s276_s1 + $0x30] sm:$0xff]  ;;  %v24_v13 = vld [vmem:[%s276_s1 + $0x38] sm:$0xff]  ;;  %v25_v15 = vld [vmem:[%s276_s1 + $0x40] sm:$0xff] }
   0x4   :  { %171 = vmatpush3.bf16.msra.mxu0 %v170_v6  ;;  %v179_v14 = vpack.c.bf16 %v24_v13, %v23_v12  ;;  %v26_v16 = vld [vmem:[%s276_s1 + $0x48] sm:$0xff]  ;;  %v27_v18 = vld [vmem:[%s276_s1 + $0x50] sm:$0xff]  ;;  %v28_v19 = vld [vmem:[%s276_s1 + $0x58] sm:$0xff] }
   0x5   :  { %172 = vmatprep.subr.bf16.mxu0 %v196_v0  ;;  %v182_v17 = vpack.c.bf16 %v26_v16, %v25_v15  ;;  %v185_v20 = vpack.c.bf16 %v28_v19, %v27_v18  ;;  %v29_v21 = vld [vmem:[%s276_s1 + $0x60] sm:$0xff]  ;;  %v30_v22 = vld [vmem:[%s276_s1 + $0x68] sm:$0xff]  ;;  %v31_v24 = vld [vmem:[%s276_s1 + $0x70] sm:$0xff] }
   0x6   :  { %v188_v23 = vpack.c.bf16 %v30_v22, %v29_v21  ;;  %v32_v25 = vld [vmem:[%s276_s1 + $0x78] sm:$0xff]  ;;  %v16_v27 = vld [vmem:[%s278_s0] sm:$0x3] }
   0x7   :  { %v191_v26 = vpack.c.bf16 %v32_v25, %v31_v24 }
   0x8   :  { %174 = vmatpush3.bf16.msra.mxu0 %v173_v8 }
   0x9   :  { %175 = vmatprep.subr.bf16.mxu0 %v196_v0  ;;  %v116_v28 = vld [vmem:[#allocation2] ss:$0 sm:$0xff] }
   0xc   :  { %177 = vmatpush3.bf16.msra.mxu0 %v176_v11 }
   0xd   :  { %178 = vmatprep.subr.bf16.mxu0 %v196_v0 }
  0x10   :  { %180 = vmatpush3.bf16.msra.mxu0 %v179_v14 }
  0x11   :  { %181 = vmatprep.subr.bf16.mxu0 %v196_v0 }
  0x14   :  { %183 = vmatpush3.bf16.msra.mxu0 %v182_v17 }
  0x15   :  { %184 = vmatprep.subr.bf16.mxu0 %v196_v0 }
  0x18   :  { %186 = vmatpush3.bf16.msra.mxu0 %v185_v20 }
  0x19   :  { %187 = vmatprep.subr.bf16.mxu0 %v196_v0 }
  0x1c   :  { %189 = vmatpush3.bf16.msra.mxu0 %v188_v23 }
  0x1d   :  { %190 = vmatprep.subr.bf16.mxu0 %v196_v0 }
  0x20   :  { %192 = vmatpush3.bf16.msra.mxu0 %v191_v26 }
  0x23   :  { %167 = vmatmul.mubr.f32.vlgmr.msra.gmra.mrb[0].mxu0 %v16_v27 }
  0xf6   :  { %v106_v29 = vpop.f32.mrb[0].mxu0 }
  0xf7   :  { %v107_v30 = vadd.f32 %v116_v28, %v106_v29  ;;  %v168_v31 = vpop.f32.mrb[1].mxu0 }
  0xf9   :  { %111 = vst.msk [vmem:[%s279_s3] sm:$0x3] %vm110_vm1, %v107_v30 }

// kernel: discriminator_forward.6
= control target key start
LH: loop header
LB: loop body
LE: loop exit
PB: predicated region body
PF: predicated region fallthrough
CT: control target
= control target key end

     0   :  { %s1891_s18 = smov 0   ;;  %s2276_s0 = inlined_call_operand.vmem [shape: f32[2,16,16], index: 0, kind: input, shape index: {}]   ;;  %s2277_s1 = inlined_call_operand.vmem [shape: bf16[9,16,32], index: 1, kind: input, shape index: {}]   ;;  %s2278_s2 = inlined_call_operand.vmem [shape: f32[1,32], index: 2, kind: input, shape index: {}]   ;;  %s2279_s3 = inlined_call_operand.vmem [shape: bf16[9,32,32], index: 3, kind: input, shape index: {}]   ;;  %s2280_s4 = inlined_call_operand.vmem [shape: f32[1,32], index: 4, kind: input, shape index: {}]   ;;  %s2281_s5 = inlined_call_operand.vmem [shape: f32[2,4,32], index: 5, kind: output, shape index: {}]  }
   0x1 LB: > { %s1537_s19 = sadd.s32 4294967295, %s1857_s18   ;;  %p1541_p0 = scmp.ge.s32.totalorder %s1857_s18, 1  ;;  %s1857_s18 = sphi %s1891_s18, %s15_s18  }
   0x2   : > { %p187_p1 = scmp.lt.s32.totalorder %s1857_s18, 3 }
   0x4   : > { %p188_p2 = pnand %p1541_p0, %p187_p1 }
   0x5   : > { %v1824_v0 = vld [vmem:[%s2277_s1 + $0x8] sm:$0xff] (!%p188_p2)   ;;  %v224_v1 = vlaneseq (!%p188_p2)  ;;  %v1859_v2 = vmov (!%p188_p2), 0.0   ;;  %p214_p3 = scmp.lt.s32.totalorder (!%p188_p2), %s1537_s19, 1  ;;  %vm1860_vm0 = vmmov (!%p188_p2), 0   ;;  %v1826_v4 = vld [vmem:[%s2277_s1] sm:$0xff] (!%p188_p2)   ;;  %vm312_vm1 = vcmask (!%p188_p2), 130048  }
   0x6   : > { %191 = sbr.rel (%p188_p2) target bundleno = 553 (0x229), region = 40  ;;  %1688 = vmatprep.subr.bf16.mxu0 (!%p188_p2), %v1859_v2  ;;  %1694 = vmatprep.subr.bf16.mxu1 (!%p188_p2), %v1859_v2  ;;  %v1825_v22 = vld [vmem:[%s2277_s1 + $0x10] sm:$0xff] (!%p188_p2)   ;;  %v1827_v29 = vld [vmem:[%s2277_s1 + $0x18] sm:$0xff] (!%p188_p2)   ;;  %v1828_v46 = vld [vmem:[%s2277_s1 + $0x20] sm:$0xff] (!%p188_p2)   ;;  %vm881_vm12 = vcmask (!%p188_p2), 261120   ;;  %vm1480_vm15 = vcmask (!%p188_p2), 254976  }
   0x7   : > { %1689 = vmatpush3.bf16.msra.mxu0 (!%p188_p2), %v1824_v0  ;;  %1690 = vmatprep.mubr.msk.bf16.mxu0 (!%p188_p2), %vm1860_vm0, %v1859_v2  ;;  %v1906_v3 = vshrl.u32 (!%p188_p2), %v224_v1, 7  ;;  %v1829_v51 = vld [vmem:[%s2277_s1 + $0x28] sm:$0xff] (!%p188_p2)   ;;  %v1830_v53 = vld [vmem:[%s2277_s1 + $0x30] sm:$0xff] (!%p188_p2)   ;;  %v1831_v58 = vld [vmem:[%s2277_s1 + $0x38] sm:$0xff] (!%p188_p2)  }
   0x8   : > { %1700 = vmatprep.subr.bf16.mxu0 (!%p188_p2), %v1859_v2  ;;  %1696 = vmatprep.mubr.msk.bf16.mxu1 (!%p188_p2), %vm1860_vm0, %v1859_v2  ;;  %v1832_v63 = vld [vmem:[%s2277_s1 + $0x40] sm:$0xff] (!%p188_p2)   ;;  %v1845_v14 = vld [vmem:[%s2279_s3 + $0x58] sm:$0xff] (!%p188_p2)  }
   0x9   : > { %v1917_v5 = vadd.s32 (!%p188_p2), 8, %v1906_v3  ;;  %1695 = vmatpush3.bf16.msra.mxu1 (!%p188_p2), %v1826_v4  ;;  %v231_v6 = vand.u32 (!%p188_p2), 3, %v1906_v3  ;;  %vm251_vm2 = vcmp.lt.s32.totalorder (!%p188_p2), %v1906_v3, 4  ;;  %vm279_vm3 = vcmp.lt.s32.totalorder (!%p188_p2), %v1906_v3, 1  ;;  %v1844_v13 = vld [vmem:[%s2279_s3 + $0x60] sm:$0xff] (!%p188_p2)  }
   0xa   : > { %1706 = vmatprep.subr.bf16.mxu1 (!%p188_p2), %v1859_v2  ;;  %vm290_vm4 = vcmp.lt.s32.totalorder (!%p188_p2), %v1906_v3, 7  ;;  %v1843_v3 = vld [vmem:[%s2279_s3 + $0x50] sm:$0xff] (!%p188_p2)  }
   0xb   : > { %v238_v7 = vand.u32 (!%p188_p2), 3, %v1917_v5  ;;  %vm254_vm5 = vcmp.ge.s32.totalorder (!%p188_p2), %v1917_v5, 12  ;;  %vm1936_vm6 = vcmp.eq.s32.totalorder (!%p188_p2), %v231_v6, 0  ;;  %vm1944_vm8 = vcmp.eq.s32.totalorder (!%p188_p2), %v231_v6, 3 }
   0xd   : > { %s2291_s19 = smov (!%p214_p3, %s1537_s19), 1  ;;  %vm1940_vm7 = vcmp.eq.s32.totalorder %v238_v7, 3  ;;  %vm1954_vm9 = vcmp.eq.s32.totalorder %v238_v7, 0 }
   0xe   : > { %s1642_s24 = sshll.u32 %s2291_s19, 4  ;;  %s1544_s11 = sshll.u32 %s2291_s19, 2 }
   0xf   : > { %s218_s27 = scalar_lea.vmem %s2276_s0, %s1642_s24  ;;  %s222_s14 = scalar_lea.vmem %s2281_s5, %s1544_s11 }
  0x10   : > { %v1927_v8 = vld [vmem:[%s218_s27] sm:$0xff]  ;;  %v1929_v9 = vld [vmem:[%s218_s27 + $0x8] sm:$0xff] }
  0x11   : > { %v261_v10 = vrot.slane %v1927_v8, 4  ;;  %v262_v11 = vrot.slane %v1929_v9, 4  ;;  %v463_v18 = vrot.slane %v1927_v8, 7  ;;  %v464_v23 = vrot.slane %v1929_v9, 7 }
  0x12   : > { %v469_v27 = vrot.slane %v1927_v8, 1  ;;  %v470_v30 = vrot.slane %v1929_v9, 1  ;;  %v531_v54 = vpack.c.bf16 %v1929_v9, %v1927_v8  ;;  %v1833_v9 = vld [vmem:[%s2279_s3 + $0x10] sm:$0xff]  }
  0x13   : > { %v1950_v15 = vsel %vm251_vm2, %v261_v10, %v262_v11  ;;  %v264_v16 = vsel %vm251_vm2, %v262_v11, %v261_v10  ;;  %v465_v40 = vsel %vm279_vm3, %v463_v18, %v464_v23  ;;  %v466_v41 = vsel %vm279_vm3, %v464_v23, %v463_v18  ;;  %v1834_v10 = vld [vmem:[%s2279_s3 + $0x18] sm:$0xff]   ;;  %v1835_v11 = vld [vmem:[%s2279_s3] sm:$0xff]  }
  0x14   : > { %v269_v19 = vsel %vm251_vm2, 0.0, %v264_v16  ;;  %v278_v20 = vrot.slane %v1950_v15, 7  ;;  %v1963_v21 = vrot.slane %v1950_v15, 1  ;;  %v1973_v28 = vsel %vm254_vm5, 0.0, %v264_v16 }
  0x15   : > { %v277_v24 = vrot.slane %v269_v19, 7  ;;  %v288_v25 = vrot.slane %v269_v19, 1  ;;  %v302_v26 = vpack.c.bf16 %v1950_v15, %v269_v19  ;;  %v471_v42 = vsel %vm290_vm4, %v469_v27, %v470_v30 }
  0x16   : > { %v472_v43 = vsel %vm290_vm4, %v470_v30, %v469_v27  ;;  %v644_v44 = vrot.slane %v1973_v28, 7  ;;  %v467_v47 = vsel %vm1936_vm6, 0.0, %v466_v41  ;;  %v468_v48 = vsel %vm1954_vm9, 0.0, %v465_v40 }
  0x17   : > { %1691 = vmatmul.mubr.msk.bf16.vlgmr.msra.gmra.mrb[0].mxu0 %vm312_vm1, %v302_v26  ;;  %v280_v31 = vsel %vm279_vm3, %v277_v24, %v278_v20  ;;  %v281_v32 = vsel %vm279_vm3, %v278_v20, %v277_v24  ;;  %v291_v33 = vsel %vm290_vm4, %v288_v25, %v1963_v21  ;;  %v292_v34 = vsel %vm290_vm4, %v1963_v21, %v288_v25 }
  0x18   : > { %1701 = vmatpush3.bf16.msra.mxu0 %v1825_v22  ;;  %v286_v35 = vsel %vm1936_vm6, 0.0, %v281_v32  ;;  %v287_v36 = vsel %vm1954_vm9, 0.0, %v280_v31  ;;  %1702 = vmatprep.mubr.msk.bf16.mxu0 %vm1860_vm0, %v1859_v2  ;;  %v297_v37 = vsel %vm1944_vm8, 0.0, %v291_v33  ;;  %v298_v38 = vsel %vm1940_vm7, 0.0, %v292_v34 }
  0x19   : > { %v299_v39 = vpack.c.bf16 %v287_v36, %v286_v35  ;;  %1712 = vmatprep.subr.bf16.mxu0 %v1859_v2  ;;  %v407_v45 = vpack.c.bf16 %v298_v38, %v297_v37  ;;  %v473_v49 = vsel %vm1944_vm8, 0.0, %v471_v42  ;;  %v474_v50 = vsel %vm1940_vm7, 0.0, %v472_v43 }
  0x1a   : > { %v475_v52 = vpack.c.bf16 %v468_v48, %v467_v47  ;;  %v645_v55 = vsel %vm279_vm3, %v278_v20, %v644_v44  ;;  %v646_v56 = vsel %vm279_vm3, %v644_v44, %v278_v20  ;;  %v587_v57 = vpack.c.bf16 %v474_v50, %v473_v49 }
  0x1b   : > { %1697 = vmatmul.mubr.msk.bf16.vlgmr.msra.gmra.mrb[0].mxu1 %vm312_vm1, %v299_v39  ;;  %v647_v59 = vsel %vm1936_vm6, 0.0, %v646_v56  ;;  %v648_v60 = vsel %vm1954_vm9, 0.0, %v645_v55  ;;  %v650_v61 = vrot.slane %v1973_v28, 1  ;;  %v711_v4 = vpack.c.bf16 %v1973_v28, %v1950_v15  ;;  %v1837_v15 = vld [vmem:[%s2279_s3 + $0x8] sm:$0xff]  }
  0x1c   : > { %1707 = vmatpush3.bf16.msra.mxu1 %v1827_v29  ;;  %1708 = vmatprep.mubr.msk.bf16.mxu1 %vm1860_vm0, %v1859_v2  ;;  %v655_v62 = vpack.c.bf16 %v648_v60, %v647_v59 }
  0x1d   : > { %1718 = vmatprep.subr.bf16.mxu1 %v1859_v2  ;;  %v651_v0 = vsel %vm290_vm4, %v1963_v21, %v650_v61  ;;  %v652_v1 = vsel %vm290_vm4, %v650_v61, %v1963_v21 }
  0x1e   : > { %v653_v6 = vsel %vm1944_vm8, 0.0, %v651_v0  ;;  %v654_v7 = vsel %vm1940_vm7, 0.0, %v652_v1  ;;  %v1579_v0 = vld [vmem:[%s2278_s2] ss:$0 sm:$0xff] }
  0x1f   : > { %1703 = vmatmul.mubr.msk.bf16.vlgmr.msra.gmra.mrb[4].mxu0 %vm312_vm1, %v407_v45  ;;  %v767_v8 = vpack.c.bf16 %v654_v7, %v653_v6 }
  0x20   : > { %1713 = vmatpush3.bf16.msra.mxu0 %v1828_v46  ;;  %1714 = vmatprep.mubr.msk.bf16.mxu0 %vm1860_vm0, %v1859_v2 }
  0x21   : > { %1724 = vmatprep.subr.bf16.mxu0 %v1859_v2 }
  0x23   : > { %1709 = vmatmul.mubr.msk.bf16.vlgmr.msra.gmra.mrb[4].mxu1 %vm312_vm1, %v475_v52 }
  0x24   : > { %1719 = vmatpush3.bf16.msra.mxu1 %v1829_v51  ;;  %1720 = vmatprep.mubr.msk.bf16.mxu1 %vm1860_vm0, %v1859_v2 }
  0x25   : > { %1730 = vmatprep.subr.bf16.mxu1 %v1859_v2 }
  0x27   : > { %1715 = vmatmul.mubr.msk.bf16.vlgmr.msra.gmra.mrb[8].mxu0 %vm312_vm1, %v531_v54 }
  0x28   : > { %1725 = vmatpush3.bf16.msra.mxu0 %v1830_v53  ;;  %1726 = vmatprep.mubr.msk.bf16.mxu0 %vm1860_vm0, %v1859_v2 }
  0x29   : > { %1736 = vmatprep.subr.bf16.mxu0 %v1859_v2 }
  0x2b   : > { %1721 = vmatmul.mubr.msk.bf16.vlgmr.msra.gmra.mrb[8].mxu1 %vm312_vm1, %v587_v57 }
  0x2c   : > { %1731 = vmatpush3.bf16.msra.mxu1 %v1831_v58  ;;  %1732 = vmatprep.mubr.msk.bf16.mxu1 %vm1860_vm0, %v1859_v2 }
  0x2d   : > { %1742 = vmatprep.subr.bf16.mxu1 %v1859_v2 }
  0x2f   : > { %1727 = vmatmul.mubr.msk.bf16.vlgmr.msra.gmra.mrb[12].mxu0 %vm312_vm1, %v655_v62 }
  0x30   : > { %1737 = vmatpush3.bf16.msra.mxu0 %v1832_v63  ;;  %1738 = vmatprep.mubr.msk.bf16.mxu0 %vm1860_vm0, %v1859_v2 }
  0x31   : > { %1750 = vmatprep.subr.bf16.mxu0 %v1859_v2 }
  0x33   : > { %1733 = vmatmul.mubr.msk.bf16.vlgmr.msra.gmra.mrb[12].mxu1 %vm312_vm1, %v711_v4 }
  0x34   : > { %1746 = vmatprep.mubr.msk.bf16.mxu1 %vm1860_vm0, %v1859_v2  ;;  %1743 = vmatpush3.bf16.msra.mxu1 %v1833_v9 }
  0x35   : > { %1744 = vmatprep.subr.bf16.mxu1 %v1859_v2 }
  0x37   : > { %1739 = vmatmul.mubr.msk.bf16.vlgmr.msra.gmra.mrb[16].mxu0 %vm312_vm1, %v767_v8 }
  0x38   : > { %1754 = vmatprep.mubr.msk.bf16.mxu0 %vm1860_vm0, %v1859_v2  ;;  %1745 = vmatpush3.bf16.msra.mxu1 %v1834_v10 }
  0x39   : > { %1751 = vmatpush3.bf16.msra.mxu0 %v1835_v11  ;;  %1758 = vmatprep.subr.bf16.mxu1 %v1859_v2 }
  0x3a   : > { %1752 = vmatprep.subr.bf16.mxu0 %v1859_v2 }
  0x3d   : > { %1753 = vmatpush3.bf16.msra.mxu0 %v1837_v15 }
  0x3e   : > { %1766 = vmatprep.subr.bf16.mxu0 %v1859_v2 }
  0xea   : > { %v350_v16 = vpop.f32.mrb[0].mxu0 }
  0xeb   : > { %v1692_v18 = vpop.f32.mrb[1].mxu0 }
  0xec   : > { %v353_v19 = vpop.f32.mrb[2].mxu0 }
  0xed   : > { %v1693_v20 = vpop.f32.mrb[3].mxu0 }
  0xee   : > { %v400_v21 = vpop.f32.mrb[0].mxu1 }
  0xef   : > { %v401_v22 = vadd.f32 %v400_v21, %v350_v16  ;;  %v1698_v23 = vpop.f32.mrb[1].mxu1 }
  0xf0   : > { %v403_v24 = vpop.f32.mrb[2].mxu1 }
  0xf1   : > { %v404_v25 = vadd.f32 %v403_v24, %v353_v19  ;;  %v1699_v26 = vpop.f32.mrb[3].mxu1 }
  0xf2   : > { %v454_v27 = vpop.f32.mrb[4].mxu0 }
  0xf3   : > { %v461_v28 = vadd.f32 %v454_v27, %v401_v22  ;;  %v1704_v29 = vpop.f32.mrb[5].mxu0 }
  0xf4   : > { %v457_v30 = vpop.f32.mrb[6].mxu0 }
  0xf5   : > { %v462_v31 = vadd.f32 %v457_v30, %v404_v25  ;;  %v1705_v32 = vpop.f32.mrb[7].mxu0 }
  0xf6   : > { %v522_v33 = vpop.f32.mrb[4].mxu1 }
  0xf7   : > { %v529_v34 = vadd.f32 %v522_v33, %v461_v28  ;;  %v1710_v35 = vpop.f32.mrb[5].mxu1 }
  0xf8   : > { %v525_v36 = vpop.f32.mrb[6].mxu1 }
  0xf9   : > { %v530_v37 = vadd.f32 %v525_v36, %v462_v31  ;;  %v1711_v38 = vpop.f32.mrb[7].mxu1 }
  0xfa   : > { %v578_v39 = vpop.f32.mrb[8].mxu0 }
  0xfb   : > { %v585_v40 = vadd.f32 %v578_v39, %v529_v34  ;;  %v1716_v41 = vpop.f32.mrb[9].mxu0  ;;  %v1836_v34 = vld [vmem:[%s2279_s3 + $0x20] sm:$0xff]  }
  0xfc   : > { %v581_v42 = vpop.f32.mrb[10].mxu0 }
  0xfd   : > { %v586_v43 = vadd.f32 %v581_v42, %v530_v37  ;;  %v1717_v44 = vpop.f32.mrb[11].mxu0 }
  0xfe   : > { %v634_v45 = vpop.f32.mrb[8].mxu1 }
  0xff   : > { %v641_v46 = vadd.f32 %v634_v45, %v585_v40  ;;  %v1722_v47 = vpop.f32.mrb[9].mxu1 }
 0x100   : > { %v637_v48 = vpop.f32.mrb[10].mxu1 }
 0x101   : > { %v642_v49 = vadd.f32 %v637_v48, %v586_v43  ;;  %v1723_v50 = vpop.f32.mrb[11].mxu1  ;;  %v1838_v48 = vld [vmem:[%s2279_s3 + $0x28] sm:$0xff]  }
 0x102   : > { %v702_v51 = vpop.f32.mrb[12].mxu0 }
 0x103   : > { %v709_v52 = vadd.f32 %v702_v51, %v641_v46  ;;  %v1728_v53 = vpop.f32.mrb[13].mxu0 }
 0x104   : > { %v705_v54 = vpop.f32.mrb[14].mxu0 }
 0x105   : > { %v710_v55 = vadd.f32 %v705_v54, %v642_v49  ;;  %v1729_v56 = vpop.f32.mrb[15].mxu0  ;;  %v1839_v49 = vld [vmem:[%s2279_s3 + $0x30] sm:$0xff]  }
 0x106   : > { %v758_v57 = vpop.f32.mrb[12].mxu1 }
 0x107   : > { %v765_v58 = vadd.f32 %v758_v57, %v709_v52  ;;  %v1734_v59 = vpop.f32.mrb[13].mxu1 }
 0x108   : > { %v761_v60 = vpop.f32.mrb[14].mxu1 }
 0x109   : > { %v766_v61 = vadd.f32 %v761_v60, %v710_v55  ;;  %v1735_v62 = vpop.f32.mrb[15].mxu1 }
 0x10a   : > { %v814_v63 = vpop.f32.mrb[16].mxu0 }
 0x10b   : > { %v821_v1 = vadd.f32 %v814_v63, %v765_v58  ;;  %v1740_v4 = vpop.f32.mrb[17].mxu0 }
 0x10c   : > { %v817_v6 = vpop.f32.mrb[18].mxu0 }
 0x10d   : > { %v830_v7 = vadd.f32 %v1579_v0, %v821_v1  ;;  %v822_v8 = vadd.f32 %v817_v6, %v766_v61  ;;  %v1741_v9 = vpop.f32.mrb[19].mxu0  ;;  %v1841_v1 = vld [vmem:[%s2279_s3 + $0x38] sm:$0xff]  }
 0x10e   : > { %v1842_v9 = vld [vmem:[%s2279_s3 + $0x48] sm:$0xff]  }
 0x10f   : > { %vm832_vm10 = vcmp.ge.f32.partialorder %v830_v7, 0.0  ;;  %v834_v10 = vmul.f32 0.2, %v830_v7  ;;  %v831_v11 = vadd.f32 %v1579_v0, %v822_v8  ;;  %v1840_v0 = vld [vmem:[%s2279_s3 + $0x40] sm:$0xff]  }
 0x111   : > { %v2105_v15 = vsel %vm832_vm10, %v830_v7, %v834_v10  ;;  %vm833_vm11 = vcmp.ge.f32.partialorder %v831_v11, 0.0  ;;  %v835_v16 = vmul.f32 0.2, %v831_v11  ;;  %v1846_v10 = vld [vmem:[%s2279_s3 + $0x68] sm:$0xff]  }
 0x112   : > { %v838_v18 = vrot.slane %v2105_v15, 4  ;;  %v1046_v20 = vrot.slane %v2105_v15, 7  ;;  %v1052_v24 = vrot.slane %v2105_v15, 1 }
 0x113   : > { %v2108_v19 = vsel %vm833_vm11, %v831_v11, %v835_v16  ;;  %v1847_v11 = vld [vmem:[%s2279_s3 + $0x70] sm:$0xff]   ;;  %v1849_v16 = vld [vmem:[%s2279_s3 + $0x78] sm:$0xff]  }
 0x114   : > { %v839_v21 = vrot.slane %v2108_v19, 4  ;;  %v1047_v22 = vrot.slane %v2108_v19, 7  ;;  %v1122_v23 = vpack.c.bf16 %v2108_v19, %v2105_v15  ;;  %v1053_v25 = vrot.slane %v2108_v19, 1  ;;  %v1848_v15 = vld [vmem:[%s2279_s3 + $0x80] sm:$0xff]  }
 0x116   : > { %v2119_v26 = vsel %vm251_vm2, %v838_v18, %v839_v21  ;;  %v841_v27 = vsel %vm251_vm2, %v839_v21, %v838_v18  ;;  %v1048_v28 = vsel %vm279_vm3, %v1046_v20, %v1047_v22  ;;  %v1049_v29 = vsel %vm279_vm3, %v1047_v22, %v1046_v20  ;;  %v1850_v18 = vld [vmem:[%s2279_s3 + $0x88] sm:$0xff]  }
 0x117   : > { %v847_v30 = vrot.slane %v2119_v26, 7  ;;  %v853_v31 = vrot.slane %v2119_v26, 1  ;;  %v842_v32 = vsel %vm251_vm2, 0.0, %v841_v27  ;;  %v2133_v33 = vsel %vm254_vm5, 0.0, %v841_v27 }
 0x118   : > { %v846_v35 = vrot.slane %v842_v32, 7  ;;  %v852_v36 = vrot.slane %v842_v32, 1  ;;  %v863_v37 = vpack.c.bf16 %v2119_v26, %v842_v32  ;;  %v1050_v38 = vsel %vm1936_vm6, 0.0, %v1049_v29 }
 0x119   : > { %v1051_v39 = vsel %vm1954_vm9, 0.0, %v1048_v28  ;;  %v1054_v40 = vsel %vm290_vm4, %v1052_v24, %v1053_v25  ;;  %v1055_v5 = vsel %vm290_vm4, %v1053_v25, %v1052_v24  ;;  %v1251_v41 = vrot.slane %v2133_v33, 7 }
 0x11a   : > { %1747 = vmatmul.mubr.msk.bf16.vlgmr.msra.gmra.mrb[16].mxu1 %vm881_vm12, %v863_v37  ;;  %v848_v42 = vsel %vm279_vm3, %v846_v35, %v847_v30  ;;  %v849_v43 = vsel %vm279_vm3, %v847_v30, %v846_v35  ;;  %v854_v44 = vsel %vm290_vm4, %v852_v36, %v853_v31  ;;  %v855_v45 = vsel %vm290_vm4, %v853_v31, %v852_v36 }
 0x11b   : > { %1759 = vmatpush3.bf16.msra.mxu1 %v1836_v34  ;;  %v850_v46 = vsel %vm1936_vm6, 0.0, %v849_v43  ;;  %v851_v47 = vsel %vm1954_vm9, 0.0, %v848_v42  ;;  %1762 = vmatprep.mubr.msk.bf16.mxu1 %vm1860_vm0, %v1859_v2  ;;  %v856_v50 = vsel %vm1944_vm8, 0.0, %v854_v44  ;;  %v857_v51 = vsel %vm1940_vm7, 0.0, %v855_v45 }
 0x11c   : > { %1760 = vmatprep.subr.bf16.mxu1 %v1859_v2  ;;  %v858_v52 = vpack.c.bf16 %v851_v47, %v850_v46  ;;  %v982_v53 = vpack.c.bf16 %v857_v51, %v856_v50  ;;  %v1058_v54 = vpack.c.bf16 %v1051_v39, %v1050_v38  ;;  %v1056_v55 = vsel %vm1944_vm8, 0.0, %v1054_v40 }
 0x11d   : > { %v1057_v56 = vsel %vm1940_vm7, 0.0, %v1055_v5  ;;  %v1252_v57 = vsel %vm279_vm3, %v847_v30, %v1251_v41  ;;  %v1253_v58 = vsel %vm279_vm3, %v1251_v41, %v847_v30  ;;  %v1326_v59 = vpack.c.bf16 %v2133_v33, %v2119_v26 }
 0x11e   : > { %1755 = vmatmul.mubr.msk.bf16.vlgmr.msra.gmra.mrb[20].mxu0 %vm881_vm12, %v858_v52  ;;  %v1186_v60 = vpack.c.bf16 %v1057_v56, %v1056_v55  ;;  %v1254_v61 = vsel %vm1936_vm6, 0.0, %v1253_v58  ;;  %v1255_v62 = vsel %vm1954_vm9, 0.0, %v1252_v57  ;;  %v1257_v63 = vrot.slane %v2133_v33, 1 }
 0x11f   : > { %1761 = vmatpush3.bf16.msra.mxu1 %v1838_v48  ;;  %1767 = vmatpush3.bf16.msra.mxu0 %v1839_v49  ;;  %v1262_v4 = vpack.c.bf16 %v1255_v62, %v1254_v61 }
 0x120   : > { %1774 = vmatprep.subr.bf16.mxu1 %v1859_v2  ;;  %1768 = vmatprep.subr.bf16.mxu0 %v1859_v2  ;;  %v1258_v12 = vsel %vm290_vm4, %v853_v31, %v1257_v63  ;;  %v1259_v17 = vsel %vm290_vm4, %v1257_v63, %v853_v31 }
 0x121   : > { %1770 = vmatprep.mubr.msk.bf16.mxu0 %vm1860_vm0, %v1859_v2  ;;  %v1260_v6 = vsel %vm1944_vm8, 0.0, %v1258_v12  ;;  %v1261_v7 = vsel %vm1940_vm7, 0.0, %v1259_v17 }
 0x122   : > { %1763 = vmatmul.mubr.msk.bf16.vlgmr.msra.gmra.mrb[20].mxu1 %vm881_vm12, %v982_v53  ;;  %v1390_v8 = vpack.c.bf16 %v1261_v7, %v1260_v6 }
 0x123   : > { %1775 = vmatpush3.bf16.msra.mxu1 %v1840_v0  ;;  %1769 = vmatpush3.bf16.msra.mxu0 %v1841_v1  ;;  %v1639_v0 = vld [vmem:[%s2280_s4] ss:$0 sm:$0xff] }
 0x124   : > { %1776 = vmatprep.subr.bf16.mxu1 %v1859_v2  ;;  %1782 = vmatprep.subr.bf16.mxu0 %v1859_v2 }
 0x125   : > { %1778 = vmatprep.mubr.msk.bf16.mxu1 %vm1860_vm0, %v1859_v2 }
 0x126   : > { %1771 = vmatmul.mubr.msk.bf16.vlgmr.msra.gmra.mrb[24].mxu0 %vm881_vm12, %v1058_v54 }
 0x127   : > { %1777 = vmatpush3.bf16.msra.mxu1 %v1842_v9  ;;  %1783 = vmatpush3.bf16.msra.mxu0 %v1843_v3 }
 0x128   : > { %1790 = vmatprep.subr.bf16.mxu1 %v1859_v2  ;;  %1784 = vmatprep.subr.bf16.mxu0 %v1859_v2 }
 0x129   : > { %1786 = vmatprep.mubr.msk.bf16.mxu0 %vm1860_vm0, %v1859_v2 }
 0x12a   : > { %1779 = vmatmul.mubr.msk.bf16.vlgmr.msra.gmra.mrb[24].mxu1 %vm881_vm12, %v1122_v23 }
 0x12b   : > { %1791 = vmatpush3.bf16.msra.mxu1 %v1844_v13  ;;  %1785 = vmatpush3.bf16.msra.mxu0 %v1845_v14 }
 0x12c   : > { %1792 = vmatprep.subr.bf16.mxu1 %v1859_v2  ;;  %1798 = vmatprep.subr.bf16.mxu0 %v1859_v2 }
 0x12d   : > { %1794 = vmatprep.mubr.msk.bf16.mxu1 %vm1860_vm0, %v1859_v2 }
 0x12e   : > { %1787 = vmatmul.mubr.msk.bf16.vlgmr.msra.gmra.mrb[28].mxu0 %vm881_vm12, %v1186_v60 }
 0x12f   : > { %1793 = vmatpush3.bf16.msra.mxu1 %v1846_v10  ;;  %1799 = vmatpush3.bf16.msra.mxu0 %v1847_v11 }
 0x130   : > { %1806 = vmatprep.subr.bf16.mxu1 %v1859_v2  ;;  %1800 = vmatprep.subr.bf16.mxu0 %v1859_v2 }
 0x131   : > { %1802 = vmatprep.mubr.msk.bf16.mxu0 %vm1860_vm0, %v1859_v2 }
 0x132   : > { %1795 = vmatmul.mubr.msk.bf16.vlgmr.msra.gmra.mrb[28].mxu1 %vm881_vm12, %v1262_v4 }
 0x133   : > { %1807 = vmatpush3.bf16.msra.mxu1 %v1848_v15  ;;  %1801 = vmatpush3.bf16.msra.mxu0 %v1849_v16 }
 0x134   : > { %1808 = vmatprep.subr.bf16.mxu1 %v1859_v2  ;;  %1810 = vmatprep.mubr.msk.bf16.mxu1 %vm1860_vm0, %v1859_v2  ;;  %vm1482_vm0 = vcmask 259076  }
 0x136   : > { %1803 = vmatmul.mubr.msk.bf16.vlgmr.msra.gmra.mrb[32].mxu0 %vm881_vm12, %v1326_v59 }
 0x137   : > { %1809 = vmatpush3.bf16.msra.mxu1 %v1850_v18 }
 0x13a   : > { %1811 = vmatmul.mubr.msk.bf16.vlgmr.msra.gmra.mrb[32].mxu1 %vm881_vm12, %v1390_v8 }
 0x1ed   : > { %v919_v19 = vpop.f32.mrb[16].mxu1 }
 0x1ee   : > { %v1748_v20 = vpop.f32.mrb[17].mxu1 }
 0x1ef   : > { %v922_v21 = vpop.f32.mrb[18].mxu1 }
 0x1f0   : > { %v1749_v22 = vpop.f32.mrb[19].mxu1 }
 0x1f1   : > { %v975_v23 = vpop.f32.mrb[20].mxu0 }
 0x1f2   : > { %v976_v24 = vadd.f32 %v975_v23, %v919_v19  ;;  %v1756_v25 = vpop.f32.mrb[21].mxu0 }
 0x1f3   : > { %v978_v26 = vpop.f32.mrb[22].mxu0 }
 0x1f4   : > { %v979_v27 = vadd.f32 %v978_v26, %v922_v21  ;;  %v1757_v28 = vpop.f32.mrb[23].mxu0 }
 0x1f5   : > { %v1037_v29 = vpop.f32.mrb[20].mxu1 }
 0x1f6   : > { %v1044_v30 = vadd.f32 %v1037_v29, %v976_v24  ;;  %v1764_v31 = vpop.f32.mrb[21].mxu1 }
 0x1f7   : > { %v1040_v32 = vpop.f32.mrb[22].mxu1 }
 0x1f8   : > { %v1045_v2 = vadd.f32 %v1040_v32, %v979_v27  ;;  %v1765_v33 = vpop.f32.mrb[23].mxu1 }
 0x1f9   : > { %v1113_v34 = vpop.f32.mrb[24].mxu0 }
 0x1fa   : > { %v1120_v35 = vadd.f32 %v1113_v34, %v1044_v30  ;;  %v1772_v36 = vpop.f32.mrb[25].mxu0 }
 0x1fb   : > { %v1116_v37 = vpop.f32.mrb[26].mxu0 }
 0x1fc   : > { %v1121_v38 = vadd.f32 %v1116_v37, %v1045_v2  ;;  %v1773_v39 = vpop.f32.mrb[27].mxu0 }
 0x1fd   : > { %v1177_v40 = vpop.f32.mrb[24].mxu1 }
 0x1fe   : > { %v1184_v5 = vadd.f32 %v1177_v40, %v1120_v35  ;;  %v1780_v41 = vpop.f32.mrb[25].mxu1 }
 0x1ff   : > { %v1180_v42 = vpop.f32.mrb[26].mxu1 }
 0x200   : > { %v1185_v43 = vadd.f32 %v1180_v42, %v1121_v38  ;;  %v1781_v44 = vpop.f32.mrb[27].mxu1 }
 0x201   : > { %v1241_v45 = vpop.f32.mrb[28].mxu0 }
 0x202   : > { %v1248_v46 = vadd.f32 %v1241_v45, %v1184_v5  ;;  %v1788_v47 = vpop.f32.mrb[29].mxu0 }
 0x203   : > { %v1244_v48 = vpop.f32.mrb[30].mxu0 }
 0x204   : > { %v1249_v49 = vadd.f32 %v1244_v48, %v1185_v43  ;;  %v1789_v50 = vpop.f32.mrb[31].mxu0 }
 0x205   : > { %v1317_v51 = vpop.f32.mrb[28].mxu1 }
 0x206   : > { %v1324_v52 = vadd.f32 %v1317_v51, %v1248_v46  ;;  %v1796_v53 = vpop.f32.mrb[29].mxu1 }
 0x207   : > { %v1320_v54 = vpop.f32.mrb[30].mxu1 }
 0x208   : > { %v1325_v55 = vadd.f32 %v1320_v54, %v1249_v49  ;;  %v1797_v56 = vpop.f32.mrb[31].mxu1 }
 0x209   : > { %v1381_v57 = vpop.f32.mrb[32].mxu0 }
 0x20a   : > { %v1388_v58 = vadd.f32 %v1381_v57, %v1324_v52  ;;  %v1804_v59 = vpop.f32.mrb[33].mxu0 }
 0x20b   : > { %v1384_v60 = vpop.f32.mrb[34].mxu0 }
 0x20c   : > { %v1389_v61 = vadd.f32 %v1384_v60, %v1325_v55  ;;  %v1805_v62 = vpop.f32.mrb[35].mxu0 }
 0x20d   : > { %v1445_v63 = vpop.f32.mrb[32].mxu1 }
 0x20e   : > { %v1452_v1 = vadd.f32 %v1445_v63, %v1388_v58  ;;  %v1812_v4 = vpop.f32.mrb[33].mxu1 }
 0x20f   : > { %v1448_v12 = vpop.f32.mrb[34].mxu1 }
 0x210   : > { %v1461_v17 = vadd.f32 %v1639_v0, %v1452_v1  ;;  %v1453_v6 = vadd.f32 %v1448_v12, %v1389_v61  ;;  %v1813_v7 = vpop.f32.mrb[35].mxu1 }
 0x212   : > { %vm1463_vm13 = vcmp.ge.f32.partialorder %v1461_v17, 0.0  ;;  %v1465_v8 = vmul.f32 0.2, %v1461_v17  ;;  %v1462_v9 = vadd.f32 %v1639_v0, %v1453_v6 }
 0x214   : > { %v1467_v3 = vsel %vm1463_vm13, %v1461_v17, %v1465_v8  ;;  %vm1464_vm14 = vcmp.ge.f32.partialorder %v1462_v9, 0.0  ;;  %v1466_v13 = vmul.f32 0.2, %v1462_v9 }
 0x215   : > { %1469 = vst.msk [vmem:[#allocation2] sm:$0xff] %vm881_vm12, %v1467_v3 }
 0x216   : > { %v1468_v14 = vsel %vm1464_vm14, %v1462_v9, %v1466_v13 }
 0x217   : > { %1470 = vst.msk [vmem:[#allocation2 + $0x8] sm:$0xff] %vm881_vm12, %v1468_v14 }
 0x21e   : > { %v1471_v10 = vld [vmem:[#allocation2] ss:$2 sm:$0xff]  ;;  %v1473_v11 = vld [vmem:[#allocation2 + $0x1] ss:$2 sm:$0xff] }
 0x21f   : > { %v1474_v15 = vadd.f32 %v1473_v11, %v1471_v10 }
 0x221   : > { %v1476_v16 = vrot.slane %v1474_v15, 2 }
 0x223   : > { %v1478_v18 = vadd.f32 %v1476_v16, %v1474_v15 }
 0x225   : > { %v1479_v19 = vmul.f32 0.25, %v1478_v18 }
 0x227   : > { %1481 = vst.msk [vmem:[%s222_s14] sm:$0x3] %vm1480_vm15, %v1479_v19 }
 0x228   : > { %1483 = vst.msk [vmem:[%s222_s14 - $0x2] sm:$0x30] %vm1482_vm0, %v1479_v19 }
 0x229 PF: > { %s15_s18 = sadd.s32 1, %s1857_s18  }
 0x22a   : > { %p12_p4 = scmp.ge.s32.totalorder %s15_s18, 4  }
 0x22c   :  { %14 = sbr.rel (!%p12_p4) target bundleno = 1 (0x1), region = 87 }

// kernel: discriminator_forward.5
= control target key start
LH: loop header
LB: loop body
LE: loop exit
PB: predicated region body
PF: predicated region fallthrough
CT: control target
= control target key end

     0   :  { %s3223_s18 = smov 0   ;;  %s4190_s0 = inlined_call_operand.vmem [shape: f32[2,64,8], index: 0, kind: input, shape index: {}]   ;;  %s4191_s1 = inlined_call_operand.vmem [shape: bf16[9,8,16], index: 1, kind: input, shape index: {}]   ;;  %s4192_s2 = inlined_call_operand.vmem [shape: f32[1,16], index: 2, kind: input, shape index: {}]   ;;  %s4193_s3 = inlined_call_operand.vmem [shape: bf16[9,16,16], index: 3, kind: input, shape index: {}]   ;;  %s4194_s4 = inlined_call_operand.vmem [shape: f32[1,16], index: 4, kind: input, shape index: {}]   ;;  %s4195_s5 = inlined_call_operand.vmem [shape: f32[2,16,16], index: 5, kind: output, shape index: {}]  }
   0x1 LB: > { %s2639_s19 = sadd.s32 4294967295, %s3190_s18   ;;  %p2643_p0 = scmp.ge.s32.totalorder %s3190_s18, 1  ;;  %s3190_s18 = sphi %s3223_s18, %s15_s18  }
   0x2   : > { %p187_p1 = scmp.lt.s32.totalorder %s3190_s18, 3 }
   0x4   : > { %p188_p2 = pnand %p2643_p0, %p187_p1 }
   0x6   : > { %191 = sbr.rel (%p188_p2) target bundleno = 756 (0x2f4), region = 40 }
   0xd   : > { %v2648_v0 = vld [vmem:[%s4191_s1 + $0x4] sm:$0xf]  ;;  %vm4196_vm0 = vcmask 1043456   ;;  %p215_p3 = scmp.lt.s32.totalorder %s2639_s19, 1  ;;  %v226_v1 = vlaneseq  ;;  %v505_v3 = vld [vmem:[%s4191_s1] sm:$0xf] }
   0xe   : > { %3157 = vmatprep.subr.msk.bf16.mxu0 %vm4196_vm0, %v2648_v0  ;;  %v527_v2 = vsel %vm4196_vm0, %v2648_v0, 0  ;;  %vm4198_vm1 = vcmask 64512   ;;  %v4199_v8 = vmov 0.0   ;;  %v607_v20 = vsel %vm4196_vm0, %v505_v3, 0  ;;  %v2657_v27 = vld [vmem:[%s4191_s1 + $0x8] sm:$0xf] }
   0xf   : > { %2850 = vmatpush3.bf16.msra.mxu0 %v527_v2  ;;  %s4388_s19 = smov (!%p215_p3, %s2639_s19), 1  ;;  %v3241_v4 = vshrl.u32 %v226_v1, 7  ;;  %v3258_v9 = vrot.slane %v4199_v8, 7  ;;  %v4230_v25 = vmov 0  ;;  %v4232_v26 = vmov 0 }
  0x10   : > { %3158 = vmatprep.subr.msk.bf16.mxu0 %vm4196_vm0, %v505_v3  ;;  %s2757_s24 = sshll.u32 %s4388_s19, 6  ;;  %v3353_v42 = vrot.slane %v4199_v8, 1  ;;  %v4238_v50 = vmov 0  ;;  %v4240_v51 = vmov 0  ;;  %s2758_s16 = sshll.u32 %s4388_s19, 4 }
  0x11   : > { %v3246_v5 = vadd.s32 8, %v3241_v4  ;;  %s3251_s27 = scalar_lea.vmem %s4190_s0, %s2757_s24  ;;  %v239_v6 = vand.u32 7, %v3241_v4  ;;  %vm4197_vm2 = vcmp.lt.s32.totalorder %v3241_v4, 1  ;;  %v3280_v17 = vadd.s32 16, %v3241_v4  ;;  %s224_s21 = scalar_lea.vmem %s4195_s5, %s2758_s16 }
  0x12   : > { %v3255_v7 = vld [vmem:[%s3251_s27] sm:$0xff]  ;;  %v3261_v10 = vld [vmem:[%s3251_s27 + $0x8] sm:$0xff]  ;;  %v3264_v11 = vld [vmem:[%s3251_s27 + $0x10] sm:$0xff]  ;;  %v3283_v18 = vadd.s32 24, %v3241_v4  ;;  %v3291_v21 = vadd.s32 32, %v3241_v4  ;;  %v3294_v22 = vadd.s32 40, %v3241_v4 }
  0x13   : > { %v246_v12 = vand.u32 7, %v3246_v5  ;;  %v3269_v13 = vrot.slane %v3255_v7, 7  ;;  %v506_v14 = vpack.c.bf16 %v3255_v7, %v4199_v8  ;;  %v3274_v15 = vld [vmem:[%s3251_s27 + $0x18] sm:$0xff]  ;;  %v3277_v16 = vld [vmem:[%s3251_s27 + $0x20] sm:$0xff]  ;;  %v3287_v19 = vpack.c.bf16 %v3264_v11, %v3261_v10  ;;  %v3302_v24 = vld [vmem:[%s3251_s27 + $0x30] sm:$0xff] }
  0x14   : > { %v3299_v23 = vpack.c.bf16 %v3277_v16, %v3274_v15  ;;  %vm3306_vm3 = vcmp.eq.s32.totalorder %v239_v6, 0  ;;  %v3320_v28 = vrot.slane %v3261_v10, 7  ;;  %v422_v29 = vrot.slane %v3264_v11, 7  ;;  %v3335_v32 = vld [vmem:[%s3251_s27 + $0x28] sm:$0xff] }
  0x15   : > { %2851 = vmatprep.mubr.msk.bf16.mxu0 %vm4198_vm1, %v506_v14  ;;  %v4231_v25 = vsel %vm3306_vm3, 4294967295, %v4230_v25  ;;  %vm3312_vm4 = vcmp.eq.s32.totalorder %v246_v12, 0  ;;  %v3326_v30 = vrot.slane %v3302_v24, 7  ;;  %v434_v31 = vsel %vm4197_vm2, %v3258_v9, %v3269_v13 }
  0x16   : > { %v4233_v26 = vsel %vm3312_vm4, 4294967295, %v4232_v26  ;;  %2852 = vmatmul.mubr.msk.bf16.vlgmr.msra.gmra.mrb[0].mxu0 %vm4198_vm1, %v3287_v19  ;;  %v453_v33 = vsel %vm3312_vm4, 0.0, %v434_v31  ;;  %v253_v34 = vand.u32 7, %v3280_v17  ;;  %v260_v35 = vand.u32 7, %v3283_v18 }
  0x17   : > { %2860 = vmatpush3.bf16.msra.mxu0 %v607_v20  ;;  %2855 = vmatprep.mubr.msk.bf16.mxu0 %vm4198_vm1, %v3299_v23  ;;  %v435_v36 = vsel %vm4197_vm2, %v3326_v30, %v3258_v9  ;;  %v267_v37 = vand.u32 7, %v3291_v21  ;;  %v274_v38 = vand.u32 7, %v3294_v22  ;;  %v423_v39 = vrot.slane %v3274_v15, 7 }
  0x18   : > { %3159 = vmatprep.subr.msk.bf16.mxu0 %vm4196_vm0, %v2657_v27  ;;  %v452_v40 = vsel %vm3306_vm3, 0.0, %v435_v36  ;;  %v424_v41 = vrot.slane %v3277_v16, 7  ;;  %v3358_v43 = vsel %vm4197_vm2, %v3320_v28, %v422_v29  ;;  %v3362_v44 = vpack.c.bf16 %v3302_v24, %v3335_v32 }
  0x19   : > { %v3365_v45 = vadd.s32 48, %v3241_v4  ;;  %v501_v46 = vpack.c.bf16 %v453_v33, %v452_v40  ;;  %vm3367_vm5 = vcmp.eq.s32.totalorder %v253_v34, 0  ;;  %vm3371_vm6 = vcmp.eq.s32.totalorder %v260_v35, 0 }
  0x1a   : > { %v3379_v49 = vsel %vm4197_vm2, %v3269_v13, %v3320_v28  ;;  %vm3383_vm7 = vcmp.eq.s32.totalorder %v267_v37, 0  ;;  %vm3389_vm8 = vcmp.eq.s32.totalorder %v274_v38, 0  ;;  %v3395_v52 = vsel %vm4197_vm2, %v423_v39, %v424_v41 }
  0x1b   : > { %v4239_v50 = vsel %vm3383_vm7, 4294967295, %v4238_v50  ;;  %v4241_v51 = vsel %vm3389_vm8, 4294967295, %v4240_v51  ;;  %v3399_v53 = vsel %vm4197_vm2, %v422_v29, %v423_v39  ;;  %v1117_v55 = vsel %vm3371_vm6, 0.0, %v3395_v52 }
  0x1c   : > { %v1116_v54 = vsel %vm3367_vm5, 0.0, %v3399_v53  ;;  %v3408_v56 = vrot.slane %v3255_v7, 1  ;;  %v454_v57 = vsel %vm3367_vm5, 0.0, %v3379_v49  ;;  %v3418_v59 = vadd.s32 56, %v3241_v4 }
  0x1d   : > { %v3415_v58 = vpack.c.bf16 %v1117_v55, %v1116_v54  ;;  %v455_v60 = vsel %vm3371_vm6, 0.0, %v3358_v43  ;;  %v456_v61 = vsel %vm3383_vm7, 0.0, %v3399_v53  ;;  %v281_v62 = vand.u32 7, %v3365_v45 }
  0x1e   : > { %2856 = vmatmul.mubr.msk.bf16.gmra.mrb[4].mxu0 %vm4198_vm1, %v3362_v44  ;;  %v425_v63 = vrot.slane %v3335_v32, 7  ;;  %v457_v0 = vsel %vm3389_vm8, 0.0, %v3395_v52  ;;  %v288_v1 = vand.u32 7, %v3418_v59  ;;  %vm4201_vm9 = vcmp.lt.s32.totalorder %v3241_v4, 7 }
  0x1f   : > { %2861 = vmatprep.mubr.msk.bf16.mxu0 %vm4198_vm1, %v501_v46  ;;  %v3435_v2 = vrot.slane %v3261_v10, 1  ;;  %v502_v3 = vpack.c.bf16 %v455_v60, %v454_v57  ;;  %v693_v14 = vsel %vm4196_vm0, %v2657_v27, 0  ;;  %v464_v17 = vrot.slane %v3274_v15, 1 }
  0x20   : > { %v503_v18 = vpack.c.bf16 %v457_v0, %v456_v61  ;;  %vm3439_vm10 = vcmp.eq.s32.totalorder %v281_v62, 0  ;;  %v4243_v20 = vmov 0  ;;  %v3445_v29 = vsel %vm4197_vm2, %v424_v41, %v425_v63 }
  0x21   : > { %4242 = vst [vmem:[#allocation3_spill] sm:$0xff] %v3435_v2  ;;  %v4244_v20 = vsel %vm3439_vm10, 4294967295, %v4243_v20  ;;  %vm3447_vm11 = vcmp.eq.s32.totalorder %v288_v1, 0  ;;  %v4245_v31 = vmov 0  ;;  %v3454_v33 = vsel %vm4197_vm2, %v425_v63, %v3326_v30 }
  0x22   : > { %v4246_v31 = vsel %vm3447_vm11, 4294967295, %v4245_v31  ;;  %vm3458_vm12 = vcmp.eq.s32.totalorder %v239_v6, 7  ;;  %v4247_v27 = vmov 0  ;;  %v475_v36 = vsel %vm4201_vm9, %v3353_v42, %v3408_v56  ;;  %v2662_v6 = vld [vmem:[%s4191_s1 + $0xc] sm:$0xf] }
  0x23   : > { %v4248_v27 = vsel %vm3458_vm12, 4294967295, %v4247_v27  ;;  %vm3468_vm13 = vcmp.eq.s32.totalorder %v246_v12, 7  ;;  %v4249_v39 = vmov 0  ;;  %v3476_v40 = vsel %vm4201_vm9, %v3408_v56, %v3435_v2 }
  0x24   : > { %v4250_v39 = vsel %vm3468_vm13, 4294967295, %v4249_v39  ;;  %v465_v41 = vrot.slane %v3277_v16, 1  ;;  %v466_v45 = vrot.slane %v3335_v32, 1  ;;  %v463_v5 = vrot.slane %v3264_v11, 1 }
  0x25   : > { %v458_v12 = vsel %vm3439_vm10, 0.0, %v3445_v29  ;;  %v459_v46 = vsel %vm3447_vm11, 0.0, %v3454_v33  ;;  %v493_v54 = vsel %vm3458_vm12, 0.0, %v475_v36  ;;  %vm3494_vm14 = vcmp.eq.s32.totalorder %v253_v34, 7 }
  0x26   : > { %2862 = vmatmul.mubr.msk.bf16.vlgmr.msra.gmra.mrb[0].mxu0 %vm4198_vm1, %v502_v3  ;;  %v3500_v57 = vsel %vm4201_vm9, %v464_v17, %v465_v41  ;;  %v494_v59 = vsel %vm3468_vm13, 0.0, %v3476_v40  ;;  %vm3506_vm15 = vcmp.eq.s32.totalorder %v260_v35, 7  ;;  %v4253_v60 = vmov 0 }
  0x27   : > { %2870 = vmatpush3.bf16.msra.mxu0 %v693_v14  ;;  %2865 = vmatprep.mubr.msk.bf16.mxu0 %vm4198_vm1, %v503_v18  ;;  %v4254_v60 = vsel %vm3506_vm15, 4294967295, %v4253_v60  ;;  %v3512_v34 = vsel %vm4201_vm9, %v465_v41, %v466_v45  ;;  %v1140_v61 = vsel %vm3494_vm14, 0.0, %v3500_v57  ;;  %v504_v0 = vpack.c.bf16 %v459_v46, %v458_v12 }
  0x28   : > { %3160 = vmatprep.subr.msk.bf16.mxu0 %vm4196_vm0, %v2662_v6  ;;  %v1141_v63 = vsel %vm3506_vm15, 0.0, %v3512_v34  ;;  %v674_v14 = vpack.c.bf16 %v494_v59, %v493_v54  ;;  %v3524_v35 = vsel %vm4201_vm9, %v463_v5, %v464_v17  ;;  %v3529_v18 = vsel %vm4201_vm9, %v3435_v2, %v463_v5  ;;  %v3545_v17 = vld [vmem:[%s3251_s27 + $0x38] sm:$0xff] }
  0x29   : > { %v3520_v3 = vpack.c.bf16 %v1141_v63, %v1140_v61  ;;  %vm3533_vm0 = vcmp.eq.s32.totalorder %v267_v37, 7  ;;  %v4256_v36 = vmov 0  ;;  %vm3539_vm2 = vcmp.eq.s32.totalorder %v274_v38, 7 }
  0x2a   : > { %v4257_v36 = vsel %vm3533_vm0, 4294967295, %v4256_v36  ;;  %v4258_v41 = vmov 0  ;;  %v495_v21 = vsel %vm3494_vm14, 0.0, %v3529_v18  ;;  %v496_v37 = vsel %vm3506_vm15, 0.0, %v3524_v35 }
  0x2b   : > { %4255 = vst [vmem:[#allocation4_spill] sm:$0xff] %v3520_v3  ;;  %v4259_v41 = vsel %vm3539_vm2, 4294967295, %v4258_v41  ;;  %v497_v22 = vsel %vm3533_vm0, 0.0, %v3500_v57  ;;  %v498_v38 = vsel %vm3539_vm2, 0.0, %v3512_v34  ;;  %v3561_v5 = vrot.slane %v3302_v24, 1 }
  0x2c   : > { %v3568_v46 = vrot.slane %v3545_v17, 7  ;;  %v1115_v59 = vsel %vm3312_vm4, 0.0, %v3358_v43  ;;  %v1118_v61 = vsel %vm3383_vm7, 0.0, %v3445_v29  ;;  %v675_v63 = vpack.c.bf16 %v496_v37, %v495_v21 }
  0x2d   : > { %v676_v8 = vpack.c.bf16 %v498_v38, %v497_v22  ;;  %vm3586_vm9 = vcmp.eq.s32.totalorder %v281_v62, 7  ;;  %vm3590_vm2 = vcmp.eq.s32.totalorder %v288_v1, 7  ;;  %vm4266_vm0 = vcmp.lt.s32.totalorder %v3241_v4, 7  ;;  %v2667_v1 = vld [vmem:[%s4191_s1 + $0x10] sm:$0xf] }
  0x2e   : > { %2866 = vmatmul.mubr.msk.bf16.gmra.mrb[4].mxu0 %vm4198_vm1, %v504_v0  ;;  %v3597_v21 = vsel %vm4266_vm0, %v466_v45, %v3561_v5  ;;  %vm4268_vm15 = vcmp.lt.s32.totalorder %v3241_v4, 1  ;;  %v1138_v37 = vsel %vm3458_vm12, 0.0, %v3529_v18  ;;  %v1139_v45 = vsel %vm3468_vm13, 0.0, %v3524_v35 }
  0x2f   : > { %2871 = vmatprep.mubr.msk.bf16.mxu0 %vm4198_vm1, %v674_v14  ;;  %vm4260_vm1 = vcmp.lt.s32.totalorder %v3241_v4, 1  ;;  %v783_v62 = vsel %vm4268_vm15, %v3568_v46, %v3269_v13  ;;  %v3617_v22 = vpack.c.bf16 %v1139_v45, %v1138_v37  ;;  %v499_v13 = vsel %vm3586_vm9, 0.0, %v3597_v21 }
  0x30   : > { %v1113_v12 = vsel %vm4260_vm1, %v3258_v9, %v3320_v28  ;;  %v1119_v28 = vsel %vm3389_vm8, 0.0, %v3454_v33  ;;  %vm4261_vm1 = vcmask 1043456   ;;  %vm4271_vm15 = vcmask 1043456  }
  0x31   : > { %v1114_v54 = vsel %vm3306_vm3, 0.0, %v1113_v12  ;;  %v835_v14 = vsel %vm4261_vm1, %v2662_v6, 0  ;;  %v3584_v3 = vpack.c.bf16 %v1119_v28, %v1118_v61  ;;  %vm4267_vm1 = vmmov %vm4266_vm0  ;;  %vm4269_vm0 = vcmask 64512   ;;  %v3182_v12 = vld [vmem:[%s4193_s3 + $0x38] sm:$0xff]  }
  0x32   : > { %v3578_v0 = vpack.c.bf16 %v1115_v59, %v1114_v54  ;;  %v476_v6 = vsel %vm4267_vm1, %v3561_v5, %v3353_v42  ;;  %vm4270_vm1 = vmmov %vm4269_vm0  ;;  %v784_v54 = vsel %vm3306_vm3, 0.0, %v783_v62  ;;  %v785_v59 = vsel %vm3312_vm4, 0.0, %v3379_v49 }
  0x33   : > { %v500_v38 = vsel %vm3590_vm2, 0.0, %v476_v6  ;;  %v787_v28 = vsel %vm3371_vm6, 0.0, %v3399_v53  ;;  %v788_v49 = vsel %vm3383_vm7, 0.0, %v3395_v52  ;;  %v929_v37 = vsel %vm4271_vm15, %v2667_v1, 0  ;;  %v2672_v53 = vld [vmem:[%s4191_s1 + $0x14] sm:$0xf] }
  0x34   : > { %v677_v61 = vpack.c.bf16 %v500_v38, %v499_v13  ;;  %v790_v52 = vsel %vm3439_vm10, 0.0, %v3454_v33  ;;  %v911_v45 = vpack.c.bf16 %v3274_v15, %v3264_v11  ;;  %v912_v13 = vpack.c.bf16 %v3335_v32, %v3277_v16  ;;  %v2677_v38 = vld [vmem:[%s4191_s1 + $0x18] sm:$0xf] }
  0x35   : > { %v913_v11 = vpack.c.bf16 %v3545_v17, %v3302_v24  ;;  %v810_v16 = vsel %vm3494_vm14, 0.0, %v3524_v35 }
  0x36   : > { %2872 = vmatmul.mubr.msk.bf16.vlgmr.msra.gmra.mrb[0].mxu0 %vm4269_vm0, %v675_v63  ;;  %v816_v63 = vpack.c.bf16 %v785_v59, %v784_v54 }
  0x37   : > { %2880 = vmatpush3.bf16.msra.mxu0 %v835_v14  ;;  %2875 = vmatprep.mubr.msk.bf16.mxu0 %vm4270_vm1, %v676_v8  ;;  %v786_v8 = vsel %vm3367_vm5, 0.0, %v3358_v43  ;;  %vm4272_vm1 = vmmov %vm4269_vm0  ;;  %v789_v14 = vsel %vm3389_vm8, 0.0, %v3445_v29 }
  0x38   : > { %3161 = vmatprep.subr.msk.bf16.mxu0 %vm4271_vm15, %v2667_v1  ;;  %v817_v6 = vpack.c.bf16 %v787_v28, %v786_v8  ;;  %v818_v62 = vpack.c.bf16 %v789_v14, %v788_v49  ;;  %vm4274_vm7 = vmmov %vm4272_vm1  ;;  %v2687_v49 = vld [vmem:[%s4191_s1 + $0x20] sm:$0xf] }
  0x3e   : > { %2876 = vmatmul.mubr.msk.bf16.gmra.mrb[4].mxu0 %vm4269_vm0, %v677_v61  ;;  %vm4273_vm0 = vcmp.lt.s32.totalorder %v3241_v4, 1 }
  0x3f   : > { %2881 = vmatprep.mubr.msk.bf16.mxu0 %vm4272_vm1, %v816_v63  ;;  %v776_v43 = vsel %vm4273_vm0, %v3326_v30, %v3568_v46  ;;  %v910_v30 = vpack.c.bf16 %v3261_v10, %v3255_v7  ;;  %vm4275_vm0 = vmmov %vm4272_vm1  ;;  %v808_v7 = vsel %vm3458_vm12, 0.0, %v3476_v40  ;;  %v809_v10 = vsel %vm3468_vm13, 0.0, %v3529_v18 }
  0x40   : > { %v791_v29 = vsel %vm3447_vm11, 0.0, %v776_v43  ;;  %vm4276_vm8 = vmmov %vm4275_vm0  ;;  %v1004_v15 = vpack.c.bf16 %v809_v10, %v808_v7  ;;  %v799_v18 = vrot.slane %v3545_v17, 1  ;;  %vm4286_vm13 = vcmp.lt.s32.totalorder %v3241_v4, 7 }
  0x41   : > { %v819_v1 = vpack.c.bf16 %v791_v29, %v790_v52  ;;  %vm4288_vm12 = vcmask 64512   ;;  %v3175_v52 = vld [vmem:[%s4193_s3 + $0x8] sm:$0xff]   ;;  %v3775_v29 = vld [vmem:[%s4193_s3] sm:$0xff]  }
  0x42   : > { %vm4289_vm3 = vmmov %vm4288_vm12  ;;  %2939 = vmatprep.subr.bf16.mxu1 %v3175_v52 }
  0x43   : > { %2940 = vmatpush3.bf16.msra.mxu1 %v3175_v52 }
  0x44   : > { %2949 = vmatprep.subr.bf16.mxu1 %v3775_v29 }
  0x46   : > { %2882 = vmatmul.mubr.msk.bf16.vlgmr.msra.gmra.mrb[0].mxu0 %vm4272_vm1, %v817_v6  ;;  %vm4278_vm1 = vmmov %vm4275_vm0 }
  0x47   : > { %2890 = vmatpush3.bf16.msra.mxu0 %v929_v37  ;;  %2885 = vmatprep.mubr.msk.bf16.mxu0 %vm4274_vm7, %v818_v62  ;;  %vm4277_vm7 = vmmov %vm4271_vm15  ;;  %v4305_v37 = vld [vmem:[#allocation3_spill] sm:$0xff] }
  0x48   : > { %3162 = vmatprep.subr.msk.bf16.mxu0 %vm4271_vm15, %v2672_v53  ;;  %v1023_v33 = vsel %vm4277_vm7, %v2672_v53, 0  ;;  %vm4279_vm15 = vmmov %vm4275_vm0 }
  0x4e   : > { %2886 = vmatmul.mubr.msk.bf16.gmra.mrb[4].mxu0 %vm4275_vm0, %v819_v1  ;;  %v2692_v1 = vld [vmem:[%s4192_s2] ss:$0 sm:$0xff] }
  0x4f   : > { %2891 = vmatprep.mubr.msk.bf16.mxu0 %vm4276_vm8, %v910_v30  ;;  %vm4280_vm8 = vmmov %vm4277_vm7  ;;  %vm4281_vm7 = vnez %v4254_v60 }
  0x50   : > { %v811_v32 = vsel %vm4281_vm7, 0.0, %v3500_v57  ;;  %v800_v57 = vsel %vm4286_vm13, %v3561_v5, %v799_v18 }
  0x51   : > { %v1005_v54 = vpack.c.bf16 %v811_v32, %v810_v16  ;;  %v814_v63 = vsel %vm3586_vm9, 0.0, %v800_v57 }
  0x56   : > { %2892 = vmatmul.mubr.msk.bf16.vlgmr.msra.gmra.mrb[0].mxu0 %vm4278_vm1, %v911_v45  ;;  %vm4282_vm1 = vmmov %vm4275_vm0 }
  0x57   : > { %2900 = vmatpush3.bf16.msra.mxu0 %v1023_v33  ;;  %2895 = vmatprep.mubr.msk.bf16.mxu0 %vm4279_vm15, %v912_v13  ;;  %vm4283_vm15 = vnez %v4257_v36 }
  0x58   : > { %3163 = vmatprep.subr.msk.bf16.mxu0 %vm4280_vm8, %v2677_v38  ;;  %v812_v40 = vsel %vm4283_vm15, 0.0, %v3512_v34  ;;  %vm4284_vm8 = vnez %v4259_v41  ;;  %v2682_v34 = vld [vmem:[%s4191_s1 + $0x1c] sm:$0xf] }
  0x59   : > { %v813_v24 = vsel %vm4284_vm8, 0.0, %v3597_v21  ;;  %v1143_v62 = vsel %vm4284_vm8, 0.0, %v800_v57 }
  0x5a   : > { %v1006_v59 = vpack.c.bf16 %v813_v24, %v812_v40 }
  0x5e   : > { %2896 = vmatmul.mubr.msk.bf16.gmra.mrb[4].mxu0 %vm4275_vm0, %v913_v11  ;;  %vm4285_vm0 = vcmask 1043456  }
  0x5f   : > { %2901 = vmatprep.mubr.msk.bf16.mxu0 %vm4282_vm1, %v1004_v15  ;;  %v1165_v35 = vsel %vm4285_vm0, %v2677_v38, 0  ;;  %vm4287_vm1 = vmmov %vm4286_vm13 }
  0x60   : > { %v807_v61 = vsel %vm4287_vm1, %v799_v18, %v3408_v56  ;;  %vm4290_vm13 = vmmov %vm4285_vm0 }
  0x61   : > { %v815_v8 = vsel %vm3590_vm2, 0.0, %v807_v61  ;;  %vm4291_vm0 = vmmov %vm4289_vm3 }
  0x62   : > { %v1007_v5 = vpack.c.bf16 %v815_v8, %v814_v63  ;;  %vm4292_vm1 = vmmov %vm4291_vm0 }
  0x63   : > { %vm4293_vm4 = vmmov %vm4290_vm13 }
  0x64   : > { %v1259_v56 = vsel %vm4293_vm4, %v2682_v34, 0 }
  0x66   : > { %2902 = vmatmul.mubr.msk.bf16.vlgmr.msra.gmra.mrb[0].mxu0 %vm4288_vm12, %v1005_v54  ;;  %vm4295_vm12 = vmmov %vm4291_vm0 }
  0x67   : > { %2910 = vmatpush3.bf16.msra.mxu0 %v1165_v35  ;;  %2905 = vmatprep.mubr.msk.bf16.mxu0 %vm4289_vm3, %v1006_v59  ;;  %vm4294_vm3 = vcmp.lt.s32.totalorder %v3241_v4, 1 }
  0x68   : > { %3164 = vmatprep.subr.msk.bf16.mxu0 %vm4290_vm13, %v2682_v34  ;;  %v1106_v28 = vsel %vm4294_vm3, %v3568_v46, %v3258_v9  ;;  %vm4296_vm13 = vmmov %vm4291_vm0 }
  0x69   : > { %v1121_v14 = vsel %vm3447_vm11, 0.0, %v1106_v28  ;;  %vm4298_vm3 = vmmov %vm4293_vm4 }
  0x6e   : > { %2906 = vmatmul.mubr.msk.bf16.gmra.mrb[4].mxu0 %vm4291_vm0, %v1007_v5 }
  0x6f   : > { %2911 = vmatprep.mubr.msk.bf16.mxu0 %vm4292_vm1, %v3578_v0  ;;  %v1120_v0 = vsel %vm3439_vm10, 0.0, %v776_v43  ;;  %vm4297_vm1 = vmmov %vm4291_vm0  ;;  %v4307_v43 = vld [vmem:[#allocation4_spill] sm:$0xff] }
  0x70   : > { %v1149_v46 = vpack.c.bf16 %v1121_v14, %v1120_v0  ;;  %vm4302_vm10 = vmmov %vm4291_vm0 }
  0x76   : > { %2912 = vmatmul.mubr.msk.bf16.vlgmr.msra.gmra.mrb[0].mxu0 %vm4295_vm12, %v3415_v58  ;;  %v1353_v58 = vsel %vm4298_vm3, %v2687_v49, 0  ;;  %vm4299_vm12 = vmmov %vm4291_vm0 }
  0x77   : > { %2920 = vmatpush3.bf16.msra.mxu0 %v1259_v56  ;;  %2915 = vmatprep.mubr.msk.bf16.mxu0 %vm4296_vm13, %v3584_v3  ;;  %vm4300_vm13 = vmmov %vm4291_vm0  ;;  %v4301_v3 = vmov 0.0  }
  0x78   : > { %3165 = vmatprep.subr.msk.bf16.mxu0 %vm4293_vm4, %v2687_v49  ;;  %v1243_v6 = vpack.c.bf16 %v4301_v3, %v3545_v17  ;;  %vm4303_vm4 = vmmov %vm4291_vm0 }
  0x79   : > { %vm4309_vm3 = vmmov %vm4303_vm4 }
  0x7e   : > { %2916 = vmatmul.mubr.msk.bf16.gmra.mrb[4].mxu0 %vm4291_vm0, %v1149_v46  ;;  %vm4304_vm0 = vcmp.lt.s32.totalorder %v3241_v4, 7 }
  0x7f   : > { %2921 = vmatprep.mubr.msk.bf16.mxu0 %vm4297_vm1, %v3287_v19  ;;  %v1142_v19 = vsel %vm4283_vm15, 0.0, %v3597_v21  ;;  %vm4306_vm1 = vmmov %vm4304_vm0 }
  0x80   : > { %v1137_v17 = vsel %vm4306_vm1, %v3353_v42, %v4305_v37  ;;  %vm4224_vm1 = vcmask 130048  }
  0x86   : > { %2922 = vmatmul.mubr.msk.bf16.vlgmr.msra.gmra.mrb[0].mxu0 %vm4299_vm12, %v3299_v23  ;;  %v1336_v23 = vpack.c.bf16 %v1143_v62, %v1142_v19  ;;  %vm4310_vm12 = vmmov %vm4309_vm3 }
  0x87   : > { %2930 = vmatpush3.bf16.msra.mxu0 %v1353_v58  ;;  %2925 = vmatprep.mubr.msk.bf16.mxu0 %vm4300_vm13, %v3362_v44  ;;  %v1130_v44 = vsel %vm4304_vm0, %v799_v18, %v3353_v42 }
  0x88   : > { %v1144_v21 = vsel %vm3586_vm9, 0.0, %v1130_v44 }
  0x8e   : > { %2926 = vmatmul.mubr.msk.bf16.gmra.mrb[4].mxu0 %vm4302_vm10, %v1243_v6  ;;  %vm4308_vm10 = vmmov %vm4303_vm4 }
  0x8f   : > { %2931 = vmatprep.mubr.msk.bf16.mxu0 %vm4303_vm4, %v3617_v22  ;;  %v1145_v22 = vsel %vm3590_vm2, 0.0, %v1137_v17 }
  0x90   : > { %v1337_v53 = vpack.c.bf16 %v1145_v22, %v1144_v21 }
  0x96   : > { %2932 = vmatmul.mubr.msk.bf16.vlgmr.msra.gmra.mrb[0].mxu0 %vm4308_vm10, %v4307_v43 }
  0x97   : > { %2935 = vmatprep.mubr.msk.bf16.mxu0 %vm4309_vm3, %v1336_v23  ;;  %vm4311_vm3 = vcmp.lt.s32.totalorder %v3241_v4, 1 }
  0x9e   : > { %2936 = vmatmul.mubr.msk.bf16.gmra.mrb[4].mxu0 %vm4310_vm12, %v1337_v53  ;;  %vm4312_vm12 = vcmp.lt.s32.totalorder %v3241_v4, 7 }
 0x169   : > { %v2933_v30 = vpop.f32.mrb[0].mxu0 }
 0x16a   : > { %v1437_v45 = vadd.f32 %v2933_v30, %v2692_v1  ;;  %v1389_v13 = vpop.f32.mrb[1].mxu0 }
 0x16b   : > { %v1435_v33 = vadd.f32 %v2692_v1, %v1389_v13  ;;  %v2934_v38 = vpop.f32.mrb[2].mxu0 }
 0x16c   : > { %vm1445_vm13 = vcmp.ge.f32.partialorder %v1437_v45, 0.0  ;;  %v1453_v7 = vmul.f32 0.2, %v1437_v45  ;;  %v1438_v10 = vadd.f32 %v2934_v38, %v2692_v1  ;;  %v1392_v11 = vpop.f32.mrb[3].mxu0 }
 0x16d   : > { %vm1443_vm4 = vcmp.ge.f32.partialorder %v1435_v33, 0.0  ;;  %v1451_v15 = vmul.f32 0.2, %v1435_v33  ;;  %v1436_v16 = vadd.f32 %v2692_v1, %v1392_v11 }
 0x16e   : > { %v3781_v32 = vsel %vm1445_vm13, %v1437_v45, %v1453_v7  ;;  %vm1446_vm0 = vcmp.ge.f32.partialorder %v1438_v10, 0.0  ;;  %v1454_v40 = vmul.f32 0.2, %v1438_v10  ;;  %vm4313_vm13 = vmmov %vm4312_vm12 }
 0x16f   : > { %v1486_v24 = vrot.slane %v3781_v32, 7  ;;  %v1510_v18 = vrot.slane %v3781_v32, 1  ;;  %v3785_v54 = vsel %vm1443_vm4, %v1435_v33, %v1451_v15  ;;  %vm1444_vm10 = vcmp.ge.f32.partialorder %v1436_v16, 0.0 }
 0x170   : > { %v3788_v59 = vrot.slane %v3785_v54, 7  ;;  %v3791_v35 = vrot.slane %v3785_v54, 1  ;;  %v3793_v57 = vsel %vm1446_vm0, %v1438_v10, %v1454_v40  ;;  %v1452_v61 = vmul.f32 0.2, %v1436_v16  ;;  %vm4314_vm0 = vmmov %vm4311_vm3 }
 0x171   : > { %v1487_v34 = vrot.slane %v3793_v57, 7  ;;  %v4223_v63 = vrot.slane %v3793_v57, 1  ;;  %v2937_v5 = vpop.f32.mrb[4].mxu0  ;;  %v1537_v56 = vpack.c.bf16 %v3785_v54, %v4301_v3  ;;  %v4357_v2 = vpack.c.bf16 %v3793_v57, %v3781_v32 }
 0x172   : > { %v3801_v28 = vsel %vm1444_vm10, %v1436_v16, %v1452_v61  ;;  %v1441_v49 = vadd.f32 %v2937_v5, %v2692_v1  ;;  %v1405_v0 = vpop.f32.mrb[5].mxu0  ;;  %v1497_v14 = vsel %vm4311_vm3, %v3258_v9, %v3788_v59  ;;  %v3811_v46 = vsel %vm4312_vm12, %v3353_v42, %v3791_v35  ;;  %vm4315_vm10 = vmmov %vm4314_vm0  ;;  %v3879_v5 = vld [vmem:[%s4193_s3 + $0x10] sm:$0xff]  }
 0x173   : > { %v3817_v58 = vsel %vm4313_vm13, %v1510_v18, %v4223_v63  ;;  %v3820_v6 = vrot.slane %v3801_v28, 7  ;;  %v3823_v19 = vrot.slane %v3801_v28, 1  ;;  %v1439_v62 = vadd.f32 %v2692_v1, %v1405_v0  ;;  %2941 = vmatprep.mubr.msk.bf16.mxu1 %vm4224_vm1, %v1537_v56  ;;  %v2938_v23 = vpop.f32.mrb[6].mxu0  ;;  %vm4316_vm3 = vmmov %vm4312_vm12 }
 0x174   : > { %v1526_v44 = vsel %vm4281_vm7, 0.0, %v3817_v58  ;;  %vm1449_vm4 = vcmp.ge.f32.partialorder %v1441_v49, 0.0  ;;  %v1457_v37 = vmul.f32 0.2, %v1441_v49  ;;  %v1442_v17 = vadd.f32 %v2938_v23, %v2692_v1  ;;  %v1408_v43 = vpop.f32.mrb[7].mxu0 }
 0x175   : > { %v3832_v21 = vsel %vm4314_vm0, %v3820_v6, %v1486_v24  ;;  %v3838_v22 = vsel %vm4315_vm10, %v3788_v59, %v3820_v6  ;;  %v3843_v53 = vsel %vm4316_vm3, %v3823_v19, %v1510_v18  ;;  %vm1447_vm12 = vcmp.ge.f32.partialorder %v1439_v62, 0.0 }
 0x176   : > { %v1501_v52 = vsel %vm3367_vm5, 0.0, %v3838_v22  ;;  %v1502_v30 = vsel %vm3371_vm6, 0.0, %v3832_v21  ;;  %v1525_v45 = vsel %vm3494_vm14, 0.0, %v3843_v53  ;;  %v3854_v13 = vsel %vm1449_vm4, %v1441_v49, %v1457_v37  ;;  %vm4317_vm4 = vmmov %vm4314_vm0 }
 0x177   : > { %v3856_v33 = vpack.c.bf16 %v1502_v30, %v1501_v52  ;;  %v3858_v38 = vpack.c.bf16 %v1526_v44, %v1525_v45  ;;  %v3861_v7 = vrot.slane %v3854_v13, 7  ;;  %v3864_v10 = vrot.slane %v3854_v13, 1  ;;  %vm4319_vm10 = vmmov %vm4317_vm4 }
 0x178   : > { %v1455_v11 = vmul.f32 0.2, %v1439_v62  ;;  %vm1450_vm13 = vcmp.ge.f32.partialorder %v1442_v17, 0.0  ;;  %v1458_v15 = vmul.f32 0.2, %v1442_v17  ;;  %v1440_v16 = vadd.f32 %v2692_v1, %v1408_v43 }
 0x179   : > { %v3868_v40 = vpack.c.bf16 %v3781_v32, %v3801_v28  ;;  %v1498_v18 = vsel %vm4317_vm4, %v3861_v7, %v3258_v9  ;;  %vm4318_vm0 = vnez %v4233_v26  ;;  %v1494_v1 = vsel %vm4319_vm10, %v1486_v24, %v1487_v34  ;;  %v3183_v32 = vld [vmem:[%s4193_s3 + $0x40] sm:$0xff]  }
 0x17a   : > { %v1500_v61 = vsel %vm4318_vm0, 0.0, %v1497_v14  ;;  %v3886_v56 = vsel %vm1447_vm12, %v1439_v62, %v1455_v11  ;;  %v3888_v49 = vsel %vm1450_vm13, %v1442_v17, %v1458_v15  ;;  %vm1448_vm3 = vcmp.ge.f32.partialorder %v1440_v16, 0.0 }
 0x17b   : > { %v1456_v0 = vmul.f32 0.2, %v1440_v16  ;;  %v1488_v23 = vrot.slane %v3886_v56, 7  ;;  %v1512_v14 = vrot.slane %v3886_v56, 1  ;;  %v3893_v44 = vrot.slane %v3888_v49, 7  ;;  %2942 = vmatmul.mubr.msk.bf16.vlgmr.msra.gmra.mrb[0].mxu1 %vm4224_vm1, %v3868_v40 }
 0x17c   : > { %v3896_v37 = vrot.slane %v3888_v49, 1  ;;  %2950 = vmatpush3.bf16.msra.mxu1 %v3775_v29  ;;  %v3905_v62 = vpack.c.bf16 %v3886_v56, %v3793_v57  ;;  %vm4321_vm12 = vnez %v4231_v25  ;;  %vm4322_vm13 = vnez %v4239_v50 }
 0x17d   : > { %v3900_v24 = vsel %vm1448_vm3, %v1440_v16, %v1456_v0  ;;  %v1499_v17 = vsel %vm4321_vm12, 0.0, %v1498_v18  ;;  %v1503_v43 = vsel %vm4322_vm13, 0.0, %v1494_v1  ;;  %2959 = vmatprep.subr.bf16.mxu1 %v3879_v5  ;;  %v1493_v29 = vsel %vm4317_vm4, %v1487_v34, %v1488_v23  ;;  %vm4325_vm3 = vmmov %vm4317_vm4 }
 0x17e   : > { %4320 = vst [vmem:[#allocation3_spill] sm:$0xff] %v3905_v62  ;;  %v1489_v52 = vrot.slane %v3900_v24, 7  ;;  %v1513_v30 = vrot.slane %v3900_v24, 1  ;;  %v3915_v45 = vpack.c.bf16 %v3854_v13, %v3900_v24  ;;  %v1531_v11 = vpack.c.bf16 %v1500_v61, %v1499_v17  ;;  %2945 = vmatprep.mubr.msk.bf16.mxu1 %vm4224_vm1, %v3905_v62  ;;  %vm4326_vm4 = vmmov %vm4325_vm3 }
 0x17f   : > { %v1827_v15 = vsel %vm3367_vm5, 0.0, %v3832_v21  ;;  %v1828_v16 = vsel %vm3371_vm6, 0.0, %v1494_v1  ;;  %v2169_v18 = vsel %vm3367_vm5, 0.0, %v1494_v1  ;;  %vm4324_vm10 = vnez %v4241_v51 }
 0x180   : > { %4323 = vst [vmem:[#allocation4_spill] sm:$0xff] %v3915_v45  ;;  %v1504_v61 = vsel %vm4324_vm10, 0.0, %v1493_v29  ;;  %v3933_v0 = vpack.c.bf16 %v1828_v16, %v1827_v15  ;;  %v2170_v17 = vsel %vm3371_vm6, 0.0, %v1493_v29  ;;  %v3940_v34 = vsel %vm4325_vm3, %v1489_v52, %v3861_v7 }
 0x181   : > { %v1533_v8 = vpack.c.bf16 %v1504_v61, %v1503_v43  ;;  %v3942_v63 = vpack.c.bf16 %v2170_v17, %v2169_v18  ;;  %v3946_v47 = vsel %vm4326_vm4, %v1488_v23, %v1489_v52  ;;  %v1506_v1 = vsel %vm3447_vm11, 0.0, %v3940_v34 }
 0x182   : > { %vm4327_vm5 = vnez %v4244_v20  ;;  %vm4328_vm6 = vcmp.lt.s32.totalorder %v3241_v4, 7  ;;  %vm4329_vm3 = vnez %v4248_v27  ;;  %vm4331_vm1 = vnez %v4250_v39 }
 0x183   : > { %v1505_v48 = vsel %vm4327_vm5, 0.0, %v3946_v47  ;;  %v1520_v15 = vsel %vm4328_vm6, %v3791_v35, %v3823_v19  ;;  %v1523_v43 = vsel %vm4329_vm3, 0.0, %v3811_v46  ;;  %vm4330_vm4 = vmmov %vm4328_vm6  ;;  %v4332_v18 = vrot.slane %v3793_v57, 1 }
 0x184   : > { %v1516_v23 = vsel %vm4330_vm4, %v1512_v14, %v1513_v30  ;;  %v3963_v52 = vpack.c.bf16 %v1506_v1, %v1505_v48  ;;  %v1524_v16 = vsel %vm4331_vm1, 0.0, %v1520_v15  ;;  %vm4333_vm11 = vmmov %vm4330_vm4  ;;  %vm4334_vm6 = vcmask 130048  }
 0x185   : > { %v1517_v61 = vsel %vm4333_vm11, %v4332_v18, %v1512_v14  ;;  %v1528_v17 = vsel %vm4284_vm8, 0.0, %v1516_v23  ;;  %2946 = vmatmul.mubr.msk.bf16.gmra.mrb[4].mxu1 %vm4334_vm6, %v3915_v45  ;;  %v3975_v46 = vpack.c.bf16 %v1524_v16, %v1523_v43  ;;  %v1851_v48 = vsel %vm3494_vm14, 0.0, %v3817_v58  ;;  %vm4335_vm4 = vmmov %vm4334_vm6  ;;  %v4370_v57 = vld [vmem:[#allocation3_spill] sm:$0xff] }
 0x186   : > { %v1527_v1 = vsel %vm4283_vm15, 0.0, %v1517_v61  ;;  %v1852_v3 = vsel %vm4281_vm7, 0.0, %v1517_v61  ;;  %2951 = vmatprep.mubr.msk.bf16.mxu1 %vm4335_vm4, %v1531_v11  ;;  %v2193_v43 = vsel %vm3494_vm14, 0.0, %v1517_v61  ;;  %v2194_v16 = vsel %vm4281_vm7, 0.0, %v1516_v23  ;;  %vm4336_vm6 = vmmov %vm4333_vm11 }
 0x187   : > { %v3985_v14 = vpack.c.bf16 %v1528_v17, %v1527_v1  ;;  %v3987_v18 = vpack.c.bf16 %v1852_v3, %v1851_v48  ;;  %v3993_v45 = vpack.c.bf16 %v2194_v16, %v2193_v43  ;;  %v1515_v62 = vsel %vm4333_vm11, %v1513_v30, %v3864_v10 }
 0x188   : > { %v1522_v11 = vsel %vm4336_vm6, %v3864_v10, %v3353_v42  ;;  %vm4337_vm4 = vcmp.lt.s32.totalorder %v3241_v4, 1  ;;  %v1529_v60 = vsel %vm3586_vm9, 0.0, %v1515_v62  ;;  %v1826_v30 = vsel %vm4318_vm0, 0.0, %v3838_v22 }
 0x189   : > { %v1824_v55 = vsel %vm4337_vm4, %v3893_v44, %v3788_v59  ;;  %v1530_v3 = vsel %vm3590_vm2, 0.0, %v1522_v11  ;;  %v1829_v48 = vsel %vm4322_vm13, 0.0, %v1493_v29  ;;  %v1830_v59 = vsel %vm4324_vm10, 0.0, %v3946_v47  ;;  %vm4338_vm14 = vmmov %vm4337_vm4  ;;  %v3178_v29 = vld [vmem:[%s4193_s3 + $0x18] sm:$0xff]  }
 0x18a   : > { %v1825_v61 = vsel %vm4321_vm12, 0.0, %v1824_v55  ;;  %v1714_v17 = vpack.c.bf16 %v1530_v3, %v1529_v60  ;;  %v1859_v43 = vpack.c.bf16 %v1830_v59, %v1829_v48  ;;  %v1817_v16 = vsel %vm4338_vm14, %v3861_v7, %v3893_v44  ;;  %vm4341_vm4 = vmmov %vm4336_vm6 }
 0x18b   : > { %v1857_v1 = vpack.c.bf16 %v1826_v30, %v1825_v61  ;;  %v1831_v11 = vsel %vm4327_vm5, 0.0, %v3940_v34  ;;  %v1955_v22 = vpack.c.bf16 %v3801_v28, %v3785_v54  ;;  %vm4339_vm7 = vnez %v4246_v31 }
 0x18c   : > { %v1832_v55 = vsel %vm4339_vm7, 0.0, %v1817_v16  ;;  %v1957_v60 = vpack.c.bf16 %v3900_v24, %v3886_v56  ;;  %v1958_v7 = vpack.c.bf16 %v3888_v49, %v3854_v13  ;;  %v1849_v3 = vsel %vm4329_vm3, 0.0, %v1520_v15 }
 0x18d   : > { %v1860_v61 = vpack.c.bf16 %v1832_v55, %v1831_v11  ;;  %v1850_v54 = vsel %vm4331_vm1, 0.0, %v3843_v53  ;;  %v1853_v28 = vsel %vm4283_vm15, 0.0, %v1516_v23  ;;  %v1854_v30 = vsel %vm4284_vm8, 0.0, %v1515_v62 }
 0x18e   : > { %vm4340_vm11 = vcmask 130048   ;;  %v2053_v56 = vpack.c.bf16 %v1850_v54, %v1849_v3  ;;  %v2055_v24 = vpack.c.bf16 %v1854_v30, %v1853_v28  ;;  %v1841_v13 = vsel %vm4336_vm6, %v3864_v10, %v3896_v37 }
 0x18f   : > { %2952 = vmatmul.mubr.msk.bf16.vlgmr.msra.gmra.mrb[0].mxu1 %vm4340_vm11, %v3856_v33  ;;  %v1848_v15 = vsel %vm4341_vm4, %v3896_v37, %v3791_v35  ;;  %vm4342_vm14 = vmmov %vm4340_vm11  ;;  %v1855_v23 = vsel %vm3586_vm9, 0.0, %v1841_v13  ;;  %vm4343_vm11 = vcmp.lt.s32.totalorder %v3241_v4, 1  ;;  %v2168_v48 = vsel %vm4318_vm0, 0.0, %v3832_v21  ;;  %v3180_v4 = vld [vmem:[%s4193_s3 + $0x28] sm:$0xff]  }
 0x190   : > { %2960 = vmatpush3.bf16.msra.mxu1 %v3879_v5  ;;  %2955 = vmatprep.mubr.msk.bf16.mxu1 %vm4342_vm14, %v1533_v8  ;;  %v1856_v33 = vsel %vm3590_vm2, 0.0, %v1848_v15  ;;  %v2166_v10 = vsel %vm4343_vm11, %v3258_v9, %v3820_v6  ;;  %v2171_v5 = vsel %vm4322_vm13, 0.0, %v3946_v47  ;;  %v2172_v59 = vsel %vm4324_vm10, 0.0, %v3940_v34  ;;  %vm4344_vm6 = vmmov %vm4343_vm11 }
 0x191   : > { %2969 = vmatprep.subr.bf16.mxu1 %v3178_v29  ;;  %v2056_v35 = vpack.c.bf16 %v1856_v33, %v1855_v23  ;;  %v2167_v8 = vsel %vm4321_vm12, 0.0, %v2166_v10  ;;  %v2201_v55 = vpack.c.bf16 %v2172_v59, %v2171_v5  ;;  %v2159_v26 = vsel %vm4344_vm6, %v3893_v44, %v3258_v9  ;;  %vm4345_vm0 = vmmov %vm4341_vm4 }
 0x192   : > { %v2199_v11 = vpack.c.bf16 %v2168_v48, %v2167_v8  ;;  %v2173_v6 = vsel %vm4327_vm5, 0.0, %v1817_v16  ;;  %v2174_v25 = vsel %vm4339_vm7, 0.0, %v2159_v26  ;;  %v2191_v50 = vsel %vm4329_vm3, 0.0, %v3843_v53  ;;  %vm4346_vm12 = vmmov %vm4345_vm0 }
 0x193   : > { %v2192_v51 = vsel %vm4331_vm1, 0.0, %v3817_v58  ;;  %v2202_v21 = vpack.c.bf16 %v2174_v25, %v2173_v6  ;;  %v2195_v47 = vsel %vm4283_vm15, 0.0, %v1515_v62  ;;  %v2196_v9 = vsel %vm4284_vm8, 0.0, %v1841_v13  ;;  %vm4347_vm15 = vmmov %vm4342_vm14  ;;  %v3179_v58 = vld [vmem:[%s4193_s3 + $0x20] sm:$0xff]  }
 0x194   : > { %v2395_v34 = vpack.c.bf16 %v2192_v51, %v2191_v50  ;;  %v2397_v20 = vpack.c.bf16 %v2196_v9, %v2195_v47  ;;  %v2183_v31 = vsel %vm4345_vm0, %v3896_v37, %v3353_v42  ;;  %v2190_v27 = vsel %vm4346_vm12, %v3353_v42, %v3823_v19  ;;  %vm4348_vm8 = vmmov %vm4342_vm14  ;;  %v3181_v42 = vld [vmem:[%s4193_s3 + $0x30] sm:$0xff]   ;;  %v4372_v19 = vld [vmem:[#allocation4_spill] sm:$0xff] }
 0x195   : > { %v2197_v39 = vsel %vm3586_vm9, 0.0, %v2183_v31  ;;  %v2198_v36 = vsel %vm3590_vm2, 0.0, %v2190_v27  ;;  %vm4349_vm1 = vmmov %vm4348_vm8  ;;  %v4374_v53 = vmov 0.0  }
 0x196   : > { %v2398_v41 = vpack.c.bf16 %v2198_v36, %v2197_v39  ;;  %vm4350_vm9 = vmmov %vm4349_vm1 }
 0x197   : > { %2956 = vmatmul.mubr.msk.bf16.gmra.mrb[4].mxu1 %vm4347_vm15, %v3963_v52  ;;  %vm4351_vm2 = vmmov %vm4349_vm1 }
 0x198   : > { %2961 = vmatprep.mubr.msk.bf16.mxu1 %vm4348_vm8, %v3975_v46  ;;  %vm4352_vm13 = vmmov %vm4349_vm1 }
 0x199   : > { %vm4353_vm10 = vmmov %vm4349_vm1 }
 0x19a   : > { %vm4354_vm5 = vmmov %vm4349_vm1 }
 0x19b   : > { %vm4355_vm3 = vmmov %vm4349_vm1 }
 0x19c   : > { %vm4356_vm7 = vmmov %vm4349_vm1 }
 0x19d   : > { %vm4358_vm4 = vmmov %vm4349_vm1 }
 0x19e   : > { %vm4359_vm14 = vmmov %vm4349_vm1 }
 0x19f   : > { %2962 = vmatmul.mubr.msk.bf16.vlgmr.msra.gmra.mrb[0].mxu1 %vm4349_vm1, %v3858_v38  ;;  %vm4360_vm11 = vmmov %vm4349_vm1  ;;  %v2300_v38 = vpack.c.bf16 %v4374_v53, %v3888_v49 }
 0x1a0   : > { %2970 = vmatpush3.bf16.msra.mxu1 %v3178_v29  ;;  %2965 = vmatprep.mubr.msk.bf16.mxu1 %vm4350_vm9, %v3985_v14  ;;  %vm4361_vm6 = vmmov %vm4349_vm1 }
 0x1a1   : > { %2979 = vmatprep.subr.bf16.mxu1 %v3179_v58  ;;  %vm4362_vm0 = vmmov %vm4349_vm1 }
 0x1a2   : > { %vm4363_vm12 = vmmov %vm4362_vm0 }
 0x1a3   : > { %vm4364_vm15 = vmmov %vm4362_vm0 }
 0x1a4   : > { %vm4365_vm8 = vmmov %vm4362_vm0 }
 0x1a5   : > { %vm4366_vm1 = vmmov %vm4362_vm0 }
 0x1a6   : > { %vm4367_vm9 = vmmov %vm4362_vm0 }
 0x1a7   : > { %2966 = vmatmul.mubr.msk.bf16.gmra.mrb[4].mxu1 %vm4351_vm2, %v1714_v17  ;;  %vm4368_vm2 = vmmov %vm4362_vm0 }
 0x1a8   : > { %2971 = vmatprep.mubr.msk.bf16.mxu1 %vm4352_vm13, %v1857_v1  ;;  %vm4369_vm13 = vmmov %vm4362_vm0 }
 0x1af   : > { %2972 = vmatmul.mubr.msk.bf16.vlgmr.msra.gmra.mrb[0].mxu1 %vm4353_vm10, %v3933_v0  ;;  %vm4371_vm10 = vmmov %vm4362_vm0 }
 0x1b0   : > { %2980 = vmatpush3.bf16.msra.mxu1 %v3179_v58  ;;  %2975 = vmatprep.mubr.msk.bf16.mxu1 %vm4354_vm5, %v1859_v43  ;;  %vm4373_vm5 = vmmov %vm4362_vm0 }
 0x1b1   : > { %2989 = vmatprep.subr.bf16.mxu1 %v3180_v4 }
 0x1b7   : > { %2976 = vmatmul.mubr.msk.bf16.gmra.mrb[4].mxu1 %vm4355_vm3, %v1860_v61  ;;  %vm4375_vm3 = vmmov %vm4362_vm0 }
 0x1b8   : > { %2981 = vmatprep.mubr.msk.bf16.mxu1 %vm4356_vm7, %v1955_v22  ;;  %vm4376_vm7 = vmmov %vm4362_vm0 }
 0x1bf   : > { %2982 = vmatmul.mubr.msk.bf16.vlgmr.msra.gmra.mrb[0].mxu1 %vm4358_vm4, %v4357_v2  ;;  %vm4377_vm4 = vmmov %vm4362_vm0 }
 0x1c0   : > { %2990 = vmatpush3.bf16.msra.mxu1 %v3180_v4  ;;  %2985 = vmatprep.mubr.msk.bf16.mxu1 %vm4359_vm14, %v1957_v60  ;;  %vm4378_vm14 = vmmov %vm4362_vm0 }
 0x1c1   : > { %2999 = vmatprep.subr.bf16.mxu1 %v3181_v42 }
 0x1c7   : > { %2986 = vmatmul.mubr.msk.bf16.gmra.mrb[4].mxu1 %vm4360_vm11, %v1958_v7  ;;  %vm4379_vm11 = vmmov %vm4362_vm0 }
 0x1c8   : > { %2991 = vmatprep.mubr.msk.bf16.mxu1 %vm4361_vm6, %v2053_v56 }
 0x1cf   : > { %2992 = vmatmul.mubr.msk.bf16.vlgmr.msra.gmra.mrb[0].mxu1 %vm4362_vm0, %v3987_v18 }
 0x1d0   : > { %3000 = vmatpush3.bf16.msra.mxu1 %v3181_v42  ;;  %2995 = vmatprep.mubr.msk.bf16.mxu1 %vm4363_vm12, %v2055_v24 }
 0x1d1   : > { %3009 = vmatprep.subr.bf16.mxu1 %v3182_v12 }
 0x1d7   : > { %2996 = vmatmul.mubr.msk.bf16.gmra.mrb[4].mxu1 %vm4364_vm15, %v2056_v35  ;;  %vm4380_vm15 = vmmov %vm4366_vm1 }
 0x1d8   : > { %3001 = vmatprep.mubr.msk.bf16.mxu1 %vm4365_vm8, %v2199_v11 }
 0x1df   : > { %3002 = vmatmul.mubr.msk.bf16.vlgmr.msra.gmra.mrb[0].mxu1 %vm4366_vm1, %v3942_v63  ;;  %v2754_v63 = vld [vmem:[%s4194_s4] ss:$0 sm:$0xff] }
 0x1e0   : > { %3010 = vmatpush3.bf16.msra.mxu1 %v3182_v12  ;;  %3005 = vmatprep.mubr.msk.bf16.mxu1 %vm4367_vm9, %v2201_v55  ;;  %vm4381_vm9 = vmmov %vm4366_vm1 }
 0x1e1   : > { %3019 = vmatprep.subr.bf16.mxu1 %v3183_v32 }
 0x1e7   : > { %3006 = vmatmul.mubr.msk.bf16.gmra.mrb[4].mxu1 %vm4368_vm2, %v2202_v21  ;;  %vm4382_vm2 = vmmov %vm4366_vm1 }
 0x1e8   : > { %3011 = vmatprep.mubr.msk.bf16.mxu1 %vm4369_vm13, %v3868_v40 }
 0x1ef   : > { %3012 = vmatmul.mubr.msk.bf16.vlgmr.msra.gmra.mrb[0].mxu1 %vm4371_vm10, %v4370_v57 }
 0x1f0   : > { %3020 = vmatpush3.bf16.msra.mxu1 %v3183_v32  ;;  %3015 = vmatprep.mubr.msk.bf16.mxu1 %vm4373_vm5, %v4372_v19 }
 0x1f7   : > { %3016 = vmatmul.mubr.msk.bf16.gmra.mrb[4].mxu1 %vm4375_vm3, %v2300_v38  ;;  %vm4383_vm3 = vmmov %vm4366_vm1 }
 0x1f8   : > { %3021 = vmatprep.mubr.msk.bf16.mxu1 %vm4376_vm7, %v2395_v34 }
 0x1ff   : > { %3022 = vmatmul.mubr.msk.bf16.vlgmr.msra.gmra.mrb[0].mxu1 %vm4377_vm4, %v3993_v45  ;;  %vm4384_vm4 = vmmov %vm4366_vm1 }
 0x200   : > { %3025 = vmatprep.mubr.msk.bf16.mxu1 %vm4378_vm14, %v2397_v20  ;;  %vm4385_vm14 = vmmov %vm4366_vm1 }
 0x207   : > { %3026 = vmatmul.mubr.msk.bf16.gmra.mrb[4].mxu1 %vm4379_vm11, %v2398_v41  ;;  %vm4386_vm11 = vmmov %vm4366_vm1 }
 0x2d2   : > { %v3023_v40 = vpop.f32.mrb[0].mxu1 }
 0x2d3   : > { %v2502_v44 = vadd.f32 %v3023_v40, %v2754_v63  ;;  %v2454_v37 = vpop.f32.mrb[1].mxu1 }
 0x2d4   : > { %v2500_v62 = vadd.f32 %v2754_v63, %v2454_v37  ;;  %v3024_v49 = vpop.f32.mrb[2].mxu1 }
 0x2d5   : > { %vm2510_vm6 = vcmp.ge.f32.partialorder %v2502_v44, 0.0  ;;  %v2518_v0 = vmul.f32 0.2, %v2502_v44  ;;  %v2503_v52 = vadd.f32 %v3024_v49, %v2754_v63  ;;  %v2457_v46 = vpop.f32.mrb[3].mxu1 }
 0x2d6   : > { %vm2508_vm0 = vcmp.ge.f32.partialorder %v2500_v62, 0.0  ;;  %v2516_v14 = vmul.f32 0.2, %v2500_v62  ;;  %v2501_v45 = vadd.f32 %v2754_v63, %v2457_v46 }
 0x2d7   : > { %v2526_v18 = vsel %vm2510_vm6, %v2502_v44, %v2518_v0  ;;  %vm2511_vm12 = vcmp.ge.f32.partialorder %v2503_v52, 0.0  ;;  %v2519_v17 = vmul.f32 0.2, %v2503_v52  ;;  %vm2564_vm6 = vcmask 125952  }
 0x2d8   : > { %2534 = vst.msk [vmem:[#allocation2 + $0x10] sm:$0xff] %vm4380_vm15, %v2526_v18  ;;  %v2524_v1 = vsel %vm2508_vm0, %v2500_v62, %v2516_v14  ;;  %vm2509_vm8 = vcmp.ge.f32.partialorder %v2501_v45, 0.0  ;;  %v2517_v43 = vmul.f32 0.2, %v2501_v45 }
 0x2d9   : > { %2532 = vst.msk [vmem:[#allocation2] sm:$0xff] %vm4366_vm1, %v2524_v1  ;;  %v2527_v16 = vsel %vm2511_vm12, %v2503_v52, %v2519_v17 }
 0x2da   : > { %2535 = vst.msk [vmem:[#allocation2 + $0x18] sm:$0xff] %vm4381_vm9, %v2527_v16  ;;  %v2525_v22 = vsel %vm2509_vm8, %v2501_v45, %v2517_v43  ;;  %v3027_v29 = vpop.f32.mrb[4].mxu1 }
 0x2db   : > { %2533 = vst.msk [vmem:[#allocation2 + $0x8] sm:$0xff] %vm4382_vm2, %v2525_v22  ;;  %v2506_v60 = vadd.f32 %v3027_v29, %v2754_v63  ;;  %v2470_v7 = vpop.f32.mrb[5].mxu1 }
 0x2dc   : > { %v2504_v3 = vadd.f32 %v2754_v63, %v2470_v7  ;;  %v3028_v61 = vpop.f32.mrb[6].mxu1 }
 0x2dd   : > { %vm2514_vm13 = vcmp.ge.f32.partialorder %v2506_v60, 0.0  ;;  %v2522_v54 = vmul.f32 0.2, %v2506_v60  ;;  %v2507_v28 = vadd.f32 %v3028_v61, %v2754_v63  ;;  %v2473_v30 = vpop.f32.mrb[7].mxu1 }
 0x2de   : > { %vm2512_vm10 = vcmp.ge.f32.partialorder %v2504_v3, 0.0  ;;  %v2520_v56 = vmul.f32 0.2, %v2504_v3  ;;  %v2505_v24 = vadd.f32 %v2754_v63, %v2473_v30 }
 0x2df   : > { %v2530_v13 = vsel %vm2514_vm13, %v2506_v60, %v2522_v54  ;;  %vm2515_vm5 = vcmp.ge.f32.partialorder %v2507_v28, 0.0  ;;  %v2523_v15 = vmul.f32 0.2, %v2507_v28 }
 0x2e0   : > { %2538 = vst.msk [vmem:[#allocation2 + $0x30] sm:$0xff] %vm4383_vm3, %v2530_v13  ;;  %v2528_v23 = vsel %vm2512_vm10, %v2504_v3, %v2520_v56  ;;  %vm2513_vm7 = vcmp.ge.f32.partialorder %v2505_v24, 0.0  ;;  %v2521_v33 = vmul.f32 0.2, %v2505_v24 }
 0x2e1   : > { %v2542_v10 = vld [vmem:[#allocation2 + $0x10] ss:$2 sm:$0xff]  ;;  %v2550_v48 = vld [vmem:[#allocation2 + $0x11] ss:$2 sm:$0xff]  ;;  %2536 = vst.msk [vmem:[#allocation2 + $0x20] sm:$0xff] %vm4384_vm4, %v2528_v23  ;;  %v2531_v35 = vsel %vm2515_vm5, %v2507_v28, %v2523_v15 }
 0x2e2   : > { %v2556_v8 = vadd.f32 %v2550_v48, %v2542_v10  ;;  %v2540_v5 = vld [vmem:[#allocation2] ss:$2 sm:$0xff]  ;;  %v2548_v59 = vld [vmem:[#allocation2 + $0x1] ss:$2 sm:$0xff]  ;;  %2539 = vst.msk [vmem:[#allocation2 + $0x38] sm:$0xff] %vm4385_vm14, %v2531_v35  ;;  %v2529_v11 = vsel %vm2513_vm7, %v2505_v24, %v2521_v33 }
 0x2e3   : > { %v2555_v55 = vadd.f32 %v2548_v59, %v2540_v5  ;;  %2537 = vst.msk [vmem:[#allocation2 + $0x28] sm:$0xff] %vm4386_vm11, %v2529_v11 }
 0x2e4   : > { %v2567_v26 = vrot.slane %v2556_v8, 4 }
 0x2e5   : > { %v2560_v6 = vrot.slane %v2555_v55, 4 }
 0x2e6   : > { %v2569_v25 = vadd.f32 %v2567_v26, %v2556_v8 }
 0x2e7   : > { %v2562_v50 = vadd.f32 %v2560_v6, %v2555_v55 }
 0x2e8   : > { %v2570_v51 = vmul.f32 0.25, %v2569_v25 }
 0x2e9   : > { %v2563_v21 = vmul.f32 0.25, %v2562_v50  ;;  %v2546_v34 = vld [vmem:[#allocation2 + $0x30] ss:$2 sm:$0xff]  ;;  %v2554_v47 = vld [vmem:[#allocation2 + $0x31] ss:$2 sm:$0xff] }
 0x2ea   : > { %2571 = vst.msk [vmem:[%s224_s21 + $0x4] sm:$0xf] %vm2564_vm6, %v2570_v51  ;;  %v2558_v9 = vadd.f32 %v2554_v47, %v2546_v34  ;;  %v2544_v20 = vld [vmem:[#allocation2 + $0x20] ss:$2 sm:$0xff]  ;;  %v2552_v31 = vld [vmem:[#allocation2 + $0x21] ss:$2 sm:$0xff] }
 0x2eb   : > { %2565 = vst.msk [vmem:[%s224_s21] sm:$0xf] %vm2564_vm6, %v2563_v21  ;;  %v2557_v27 = vadd.f32 %v2552_v31, %v2544_v20 }
 0x2ec   : > { %v2579_v39 = vrot.slane %v2558_v9, 4 }
 0x2ed   : > { %v2573_v36 = vrot.slane %v2557_v27, 4 }
 0x2ee   : > { %v2581_v41 = vadd.f32 %v2579_v39, %v2558_v9 }
 0x2ef   : > { %v2575_v58 = vadd.f32 %v2573_v36, %v2557_v27 }
 0x2f0   : > { %v2582_v4 = vmul.f32 0.25, %v2581_v41 }
 0x2f1   : > { %v2576_v42 = vmul.f32 0.25, %v2575_v58 }
 0x2f2   : > { %2583 = vst.msk [vmem:[%s224_s21 + $0xc] sm:$0xf] %vm2564_vm6, %v2582_v4 }
 0x2f3   : > { %2577 = vst.msk [vmem:[%s224_s21 + $0x8] sm:$0xf] %vm2564_vm6, %v2576_v42 }
 0x2f4 PF: > { %s15_s18 = sadd.s32 1, %s3190_s18  }
 0x2f5   : > { %p12_p4 = scmp.ge.s32.totalorder %s15_s18, 4  }
 0x2f7   :  { %14 = sbr.rel (!%p12_p4) target bundleno = 1 (0x1), region = 93 }

// kernel: discriminator_forward.4
= control target key start
LH: loop header
LB: loop body
LE: loop exit
PB: predicated region body
PF: predicated region fallthrough
CT: control target
= control target key end

     0   :  { %s9204_s18 = smov 0   ;;  %s12212_s0 = inlined_call_operand.vmem [shape: f32[2,256,4], index: 0, kind: input, shape index: {}]   ;;  %s12213_s1 = inlined_call_operand.vmem [shape: bf16[9,4,8], index: 1, kind: input, shape index: {}]   ;;  %s12214_s2 = inlined_call_operand.vmem [shape: f32[1,8], index: 2, kind: input, shape index: {}]   ;;  %s12215_s3 = inlined_call_operand.vmem [shape: bf16[9,8,8], index: 3, kind: input, shape index: {}]   ;;  %s12216_s4 = inlined_call_operand.vmem [shape: f32[1,8], index: 4, kind: input, shape index: {}]   ;;  %s12217_s5 = inlined_call_operand.vmem [shape: f32[2,64,8], index: 5, kind: output, shape index: {}]  }
   0x1 LB: > { %s7391_s19 = sadd.s32 4294967295, %s9170_s18   ;;  %p7395_p0 = scmp.ge.s32.totalorder %s9170_s18, 1  ;;  %s9170_s18 = sphi %s9204_s18, %s15_s18  }
   0x2   : > { %p187_p1 = scmp.lt.s32.totalorder %s9170_s18, 3 }
   0x4   : > { %p188_p2 = pnand %p7395_p0, %p187_p1 }
   0x6   : > { %191 = sbr.rel (%p188_p2) target bundleno = 1591 (0x637), region = 40 }
   0xd   : > { %v7400_v0 = vld [vmem:[%s12213_s1 + $0x2] sm:$0x3]  ;;  %vm12288_vm0 = vcmask 1041408   ;;  %v1333_v1 = vld [vmem:[%s12213_s1] sm:$0x3]  ;;  %v12218_v3 = vmov 0.0|0.0   ;;  %v226_v17 = vlaneseq }
   0xe   : > { %9136 = vmatprep.subr.msk.bf16.mxu0 %vm12288_vm0, %v7400_v0  ;;  %v1403_v2 = vsel %vm12288_vm0, %v7400_v0, 0  ;;  %8014 = vmatprep.mubr.bf16.mxu0 %v12218_v3  ;;  %p215_p3 = scmp.lt.s32.totalorder %s7391_s19, 1  ;;  %vm12294_vm1 = vcmask 31744   ;;  %v1615_v9 = vsel %vm12288_vm0, %v1333_v1, 0  ;;  %v9251_v10 = vld [vmem:[%s12213_s1 + $0x4] sm:$0x3] }
   0xf   : > { %8013 = vmatpush3.bf16.msra.mxu0 %v1403_v2  ;;  %8320 = vmatprep.mubr.bf16.mxu1 %v12218_v3  ;;  %v9285_v19 = vshrl.u32 %v226_v17, 7  ;;  %v12580_v36 = vmov 0  ;;  %v12221_v56 = vmov 0.0   ;;  %v12594_v3 = vmov 0 }
  0x10   : > { %9137 = vmatprep.subr.msk.bf16.mxu0 %vm12288_vm0, %v1333_v1  ;;  %s13682_s19 = smov (!%p215_p3, %s7391_s19), 1  ;;  %v9413_v57 = vrot.slane %v12221_v56, 7 }
  0x11   : > { %s7704_s24 = sshll.u32 %s13682_s19, 8  ;;  %v229_v25 = vadd.s32 16, %v9285_v19  ;;  %vm12315_vm2 = vcmp.lt.s32.totalorder %v9285_v19, 1  ;;  %vm12291_vm4 = vcmp.lt.s32.totalorder %v9285_v19, 7  ;;  %v263_v1 = vand.u32 15, %v9285_v19  ;;  %s7705_s16 = sshll.u32 %s13682_s19, 6 }
  0x12   : > { %s9229_s27 = scalar_lea.vmem %s12212_s0, %s7704_s24  ;;  %12589 = vst [vmem:[#allocation17_spill] sm:$0xff] %v9413_v57  ;;  %s12146_s21 = scalar_lea.vmem %s12217_s5, %s7705_s16 }
  0x13   : > { %v9232_v4 = vld [vmem:[%s9229_s27] sm:$0xff]  ;;  %v9235_v5 = vld [vmem:[%s9229_s27 + $0x8] sm:$0xff]  ;;  %v9238_v6 = vld [vmem:[%s9229_s27 + $0x10] sm:$0xff]  ;;  %v277_v27 = vand.u32 15, %v229_v25  ;;  %vm9457_vm5 = vcmp.eq.s32.totalorder %v263_v1, 0 }
  0x14   : > { %v9241_v7 = vld [vmem:[%s9229_s27 + $0x18] sm:$0xff]  ;;  %v9245_v8 = vpack.c.bf16 %v9235_v5, %v9232_v4  ;;  %v9260_v12 = vld [vmem:[%s9229_s27 + $0x20] sm:$0xff]  ;;  %v9263_v13 = vld [vmem:[%s9229_s27 + $0x28] sm:$0xff]  ;;  %v12595_v3 = vsel %vm9457_vm5, 4294967295, %v12594_v3 }
  0x15   : > { %v9257_v11 = vpack.c.bf16 %v9241_v7, %v9238_v6  ;;  %v9268_v14 = vld [vmem:[%s9229_s27 + $0x30] sm:$0xff]  ;;  %v9271_v15 = vld [vmem:[%s9229_s27 + $0x38] sm:$0xff]  ;;  %v9277_v16 = vpack.c.bf16 %v9263_v13, %v9260_v12  ;;  %v9290_v20 = vld [vmem:[%s9229_s27 + $0x40] sm:$0xff]  ;;  %v12223_v28 = vrot.slane %v9241_v7, 7  ;;  %v1001_v29 = vrot.slane %v9260_v12, 7  ;;  %12596 = vst [vmem:[#allocation22_spill] sm:$0xff] %v12595_v3 }
  0x16   : > { %12573 = vst [vmem:[#allocation3_spill] sm:$0xff] %v9245_v8  ;;  %8015 = vmatmul.mubr.msk.bf16.vlgmr.msra.gmra.mrb[0].mxu0 %vm12294_vm1, %v9245_v8  ;;  %v9281_v18 = vpack.c.bf16 %v9271_v15, %v9268_v14  ;;  %v9293_v21 = vld [vmem:[%s9229_s27 + $0x48] sm:$0xff]  ;;  %v9296_v22 = vld [vmem:[%s9229_s27 + $0x50] sm:$0xff]  ;;  %v9299_v23 = vld [vmem:[%s9229_s27 + $0x58] sm:$0xff]  ;;  %v12222_v32 = vrot.slane %v9263_v13, 7  ;;  %vm9334_vm3 = vcmp.eq.s32.totalorder %v277_v27, 0 }
  0x17   : > { %12574 = vst [vmem:[#allocation4_spill] sm:$0xff] %v9257_v11  ;;  %8047 = vmatpush3.bf16.msra.mxu0 %v1615_v9  ;;  %8018 = vmatprep.mubr.msk.bf16.mxu0 %vm12294_vm1, %v9257_v11  ;;  %12575 = vst [vmem:[#allocation5_spill] sm:$0xff] %v9277_v16  ;;  %v9303_v24 = vpack.c.bf16 %v9293_v21, %v9290_v20  ;;  %v9308_v26 = vpack.c.bf16 %v9299_v23, %v9296_v22  ;;  %v9317_v30 = vld [vmem:[%s9229_s27 + $0x60] sm:$0xff]  ;;  %v9320_v31 = vld [vmem:[%s9229_s27 + $0x68] sm:$0xff]  ;;  %v12581_v36 = vsel %vm9334_vm3, 4294967295, %v12580_v36 }
  0x18   : > { %9138 = vmatprep.subr.msk.bf16.mxu0 %vm12288_vm0, %v9251_v10  ;;  %12576 = vst [vmem:[#allocation6_spill] sm:$0xff] %v9281_v18  ;;  %v9324_v33 = vld [vmem:[%s9229_s27 + $0x70] sm:$0xff]  ;;  %v9327_v34 = vld [vmem:[%s9229_s27 + $0x78] sm:$0xff]  ;;  %v9332_v35 = vpack.c.bf16 %v9320_v31, %v9317_v30  ;;  %12582 = vst [vmem:[#allocation10_spill] sm:$0xff] %v12581_v36  ;;  %v9346_v38 = vsel %vm12315_vm2, %v12223_v28, %v1001_v29  ;;  %v9352_v39 = vsel %vm12315_vm2, %v1001_v29, %v12222_v32 }
  0x19   : > { %12577 = vst [vmem:[#allocation7_spill] sm:$0xff] %v9303_v24  ;;  %12578 = vst [vmem:[#allocation8_spill] sm:$0xff] %v9308_v26  ;;  %v9340_v37 = vpack.c.bf16 %v9327_v34, %v9324_v33  ;;  %v3084_v40 = vsel %vm9334_vm3, 0.0, %v9346_v38  ;;  %v9365_v42 = vld [vmem:[%s9229_s27 + $0x80] sm:$0xff]  ;;  %v9368_v43 = vld [vmem:[%s9229_s27 + $0x88] sm:$0xff]  ;;  %v12220_v54 = vrot.slane %v9241_v7, 1 }
  0x1a   : > { %12579 = vst [vmem:[#allocation9_spill] sm:$0xff] %v9332_v35  ;;  %v9358_v41 = vpack.c.bf16 %v9352_v39, %v3084_v40  ;;  %v9371_v44 = vld [vmem:[%s9229_s27 + $0x90] sm:$0xff]  ;;  %v9374_v45 = vld [vmem:[%s9229_s27 + $0x98] sm:$0xff]  ;;  %v9378_v46 = vpack.c.bf16 %v9368_v43, %v9365_v42  ;;  %v9389_v48 = vld [vmem:[%s9229_s27 + $0xa0] sm:$0xff]  ;;  %v1162_v55 = vrot.slane %v9260_v12, 1  ;;  %v1163_v60 = vrot.slane %v9263_v13, 1 }
  0x1b   : > { %12583 = vst [vmem:[#allocation11_spill] sm:$0xff] %v9340_v37  ;;  %v9382_v47 = vpack.c.bf16 %v9374_v45, %v9371_v44  ;;  %v9392_v49 = vld [vmem:[%s9229_s27 + $0xa8] sm:$0xff]  ;;  %v9395_v50 = vld [vmem:[%s9229_s27 + $0xb0] sm:$0xff]  ;;  %v9398_v51 = vld [vmem:[%s9229_s27 + $0xb8] sm:$0xff]  ;;  %v1164_v61 = vrot.slane %v9268_v14, 1  ;;  %v1165_v2 = vrot.slane %v9271_v15, 1 }
  0x1c   : > { %12584 = vst [vmem:[#allocation12_spill] sm:$0xff] %v9358_v41  ;;  %12585 = vst [vmem:[#allocation13_spill] sm:$0xff] %v9378_v46  ;;  %v9402_v52 = vpack.c.bf16 %v9392_v49, %v9389_v48  ;;  %v9406_v53 = vpack.c.bf16 %v9398_v51, %v9395_v50  ;;  %v9419_v58 = vld [vmem:[%s9229_s27 + $0xc0] sm:$0xff]  ;;  %v9422_v59 = vld [vmem:[%s9229_s27 + $0xc8] sm:$0xff]  ;;  %v1166_v9 = vrot.slane %v9290_v20, 1  ;;  %v9445_v17 = vsel %vm12291_vm4, %v12220_v54, %v1162_v55 }
  0x1d   : > { %12586 = vst [vmem:[#allocation14_spill] sm:$0xff] %v9382_v47  ;;  %v9427_v62 = vld [vmem:[%s9229_s27 + $0xd0] sm:$0xff]  ;;  %v9430_v63 = vld [vmem:[%s9229_s27 + $0xd8] sm:$0xff]  ;;  %v9433_v0 = vld [vmem:[%s9229_s27 + $0xe8] sm:$0xff]  ;;  %v9449_v25 = vpack.c.bf16 %v9422_v59, %v9419_v58  ;;  %v1167_v27 = vrot.slane %v9293_v21, 1  ;;  %v1168_v29 = vrot.slane %v9296_v22, 1  ;;  %v9464_v56 = vsel %vm12291_vm4, %v1163_v60, %v1164_v61 }
  0x1e   : > { %8019 = vmatmul.mubr.msk.bf16.gmra.mrb[4].mxu0 %vm12294_vm1, %v9277_v16  ;;  %12587 = vst [vmem:[#allocation15_spill] sm:$0xff] %v9402_v52  ;;  %12588 = vst [vmem:[#allocation16_spill] sm:$0xff] %v9406_v53  ;;  %v9439_v12 = vrot.slane %v9433_v0, 7  ;;  %v9455_v40 = vpack.c.bf16 %v9430_v63, %v9427_v62  ;;  %v231_v54 = vadd.s32 32, %v9285_v19  ;;  %v9468_v32 = vsel %vm12291_vm4, %v1162_v55, %v1163_v60 }
  0x1f   : > { %8022 = vmatprep.mubr.msk.bf16.mxu0 %vm12294_vm1, %v9281_v18  ;;  %12590 = vst [vmem:[#allocation18_spill] sm:$0xff] %v9433_v0  ;;  %12591 = vst [vmem:[#allocation19_spill] sm:$0xff] %v9445_v17  ;;  %v1169_v28 = vrot.slane %v9299_v23, 1  ;;  %v1170_v41 = vrot.slane %v9317_v30, 1  ;;  %v9485_v55 = vsel %vm12291_vm4, %v1164_v61, %v1165_v2  ;;  %v9488_v60 = vrot.slane %v9232_v4, 7 }
  0x20   : > { %12592 = vst [vmem:[#allocation20_spill] sm:$0xff] %v9449_v25  ;;  %12593 = vst [vmem:[#allocation21_spill] sm:$0xff] %v9455_v40  ;;  %v1059_v1 = vsel %vm12315_vm2, %v9439_v12, %v9413_v57  ;;  %v1174_v61 = vrot.slane %v9365_v42, 1  ;;  %v291_v18 = vand.u32 15, %v231_v54  ;;  %v1175_v11 = vrot.slane %v9368_v43, 1 }
  0x21   : > { %12597 = vst [vmem:[#allocation23_spill] sm:$0xff] %v9464_v56  ;;  %12598 = vst [vmem:[#allocation24_spill] sm:$0xff] %v9468_v32  ;;  %v9515_v16 = vsel %vm12291_vm4, %v1169_v28, %v1170_v41  ;;  %v1176_v8 = vrot.slane %v9371_v44, 1  ;;  %v235_v54 = vadd.s32 64, %v9285_v19 }
  0x22   : > { %12600 = vst [vmem:[#allocation26_spill] sm:$0xff] %v9485_v55  ;;  %12601 = vst [vmem:[#allocation27_spill] sm:$0xff] %v9488_v60  ;;  %vm9547_vm6 = vcmp.eq.s32.totalorder %v291_v18, 0  ;;  %v1179_v18 = vrot.slane %v9392_v49, 1 }
  0x23   : > { %12605 = vst [vmem:[#allocation31_spill] sm:$0xff] %v9515_v16 }
  0x26   : > { %8023 = vmatmul.mubr.msk.bf16.gmra.mrb[8].mxu0 %vm12294_vm1, %v9303_v24  ;;  %v998_v24 = vrot.slane %v9235_v5, 7 }
  0x27   : > { %8026 = vmatprep.mubr.msk.bf16.mxu0 %vm12294_vm1, %v9308_v26  ;;  %v9507_v26 = vsel %vm12291_vm4, %v1166_v9, %v1167_v27 }
  0x28   : > { %12603 = vst [vmem:[#allocation29_spill] sm:$0xff] %v9507_v26 }
  0x2e   : > { %8027 = vmatmul.mubr.msk.bf16.gmra.mrb[12].mxu0 %vm12294_vm1, %v9332_v35  ;;  %v1173_v35 = vrot.slane %v9327_v34, 1 }
  0x2f   : > { %8030 = vmatprep.mubr.msk.bf16.mxu0 %vm12294_vm1, %v9340_v37  ;;  %v9495_v37 = vld [vmem:[%s9229_s27 + $0xe0] sm:$0xff] }
  0x36   : > { %8031 = vmatmul.mubr.msk.bf16.gmra.mrb[16].mxu0 %vm12294_vm1, %v9378_v46  ;;  %v1172_v46 = vrot.slane %v9324_v33, 1 }
  0x37   : > { %8034 = vmatprep.mubr.msk.bf16.mxu0 %vm12294_vm1, %v9382_v47  ;;  %v1171_v47 = vrot.slane %v9320_v31, 1 }
  0x39   : > { %v9531_v3 = vsel %vm12291_vm4, %v1171_v47, %v1172_v46  ;;  %v9535_v26 = vsel %vm12291_vm4, %v1170_v41, %v1171_v47 }
  0x3a   : > { %12608 = vst [vmem:[#allocation34_spill] sm:$0xff] %v9531_v3  ;;  %12609 = vst [vmem:[#allocation35_spill] sm:$0xff] %v9535_v26  ;;  %v9563_v26 = vsel %vm12315_vm2, %v9488_v60, %v998_v24  ;;  %v9571_v3 = vsel %vm12291_vm4, %v1175_v11, %v1176_v8 }
  0x3b   : > { %12616 = vst [vmem:[#allocation40_spill] sm:$0xff] %v9563_v26  ;;  %12617 = vst [vmem:[#allocation41_spill] sm:$0xff] %v9571_v3 }
  0x3e   : > { %8035 = vmatmul.mubr.msk.bf16.gmra.mrb[20].mxu0 %vm12294_vm1, %v9402_v52  ;;  %v233_v52 = vadd.s32 48, %v9285_v19 }
  0x3f   : > { %8038 = vmatprep.mubr.msk.bf16.mxu0 %vm12294_vm1, %v9406_v53  ;;  %v9478_v53 = vsel %vm12291_vm4, %v1165_v2, %v1166_v9  ;;  %v1124_v2 = vsel %vm9457_vm5, 0.0, %v1059_v1  ;;  %v9521_v1 = vpack.c.bf16 %v9433_v0, %v9495_v37  ;;  %v9525_v9 = vsel %vm12291_vm4, %v1168_v29, %v1169_v28 }
  0x40   : > { %12599 = vst [vmem:[#allocation25_spill] sm:$0xff] %v9478_v53  ;;  %12607 = vst [vmem:[#allocation33_spill] sm:$0xff] %v9525_v9  ;;  %v1057_v0 = vsel %vm12315_vm2, %v9413_v57, %v9488_v60  ;;  %v1177_v28 = vrot.slane %v9374_v45, 1  ;;  %v12611_v9 = vmov 0  ;;  %v305_v47 = vand.u32 15, %v233_v52 }
  0x41   : > { %12606 = vst [vmem:[#allocation32_spill] sm:$0xff] %v9521_v1  ;;  %v12612_v9 = vsel %vm9547_vm6, 4294967295, %v12611_v9  ;;  %v1182_v52 = vrot.slane %v9419_v58, 1  ;;  %v1003_v60 = vrot.slane %v9268_v14, 7  ;;  %v319_v14 = vand.u32 15, %v235_v54 }
  0x42   : > { %12613 = vst [vmem:[#allocation37_spill] sm:$0xff] %v12612_v9  ;;  %v9601_v36 = vsel %vm12291_vm4, %v1176_v8, %v1177_v28  ;;  %vm9622_vm7 = vcmp.eq.s32.totalorder %v305_v47, 0  ;;  %v9645_v47 = vld [vmem:[%s12213_s1 + $0x6] sm:$0x3] }
  0x43   : > { %12622 = vst [vmem:[#allocation45_spill] sm:$0xff] %v9601_v36  ;;  %vm9631_vm8 = vcmp.eq.s32.totalorder %v319_v14, 0  ;;  %v1130_v14 = vsel %vm9622_vm7, 0.0, %v9346_v38 }
  0x46   : > { %8039 = vmatmul.mubr.msk.bf16.gmra.mrb[24].mxu0 %vm12294_vm1, %v9449_v25  ;;  %v9499_v25 = vsel %vm12291_vm4, %v1167_v27, %v1168_v29  ;;  %v1317_v27 = vpack.c.bf16 %v9413_v57, %v1124_v2  ;;  %v1178_v29 = vrot.slane %v9389_v48, 1  ;;  %v9545_v2 = vsel %vm12291_vm4, %v1173_v35, %v1174_v61 }
  0x47   : > { %8042 = vmatprep.mubr.msk.bf16.mxu0 %vm12294_vm1, %v9455_v40  ;;  %12602 = vst [vmem:[#allocation28_spill] sm:$0xff] %v9499_v25  ;;  %v9511_v40 = vrot.slane %v9238_v6, 7  ;;  %12610 = vst [vmem:[#allocation36_spill] sm:$0xff] %v9545_v2  ;;  %v9558_v57 = vsel %vm12291_vm4, %v1172_v46, %v1173_v35  ;;  %v1180_v2 = vrot.slane %v9395_v50, 1  ;;  %v1126_v35 = vsel %vm9334_vm3, 0.0, %v1057_v0 }
  0x48   : > { %12615 = vst [vmem:[#allocation39_spill] sm:$0xff] %v9558_v57  ;;  %v1181_v46 = vrot.slane %v9398_v51, 1 }
  0x49   : > { %12604 = vst [vmem:[#allocation30_spill] sm:$0xff] %v9511_v40  ;;  %v9554_v41 = vsel %vm12315_vm2, %v998_v24, %v9511_v40  ;;  %v9580_v24 = vsel %vm12291_vm4, %v1174_v61, %v1175_v11  ;;  %v1183_v11 = vrot.slane %v9422_v59, 1  ;;  %v1184_v61 = vrot.slane %v9427_v62, 1 }
  0x4a   : > { %12614 = vst [vmem:[#allocation38_spill] sm:$0xff] %v9554_v41  ;;  %12618 = vst [vmem:[#allocation42_spill] sm:$0xff] %v9580_v24  ;;  %v1128_v0 = vsel %vm9547_vm6, 0.0, %v9554_v41  ;;  %v9608_v41 = vsel %vm12291_vm4, %v1179_v18, %v1180_v2  ;;  %v9612_v24 = vsel %vm12291_vm4, %v1178_v29, %v1179_v18  ;;  %v12628_v18 = vmov 0 }
  0x4b   : > { %12623 = vst [vmem:[#allocation46_spill] sm:$0xff] %v9608_v41  ;;  %v12629_v18 = vsel %vm9631_vm8, 4294967295, %v12628_v18 }
  0x4c   : > { %12630 = vst [vmem:[#allocation49_spill] sm:$0xff] %v12629_v18 }
  0x4e   : > { %8043 = vmatmul.mubr.msk.bf16.gmra.mrb[28].mxu0 %vm12294_vm1, %v9521_v1  ;;  %v12619_v1 = vrot.slane %v9241_v7, 7 }
  0x4f   : > { %8048 = vmatprep.mubr.msk.bf16.mxu0 %vm12294_vm1, %v1317_v27  ;;  %v9595_v27 = vsel %vm12291_vm4, %v1177_v28, %v1178_v29  ;;  %v9619_v28 = vsel %vm12291_vm4, %v1181_v46, %v1182_v52  ;;  %v9629_v29 = vsel %vm12291_vm4, %v1180_v2, %v1181_v46  ;;  %v9649_v2 = vsel %vm12291_vm4, %v1183_v11, %v1184_v61 }
  0x50   : > { %v9588_v3 = vsel %vm12315_vm2, %v9511_v40, %v12619_v1  ;;  %12621 = vst [vmem:[#allocation44_spill] sm:$0xff] %v9595_v27  ;;  %v1318_v1 = vpack.c.bf16 %v9563_v26, %v1126_v35  ;;  %v1845_v40 = vsel %vm12288_vm0, %v9251_v10, 0  ;;  %v1185_v27 = vrot.slane %v9430_v63, 1  ;;  %12627 = vst [vmem:[#allocation48_spill] sm:$0xff] %v9629_v29 }
  0x51   : > { %12620 = vst [vmem:[#allocation43_spill] sm:$0xff] %v9588_v3  ;;  %v1319_v8 = vpack.c.bf16 %v9588_v3, %v1128_v0  ;;  %v1004_v10 = vrot.slane %v9271_v15, 7  ;;  %v12624_v35 = vmov 0  ;;  %v237_v26 = vadd.s32 80, %v9285_v19  ;;  %12633 = vst [vmem:[#allocation51_spill] sm:$0xff] %v9649_v2 }
  0x52   : > { %v12625_v35 = vsel %vm9622_vm7, 4294967295, %v12624_v35  ;;  %v12631_v0 = vrot.slane %v9263_v13, 7  ;;  %v239_v15 = vadd.s32 96, %v9285_v19  ;;  %v9654_v13 = vsel %vm12291_vm4, %v1182_v52, %v1183_v11 }
  0x53   : > { %12626 = vst [vmem:[#allocation47_spill] sm:$0xff] %v12625_v35  ;;  %12634 = vst [vmem:[#allocation52_spill] sm:$0xff] %v9654_v13  ;;  %v1005_v46 = vrot.slane %v9290_v20, 7  ;;  %v9678_v52 = vsel %vm12291_vm4, %v1184_v61, %v1185_v27  ;;  %v1007_v11 = vrot.slane %v9296_v22, 7  ;;  %v1008_v35 = vrot.slane %v9299_v23, 7 }
  0x54   : > { %v9639_v54 = vsel %vm12315_vm2, %v12631_v0, %v1003_v60  ;;  %v12635_v0 = vrot.slane %v9495_v37, 1  ;;  %12637 = vst [vmem:[#allocation54_spill] sm:$0xff] %v9678_v52  ;;  %v12641_v23 = vmov 0  ;;  %v243_v61 = vadd.s32 128, %v9285_v19 }
  0x55   : > { %12632 = vst [vmem:[#allocation50_spill] sm:$0xff] %v9639_v54  ;;  %v1132_v20 = vsel %vm9631_vm8, 0.0, %v9639_v54  ;;  %v12638_v54 = vmov 0  ;;  %v9694_v22 = vsel %vm12315_vm2, %v1004_v10, %v1005_v46 }
  0x56   : > { %8049 = vmatmul.mubr.msk.bf16.vlgmr.msra.gmra.mrb[0].mxu0 %vm12294_vm1, %v1318_v1  ;;  %v9665_v3 = vsel %vm12291_vm4, %v1185_v27, %v12635_v0  ;;  %v9669_v1 = vsel %vm12315_vm2, %v1003_v60, %v1004_v10  ;;  %v1320_v0 = vpack.c.bf16 %v9352_v39, %v1130_v14  ;;  %v1006_v60 = vrot.slane %v9293_v21, 7 }
  0x57   : > { %8081 = vmatpush3.bf16.msra.mxu0 %v1845_v40  ;;  %8052 = vmatprep.mubr.msk.bf16.mxu0 %vm12294_vm1, %v1319_v8  ;;  %12636 = vst [vmem:[#allocation53_spill] sm:$0xff] %v9665_v3  ;;  %v333_v40 = vand.u32 15, %v237_v26  ;;  %v347_v8 = vand.u32 15, %v239_v15  ;;  %v1321_v18 = vpack.c.bf16 %v9669_v1, %v1132_v20  ;;  %v2108_v26 = vsel %vm9547_vm6, 0.0, %v9346_v38 }
  0x58   : > { %9139 = vmatprep.subr.msk.bf16.mxu0 %vm12288_vm0, %v9645_v47  ;;  %v241_v27 = vadd.s32 112, %v9285_v19  ;;  %v9698_v21 = vpack.c.bf16 %v9352_v39, %v2108_v26  ;;  %v9706_v38 = vsel %vm12315_vm2, %v1006_v60, %v1007_v11  ;;  %v9713_v10 = vsel %vm12315_vm2, %v1005_v46, %v1006_v60 }
  0x59   : > { %vm9688_vm9 = vcmp.eq.s32.totalorder %v333_v40, 0  ;;  %vm9700_vm10 = vcmp.eq.s32.totalorder %v347_v8, 0  ;;  %v1009_v15 = vrot.slane %v9317_v30, 7  ;;  %v9721_v14 = vsel %vm12315_vm2, %v1007_v11, %v1008_v35 }
  0x5a   : > { %v12639_v54 = vsel %vm9688_vm9, 4294967295, %v12638_v54  ;;  %v12642_v23 = vsel %vm9700_vm10, 4294967295, %v12641_v23  ;;  %v1134_v39 = vsel %vm9688_vm9, 0.0, %v9694_v22  ;;  %v1136_v20 = vsel %vm9700_vm10, 0.0, %v9706_v38 }
  0x5b   : > { %12640 = vst [vmem:[#allocation55_spill] sm:$0xff] %v12639_v54  ;;  %12643 = vst [vmem:[#allocation56_spill] sm:$0xff] %v12642_v23  ;;  %v361_v40 = vand.u32 15, %v241_v27  ;;  %v375_v8 = vand.u32 15, %v243_v61  ;;  %v1322_v46 = vpack.c.bf16 %v9713_v10, %v1134_v39  ;;  %v1323_v60 = vpack.c.bf16 %v9721_v14, %v1136_v20 }
  0x5c   : > { %v1012_v30 = vrot.slane %v9327_v34, 7  ;;  %v12644_v26 = vmov 0  ;;  %v9737_v11 = vsel %vm12315_vm2, %v1008_v35, %v1009_v15  ;;  %v245_v27 = vadd.s32 144, %v9285_v19 }
  0x5d   : > { %vm9731_vm11 = vcmp.eq.s32.totalorder %v361_v40, 0  ;;  %vm9740_vm12 = vcmp.eq.s32.totalorder %v375_v8, 0  ;;  %v247_v34 = vadd.s32 160, %v9285_v19  ;;  %v1013_v39 = vrot.slane %v9365_v42, 7 }
  0x5e   : > { %8053 = vmatmul.mubr.msk.bf16.gmra.mrb[4].mxu0 %vm12294_vm1, %v1320_v0  ;;  %v1010_v0 = vrot.slane %v9320_v31, 7  ;;  %v12645_v26 = vsel %vm9731_vm11, 4294967295, %v12644_v26  ;;  %v1138_v61 = vsel %vm9731_vm11, 0.0, %v9737_v11  ;;  %v389_v8 = vand.u32 15, %v245_v27 }
  0x5f   : > { %8056 = vmatprep.mubr.msk.bf16.mxu0 %vm12294_vm1, %v1321_v18  ;;  %v1011_v18 = vrot.slane %v9324_v33, 7  ;;  %12646 = vst [vmem:[#allocation57_spill] sm:$0xff] %v12645_v26  ;;  %v12647_v33 = vmov 0  ;;  %v1016_v42 = vrot.slane %v9374_v45, 7  ;;  %v12651_v26 = vmov 0 }
  0x60   : > { %v12648_v33 = vsel %vm9740_vm12, 4294967295, %v12647_v33  ;;  %v9753_v35 = vsel %vm12315_vm2, %v1009_v15, %v1010_v0  ;;  %vm9771_vm13 = vcmp.eq.s32.totalorder %v389_v8, 0  ;;  %v249_v27 = vadd.s32 176, %v9285_v19 }
  0x61   : > { %12649 = vst [vmem:[#allocation58_spill] sm:$0xff] %v12648_v33  ;;  %v9746_v31 = vsel %vm12315_vm2, %v1010_v0, %v1011_v18  ;;  %v9761_v20 = vsel %vm12315_vm2, %v1011_v18, %v1012_v30  ;;  %v1324_v15 = vpack.c.bf16 %v9753_v35, %v1138_v61  ;;  %v1014_v0 = vrot.slane %v9368_v43, 7 }
  0x62   : > { %12650 = vst [vmem:[#allocation59_spill] sm:$0xff] %v9761_v20  ;;  %v1140_v40 = vsel %vm9740_vm12, 0.0, %v9746_v31  ;;  %v12652_v26 = vsel %vm9771_vm13, 4294967295, %v12651_v26  ;;  %v9777_v18 = vsel %vm12315_vm2, %v1012_v30, %v1013_v39  ;;  %v251_v45 = vadd.s32 192, %v9285_v19 }
  0x63   : > { %v1325_v9 = vpack.c.bf16 %v9761_v20, %v1140_v40  ;;  %12653 = vst [vmem:[#allocation60_spill] sm:$0xff] %v12652_v26  ;;  %v9793_v30 = vsel %vm12315_vm2, %v1013_v39, %v1014_v0  ;;  %v1017_v61 = vrot.slane %v9389_v48, 7  ;;  %v1020_v48 = vrot.slane %v9398_v51, 7 }
  0x64   : > { %12657 = vst [vmem:[#allocation62_spill] sm:$0xff] %v9793_v30  ;;  %v12659_v20 = vmov 0  ;;  %v255_v51 = vadd.s32 224, %v9285_v19  ;;  %vm12673_vm6 = vcmask 31744  }
  0x66   : > { %8057 = vmatmul.mubr.msk.bf16.gmra.mrb[8].mxu0 %vm12294_vm1, %v1322_v46  ;;  %v1015_v46 = vrot.slane %v9371_v44, 7  ;;  %v12654_v44 = vmov 0 }
  0x67   : > { %8060 = vmatprep.mubr.msk.bf16.mxu0 %vm12294_vm1, %v1323_v60  ;;  %v403_v60 = vand.u32 15, %v247_v34  ;;  %v1142_v34 = vsel %vm9771_vm13, 0.0, %v9777_v18 }
  0x68   : > { %v9786_v43 = vsel %vm12315_vm2, %v1014_v0, %v1015_v46  ;;  %v9801_v40 = vsel %vm12315_vm2, %v1015_v46, %v1016_v42  ;;  %v1326_v39 = vpack.c.bf16 %v9793_v30, %v1142_v34  ;;  %v1018_v0 = vrot.slane %v9392_v49, 7 }
  0x69   : > { %vm9780_vm14 = vcmp.eq.s32.totalorder %v403_v60, 0  ;;  %12658 = vst [vmem:[#allocation63_spill] sm:$0xff] %v9801_v40  ;;  %v417_v60 = vand.u32 15, %v249_v27  ;;  %v9817_v46 = vsel %vm12315_vm2, %v1016_v42, %v1017_v61  ;;  %v253_v27 = vadd.s32 208, %v9285_v19 }
  0x6a   : > { %v12655_v44 = vsel %vm9780_vm14, 4294967295, %v12654_v44  ;;  %v1144_v8 = vsel %vm9780_vm14, 0.0, %v9786_v43  ;;  %12662 = vst [vmem:[#allocation65_spill] sm:$0xff] %v9817_v46  ;;  %v9833_v42 = vsel %vm12315_vm2, %v1017_v61, %v1018_v0  ;;  %v1021_v34 = vrot.slane %v9419_v58, 7 }
  0x6b   : > { %12656 = vst [vmem:[#allocation61_spill] sm:$0xff] %v12655_v44  ;;  %v1327_v26 = vpack.c.bf16 %v9801_v40, %v1144_v8  ;;  %vm9811_vm15 = vcmp.eq.s32.totalorder %v417_v60, 0  ;;  %v1024_v58 = vrot.slane %v9430_v63, 7  ;;  %v12667_v40 = vmov 0 }
  0x6c   : > { %v12660_v20 = vsel %vm9811_vm15, 4294967295, %v12659_v20  ;;  %v228_v63 = vadd.s32 8, %v9285_v19 }
  0x6d   : > { %12661 = vst [vmem:[#allocation64_spill] sm:$0xff] %v12660_v20 }
  0x6e   : > { %8061 = vmatmul.mubr.msk.bf16.gmra.mrb[12].mxu0 %vm12294_vm1, %v1324_v15  ;;  %v431_v15 = vand.u32 15, %v251_v45  ;;  %v1146_v45 = vsel %vm9811_vm15, 0.0, %v9817_v46 }
  0x6f   : > { %8064 = vmatprep.mubr.msk.bf16.mxu0 %vm12294_vm1, %v1325_v9  ;;  %v1019_v9 = vrot.slane %v9395_v50, 7  ;;  %v12663_v50 = vmov 0  ;;  %v1328_v61 = vpack.c.bf16 %v9833_v42, %v1146_v45  ;;  %v1025_v45 = vrot.slane %v9495_v37, 7 }
  0x70   : > { %vm9820_vm0 = vcmp.eq.s32.totalorder %v431_v15, 0  ;;  %v445_v15 = vand.u32 15, %v253_v27  ;;  %v257_v27 = vadd.s32 240, %v9285_v19 }
  0x71   : > { %v12664_v50 = vsel %vm9820_vm0, 4294967295, %v12663_v50  ;;  %v9826_v49 = vsel %vm12315_vm2, %v1018_v0, %v1019_v9  ;;  %v9841_v8 = vsel %vm12315_vm2, %v1019_v9, %v1020_v48  ;;  %v1022_v0 = vrot.slane %v9422_v59, 7 }
  0x72   : > { %12665 = vst [vmem:[#allocation66_spill] sm:$0xff] %v12664_v50  ;;  %12666 = vst [vmem:[#allocation67_spill] sm:$0xff] %v9841_v8  ;;  %v1148_v60 = vsel %vm9820_vm0, 0.0, %v9826_v49  ;;  %vm9851_vm4 = vcmp.eq.s32.totalorder %v445_v15, 0  ;;  %v9857_v9 = vsel %vm12315_vm2, %v1020_v48, %v1021_v34  ;;  %v230_v50 = vadd.s32 24, %v9285_v19 }
  0x73   : > { %v1329_v20 = vpack.c.bf16 %v9841_v8, %v1148_v60  ;;  %v12668_v40 = vsel %vm9851_vm4, 4294967295, %v12667_v40  ;;  %vm12674_vm0 = vmmov %vm12673_vm6  ;;  %v9873_v48 = vsel %vm12315_vm2, %v1021_v34, %v1022_v0  ;;  %v270_v34 = vand.u32 15, %v228_v63 }
  0x74   : > { %12669 = vst [vmem:[#allocation68_spill] sm:$0xff] %v12668_v40 }
  0x76   : > { %8065 = vmatmul.mubr.msk.bf16.gmra.mrb[16].mxu0 %vm12294_vm1, %v1326_v39  ;;  %v459_v39 = vand.u32 15, %v255_v51  ;;  %v1150_v51 = vsel %vm9851_vm4, 0.0, %v9857_v9  ;;  %vm12686_vm4 = vcmask 31744  }
  0x77   : > { %8068 = vmatprep.mubr.msk.bf16.mxu0 %vm12294_vm1, %v1327_v26  ;;  %v1023_v26 = vrot.slane %v9427_v62, 7  ;;  %v12670_v62 = vmov 0  ;;  %v1330_v40 = vpack.c.bf16 %v9873_v48, %v1150_v51  ;;  %v232_v51 = vadd.s32 40, %v9285_v19  ;;  %vm12687_vm15 = vmmov %vm12686_vm4 }
  0x78   : > { %vm9860_vm1 = vcmp.eq.s32.totalorder %v459_v39, 0  ;;  %v473_v39 = vand.u32 15, %v257_v27  ;;  %v9901_v27 = vsel %vm12315_vm2, %v1024_v58, %v1025_v45 }
  0x79   : > { %v12671_v62 = vsel %vm9860_vm1, 4294967295, %v12670_v62  ;;  %v9866_v59 = vsel %vm12315_vm2, %v1022_v0, %v1023_v26  ;;  %v9881_v60 = vsel %vm12315_vm2, %v1023_v26, %v1024_v58  ;;  %v12679_v26 = vmov 0 }
  0x7a   : > { %12672 = vst [vmem:[#allocation69_spill] sm:$0xff] %v12671_v62  ;;  %12675 = vst [vmem:[#allocation70_spill] sm:$0xff] %v9881_v60  ;;  %v1152_v15 = vsel %vm9860_vm1, 0.0, %v9866_v59  ;;  %vm12685_vm1 = vcmp.lt.s32.totalorder %v9285_v19, 7  ;;  %v9917_v58 = vsel %vm12315_vm2, %v1025_v45, %v9439_v12  ;;  %v12690_v45 = vmov 0 }
  0x7b   : > { %v1331_v8 = vpack.c.bf16 %v9881_v60, %v1152_v15  ;;  %12688 = vst [vmem:[#allocation75_spill] sm:$0xff] %v9917_v58  ;;  %v298_v60 = vand.u32 15, %v232_v51  ;;  %vm12697_vm2 = vcmask 31744  }
  0x7e   : > { %8069 = vmatmul.mubr.msk.bf16.gmra.mrb[20].mxu0 %vm12673_vm6, %v1328_v61  ;;  %v12677_v61 = vmov 0.0   ;;  %vm9903_vm6 = vcmp.eq.s32.totalorder %v270_v34, 15  ;;  %v284_v34 = vand.u32 15, %v230_v50  ;;  %v12694_v50 = vmov 0 }
  0x7f   : > { %8072 = vmatprep.mubr.msk.bf16.mxu0 %vm12674_vm0, %v1329_v20  ;;  %v9887_v20 = vrot.slane %v9232_v4, 1  ;;  %v9890_v0 = vrot.slane %v12677_v61, 1  ;;  %vm9895_vm0 = vcmp.eq.s32.totalorder %v473_v39, 0  ;;  %v12682_v4 = vmov 0 }
  0x80   : > { %v12680_v26 = vsel %vm9895_vm0, 4294967295, %v12679_v26  ;;  %v12683_v4 = vsel %vm9903_vm6, 4294967295, %v12682_v4  ;;  %v1154_v15 = vsel %vm9895_vm0, 0.0, %v9901_v27  ;;  %v1159_v39 = vrot.slane %v9235_v5, 1 }
  0x81   : > { %12676 = vst [vmem:[#allocation71_spill] sm:$0xff] %v9887_v20  ;;  %12678 = vst [vmem:[#allocation72_spill] sm:$0xff] %v9890_v0  ;;  %v1218_v63 = vsel %vm12685_vm1, %v9890_v0, %v9887_v20  ;;  %v9924_v61 = vrot.slane %v9238_v6, 1  ;;  %vm9930_vm1 = vcmp.eq.s32.totalorder %v284_v34, 15  ;;  %v234_v6 = vadd.s32 56, %v9285_v19 }
  0x82   : > { %12681 = vst [vmem:[#allocation73_spill] sm:$0xff] %v12680_v26  ;;  %12684 = vst [vmem:[#allocation74_spill] sm:$0xff] %v12683_v4  ;;  %v12691_v45 = vsel %vm9930_vm1, 4294967295, %v12690_v45 }
  0x83   : > { %12689 = vst [vmem:[#allocation76_spill] sm:$0xff] %v9924_v61  ;;  %12692 = vst [vmem:[#allocation77_spill] sm:$0xff] %v12691_v45 }
  0x86   : > { %8073 = vmatmul.mubr.msk.bf16.gmra.mrb[24].mxu0 %vm12686_vm4, %v1330_v40  ;;  %v1286_v40 = vsel %vm9903_vm6, 0.0, %v1218_v63  ;;  %vm12693_vm4 = vcmp.lt.s32.totalorder %v9285_v19, 7  ;;  %v236_v63 = vadd.s32 72, %v9285_v19 }
  0x87   : > { %8076 = vmatprep.mubr.msk.bf16.mxu0 %vm12687_vm15, %v1331_v8  ;;  %v1332_v8 = vpack.c.bf16 %v9917_v58, %v1154_v15  ;;  %v1778_v62 = vpack.c.bf16 %v1286_v40, %v9890_v0  ;;  %v9937_v5 = vsel %vm12693_vm4, %v1159_v39, %v9924_v61  ;;  %vm9940_vm15 = vcmp.eq.s32.totalorder %v298_v60, 15  ;;  %vm12698_vm6 = vmmov %vm12693_vm4 }
  0x88   : > { %v12695_v50 = vsel %vm9940_vm15, 4294967295, %v12694_v50  ;;  %v9949_v51 = vsel %vm12698_vm6, %v9887_v20, %v1159_v39  ;;  %v1288_v15 = vsel %vm9930_vm1, 0.0, %v9937_v5  ;;  %vm12699_vm4 = vmmov %vm12697_vm2  ;;  %v12700_v60 = vrot.slane %v9241_v7, 1 }
  0x89   : > { %12696 = vst [vmem:[#allocation78_spill] sm:$0xff] %v12695_v50  ;;  %vm12701_vm0 = vmmov %vm12698_vm6  ;;  %v1290_v40 = vsel %vm9940_vm15, 0.0, %v9445_v17  ;;  %v326_v39 = vand.u32 15, %v236_v63  ;;  %v1779_v20 = vpack.c.bf16 %v1288_v15, %v9949_v51  ;;  %v12704_v7 = vmov 0  ;;  %v9982_v63 = vld [vmem:[%s12213_s1 + $0x8] sm:$0x3] }
  0x8a   : > { %v9960_v34 = vsel %vm12701_vm0, %v9924_v61, %v12700_v60  ;;  %v238_v60 = vadd.s32 88, %v9285_v19  ;;  %v12707_v61 = vmov 0  ;;  %vm12711_vm15 = vcmask 1041408  }
  0x8b   : > { %12702 = vst [vmem:[#allocation79_spill] sm:$0xff] %v9960_v34  ;;  %v1780_v45 = vpack.c.bf16 %v1290_v40, %v9960_v34  ;;  %vm9974_vm0 = vcmp.eq.s32.totalorder %v326_v39, 15 }
  0x8c   : > { %v12708_v61 = vsel %vm9974_vm0, 4294967295, %v12707_v61  ;;  %v1294_v15 = vsel %vm9974_vm0, 0.0, %v9478_v53  ;;  %v340_v40 = vand.u32 15, %v238_v60  ;;  %v244_v60 = vadd.s32 136, %v9285_v19 }
  0x8d   : > { %12709 = vst [vmem:[#allocation81_spill] sm:$0xff] %v12708_v61  ;;  %vm12718_vm0 = vcmask 31744   ;;  %v12721_v61 = vld [vmem:[#allocation33_spill] sm:$0xff] }
  0x8e   : > { %8077 = vmatmul.mubr.msk.bf16.gmra.mrb[28].mxu0 %vm12697_vm2, %v1332_v8  ;;  %v312_v8 = vand.u32 15, %v234_v6  ;;  %vm12703_vm2 = vcmask 1041408   ;;  %v240_v6 = vadd.s32 104, %v9285_v19 }
  0x8f   : > { %8082 = vmatprep.mubr.msk.bf16.mxu0 %vm12699_vm4, %v1778_v62  ;;  %v2299_v62 = vsel %vm12703_vm2, %v9645_v47, 0  ;;  %vm12710_vm2 = vmmov %vm12699_vm4 }
  0x90   : > { %vm9969_vm6 = vcmp.eq.s32.totalorder %v312_v8, 15  ;;  %v354_v8 = vand.u32 15, %v240_v6 }
  0x91   : > { %v12705_v7 = vsel %vm9969_vm6, 4294967295, %v12704_v7  ;;  %v1292_v47 = vsel %vm9969_vm6, 0.0, %v9464_v56 }
  0x92   : > { %12706 = vst [vmem:[#allocation80_spill] sm:$0xff] %v12705_v7  ;;  %v1781_v39 = vpack.c.bf16 %v1292_v47, %v9468_v32  ;;  %v12715_v7 = vmov 0  ;;  %v12722_v32 = vmov 0 }
  0x96   : > { %8083 = vmatmul.mubr.msk.bf16.vlgmr.msra.gmra.mrb[0].mxu0 %vm12699_vm4, %v1779_v20  ;;  %v1782_v20 = vpack.c.bf16 %v1294_v15, %v9485_v55  ;;  %vm9996_vm4 = vcmp.eq.s32.totalorder %v340_v40, 15  ;;  %v382_v40 = vand.u32 15, %v244_v60 }
  0x97   : > { %8115 = vmatpush3.bf16.msra.mxu0 %v2299_v62  ;;  %8086 = vmatprep.mubr.msk.bf16.mxu0 %vm12710_vm2, %v1780_v45  ;;  %v12712_v62 = vmov 0  ;;  %v242_v45 = vadd.s32 120, %v9285_v19  ;;  %vm10001_vm2 = vcmp.eq.s32.totalorder %v354_v8, 15  ;;  %v1296_v6 = vsel %vm9996_vm4, 0.0, %v9499_v25  ;;  %v12720_v8 = vld [vmem:[#allocation29_spill] sm:$0xff] }
  0x98   : > { %9140 = vmatprep.subr.msk.bf16.mxu0 %vm12711_vm15, %v9982_v63  ;;  %v12713_v62 = vsel %vm9996_vm4, 4294967295, %v12712_v62  ;;  %v12716_v7 = vsel %vm10001_vm2, 4294967295, %v12715_v7  ;;  %vm12719_vm15 = vmmov %vm12718_vm0  ;;  %v1298_v47 = vsel %vm10001_vm2, 0.0, %v9515_v16  ;;  %v1783_v55 = vpack.c.bf16 %v1296_v6, %v12720_v8  ;;  %v12730_v6 = vld [vmem:[#allocation36_spill] sm:$0xff] }
  0x99   : > { %12714 = vst [vmem:[#allocation82_spill] sm:$0xff] %v12713_v62  ;;  %12717 = vst [vmem:[#allocation83_spill] sm:$0xff] %v12716_v7  ;;  %v368_v15 = vand.u32 15, %v242_v45  ;;  %v1784_v53 = vpack.c.bf16 %v1298_v47, %v12721_v61  ;;  %v248_v62 = vadd.s32 168, %v9285_v19  ;;  %v12729_v45 = vld [vmem:[#allocation34_spill] sm:$0xff]  ;;  %v12732_v8 = vmov 0 }
  0x9a   : > { %vm12728_vm2 = vmmov %vm12719_vm15 }
  0x9b   : > { %vm10016_vm6 = vcmp.eq.s32.totalorder %v368_v15, 15  ;;  %v410_v61 = vand.u32 15, %v248_v62  ;;  %v12739_v62 = vld [vmem:[#allocation41_spill] sm:$0xff] }
  0x9c   : > { %v12723_v32 = vsel %vm10016_vm6, 4294967295, %v12722_v32  ;;  %v1300_v60 = vsel %vm10016_vm6, 0.0, %v12729_v45 }
  0x9d   : > { %12724 = vst [vmem:[#allocation84_spill] sm:$0xff] %v12723_v32  ;;  %v252_v32 = vadd.s32 200, %v9285_v19 }
  0x9e   : > { %8087 = vmatmul.mubr.msk.bf16.gmra.mrb[4].mxu0 %vm12718_vm0, %v1781_v39  ;;  %v246_v39 = vadd.s32 152, %v9285_v19  ;;  %vm10021_vm0 = vcmp.eq.s32.totalorder %v382_v40, 15  ;;  %v12731_v40 = vld [vmem:[#allocation35_spill] sm:$0xff] }
  0x9f   : > { %8090 = vmatprep.mubr.msk.bf16.mxu0 %vm12719_vm15, %v1782_v20  ;;  %v12725_v20 = vmov 0  ;;  %v1302_v47 = vsel %vm10021_vm0, 0.0, %v12730_v6  ;;  %v1785_v7 = vpack.c.bf16 %v1300_v60, %v12731_v40  ;;  %v12740_v60 = vld [vmem:[#allocation44_spill] sm:$0xff]  ;;  %v12742_v40 = vmov 0 }
  0xa0   : > { %v12726_v20 = vsel %vm10021_vm0, 4294967295, %v12725_v20  ;;  %v396_v15 = vand.u32 15, %v246_v39  ;;  %v1786_v16 = vpack.c.bf16 %v1302_v47, %v9558_v57  ;;  %vm12738_vm0 = vmmov %vm12719_vm15  ;;  %v438_v57 = vand.u32 15, %v252_v32 }
  0xa1   : > { %12727 = vst [vmem:[#allocation85_spill] sm:$0xff] %v12726_v20 }
  0xa2   : > { %vm10036_vm4 = vcmp.eq.s32.totalorder %v396_v15, 15 }
  0xa3   : > { %v12733_v8 = vsel %vm10036_vm4, 4294967295, %v12732_v8  ;;  %v1304_v39 = vsel %vm10036_vm4, 0.0, %v12739_v62 }
  0xa4   : > { %12734 = vst [vmem:[#allocation34_spill] sm:$0xff] %v12733_v8 }
  0xa6   : > { %8091 = vmatmul.mubr.msk.bf16.gmra.mrb[8].mxu0 %vm12719_vm15, %v1783_v55  ;;  %v12735_v55 = vmov 0 }
  0xa7   : > { %8094 = vmatprep.mubr.msk.bf16.mxu0 %vm12728_vm2, %v1784_v53  ;;  %v250_v53 = vadd.s32 184, %v9285_v19  ;;  %vm10041_vm2 = vcmp.eq.s32.totalorder %v410_v61, 15  ;;  %v12741_v61 = vld [vmem:[#allocation42_spill] sm:$0xff] }
  0xa8   : > { %v12736_v55 = vsel %vm10041_vm2, 4294967295, %v12735_v55  ;;  %v1306_v47 = vsel %vm10041_vm2, 0.0, %v12740_v60  ;;  %v1787_v20 = vpack.c.bf16 %v1304_v39, %v12741_v61  ;;  %vm12748_vm2 = vmmov %vm12719_vm15 }
  0xa9   : > { %12737 = vst [vmem:[#allocation86_spill] sm:$0xff] %v12736_v55  ;;  %v424_v15 = vand.u32 15, %v250_v53  ;;  %v1788_v6 = vpack.c.bf16 %v1306_v47, %v9601_v36  ;;  %v256_v55 = vadd.s32 232, %v9285_v19  ;;  %v12749_v36 = vmov 0 }
  0xab   : > { %vm10056_vm6 = vcmp.eq.s32.totalorder %v424_v15, 15  ;;  %v466_v47 = vand.u32 15, %v256_v55 }
  0xac   : > { %v12743_v40 = vsel %vm10056_vm6, 4294967295, %v12742_v40  ;;  %v1308_v32 = vsel %vm10056_vm6, 0.0, %v9608_v41 }
  0xad   : > { %12744 = vst [vmem:[#allocation41_spill] sm:$0xff] %v12743_v40 }
  0xae   : > { %8095 = vmatmul.mubr.msk.bf16.gmra.mrb[12].mxu0 %vm12719_vm15, %v1785_v7  ;;  %v12745_v7 = vmov 0 }
  0xaf   : > { %8098 = vmatprep.mubr.msk.bf16.mxu0 %vm12738_vm0, %v1786_v16  ;;  %v254_v16 = vadd.s32 216, %v9285_v19  ;;  %vm10061_vm0 = vcmp.eq.s32.totalorder %v438_v57, 15  ;;  %v1789_v57 = vpack.c.bf16 %v1308_v32, %v9612_v24 }
  0xb0   : > { %v12746_v7 = vsel %vm10061_vm0, 4294967295, %v12745_v7  ;;  %v1310_v53 = vsel %vm10061_vm0, 0.0, %v9619_v28  ;;  %vm12755_vm0 = vmmov %vm12719_vm15 }
  0xb1   : > { %12747 = vst [vmem:[#allocation44_spill] sm:$0xff] %v12746_v7  ;;  %v452_v39 = vand.u32 15, %v254_v16  ;;  %v1790_v15 = vpack.c.bf16 %v1310_v53, %v9629_v29  ;;  %v10087_v7 = vld [vmem:[%s9229_s27 + $0xf8] sm:$0xff] }
  0xb2   : > { %v12756_v16 = vld [vmem:[#allocation18_spill] sm:$0xff] }
  0xb3   : > { %vm10076_vm4 = vcmp.eq.s32.totalorder %v452_v39, 15  ;;  %v10094_v32 = vrot.slane %v12756_v16, 1 }
  0xb4   : > { %v12750_v36 = vsel %vm10076_vm4, 4294967295, %v12749_v36  ;;  %v1312_v55 = vsel %vm10076_vm4, 0.0, %v9649_v2  ;;  %vm12764_vm4 = vcmask 31744  }
  0xb5   : > { %12751 = vst [vmem:[#allocation42_spill] sm:$0xff] %v12750_v36  ;;  %12757 = vst [vmem:[#allocation18_spill] sm:$0xff] %v10094_v32  ;;  %v12762_v36 = vld [vmem:[#allocation27_spill] sm:$0xff] }
  0xb6   : > { %8099 = vmatmul.mubr.msk.bf16.gmra.mrb[16].mxu0 %vm12719_vm15, %v1787_v20  ;;  %v258_v20 = vadd.s32 248, %v9285_v19  ;;  %vm12765_vm6 = vmmov %vm12764_vm4 }
  0xb7   : > { %8102 = vmatprep.mubr.msk.bf16.mxu0 %vm12748_vm2, %v1788_v6  ;;  %vm10081_vm2 = vcmp.eq.s32.totalorder %v466_v47, 15  ;;  %v12752_v6 = vmov 0  ;;  %v10100_v47 = vrot.slane %v10087_v7, 7 }
  0xb8   : > { %v12753_v6 = vsel %vm10081_vm2, 4294967295, %v12752_v6  ;;  %v1314_v53 = vsel %vm10081_vm2, 0.0, %v9665_v3  ;;  %v480_v39 = vand.u32 15, %v258_v20  ;;  %vm12763_vm2 = vcmp.lt.s32.totalorder %v9285_v19, 1 }
  0xb9   : > { %12754 = vst [vmem:[#allocation87_spill] sm:$0xff] %v12753_v6  ;;  %v1792_v29 = vpack.c.bf16 %v1314_v53, %v9678_v52  ;;  %v2103_v20 = vsel %vm12763_vm2, %v10100_v47, %v12762_v36  ;;  %v12770_v36 = vld [vmem:[#allocation40_spill] sm:$0xff]  ;;  %vm12776_vm2 = vmmov %vm12764_vm4 }
  0xba   : > { %v2104_v52 = vsel %vm9457_vm5, 0.0, %v2103_v20  ;;  %v7483_v20 = vld [vmem:[%s12213_s1 + $0xa] sm:$0x3] }
  0xbb   : > { %v2232_v3 = vpack.c.bf16 %v12770_v36, %v2104_v52  ;;  %v12778_v52 = vld [vmem:[#allocation50_spill] sm:$0xff]  ;;  %v2112_v36 = vsel %vm9631_vm8, 0.0, %v9694_v22 }
  0xbe   : > { %8103 = vmatmul.mubr.msk.bf16.gmra.mrb[20].mxu0 %vm12719_vm15, %v1789_v57  ;;  %v1791_v57 = vpack.c.bf16 %v1312_v55, %v9654_v13  ;;  %vm12761_vm15 = vcmp.lt.s32.totalorder %v9285_v19, 7  ;;  %v12766_v55 = vrot.slane %v9495_v37, 1 }
  0xbf   : > { %8106 = vmatprep.mubr.msk.bf16.mxu0 %vm12755_vm0, %v1790_v15  ;;  %vm10104_vm0 = vcmp.eq.s32.totalorder %v480_v39, 15  ;;  %v12758_v15 = vmov 0  ;;  %v1220_v16 = vsel %vm12761_vm15, %v10094_v32, %v9890_v0  ;;  %vm12767_vm1 = vmmov %vm12761_vm15  ;;  %v12769_v0 = vld [vmem:[#allocation22_spill] sm:$0xff] }
  0xc0   : > { %v12759_v15 = vsel %vm10104_vm0, 4294967295, %v12758_v15  ;;  %v10123_v53 = vsel %vm12767_vm1, %v12766_v55, %v10094_v32  ;;  %v1316_v39 = vsel %vm10104_vm0, 0.0, %v1220_v16  ;;  %v12774_v55 = vld [vmem:[#allocation43_spill] sm:$0xff]  ;;  %vm12775_vm1 = vcmask 1041408   ;;  %vm12777_vm15 = vmmov %vm12776_vm2 }
  0xc1   : > { %12760 = vst [vmem:[#allocation88_spill] sm:$0xff] %v12759_v15  ;;  %12768 = vst [vmem:[#allocation27_spill] sm:$0xff] %v10123_v53  ;;  %v1793_v6 = vpack.c.bf16 %v1316_v39, %v10123_v53  ;;  %v2561_v16 = vsel %vm12775_vm1, %v9982_v63, 0  ;;  %v2110_v39 = vsel %vm9622_vm7, 0.0, %v12778_v52 }
  0xc2   : > { %v2235_v63 = vpack.c.bf16 %v9669_v1, %v2110_v39 }
  0xc6   : > { %8107 = vmatmul.mubr.msk.bf16.gmra.mrb[24].mxu0 %vm12764_vm4, %v1791_v57 }
  0xc7   : > { %8110 = vmatprep.mubr.msk.bf16.mxu0 %vm12765_vm6, %v1792_v29  ;;  %v12771_v29 = vld [vmem:[#allocation38_spill] sm:$0xff]  ;;  %vm12773_vm6 = vmmov %vm12764_vm4 }
  0xc8   : > { %v2106_v37 = vsel %vm9334_vm3, 0.0, %v12771_v29  ;;  %v2236_v29 = vpack.c.bf16 %v9713_v10, %v2112_v36  ;;  %v2118_v36 = vsel %vm9731_vm11, 0.0, %v9746_v31 }
  0xc9   : > { %v2233_v32 = vpack.c.bf16 %v12774_v55, %v2106_v37 }
  0xce   : > { %8111 = vmatmul.mubr.msk.bf16.gmra.mrb[28].mxu0 %vm12764_vm4, %v1793_v6  ;;  %vm12781_vm4 = vmmov %vm12775_vm1 }
  0xcf   : > { %8116 = vmatprep.mubr.msk.bf16.mxu0 %vm12773_vm6, %v2232_v3  ;;  %vm12782_vm6 = vmmov %vm12776_vm2 }
  0xd0   : > { %vm12783_vm1 = vmmov %vm12776_vm2 }
  0xd1   : > { %vm12799_vm3 = vmmov %vm12783_vm1 }
  0xd6   : > { %8117 = vmatmul.mubr.msk.bf16.vlgmr.msra.gmra.mrb[0].mxu0 %vm12776_vm2, %v2233_v32  ;;  %v2116_v32 = vsel %vm9700_vm10, 0.0, %v9737_v11  ;;  %vm12784_vm2 = vmmov %vm12783_vm1 }
  0xd7   : > { %8149 = vmatpush3.bf16.msra.mxu0 %v2561_v16  ;;  %8120 = vmatprep.mubr.msk.bf16.mxu0 %vm12777_vm15, %v9698_v21  ;;  %v2114_v21 = vsel %vm9688_vm9, 0.0, %v9706_v38  ;;  %v2238_v16 = vpack.c.bf16 %v9753_v35, %v2116_v32  ;;  %vm12785_vm15 = vmmov %vm12783_vm1  ;;  %v2122_v32 = vsel %vm9771_vm13, 0.0, %v9786_v43 }
  0xd8   : > { %9141 = vmatprep.subr.msk.bf16.mxu0 %vm12781_vm4, %v7483_v20  ;;  %v2237_v37 = vpack.c.bf16 %v9721_v14, %v2114_v21  ;;  %vm12788_vm4 = vmmov %vm12783_vm1  ;;  %v12797_v21 = vld [vmem:[#allocation67_spill] sm:$0xff] }
  0xde   : > { %8121 = vmatmul.mubr.msk.bf16.gmra.mrb[4].mxu0 %vm12782_vm6, %v2235_v63  ;;  %v2120_v63 = vsel %vm9740_vm12, 0.0, %v9777_v18  ;;  %vm12789_vm6 = vmmov %vm12783_vm1 }
  0xdf   : > { %8124 = vmatprep.mubr.msk.bf16.mxu0 %vm12783_vm1, %v2236_v29  ;;  %v12787_v29 = vld [vmem:[#allocation59_spill] sm:$0xff]  ;;  %v2240_v23 = vpack.c.bf16 %v9793_v30, %v2120_v63 }
  0xe0   : > { %v2239_v57 = vpack.c.bf16 %v12787_v29, %v2118_v36  ;;  %v12795_v36 = vld [vmem:[#allocation66_spill] sm:$0xff] }
  0xe6   : > { %8125 = vmatmul.mubr.msk.bf16.gmra.mrb[8].mxu0 %vm12784_vm2, %v2237_v37  ;;  %v2124_v37 = vsel %vm9780_vm14, 0.0, %v9817_v46  ;;  %vm12792_vm2 = vmmov %vm12783_vm1  ;;  %v10195_v46 = vld [vmem:[%s9229_s27 + $0xf0] sm:$0xff]  ;;  %vm12812_vm14 = vcmask 1041408  }
  0xe7   : > { %8128 = vmatprep.mubr.msk.bf16.mxu0 %vm12785_vm15, %v2238_v16  ;;  %v12791_v16 = vld [vmem:[#allocation63_spill] sm:$0xff]  ;;  %v2242_v39 = vpack.c.bf16 %v9833_v42, %v2124_v37 }
  0xe8   : > { %v2241_v33 = vpack.c.bf16 %v12791_v16, %v2122_v32  ;;  %v12802_v32 = vld [vmem:[#allocation69_spill] sm:$0xff] }
  0xee   : > { %8129 = vmatmul.mubr.msk.bf16.gmra.mrb[12].mxu0 %vm12788_vm4, %v2239_v57  ;;  %v12793_v57 = vld [vmem:[#allocation64_spill] sm:$0xff]  ;;  %vm12796_vm4 = vnez %v12795_v36  ;;  %v2070_v36 = vrot.slane %v10195_v46, 7 }
  0xef   : > { %8132 = vmatprep.mubr.msk.bf16.mxu0 %vm12789_vm6, %v2240_v23  ;;  %vm12794_vm15 = vnez %v12793_v57  ;;  %v2128_v63 = vsel %vm12796_vm4, 0.0, %v9857_v9  ;;  %vm12798_vm6 = vmmov %vm12783_vm1  ;;  %v12804_v57 = vld [vmem:[#allocation70_spill] sm:$0xff]  ;;  %vm12805_vm4 = vcmp.lt.s32.totalorder %v9285_v19, 1 }
  0xf0   : > { %v2126_v23 = vsel %vm12794_vm15, 0.0, %v9826_v49  ;;  %v2244_v44 = vpack.c.bf16 %v9873_v48, %v2128_v63  ;;  %vm12809_vm15 = vmmov %vm12799_vm3 }
  0xf1   : > { %v2243_v30 = vpack.c.bf16 %v12797_v21, %v2126_v23 }
  0xf6   : > { %8133 = vmatmul.mubr.msk.bf16.gmra.mrb[16].mxu0 %vm12783_vm1, %v2241_v33  ;;  %v12800_v33 = vld [vmem:[#allocation68_spill] sm:$0xff] }
  0xf7   : > { %8136 = vmatprep.mubr.msk.bf16.mxu0 %vm12792_vm2, %v2242_v39  ;;  %vm12801_vm1 = vnez %v12800_v33  ;;  %vm12803_vm2 = vnez %v12802_v32 }
  0xf8   : > { %v2130_v39 = vsel %vm12801_vm1, 0.0, %v9866_v59  ;;  %v2132_v37 = vsel %vm12803_vm2, 0.0, %v9901_v27  ;;  %vm12807_vm1 = vmmov %vm12805_vm4  ;;  %vm12808_vm2 = vnez %v12680_v26  ;;  %v12826_v26 = vld [vmem:[#allocation11_spill] sm:$0xff] }
  0xf9   : > { %v2245_v23 = vpack.c.bf16 %v12804_v57, %v2130_v39  ;;  %v2246_v63 = vpack.c.bf16 %v9917_v58, %v2132_v37  ;;  %v12810_v58 = vld [vmem:[#allocation3_spill] sm:$0xff] }
  0xfe   : > { %8137 = vmatmul.mubr.msk.bf16.gmra.mrb[20].mxu0 %vm12798_vm6, %v2243_v30  ;;  %v10211_v30 = vsel %vm12805_vm4, %v9439_v12, %v2070_v36  ;;  %vm12806_vm6 = vmmov %vm12799_vm3  ;;  %v2823_v12 = vsel %vm12812_vm14, %v7483_v20, 0  ;;  %v12824_v20 = vld [vmem:[#allocation9_spill] sm:$0xff] }
  0xff   : > { %8140 = vmatprep.mubr.msk.bf16.mxu0 %vm12799_vm3, %v2244_v44  ;;  %v10218_v44 = vsel %vm12807_vm1, %v2070_v36, %v10100_v47  ;;  %v2134_v39 = vsel %vm12808_vm2, 0.0, %v10211_v30  ;;  %vm12811_vm4 = vmmov %vm12799_vm3  ;;  %v12815_v36 = vld [vmem:[#allocation5_spill] sm:$0xff] }
 0x100   : > { %v2247_v37 = vpack.c.bf16 %v10218_v44, %v2134_v39  ;;  %vm12814_vm1 = vmmov %vm12799_vm3  ;;  %v12818_v39 = vld [vmem:[#allocation6_spill] sm:$0xff] }
 0x101   : > { %vm12825_vm2 = vmmov %vm12814_vm1 }
 0x102   : > { %vm12828_vm13 = vmmov %vm12814_vm1 }
 0x106   : > { %8141 = vmatmul.mubr.msk.bf16.gmra.mrb[24].mxu0 %vm12799_vm3, %v2245_v23  ;;  %v7500_v23 = vld [vmem:[%s12213_s1 + $0xc] sm:$0x3]  ;;  %vm12816_vm3 = vmmov %vm12814_vm1 }
 0x107   : > { %8144 = vmatprep.mubr.msk.bf16.mxu0 %vm12806_vm6, %v2246_v63  ;;  %v12813_v63 = vld [vmem:[#allocation4_spill] sm:$0xff]  ;;  %vm12817_vm6 = vmmov %vm12812_vm14 }
 0x108   : > { %vm12823_vm14 = vmmov %vm12814_vm1 }
 0x10e   : > { %8145 = vmatmul.mubr.msk.bf16.gmra.mrb[28].mxu0 %vm12809_vm15, %v2247_v37  ;;  %vm12819_vm15 = vmmov %vm12814_vm1  ;;  %v12820_v37 = vld [vmem:[#allocation7_spill] sm:$0xff] }
 0x10f   : > { %8150 = vmatprep.mubr.msk.bf16.mxu0 %vm12811_vm4, %v12810_v58  ;;  %vm12821_vm4 = vmmov %vm12814_vm1  ;;  %v12822_v58 = vld [vmem:[#allocation8_spill] sm:$0xff] }
 0x116   : > { %8151 = vmatmul.mubr.msk.bf16.vlgmr.msra.gmra.mrb[0].mxu0 %vm12814_vm1, %v12813_v63  ;;  %v12831_v63 = vld [vmem:[#allocation15_spill] sm:$0xff] }
 0x117   : > { %8183 = vmatpush3.bf16.msra.mxu0 %v2823_v12  ;;  %8154 = vmatprep.mubr.msk.bf16.mxu0 %vm12816_vm3, %v12815_v36  ;;  %v12827_v12 = vld [vmem:[#allocation13_spill] sm:$0xff]  ;;  %v12829_v36 = vld [vmem:[#allocation14_spill] sm:$0xff]  ;;  %vm12830_vm3 = vmmov %vm12814_vm1 }
 0x118   : > { %9142 = vmatprep.subr.msk.bf16.mxu0 %vm12817_vm6, %v7500_v23  ;;  %vm12832_vm6 = vmmov %vm12814_vm1 }
 0x11e   : > { %8155 = vmatmul.mubr.msk.bf16.gmra.mrb[4].mxu0 %vm12819_vm15, %v12818_v39  ;;  %v12833_v39 = vld [vmem:[#allocation16_spill] sm:$0xff]  ;;  %vm12834_vm15 = vmmov %vm12814_vm1 }
 0x11f   : > { %8158 = vmatprep.mubr.msk.bf16.mxu0 %vm12821_vm4, %v12820_v37  ;;  %v12835_v37 = vld [vmem:[#allocation20_spill] sm:$0xff]  ;;  %vm12836_vm4 = vmmov %vm12814_vm1 }
 0x126   : > { %8159 = vmatmul.mubr.msk.bf16.gmra.mrb[8].mxu0 %vm12823_vm14, %v12822_v58  ;;  %v12837_v58 = vld [vmem:[#allocation21_spill] sm:$0xff]  ;;  %vm12840_vm14 = vmmov %vm12814_vm1 }
 0x127   : > { %8162 = vmatprep.mubr.msk.bf16.mxu0 %vm12825_vm2, %v12824_v20  ;;  %vm12838_vm2 = vmmov %vm12814_vm1  ;;  %v12839_v20 = vld [vmem:[#allocation32_spill] sm:$0xff] }
 0x12e   : > { %8163 = vmatmul.mubr.msk.bf16.gmra.mrb[12].mxu0 %vm12814_vm1, %v12826_v26 }
 0x12f   : > { %8166 = vmatprep.mubr.msk.bf16.mxu0 %vm12828_vm13, %v12827_v12  ;;  %vm12841_vm13 = vnez %v12683_v4 }
 0x130   : > { %v2201_v12 = vsel %vm12841_vm13, 0.0, %v9937_v5 }
 0x136   : > { %8167 = vmatmul.mubr.msk.bf16.gmra.mrb[16].mxu0 %vm12830_vm3, %v12829_v36  ;;  %v10265_v36 = vpack.c.bf16 %v10087_v7, %v10195_v46 }
 0x137   : > { %8170 = vmatprep.mubr.msk.bf16.mxu0 %vm12832_vm6, %v12831_v63  ;;  %v2756_v63 = vpack.c.bf16 %v2201_v12, %v9949_v51  ;;  %vm12844_vm6 = vmmov %vm12814_vm1  ;;  %v7517_v51 = vld [vmem:[%s12213_s1 + $0xe] sm:$0x3] }
 0x138   : > { %v12851_v12 = vld [vmem:[#allocation80_spill] sm:$0xff] }
 0x13e   : > { %8171 = vmatmul.mubr.msk.bf16.gmra.mrb[20].mxu0 %vm12834_vm15, %v12833_v39  ;;  %vm12845_vm15 = vnez %v12695_v50 }
 0x13f   : > { %8174 = vmatprep.mubr.msk.bf16.mxu0 %vm12836_vm4, %v12835_v37  ;;  %v12842_v37 = vld [vmem:[#allocation77_spill] sm:$0xff]  ;;  %v2205_v4 = vsel %vm12845_vm15, 0.0, %v9464_v56  ;;  %vm12847_vm4 = vcmask 1041408  }
 0x140   : > { %vm12843_vm3 = vnez %v12842_v37  ;;  %v3277_v26 = vsel %vm12847_vm4, %v7500_v23, 0  ;;  %v12853_v37 = vld [vmem:[#allocation81_spill] sm:$0xff]  ;;  %vm12855_vm15 = vmmov %vm12847_vm4 }
 0x146   : > { %8175 = vmatmul.mubr.msk.bf16.gmra.mrb[24].mxu0 %vm12838_vm2, %v12837_v58  ;;  %v2203_v58 = vsel %vm12843_vm3, 0.0, %v9445_v17  ;;  %vm12848_vm2 = vmmov %vm12814_vm1 }
 0x147   : > { %8178 = vmatprep.mubr.msk.bf16.mxu0 %vm12840_vm14, %v12839_v20  ;;  %v2757_v5 = vpack.c.bf16 %v2203_v58, %v9960_v34  ;;  %v12846_v20 = vld [vmem:[#allocation24_spill] sm:$0xff]  ;;  %vm12849_vm14 = vmmov %vm12814_vm1  ;;  %v12865_v34 = vld [vmem:[#allocation35_spill] sm:$0xff] }
 0x148   : > { %v2758_v39 = vpack.c.bf16 %v2205_v4, %v12846_v20  ;;  %v12856_v4 = vld [vmem:[#allocation26_spill] sm:$0xff]  ;;  %v12857_v20 = vld [vmem:[#allocation29_spill] sm:$0xff]  ;;  %vm12858_vm4 = vmmov %vm12848_vm2 }
 0x14e   : > { %8179 = vmatmul.mubr.msk.bf16.gmra.mrb[28].mxu0 %vm12814_vm1, %v10265_v36  ;;  %vm12852_vm1 = vnez %v12851_v12  ;;  %v12862_v12 = vld [vmem:[#allocation83_spill] sm:$0xff] }
 0x14f   : > { %8184 = vmatprep.mubr.msk.bf16.mxu0 %vm12844_vm6, %v2756_v63  ;;  %v12850_v63 = vld [vmem:[#allocation25_spill] sm:$0xff]  ;;  %vm12854_vm6 = vnez %v12853_v37 }
 0x150   : > { %v2207_v50 = vsel %vm12852_vm1, 0.0, %v12850_v63  ;;  %v2209_v58 = vsel %vm12854_vm6, 0.0, %v9499_v25  ;;  %vm12863_vm1 = vnez %v12862_v12  ;;  %v12864_v37 = vld [vmem:[#allocation33_spill] sm:$0xff]  ;;  %vm12867_vm6 = vmmov %vm12848_vm2 }
 0x151   : > { %v2759_v23 = vpack.c.bf16 %v2207_v50, %v12856_v4  ;;  %v2760_v56 = vpack.c.bf16 %v2209_v58, %v12857_v20  ;;  %v2213_v63 = vsel %vm12863_vm1, 0.0, %v12729_v45  ;;  %v12868_v50 = vld [vmem:[#allocation36_spill] sm:$0xff]  ;;  %v12873_v20 = vld [vmem:[#allocation39_spill] sm:$0xff]  ;;  %vm12874_vm1 = vmmov %vm12867_vm6 }
 0x152   : > { %v2762_v17 = vpack.c.bf16 %v2213_v63, %v12865_v34  ;;  %v12869_v58 = vld [vmem:[#allocation84_spill] sm:$0xff] }
 0x156   : > { %8185 = vmatmul.mubr.msk.bf16.vlgmr.msra.gmra.mrb[0].mxu0 %vm12848_vm2, %v2757_v5 }
 0x157   : > { %8217 = vmatpush3.bf16.msra.mxu0 %v3277_v26  ;;  %8188 = vmatprep.mubr.msk.bf16.mxu0 %vm12849_vm14, %v2758_v39  ;;  %v12859_v26 = vld [vmem:[#allocation31_spill] sm:$0xff]  ;;  %v12860_v39 = vld [vmem:[#allocation82_spill] sm:$0xff] }
 0x158   : > { %9143 = vmatprep.subr.msk.bf16.mxu0 %vm12855_vm15, %v7517_v51  ;;  %vm12861_vm14 = vnez %v12860_v39  ;;  %vm12866_vm15 = vmmov %vm12848_vm2 }
 0x159   : > { %v2211_v5 = vsel %vm12861_vm14, 0.0, %v12859_v26  ;;  %vm12875_vm14 = vmmov %vm12874_vm1 }
 0x15a   : > { %v2761_v25 = vpack.c.bf16 %v2211_v5, %v12864_v37  ;;  %v12879_v5 = vld [vmem:[#allocation45_spill] sm:$0xff] }
 0x15e   : > { %8189 = vmatmul.mubr.msk.bf16.gmra.mrb[4].mxu0 %vm12858_vm4, %v2759_v23  ;;  %vm12870_vm4 = vnez %v12869_v58  ;;  %v12871_v23 = vld [vmem:[#allocation85_spill] sm:$0xff] }
 0x15f   : > { %8192 = vmatprep.mubr.msk.bf16.mxu0 %vm12848_vm2, %v2760_v56  ;;  %v2215_v56 = vsel %vm12870_vm4, 0.0, %v12868_v50  ;;  %vm12872_vm2 = vnez %v12871_v23  ;;  %vm12881_vm4 = vmmov %vm12874_vm1 }
 0x160   : > { %v2217_v39 = vsel %vm12872_vm2, 0.0, %v12739_v62  ;;  %v2763_v26 = vpack.c.bf16 %v2215_v56, %v12873_v20  ;;  %vm12880_vm2 = vmmov %vm12874_vm1  ;;  %v2166_v56 = vrot.slane %v10195_v46, 1 }
 0x161   : > { %v2764_v12 = vpack.c.bf16 %v2217_v39, %v12741_v61 }
 0x166   : > { %8193 = vmatmul.mubr.msk.bf16.gmra.mrb[8].mxu0 %vm12866_vm15, %v2761_v25  ;;  %vm12876_vm15 = vnez %v12733_v8  ;;  %v12877_v25 = vld [vmem:[#allocation86_spill] sm:$0xff] }
 0x167   : > { %8196 = vmatprep.mubr.msk.bf16.mxu0 %vm12867_vm6, %v2762_v17  ;;  %v2219_v17 = vsel %vm12876_vm15, 0.0, %v12740_v60  ;;  %vm12878_vm6 = vnez %v12877_v25  ;;  %v12885_v25 = vld [vmem:[#allocation48_spill] sm:$0xff] }
 0x168   : > { %v2221_v63 = vsel %vm12878_vm6, 0.0, %v9608_v41  ;;  %v2765_v58 = vpack.c.bf16 %v2219_v17, %v12879_v5  ;;  %v12886_v41 = vld [vmem:[#allocation18_spill] sm:$0xff]  ;;  %vm12887_vm6 = vcmp.lt.s32.totalorder %v9285_v19, 7 }
 0x169   : > { %v2766_v23 = vpack.c.bf16 %v2221_v63, %v9612_v24  ;;  %v12890_v63 = vld [vmem:[#allocation42_spill] sm:$0xff] }
 0x16e   : > { %8197 = vmatmul.mubr.msk.bf16.gmra.mrb[12].mxu0 %vm12874_vm1, %v2763_v26  ;;  %vm12882_vm1 = vnez %v12743_v40  ;;  %v12883_v26 = vld [vmem:[#allocation44_spill] sm:$0xff]  ;;  %v12892_v40 = vld [vmem:[#allocation87_spill] sm:$0xff] }
 0x16f   : > { %8200 = vmatprep.mubr.msk.bf16.mxu0 %vm12875_vm14, %v2764_v12  ;;  %v2223_v12 = vsel %vm12882_vm1, 0.0, %v9619_v28  ;;  %vm12884_vm14 = vnez %v12883_v26  ;;  %vm12891_vm1 = vnez %v12890_v63 }
 0x170   : > { %v2225_v39 = vsel %vm12884_vm14, 0.0, %v9649_v2  ;;  %v2767_v8 = vpack.c.bf16 %v2223_v12, %v12885_v25  ;;  %vm12893_vm14 = vnez %v12892_v40  ;;  %v10349_v12 = vrot.slane %v10087_v7, 1  ;;  %v12895_v2 = vld [vmem:[#allocation71_spill] sm:$0xff]  ;;  %v12897_v25 = vld [vmem:[#allocation17_spill] sm:$0xff] }
 0x171   : > { %v2768_v17 = vpack.c.bf16 %v2225_v39, %v9654_v13  ;;  %v12894_v39 = vld [vmem:[#allocation54_spill] sm:$0xff] }
 0x176   : > { %8201 = vmatmul.mubr.msk.bf16.gmra.mrb[16].mxu0 %vm12880_vm2, %v2765_v58  ;;  %v10338_v58 = vsel %vm12887_vm6, %v12886_v41, %v2166_v56 }
 0x177   : > { %8204 = vmatprep.mubr.msk.bf16.mxu0 %vm12881_vm4, %v2766_v23  ;;  %vm12888_vm4 = vmmov %vm12880_vm2  ;;  %v12889_v23 = vld [vmem:[#allocation53_spill] sm:$0xff]  ;;  %v2229_v46 = vsel %vm12893_vm14, 0.0, %v10338_v58 }
 0x178   : > { %v2227_v26 = vsel %vm12891_vm1, 0.0, %v12889_v23  ;;  %v2770_v41 = vpack.c.bf16 %v2229_v46, %v10123_v53  ;;  %vm12899_vm14 = vmmov %vm12880_vm2 }
 0x179   : > { %v2769_v13 = vpack.c.bf16 %v2227_v26, %v12894_v39  ;;  %vm12900_vm1 = vmmov %vm12887_vm6 }
 0x17a   : > { %v10366_v7 = vsel %vm12900_vm1, %v2166_v56, %v10349_v12  ;;  %vm12905_vm1 = vcmask 1041408  }
 0x17e   : > { %8205 = vmatmul.mubr.msk.bf16.gmra.mrb[20].mxu0 %vm12888_vm4, %v2767_v8  ;;  %v2199_v8 = vsel %vm12887_vm6, %v10349_v12, %v12895_v2  ;;  %vm12898_vm4 = vcmp.lt.s32.totalorder %v9285_v19, 1  ;;  %vm12901_vm6 = vmmov %vm12880_vm2 }
 0x17f   : > { %8208 = vmatprep.mubr.msk.bf16.mxu0 %vm12880_vm2, %v2768_v17  ;;  %v12896_v17 = vld [vmem:[#allocation30_spill] sm:$0xff]  ;;  %v2231_v26 = vsel %vm10104_vm0, 0.0, %v2199_v8  ;;  %v12906_v8 = vld [vmem:[#allocation12_spill] sm:$0xff] }
 0x180   : > { %v3081_v63 = vsel %vm12898_vm4, %v12897_v25, %v12896_v17  ;;  %v2771_v46 = vpack.c.bf16 %v2231_v26, %v10366_v7  ;;  %vm12902_vm4 = vmmov %vm12880_vm2  ;;  %v3539_v17 = vsel %vm12905_vm1, %v7517_v51, 0  ;;  %v3092_v51 = vsel %vm9688_vm9, 0.0, %v9737_v11 }
 0x181   : > { %v3082_v2 = vsel %vm9457_vm5, 0.0, %v3081_v63  ;;  %v7533_v63 = vld [vmem:[%s12213_s1 + $0x10] sm:$0x3]  ;;  %vm12907_vm5 = vmmov %vm12880_vm2  ;;  %v3094_v26 = vsel %vm9700_vm10, 0.0, %v9746_v31  ;;  %v3098_v11 = vsel %vm9740_vm12, 0.0, %v9786_v43  ;;  %vm12941_vm12 = vcmask 1041408  }
 0x182   : > { %v3210_v53 = vpack.c.bf16 %v12774_v55, %v3082_v2  ;;  %v3216_v2 = vpack.c.bf16 %v12787_v29, %v3094_v26  ;;  %v3218_v31 = vpack.c.bf16 %v12791_v16, %v3098_v11  ;;  %v12920_v29 = vld [vmem:[#allocation60_spill] sm:$0xff] }
 0x183   : > { %v12925_v16 = vld [vmem:[#allocation64_spill] sm:$0xff] }
 0x184   : > { %v12948_v11 = vld [vmem:[#allocation8_spill] sm:$0xff] }
 0x186   : > { %8209 = vmatmul.mubr.msk.bf16.gmra.mrb[24].mxu0 %vm12880_vm2, %v2769_v13  ;;  %v12903_v13 = vld [vmem:[#allocation37_spill] sm:$0xff] }
 0x187   : > { %8212 = vmatprep.mubr.msk.bf16.mxu0 %vm12899_vm14, %v2770_v41  ;;  %vm12904_vm14 = vnez %v12903_v13 }
 0x188   : > { %v3086_v41 = vsel %vm12904_vm14, 0.0, %v12778_v52 }
 0x189   : > { %v3212_v56 = vpack.c.bf16 %v9669_v1, %v3086_v41  ;;  %v3090_v1 = vsel %vm9631_vm8, 0.0, %v9706_v38  ;;  %v3215_v38 = vpack.c.bf16 %v9753_v35, %v3092_v51  ;;  %v12916_v41 = vld [vmem:[#allocation62_spill] sm:$0xff]  ;;  %v12919_v35 = vld [vmem:[#allocation65_spill] sm:$0xff] }
 0x18a   : > { %v3214_v52 = vpack.c.bf16 %v9721_v14, %v3090_v1  ;;  %v3096_v14 = vsel %vm9731_vm11, 0.0, %v9777_v18 }
 0x18e   : > { %8213 = vmatmul.mubr.msk.bf16.gmra.mrb[28].mxu0 %vm12901_vm6, %v2771_v46  ;;  %vm12908_vm6 = vmmov %vm12905_vm1  ;;  %v12915_v46 = vld [vmem:[#allocation58_spill] sm:$0xff] }
 0x18f   : > { %8218 = vmatprep.mubr.msk.bf16.mxu0 %vm12902_vm4, %v3210_v53  ;;  %v3088_v53 = vsel %vm9622_vm7, 0.0, %v9694_v22  ;;  %vm12909_vm4 = vmmov %vm12880_vm2 }
 0x190   : > { %v3213_v55 = vpack.c.bf16 %v9713_v10, %v3088_v53  ;;  %vm12910_vm1 = vmmov %vm12880_vm2  ;;  %v12914_v10 = vld [vmem:[#allocation57_spill] sm:$0xff] }
 0x196   : > { %8219 = vmatmul.mubr.msk.bf16.vlgmr.msra.gmra.mrb[0].mxu0 %vm12880_vm2, %v12906_v8  ;;  %vm12913_vm2 = vmmov %vm12910_vm1  ;;  %v12922_v8 = vld [vmem:[#allocation61_spill] sm:$0xff] }
 0x197   : > { %8251 = vmatpush3.bf16.msra.mxu0 %v3539_v17  ;;  %8222 = vmatprep.mubr.msk.bf16.mxu0 %vm12907_vm5, %v3212_v56  ;;  %vm12912_vm5 = vmmov %vm12910_vm1  ;;  %v3217_v56 = vpack.c.bf16 %v12916_v41, %v3096_v14  ;;  %v12946_v14 = vld [vmem:[#allocation7_spill] sm:$0xff]  ;;  %v12949_v41 = vld [vmem:[#allocation9_spill] sm:$0xff] }
 0x198   : > { %9144 = vmatprep.subr.msk.bf16.mxu0 %vm12908_vm6, %v7533_v63  ;;  %vm12917_vm6 = vmmov %vm12910_vm1 }
 0x199   : > { %vm12924_vm9 = vmmov %vm12913_vm2 }
 0x19e   : > { %8223 = vmatmul.mubr.msk.bf16.gmra.mrb[4].mxu0 %vm12909_vm4, %v3213_v55  ;;  %vm12918_vm4 = vmmov %vm12910_vm1  ;;  %v12927_v55 = vld [vmem:[#allocation66_spill] sm:$0xff] }
 0x19f   : > { %8226 = vmatprep.mubr.msk.bf16.mxu0 %vm12910_vm1, %v3214_v52  ;;  %vm12921_vm1 = vnez %v12920_v29 }
 0x1a0   : > { %v3100_v17 = vsel %vm12921_vm1, 0.0, %v12919_v35  ;;  %vm12930_vm1 = vmmov %vm12913_vm2  ;;  %v12957_v35 = vld [vmem:[#allocation15_spill] sm:$0xff] }
 0x1a1   : > { %v3219_v53 = vpack.c.bf16 %v9833_v42, %v3100_v17  ;;  %vm12943_vm11 = vmmov %vm12930_vm1  ;;  %v12959_v17 = vld [vmem:[#allocation16_spill] sm:$0xff] }
 0x1a6   : > { %8227 = vmatmul.mubr.msk.bf16.gmra.mrb[8].mxu0 %vm12912_vm5, %v3215_v38  ;;  %vm12923_vm5 = vnez %v12922_v8 }
 0x1a7   : > { %8230 = vmatprep.mubr.msk.bf16.mxu0 %vm12913_vm2, %v3216_v2  ;;  %v3102_v18 = vsel %vm12923_vm5, 0.0, %v9826_v49  ;;  %vm12929_vm5 = vmmov %vm12913_vm2  ;;  %v12942_v2 = vld [vmem:[#allocation5_spill] sm:$0xff] }
 0x1a8   : > { %v3220_v43 = vpack.c.bf16 %v12797_v21, %v3102_v18  ;;  %v12933_v21 = vld [vmem:[#allocation75_spill] sm:$0xff]  ;;  %v12961_v18 = vld [vmem:[#allocation20_spill] sm:$0xff] }
 0x1ae   : > { %8231 = vmatmul.mubr.msk.bf16.gmra.mrb[12].mxu0 %vm12917_vm6, %v3217_v56  ;;  %vm12926_vm6 = vnez %v12925_v16  ;;  %v12951_v56 = vld [vmem:[#allocation11_spill] sm:$0xff] }
 0x1af   : > { %8234 = vmatprep.mubr.msk.bf16.mxu0 %vm12918_vm4, %v3218_v31  ;;  %v3104_v1 = vsel %vm12926_vm6, 0.0, %v9857_v9  ;;  %vm12928_vm4 = vnez %v12927_v55  ;;  %v12955_v31 = vld [vmem:[#allocation14_spill] sm:$0xff] }
 0x1b0   : > { %v3106_v52 = vsel %vm12928_vm4, 0.0, %v9866_v59  ;;  %v3221_v51 = vpack.c.bf16 %v9873_v48, %v3104_v1  ;;  %vm12934_vm4 = vcmp.lt.s32.totalorder %v9285_v19, 1  ;;  %v12967_v1 = vld [vmem:[#allocation19_spill] sm:$0xff] }
 0x1b1   : > { %v3222_v49 = vpack.c.bf16 %v12804_v57, %v3106_v52  ;;  %v3051_v48 = vsel %vm12934_vm4, %v10100_v47, %v12897_v25  ;;  %v12936_v57 = vld [vmem:[#allocation73_spill] sm:$0xff]  ;;  %v12944_v47 = vld [vmem:[#allocation6_spill] sm:$0xff]  ;;  %vm12945_vm4 = vmmov %vm12930_vm1 }
 0x1b2   : > { %vm12937_vm6 = vnez %v12936_v57 }
 0x1b6   : > { %8235 = vmatmul.mubr.msk.bf16.gmra.mrb[16].mxu0 %vm12913_vm2, %v3219_v53  ;;  %vm12931_vm2 = vnez %v12800_v33  ;;  %v12962_v53 = vld [vmem:[#allocation21_spill] sm:$0xff] }
 0x1b7   : > { %8238 = vmatprep.mubr.msk.bf16.mxu0 %vm12924_vm9, %v3220_v43  ;;  %v3108_v42 = vsel %vm12931_vm2, 0.0, %v9901_v27  ;;  %vm12932_vm9 = vnez %v12802_v32  ;;  %v3112_v27 = vsel %vm12937_vm6, 0.0, %v3051_v48  ;;  %vm12938_vm2 = vmmov %vm12930_vm1  ;;  %v12964_v43 = vld [vmem:[#allocation32_spill] sm:$0xff]  ;;  %v12974_v48 = vld [vmem:[#allocation25_spill] sm:$0xff] }
 0x1b8   : > { %v3110_v9 = vsel %vm12932_vm9, 0.0, %v10211_v30  ;;  %v3223_v26 = vpack.c.bf16 %v12933_v21, %v3108_v42  ;;  %v3225_v38 = vpack.c.bf16 %v12897_v25, %v3112_v27  ;;  %v12939_v30 = vld [vmem:[#allocation4_spill] sm:$0xff]  ;;  %vm12940_vm9 = vmmov %vm12930_vm1  ;;  %v12971_v21 = vld [vmem:[#allocation23_spill] sm:$0xff] }
 0x1b9   : > { %v3224_v59 = vpack.c.bf16 %v10218_v44, %v3110_v9  ;;  %v3801_v44 = vsel %vm12941_vm12, %v7533_v63, 0  ;;  %v12953_v63 = vld [vmem:[#allocation13_spill] sm:$0xff]  ;;  %vm12954_vm12 = vmmov %vm12930_vm1  ;;  %v12970_v9 = vmov 0.0|0.0   ;;  %v12975_v27 = vld [vmem:[#allocation78_spill] sm:$0xff] }
 0x1be   : > { %8239 = vmatmul.mubr.msk.bf16.gmra.mrb[20].mxu0 %vm12929_vm5, %v3221_v51  ;;  %vm12935_vm5 = vmmov %vm12930_vm1  ;;  %v3179_v51 = vsel %vm12841_vm13, 0.0, %v12967_v1 }
 0x1bf   : > { %8242 = vmatprep.mubr.msk.bf16.mxu0 %vm12930_vm1, %v3222_v49  ;;  %v12969_v49 = vld [vmem:[#allocation79_spill] sm:$0xff] }
 0x1c0   : > { %v3734_v42 = vpack.c.bf16 %v3179_v51, %v12969_v49  ;;  %v12996_v49 = vld [vmem:[#allocation85_spill] sm:$0xff] }
 0x1c6   : > { %8243 = vmatmul.mubr.msk.bf16.gmra.mrb[24].mxu0 %vm12935_vm5, %v3223_v26  ;;  %vm12947_vm5 = vmmov %vm12930_vm1 }
 0x1c7   : > { %8246 = vmatprep.mubr.msk.bf16.mxu0 %vm12930_vm1, %v3224_v59  ;;  %v3181_v59 = vsel %vm12843_vm3, 0.0, %v12971_v21 }
 0x1ce   : > { %8247 = vmatmul.mubr.msk.bf16.gmra.mrb[28].mxu0 %vm12938_vm2, %v3225_v38  ;;  %vm12950_vm2 = vmmov %vm12930_vm1 }
 0x1cf   : > { %8252 = vmatprep.mubr.msk.bf16.mxu0 %vm12940_vm9, %v12939_v30  ;;  %vm12952_vm9 = vmmov %vm12930_vm1  ;;  %v12977_v30 = vld [vmem:[#allocation24_spill] sm:$0xff] }
 0x1d6   : > { %8253 = vmatmul.mubr.msk.bf16.vlgmr.msra.gmra.mrb[0].mxu0 %vm12943_vm11, %v12942_v2  ;;  %vm12956_vm11 = vmmov %vm12930_vm1  ;;  %v12979_v2 = vld [vmem:[#allocation28_spill] sm:$0xff] }
 0x1d7   : > { %8285 = vmatpush3.bf16.msra.mxu0 %v3801_v44  ;;  %8256 = vmatprep.mubr.msk.bf16.mxu0 %vm12945_vm4, %v12944_v47  ;;  %vm12958_vm4 = vmmov %vm12930_vm1  ;;  %v12980_v47 = vld [vmem:[#allocation80_spill] sm:$0xff] }
 0x1de   : > { %8257 = vmatmul.mubr.msk.bf16.gmra.mrb[4].mxu0 %vm12947_vm5, %v12946_v14  ;;  %vm12960_vm5 = vmmov %vm12930_vm1 }
 0x1df   : > { %8260 = vmatprep.mubr.msk.bf16.mxu0 %vm12930_vm1, %v12948_v11  ;;  %v12982_v11 = vld [vmem:[#allocation31_spill] sm:$0xff] }
 0x1e6   : > { %8261 = vmatmul.mubr.msk.bf16.gmra.mrb[8].mxu0 %vm12950_vm2, %v12949_v41  ;;  %vm12963_vm2 = vmmov %vm12930_vm1  ;;  %v12983_v41 = vld [vmem:[#allocation81_spill] sm:$0xff] }
 0x1e7   : > { %8264 = vmatprep.mubr.msk.bf16.mxu0 %vm12952_vm9, %v12951_v56  ;;  %vm12965_vm9 = vmmov %vm12930_vm1 }
 0x1ee   : > { %8265 = vmatmul.mubr.msk.bf16.gmra.mrb[12].mxu0 %vm12954_vm12, %v12953_v63  ;;  %vm12966_vm12 = vmmov %vm12930_vm1  ;;  %v12985_v63 = vld [vmem:[#allocation29_spill] sm:$0xff] }
 0x1ef   : > { %8268 = vmatprep.mubr.msk.bf16.mxu0 %vm12956_vm11, %v12955_v31  ;;  %vm12973_vm11 = vmmov %vm12930_vm1 }
 0x1f6   : > { %8269 = vmatmul.mubr.msk.bf16.gmra.mrb[16].mxu0 %vm12958_vm4, %v12957_v35  ;;  %vm12976_vm4 = vnez %v12975_v27 }
 0x1f7   : > { %8272 = vmatprep.mubr.msk.bf16.mxu0 %vm12960_vm5, %v12959_v17  ;;  %v3183_v38 = vsel %vm12976_vm4, 0.0, %v12974_v48  ;;  %vm12978_vm5 = vmmov %vm12930_vm1 }
 0x1f8   : > { %v3736_v44 = vpack.c.bf16 %v3183_v38, %v12856_v4  ;;  %v12988_v4 = vld [vmem:[#allocation82_spill] sm:$0xff]  ;;  %v13004_v38 = vld [vmem:[#allocation48_spill] sm:$0xff] }
 0x1fe   : > { %8273 = vmatmul.mubr.msk.bf16.gmra.mrb[20].mxu0 %vm12930_vm1, %v12961_v18  ;;  %v12990_v18 = vld [vmem:[#allocation83_spill] sm:$0xff] }
 0x1ff   : > { %8276 = vmatprep.mubr.msk.bf16.mxu0 %vm12963_vm2, %v12962_v53  ;;  %vm12981_vm2 = vnez %v12980_v47 }
 0x200   : > { %v3185_v14 = vsel %vm12981_vm2, 0.0, %v12979_v2  ;;  %v13012_v2 = vld [vmem:[#allocation52_spill] sm:$0xff] }
 0x201   : > { %v3737_v31 = vpack.c.bf16 %v3185_v14, %v12985_v63 }
 0x206   : > { %8277 = vmatmul.mubr.msk.bf16.gmra.mrb[24].mxu0 %vm12965_vm9, %v12964_v43  ;;  %vm12984_vm9 = vnez %v12983_v41 }
 0x207   : > { %8280 = vmatprep.mubr.msk.bf16.mxu0 %vm12966_vm12, %v10265_v36  ;;  %v3735_v36 = vpack.c.bf16 %v3181_v59, %v12977_v30  ;;  %v3187_v56 = vsel %vm12984_vm9, 0.0, %v12982_v11  ;;  %vm12986_vm12 = vmmov %vm12930_vm1  ;;  %v13002_v59 = vld [vmem:[#allocation86_spill] sm:$0xff]  ;;  %v13013_v11 = vld [vmem:[#allocation72_spill] sm:$0xff] }
 0x208   : > { %v3738_v35 = vpack.c.bf16 %v3187_v56, %v12864_v37  ;;  %v12994_v37 = vld [vmem:[#allocation84_spill] sm:$0xff]  ;;  %v13016_v56 = vld [vmem:[#allocation42_spill] sm:$0xff] }
 0x20e   : > { %8281 = vmatmul.mubr.bf16.gmra.mrb[28].mxu0 %v12970_v9 }
 0x20f   : > { %8286 = vmatprep.mubr.msk.bf16.mxu0 %vm12973_vm11, %v3734_v42  ;;  %vm12987_vm11 = vmmov %vm12930_vm1 }
 0x210   : > { %vm12992_vm13 = vmmov %vm12987_vm11 }
 0x211   : > { %vm12993_vm9 = vmmov %vm12987_vm11 }
 0x216   : > { %8287 = vmatmul.mubr.msk.bf16.vlgmr.msra.gmra.mrb[0].mxu0 %vm12978_vm5, %v3735_v36  ;;  %vm12989_vm5 = vnez %v12988_v4  ;;  %v13010_v36 = vld [vmem:[#allocation44_spill] sm:$0xff] }
 0x217   : > { %8290 = vmatprep.mubr.msk.bf16.mxu0 %vm12930_vm1, %v3736_v44  ;;  %v3189_v17 = vsel %vm12989_vm5, 0.0, %v12729_v45  ;;  %vm12991_vm1 = vnez %v12990_v18 }
 0x218   : > { %v3191_v53 = vsel %vm12991_vm1, 0.0, %v12868_v50  ;;  %v3739_v43 = vpack.c.bf16 %v3189_v17, %v12865_v34  ;;  %vm12998_vm1 = vmmov %vm12993_vm9  ;;  %v13000_v34 = vld [vmem:[#allocation46_spill] sm:$0xff]  ;;  %v13020_v17 = vld [vmem:[#allocation76_spill] sm:$0xff] }
 0x219   : > { %v3740_v1 = vpack.c.bf16 %v3191_v53, %v12873_v20  ;;  %vm12999_vm5 = vmmov %vm12998_vm1  ;;  %v3197_v21 = vsel %vm12876_vm15, 0.0, %v13000_v34  ;;  %vm13018_vm15 = vnez %v12892_v40 }
 0x21a   : > { %v3743_v48 = vpack.c.bf16 %v3197_v21, %v9612_v24 }
 0x21e   : > { %8291 = vmatmul.mubr.msk.bf16.gmra.mrb[4].mxu0 %vm12986_vm12, %v3737_v31  ;;  %vm12995_vm12 = vnez %v12994_v37  ;;  %v13019_v31 = vld [vmem:[#allocation27_spill] sm:$0xff] }
 0x21f   : > { %8294 = vmatprep.mubr.msk.bf16.mxu0 %vm12987_vm11, %v3738_v35  ;;  %v3193_v51 = vsel %vm12995_vm12, 0.0, %v12739_v62  ;;  %vm12997_vm11 = vnez %v12996_v49 }
 0x220   : > { %v3195_v45 = vsel %vm12997_vm11, 0.0, %v12740_v60  ;;  %v3741_v42 = vpack.c.bf16 %v3193_v51, %v12741_v61  ;;  %vm13006_vm11 = vmmov %vm12998_vm1  ;;  %v13007_v61 = vld [vmem:[#allocation51_spill] sm:$0xff] }
 0x221   : > { %v3742_v50 = vpack.c.bf16 %v3195_v45, %v12879_v5  ;;  %v13008_v5 = vld [vmem:[#allocation41_spill] sm:$0xff]  ;;  %v10586_v51 = vld [vmem:[%s12214_s2] ss:$0 sm:$0xff] }
 0x226   : > { %8295 = vmatmul.mubr.msk.bf16.gmra.mrb[8].mxu0 %vm12992_vm13, %v3739_v43  ;;  %vm13003_vm13 = vnez %v13002_v59 }
 0x227   : > { %8298 = vmatprep.mubr.msk.bf16.mxu0 %vm12993_vm9, %v3740_v1  ;;  %v3199_v62 = vsel %vm13003_vm13, 0.0, %v9619_v28  ;;  %vm13005_vm9 = vmmov %vm12998_vm1  ;;  %vm13014_vm13 = vcmp.lt.s32.totalorder %v9285_v19, 7  ;;  %v4403_v1 = vld [vmem:[%s12215_s3] sm:$0xf] }
 0x228   : > { %v3744_v60 = vpack.c.bf16 %v3199_v62, %v13004_v38  ;;  %v3147_v24 = vsel %vm13014_vm13, %v10349_v12, %v13013_v11 }
 0x22e   : > { %8299 = vmatmul.mubr.msk.bf16.gmra.mrb[12].mxu0 %vm12998_vm1, %v3741_v42  ;;  %vm13009_vm1 = vnez %v13008_v5 }
 0x22f   : > { %8302 = vmatprep.mubr.msk.bf16.mxu0 %vm12999_vm5, %v3742_v50  ;;  %v3201_v30 = vsel %vm13009_vm1, 0.0, %v13007_v61  ;;  %vm13011_vm5 = vnez %v13010_v36  ;;  %vm13017_vm1 = vnez %v13016_v56 }
 0x230   : > { %v3203_v44 = vsel %vm13011_vm5, 0.0, %v12889_v23  ;;  %v3745_v14 = vpack.c.bf16 %v3201_v30, %v13012_v2  ;;  %v3205_v63 = vsel %vm13017_vm1, 0.0, %v10338_v58  ;;  %v3207_v23 = vsel %vm13018_vm15, 0.0, %v3147_v24  ;;  %vm13021_vm5 = vmmov %vm13014_vm13 }
 0x231   : > { %v3746_v28 = vpack.c.bf16 %v3203_v44, %v12894_v39  ;;  %v3747_v35 = vpack.c.bf16 %v3205_v63, %v13019_v31  ;;  %v3748_v39 = vpack.c.bf16 %v3207_v23, %v10366_v7  ;;  %v3177_v12 = vsel %vm13021_vm5, %v13013_v11, %v13020_v17  ;;  %vm13022_vm13 = vmmov %vm13005_vm9  ;;  %v7551_v7 = vld [vmem:[%s12215_s3 + $0x4] sm:$0xf] }
 0x232   : > { %v3209_v53 = vsel %vm10104_vm0, 0.0, %v3177_v12  ;;  %vm12436_vm15 = vcmask 1043456  }
 0x233   : > { %v3749_v58 = vpack.c.bf16 %v3209_v53, %v13013_v11  ;;  %9145 = vmatprep.subr.msk.bf16.mxu1 %vm12436_vm15, %v7551_v7  ;;  %v4473_v43 = vsel %vm12436_vm15, %v7551_v7, 0 }
 0x234   : > { %8319 = vmatpush3.bf16.msra.mxu1 %v4473_v43 }
 0x235   : > { %9146 = vmatprep.subr.msk.bf16.mxu1 %vm12436_vm15, %v4403_v1  ;;  %vm12439_vm15 = vcmask 64512  }
 0x236   : > { %8303 = vmatmul.mubr.msk.bf16.gmra.mrb[16].mxu0 %vm13005_vm9, %v3743_v48 }
 0x237   : > { %8306 = vmatprep.mubr.msk.bf16.mxu0 %vm13006_vm11, %v3744_v60  ;;  %vm13015_vm11 = vmmov %vm13005_vm9 }
 0x23e   : > { %8307 = vmatmul.mubr.msk.bf16.gmra.mrb[20].mxu0 %vm13005_vm9, %v3745_v14 }
 0x23f   : > { %8310 = vmatprep.mubr.msk.bf16.mxu0 %vm13015_vm11, %v3746_v28  ;;  %vm13023_vm11 = vmmov %vm13005_vm9 }
 0x246   : > { %8311 = vmatmul.mubr.msk.bf16.gmra.mrb[24].mxu0 %vm13022_vm13, %v3747_v35 }
 0x247   : > { %8314 = vmatprep.mubr.msk.bf16.mxu0 %vm13005_vm9, %v3748_v39 }
 0x24e   : > { %8315 = vmatmul.mubr.msk.bf16.gmra.mrb[28].mxu0 %vm13023_vm11, %v3749_v58 }
 0x2e9   : > { %v8288_v45 = vpop.f32.mrb[0].mxu0 }
 0x2ea   : > { %v4005_v42 = vadd.f32 %v8288_v45, %v10586_v51  ;;  %v3837_v50 = vpop.f32.mrb[1].mxu0  ;;  %v7583_v45 = vld [vmem:[%s12215_s3 + $0x8] sm:$0xf] }
 0x2eb   : > { %v4003_v34 = vadd.f32 %v10586_v51, %v3837_v50  ;;  %v8289_v21 = vpop.f32.mrb[2].mxu0 }
 0x2ec   : > { %v4069_v62 = vmul.f32 0.2, %v4005_v42  ;;  %v4006_v48 = vadd.f32 %v8289_v21, %v10586_v51  ;;  %v3840_v38 = vpop.f32.mrb[3].mxu0  ;;  %vm4037_vm5 = vcmp.ge.f32.partialorder %v4005_v42, 0.0 }
 0x2ed   : > { %vm4035_vm13 = vcmp.ge.f32.partialorder %v4003_v34, 0.0  ;;  %v4067_v60 = vmul.f32 0.2, %v4003_v34  ;;  %v4004_v61 = vadd.f32 %v10586_v51, %v3840_v38 }
 0x2ee   : > { %vm4038_vm9 = vcmp.ge.f32.partialorder %v4006_v48, 0.0  ;;  %v4070_v30 = vmul.f32 0.2, %v4006_v48  ;;  %v4101_v2 = vsel %vm4037_vm5, %v4005_v42, %v4069_v62  ;;  %vm13029_vm5 = vcmask 1043456  }
 0x2ef   : > { %v10592_v44 = vsel %vm4035_vm13, %v4003_v34, %v4067_v60  ;;  %vm4036_vm11 = vcmp.ge.f32.partialorder %v4004_v61, 0.0  ;;  %v4068_v28 = vmul.f32 0.2, %v4004_v61  ;;  %v4685_v53 = vsel %vm13029_vm5, %v4403_v1, 0 }
 0x2f0   : > { %13024 = vst [vmem:[#allocation40_spill] sm:$0xff] %v10592_v44  ;;  %v10594_v14 = vsel %vm4038_vm9, %v4006_v48, %v4070_v30  ;;  %v10600_v23 = vrot.slane %v10592_v44, 7  ;;  %vm13030_vm13 = vcmp.lt.s32.totalorder %v9285_v19, 1  ;;  %v10626_v62 = vrot.slane %v4101_v2, 7 }
 0x2f1   : > { %v10597_v24 = vpack.c.bf16 %v10594_v14, %v4101_v2  ;;  %v8292_v63 = vpop.f32.mrb[4].mxu0  ;;  %v10602_v31 = vsel %vm4036_vm11, %v4004_v61, %v4068_v28  ;;  %v12440_v42 = vrot.slane %v10594_v14, 7  ;;  %v13032_v61 = vld [vmem:[#allocation10_spill] sm:$0xff] }
 0x2f2   : > { %13026 = vst [vmem:[#allocation43_spill] sm:$0xff] %v10600_v23  ;;  %13027 = vst [vmem:[#allocation50_spill] sm:$0xff] %v10602_v31  ;;  %v4009_v35 = vadd.f32 %v8292_v63, %v10586_v51  ;;  %v3853_v39 = vpop.f32.mrb[5].mxu0  ;;  %v10607_v17 = vpack.c.bf16 %v10602_v31, %v10592_v44  ;;  %v4198_v50 = vrot.slane %v10602_v31, 7  ;;  %v4256_v1 = vsel %vm13030_vm13, %v12897_v25, %v10600_v23 }
 0x2f3   : > { %13025 = vst [vmem:[#allocation38_spill] sm:$0xff] %v10597_v24  ;;  %v8293_v12 = vpop.f32.mrb[6].mxu0  ;;  %v4007_v58 = vadd.f32 %v10586_v51, %v3853_v39  ;;  %13031 = vst [vmem:[#allocation63_spill] sm:$0xff] %v10626_v62  ;;  %vm13033_vm12 = vnez %v13032_v61  ;;  %v10636_v63 = vsel %vm13030_vm13, %v10626_v62, %v12440_v42 }
 0x2f4   : > { %13028 = vst [vmem:[#allocation59_spill] sm:$0xff] %v10607_v17  ;;  %v4010_v7 = vadd.f32 %v8293_v12, %v10586_v51  ;;  %v3856_v43 = vpop.f32.mrb[7].mxu0  ;;  %8321 = vmatmul.mubr.msk.bf16.vlgmr.msra.gmra.mrb[0].mxu1 %vm12439_vm15, %v10607_v17  ;;  %v4073_v21 = vmul.f32 0.2, %v4009_v35  ;;  %vm4041_vm9 = vcmp.ge.f32.partialorder %v4009_v35, 0.0  ;;  %v4261_v30 = vsel %vm13033_vm12, 0.0, %v4256_v1 }
 0x2f5   : > { %v4008_v34 = vadd.f32 %v10586_v51, %v3856_v43  ;;  %8353 = vmatpush3.bf16.msra.mxu1 %v4685_v53  ;;  %8324 = vmatprep.mubr.msk.bf16.mxu1 %vm12439_vm15, %v10597_v24  ;;  %vm4039_vm11 = vcmp.ge.f32.partialorder %v4007_v58, 0.0  ;;  %v4071_v48 = vmul.f32 0.2, %v4007_v58  ;;  %13034 = vst [vmem:[#allocation67_spill] sm:$0xff] %v10636_v63  ;;  %vm13035_vm15 = vmmov %vm13030_vm13 }
 0x2f6   : > { %9147 = vmatprep.subr.msk.bf16.mxu1 %vm13029_vm5, %v7583_v45  ;;  %vm4042_vm0 = vcmp.ge.f32.partialorder %v4010_v7, 0.0  ;;  %v4074_v38 = vmul.f32 0.2, %v4010_v7  ;;  %v10641_v39 = vsel %vm13035_vm15, %v4198_v50, %v10626_v62  ;;  %vm13037_vm5 = vmmov %vm13030_vm13  ;;  %v10648_v53 = vsel %vm4041_vm9, %v4009_v35, %v4073_v21 }
 0x2f7   : > { %vm4040_vm1 = vcmp.ge.f32.partialorder %v4008_v34, 0.0  ;;  %v4072_v60 = vmul.f32 0.2, %v4008_v34  ;;  %13036 = vst [vmem:[#allocation68_spill] sm:$0xff] %v10641_v39  ;;  %v10646_v12 = vsel %vm13037_vm5, %v10600_v23, %v4198_v50  ;;  %v10655_v42 = vsel %vm4039_vm11, %v4007_v58, %v4071_v48 }
 0x2f8   : > { %13038 = vst [vmem:[#allocation69_spill] sm:$0xff] %v10646_v12  ;;  %v10650_v43 = vsel %vm4042_vm0, %v4010_v7, %v4074_v38  ;;  %vm13040_vm15 = vcmask 1043456   ;;  %v10664_v50 = vrot.slane %v4101_v2, 1  ;;  %v10674_v48 = vpack.c.bf16 %v10646_v12, %v4261_v30 }
 0x2f9   : > { %v8296_v28 = vpop.f32.mrb[8].mxu0  ;;  %v10652_v1 = vsel %vm4040_vm1, %v4008_v34, %v4072_v60  ;;  %v10659_v24 = vpack.c.bf16 %v10650_v43, %v10648_v53  ;;  %v10662_v17 = vsel %vm13040_vm15, %v7583_v45, 0  ;;  %vm13043_vm1 = vcmask 64512  }
 0x2fa   : > { %v3869_v9 = vpop.f32.mrb[9].mxu0  ;;  %13041 = vst [vmem:[#allocation3_spill] sm:$0xff] %v10664_v50  ;;  %v10668_v35 = vpack.c.bf16 %v10652_v1, %v10655_v42  ;;  %v4013_v7 = vadd.f32 %v8296_v28, %v10586_v51  ;;  %v4202_v2 = vrot.slane %v10652_v1, 7  ;;  %vm13044_vm13 = vmmov %vm13043_vm1  ;;  %v4203_v30 = vrot.slane %v10648_v53, 7 }
 0x2fb   : > { %13039 = vst [vmem:[#allocation70_spill] sm:$0xff] %v10659_v24  ;;  %v8297_v62 = vpop.f32.mrb[10].mxu0  ;;  %v4011_v34 = vadd.f32 %v10586_v51, %v3869_v9  ;;  %v4263_v52 = vsel %vm12904_vm14, 0.0, %v10641_v39  ;;  %vm13045_vm15 = vcmp.lt.s32.totalorder %v9285_v19, 1  ;;  %v13049_v39 = vrot.slane %v10594_v14, 7 }
 0x2fc   : > { %13042 = vst [vmem:[#allocation26_spill] sm:$0xff] %v10668_v35  ;;  %v3872_v58 = vpop.f32.mrb[11].mxu0  ;;  %v4014_v38 = vadd.f32 %v8297_v62, %v10586_v51  ;;  %vm4045_vm0 = vcmp.ge.f32.partialorder %v4013_v7, 0.0  ;;  %v4077_v60 = vmul.f32 0.2, %v4013_v7  ;;  %8325 = vmatmul.mubr.msk.bf16.gmra.mrb[4].mxu1 %vm13043_vm1, %v10668_v35  ;;  %v10717_v21 = vpack.c.bf16 %v10636_v63, %v4263_v52 }
 0x2fd   : > { %v4012_v45 = vadd.f32 %v10586_v51, %v3872_v58  ;;  %v4075_v23 = vmul.f32 0.2, %v4011_v34  ;;  %8328 = vmatprep.mubr.msk.bf16.mxu1 %vm13044_vm13, %v10659_v24  ;;  %v4201_v58 = vrot.slane %v10655_v42, 7  ;;  %vm4043_vm5 = vcmp.ge.f32.partialorder %v4011_v34, 0.0 }
 0x2fe   : > { %vm4046_vm9 = vcmp.ge.f32.partialorder %v4014_v38, 0.0  ;;  %v4078_v9 = vmul.f32 0.2, %v4014_v38  ;;  %v10688_v31 = vsel %vm4045_vm0, %v4013_v7, %v4077_v60  ;;  %vm13050_vm0 = vmmov %vm13045_vm15  ;;  %v13068_v54 = vrot.slane %v10650_v43, 7 }
 0x2ff   : > { %vm4044_vm11 = vcmp.ge.f32.partialorder %v4012_v45, 0.0  ;;  %v4076_v28 = vmul.f32 0.2, %v4012_v45  ;;  %v10700_v11 = vsel %vm13045_vm15, %v4201_v58, %v4202_v2  ;;  %v10704_v60 = vsel %vm4043_vm5, %v4011_v34, %v4075_v23  ;;  %vm13055_vm5 = vmmov %vm13043_vm1 }
 0x300   : > { %v10693_v44 = vsel %vm4046_vm9, %v4014_v38, %v4078_v9  ;;  %13046 = vst [vmem:[#allocation33_spill] sm:$0xff] %v10700_v11  ;;  %vm13053_vm9 = vmmov %vm13050_vm0 }
 0x301   : > { %v8300_v35 = vpop.f32.mrb[12].mxu0  ;;  %v10695_v24 = vsel %vm4044_vm11, %v4012_v45, %v4076_v28  ;;  %v10708_v12 = vpack.c.bf16 %v10693_v44, %v10688_v31  ;;  %v10726_v45 = vsel %vm13050_vm0, %v13049_v39, %v4201_v58  ;;  %v4205_v39 = vrot.slane %v10704_v60, 7 }
 0x302   : > { %v4017_v62 = vadd.f32 %v8300_v35, %v10586_v51  ;;  %v3885_v15 = vpop.f32.mrb[13].mxu0  ;;  %v10714_v9 = vpack.c.bf16 %v10695_v24, %v10704_v60  ;;  %13051 = vst [vmem:[#allocation39_spill] sm:$0xff] %v10726_v45  ;;  %v4265_v52 = vsel %vm9622_vm7, 0.0, %v10726_v45 }
 0x303   : > { %13047 = vst [vmem:[#allocation35_spill] sm:$0xff] %v10708_v12  ;;  %v8301_v38 = vpop.f32.mrb[14].mxu0  ;;  %v4015_v23 = vadd.f32 %v10586_v51, %v3885_v15  ;;  %v6154_v15 = vsel %vm13033_vm12, 0.0, %v10726_v45  ;;  %v10747_v13 = vpack.c.bf16 %v10700_v11, %v4265_v52  ;;  %v13063_v52 = vrot.slane %v10695_v24, 7 }
 0x304   : > { %13048 = vst [vmem:[#allocation36_spill] sm:$0xff] %v10714_v9  ;;  %v3888_v28 = vpop.f32.mrb[15].mxu0  ;;  %v4018_v34 = vadd.f32 %v8301_v38, %v10586_v51  ;;  %v4081_v35 = vmul.f32 0.2, %v4017_v62  ;;  %8329 = vmatmul.mubr.msk.bf16.gmra.mrb[8].mxu1 %vm13043_vm1, %v10714_v9  ;;  %v13052_v38 = vrot.slane %v10650_v43, 7  ;;  %vm4049_vm11 = vcmp.ge.f32.partialorder %v4017_v62, 0.0  ;;  %vm13058_vm1 = vmmov %vm13053_vm9 }
 0x305   : > { %v4016_v7 = vadd.f32 %v10586_v51, %v3888_v28  ;;  %vm4047_vm13 = vcmp.ge.f32.partialorder %v4015_v23, 0.0  ;;  %v4079_v58 = vmul.f32 0.2, %v4015_v23  ;;  %8332 = vmatprep.mubr.msk.bf16.mxu1 %vm13055_vm5, %v10708_v12  ;;  %13056 = vst [vmem:[#allocation18_spill] sm:$0xff] %v10747_v13  ;;  %v10754_v45 = vsel %vm13058_vm1, %v4202_v2, %v4203_v30 }
 0x306   : > { %v10740_v28 = vsel %vm13053_vm9, %v4203_v30, %v13052_v38  ;;  %vm4050_vm15 = vcmp.ge.f32.partialorder %v4018_v34, 0.0  ;;  %v4082_v9 = vmul.f32 0.2, %v4018_v34  ;;  %v10750_v38 = vpack.c.bf16 %v10700_v11, %v6154_v15  ;;  %13059 = vst [vmem:[#allocation54_spill] sm:$0xff] %v10754_v45  ;;  %vm13064_vm9 = vmmov %vm13058_vm1 }
 0x307   : > { %13054 = vst [vmem:[#allocation45_spill] sm:$0xff] %v10740_v28  ;;  %vm4048_vm0 = vcmp.ge.f32.partialorder %v4016_v7, 0.0  ;;  %v4080_v6 = vmul.f32 0.2, %v4016_v7  ;;  %v10757_v12 = vsel %vm4049_vm11, %v4017_v62, %v4081_v35  ;;  %v10766_v15 = vsel %vm4047_vm13, %v4015_v23, %v4079_v58  ;;  %vm13066_vm13 = vmmov %vm13055_vm5 }
 0x308   : > { %13057 = vst [vmem:[#allocation53_spill] sm:$0xff] %v10750_v38  ;;  %v10759_v40 = vsel %vm4050_vm15, %v4018_v34, %v4082_v9  ;;  %v10786_v62 = vsel %vm13064_vm9, %v4205_v39, %v13063_v52  ;;  %v4267_v52 = vsel %vm9631_vm8, 0.0, %v10754_v45  ;;  %v10801_v34 = vsel %vm13064_vm9, %v13068_v54, %v4205_v39 }
 0x309   : > { %v8304_v61 = vpop.f32.mrb[16].mxu0  ;;  %13060 = vst [vmem:[#allocation71_spill] sm:$0xff] %v10759_v40  ;;  %v10761_v56 = vsel %vm4048_vm0, %v4016_v7, %v4080_v6  ;;  %v10770_v2 = vpack.c.bf16 %v10759_v40, %v10757_v12  ;;  %13065 = vst [vmem:[#allocation62_spill] sm:$0xff] %v10786_v62  ;;  %vm13126_vm12 = vnez %v12920_v29 }
 0x30a   : > { %v3901_v63 = vpop.f32.mrb[17].mxu0  ;;  %v10775_v35 = vpack.c.bf16 %v10761_v56, %v10766_v15  ;;  %v4021_v6 = vadd.f32 %v8304_v61, %v10586_v51  ;;  %vm13067_vm0 = vmmov %vm13066_vm13  ;;  %13069 = vst [vmem:[#allocation65_spill] sm:$0xff] %v10801_v34 }
 0x30b   : > { %13061 = vst [vmem:[#allocation30_spill] sm:$0xff] %v10770_v2  ;;  %v8305_v30 = vpop.f32.mrb[18].mxu0  ;;  %v4019_v7 = vadd.f32 %v10586_v51, %v3901_v63 }
 0x30c   : > { %13062 = vst [vmem:[#allocation12_spill] sm:$0xff] %v10775_v35  ;;  %v3904_v9 = vpop.f32.mrb[19].mxu0  ;;  %v4022_v23 = vadd.f32 %v8305_v30, %v10586_v51  ;;  %vm4053_vm11 = vcmp.ge.f32.partialorder %v4021_v6, 0.0  ;;  %v4085_v36 = vmul.f32 0.2, %v4021_v6  ;;  %8333 = vmatmul.mubr.msk.bf16.gmra.mrb[12].mxu1 %vm13066_vm13, %v10775_v35  ;;  %vm13075_vm13 = vmmov %vm13067_vm0  ;;  %v13077_v35 = vrot.slane %v10688_v31, 7 }
 0x30d   : > { %v4020_v58 = vadd.f32 %v10586_v51, %v3904_v9  ;;  %v4083_v61 = vmul.f32 0.2, %v4019_v7  ;;  %8336 = vmatprep.mubr.msk.bf16.mxu1 %vm13067_vm0, %v10770_v2  ;;  %v4209_v9 = vrot.slane %v10766_v15, 7  ;;  %vm4051_vm1 = vcmp.ge.f32.partialorder %v4019_v7, 0.0 }
 0x30e   : > { %vm4054_vm5 = vcmp.ge.f32.partialorder %v4022_v23, 0.0  ;;  %v4086_v63 = vmul.f32 0.2, %v4022_v23  ;;  %v10807_v2 = vsel %vm4053_vm11, %v4021_v6, %v4085_v36  ;;  %v10823_v6 = vpack.c.bf16 %v10740_v28, %v4267_v52 }
 0x30f   : > { %vm4052_vm15 = vcmp.ge.f32.partialorder %v4020_v58, 0.0  ;;  %v4084_v30 = vmul.f32 0.2, %v4020_v58  ;;  %13070 = vst [vmem:[#allocation61_spill] sm:$0xff] %v10807_v2  ;;  %v10816_v38 = vsel %vm4051_vm1, %v4019_v7, %v4083_v61  ;;  %v13080_v7 = vmov %v13077_v35 }
 0x310   : > { %v10810_v3 = vsel %vm4054_vm5, %v4022_v23, %v4086_v63  ;;  %13073 = vst [vmem:[#allocation75_spill] sm:$0xff] %v10823_v6  ;;  %v13076_v23 = vrot.slane %v10693_v44, 7  ;;  %vm13078_vm5 = vmmov %vm13064_vm9 }
 0x311   : > { %v8308_v11 = vpop.f32.mrb[20].mxu0  ;;  %v10812_v45 = vsel %vm4052_vm15, %v4020_v58, %v4084_v30  ;;  %v10820_v62 = vpack.c.bf16 %v10810_v3, %v10807_v2  ;;  %vm13082_vm15 = vmmov %vm13078_vm5 }
 0x312   : > { %13071 = vst [vmem:[#allocation64_spill] sm:$0xff] %v10812_v45  ;;  %v4025_v5 = vadd.f32 %v8308_v11, %v10586_v51  ;;  %v3917_v54 = vpop.f32.mrb[21].mxu0  ;;  %v10828_v58 = vpack.c.bf16 %v10812_v45, %v10816_v38  ;;  %v10843_v13 = vsel %vm13078_vm5, %v13077_v35, %v13076_v23  ;;  %vm13085_vm0 = vmmov %vm13078_vm5 }
 0x313   : > { %13072 = vst [vmem:[#allocation66_spill] sm:$0xff] %v10820_v62  ;;  %v8309_v36 = vpop.f32.mrb[22].mxu0  ;;  %v4023_v61 = vadd.f32 %v10586_v51, %v3917_v54  ;;  %13079 = vst [vmem:[#allocation5_spill] sm:$0xff] %v10843_v13  ;;  %v13081_v54 = vrot.slane %v10695_v24, 7 }
 0x314   : > { %13074 = vst [vmem:[#allocation4_spill] sm:$0xff] %v10828_v58  ;;  %vm4057_vm11 = vcmp.ge.f32.partialorder %v4025_v5, 0.0  ;;  %v4089_v11 = vmul.f32 0.2, %v4025_v5  ;;  %v3920_v63 = vpop.f32.mrb[23].mxu0  ;;  %v4026_v30 = vadd.f32 %v8309_v36, %v10586_v51  ;;  %8337 = vmatmul.mubr.msk.bf16.gmra.mrb[16].mxu1 %vm13075_vm13, %v10828_v58  ;;  %vm13087_vm9 = vmmov %vm13075_vm13  ;;  %v13092_v58 = vrot.slane %v10757_v12, 7 }
 0x315   : > { %v4024_v39 = vadd.f32 %v10586_v51, %v3920_v63  ;;  %v10851_v36 = vsel %vm13082_vm15, %v13081_v54, %v13080_v7  ;;  %v13084_v63 = vrot.slane %v10761_v56, 7  ;;  %vm4055_vm1 = vcmp.ge.f32.partialorder %v4023_v61, 0.0  ;;  %8340 = vmatprep.mubr.msk.bf16.mxu1 %vm13087_vm9, %v10820_v62  ;;  %vm13089_vm15 = vmmov %vm13085_vm0 }
 0x316   : > { %13083 = vst [vmem:[#allocation6_spill] sm:$0xff] %v10851_v36  ;;  %v10860_v28 = vsel %vm4057_vm11, %v4025_v5, %v4089_v11  ;;  %v4087_v35 = vmul.f32 0.2, %v4023_v61  ;;  %vm4058_vm13 = vcmp.ge.f32.partialorder %v4026_v30, 0.0  ;;  %v4090_v23 = vmul.f32 0.2, %v4026_v30  ;;  %vm13093_vm11 = vmmov %vm13085_vm0 }
 0x317   : > { %v10857_v52 = vsel %vm13085_vm0, %v4209_v9, %v13084_v63  ;;  %vm4056_vm5 = vcmp.ge.f32.partialorder %v4024_v39, 0.0  ;;  %v4088_v7 = vmul.f32 0.2, %v4024_v39  ;;  %v13088_v63 = vrot.slane %v10693_v44, 7 }
 0x318   : > { %13086 = vst [vmem:[#allocation7_spill] sm:$0xff] %v10857_v52  ;;  %v13091_v11 = vrot.slane %v10759_v40, 7  ;;  %v10881_v54 = vsel %vm4058_vm13, %v4026_v30, %v4090_v23  ;;  %v10891_v37 = vsel %vm4055_vm1, %v4023_v61, %v4087_v35  ;;  %vm13100_vm0 = vnez %v12914_v10 }
 0x319   : > { %v8312_v6 = vpop.f32.mrb[24].mxu0  ;;  %v10870_v5 = vsel %vm13089_vm15, %v13088_v63, %v4209_v9  ;;  %v10883_v34 = vsel %vm4056_vm5, %v4024_v39, %v4088_v7  ;;  %v4271_v9 = vsel %vm9700_vm10, 0.0, %v10851_v36  ;;  %13096 = vst [vmem:[#allocation13_spill] sm:$0xff] %v10891_v37  ;;  %vm13101_vm13 = vcmask 64512  }
 0x31a   : > { %13090 = vst [vmem:[#allocation8_spill] sm:$0xff] %v10870_v5  ;;  %v10878_v62 = vsel %vm13093_vm11, %v13092_v58, %v13091_v11  ;;  %13095 = vst [vmem:[#allocation11_spill] sm:$0xff] %v10883_v34  ;;  %v3933_v20 = vpop.f32.mrb[25].mxu0  ;;  %v10895_v58 = vpack.c.bf16 %v10881_v54, %v10860_v28  ;;  %v10900_v23 = vpack.c.bf16 %v10883_v34, %v10891_v37  ;;  %v4273_v39 = vsel %vm13100_vm0, 0.0, %v10870_v5 }
 0x31b   : > { %13094 = vst [vmem:[#allocation9_spill] sm:$0xff] %v10878_v62  ;;  %v8313_v30 = vpop.f32.mrb[26].mxu0  ;;  %v4029_v7 = vadd.f32 %v8312_v6, %v10586_v51  ;;  %v4027_v11 = vadd.f32 %v10586_v51, %v3933_v20  ;;  %v10907_v35 = vpack.c.bf16 %v10843_v13, %v4271_v9  ;;  %vm13102_vm11 = vmmov %vm13101_vm13  ;;  %v4217_v9 = vrot.slane %v10891_v37, 7 }
 0x31c   : > { %13097 = vst [vmem:[#allocation14_spill] sm:$0xff] %v10895_v58  ;;  %13098 = vst [vmem:[#allocation15_spill] sm:$0xff] %v10900_v23  ;;  %v3936_v63 = vpop.f32.mrb[27].mxu0  ;;  %v4030_v49 = vadd.f32 %v8313_v30, %v10586_v51  ;;  %8341 = vmatmul.mubr.msk.bf16.gmra.mrb[20].mxu1 %vm13101_vm13, %v10900_v23  ;;  %v10920_v30 = vpack.c.bf16 %v10857_v52, %v4273_v39  ;;  %v13106_v10 = vrot.slane %v10761_v56, 7  ;;  %vm13107_vm13 = vcmp.lt.s32.totalorder %v9285_v19, 1 }
 0x31d   : > { %v4028_v61 = vadd.f32 %v10586_v51, %v3936_v63  ;;  %13099 = vst [vmem:[#allocation16_spill] sm:$0xff] %v10907_v35  ;;  %vm4061_vm1 = vcmp.ge.f32.partialorder %v4029_v7, 0.0  ;;  %v4093_v59 = vmul.f32 0.2, %v4029_v7  ;;  %vm4059_vm9 = vcmp.ge.f32.partialorder %v4027_v11, 0.0  ;;  %8344 = vmatprep.mubr.msk.bf16.mxu1 %vm13102_vm11, %v10895_v58 }
 0x31e   : > { %v4091_v22 = vmul.f32 0.2, %v4027_v11  ;;  %vm4062_vm5 = vcmp.ge.f32.partialorder %v4030_v49, 0.0  ;;  %v4094_v20 = vmul.f32 0.2, %v4030_v49  ;;  %13104 = vst [vmem:[#allocation21_spill] sm:$0xff] %v10920_v30 }
 0x31f   : > { %vm4060_vm15 = vcmp.ge.f32.partialorder %v4028_v61, 0.0  ;;  %v4092_v6 = vmul.f32 0.2, %v4028_v61  ;;  %v10917_v63 = vsel %vm4061_vm1, %v4029_v7, %v4093_v59  ;;  %v13105_v35 = vrot.slane %v10757_v12, 7 }
 0x320   : > { %13103 = vst [vmem:[#allocation20_spill] sm:$0xff] %v10917_v63  ;;  %v10933_v36 = vsel %vm4059_vm9, %v4027_v11, %v4091_v22  ;;  %v10935_v7 = vsel %vm4062_vm5, %v4030_v49, %v4094_v20  ;;  %vm13110_vm1 = vnez %v12915_v46  ;;  %v4223_v58 = vrot.slane %v10917_v63, 7  ;;  %vm13114_vm9 = vmmov %vm13102_vm11 }
 0x321   : > { %v10928_v23 = vsel %vm13107_vm13, %v13106_v10, %v13105_v35  ;;  %13109 = vst [vmem:[#allocation19_spill] sm:$0xff] %v10933_v36  ;;  %v8316_v59 = vpop.f32.mrb[28].mxu0  ;;  %v10937_v39 = vsel %vm4060_vm15, %v4028_v61, %v4092_v6  ;;  %v4218_v35 = vrot.slane %v10883_v34, 7  ;;  %v10948_v22 = vpack.c.bf16 %v10935_v7, %v10917_v63  ;;  %vm13117_vm5 = vmmov %vm13107_vm13 }
 0x322   : > { %13108 = vst [vmem:[#allocation32_spill] sm:$0xff] %v10928_v23  ;;  %v4033_v30 = vadd.f32 %v8316_v59, %v10586_v51  ;;  %v3949_v52 = vpop.f32.mrb[29].mxu0  ;;  %v4275_v10 = vsel %vm13110_vm1, 0.0, %v10928_v23  ;;  %v4221_v61 = vrot.slane %v10933_v36, 7  ;;  %v10955_v6 = vpack.c.bf16 %v10937_v39, %v10933_v36  ;;  %vm13120_vm15 = vmmov %vm13117_vm5 }
 0x323   : > { %13111 = vst [vmem:[#allocation79_spill] sm:$0xff] %v10948_v22  ;;  %v8317_v49 = vpop.f32.mrb[30].mxu0  ;;  %v4031_v13 = vadd.f32 %v10586_v51, %v3949_v52  ;;  %v10961_v23 = vpack.c.bf16 %v10878_v62, %v4275_v10  ;;  %v13115_v11 = vrot.slane %v10812_v45, 7  ;;  %v13116_v20 = vrot.slane %v10816_v38, 7  ;;  %vm13124_vm11 = vmmov %vm13117_vm5 }
 0x324   : > { %13112 = vst [vmem:[#allocation23_spill] sm:$0xff] %v10955_v6  ;;  %v3952_v59 = vpop.f32.mrb[31].mxu0  ;;  %v4034_v5 = vadd.f32 %v8317_v49, %v10586_v51  ;;  %v4097_v34 = vmul.f32 0.2, %v4033_v30  ;;  %8345 = vmatmul.mubr.msk.bf16.gmra.mrb[24].mxu1 %vm13114_vm9, %v10955_v6  ;;  %v13119_v49 = vrot.slane %v10759_v40, 7  ;;  %v13122_v10 = vrot.slane %v10810_v3, 7 }
 0x325   : > { %v4032_v46 = vadd.f32 %v10586_v51, %v3952_v59  ;;  %13113 = vst [vmem:[#allocation25_spill] sm:$0xff] %v10961_v23  ;;  %v10971_v63 = vsel %vm13117_vm5, %v13116_v20, %v13115_v11  ;;  %v13118_v52 = vmov %v13116_v20  ;;  %v13123_v59 = vrot.slane %v10807_v2, 7  ;;  %v13343_v57 = vld [vmem:[#allocation21_spill] sm:$0xff] }
 0x326   : > { %v10979_v51 = vsel %vm13120_vm15, %v13119_v49, %v13118_v52  ;;  %v4224_v23 = vrot.slane %v10935_v7, 7  ;;  %vm4065_vm13 = vcmp.ge.f32.partialorder %v4033_v30, 0.0  ;;  %vm4063_vm9 = vcmp.ge.f32.partialorder %v4031_v13, 0.0 }
 0x327   : > { %13121 = vst [vmem:[#allocation78_spill] sm:$0xff] %v10979_v51  ;;  %v10987_v6 = vsel %vm13124_vm11, %v13123_v59, %v13122_v10  ;;  %v4095_v11 = vmul.f32 0.2, %v4031_v13  ;;  %vm13125_vm5 = vcmask 64512   ;;  %vm4066_vm7 = vcmp.ge.f32.partialorder %v4034_v5, 0.0 }
 0x328   : > { %8348 = vmatprep.mubr.msk.bf16.mxu1 %vm13125_vm5, %v10948_v22  ;;  %v4098_v20 = vmul.f32 0.2, %v4034_v5  ;;  %vm4064_vm15 = vcmp.ge.f32.partialorder %v4032_v46, 0.0  ;;  %v4096_v52 = vmul.f32 0.2, %v4032_v46  ;;  %v4277_v62 = vsel %vm13126_vm12, 0.0, %v10979_v51  ;;  %vm13129_vm5 = vmmov %vm13124_vm11 }
 0x329   : > { %v10992_v49 = vsel %vm4063_vm9, %v4031_v13, %v4095_v11  ;;  %v13127_v10 = vmov %v13123_v59  ;;  %v13128_v59 = vrot.slane %v10812_v45, 7  ;;  %v11007_v22 = vsel %vm13129_vm5, %v4217_v9, %v4218_v35  ;;  %vm13137_vm9 = vmmov %vm13129_vm5 }
 0x32a   : > { %v4222_v37 = vrot.slane %v10937_v39, 7  ;;  %v11010_v13 = vsel %vm4065_vm13, %v4033_v30, %v4097_v34  ;;  %v11012_v11 = vsel %vm4066_vm7, %v4034_v5, %v4098_v20  ;;  %v4128_v29 = vsel %vm4064_vm15, %v4032_v46, %v4096_v52  ;;  %vm13134_vm13 = vmmov %vm13129_vm5 }
 0x32b   : > { %v11003_v36 = vsel %vm13124_vm11, %v13128_v59, %v13127_v10  ;;  %v11018_v45 = vpack.c.bf16 %v11012_v11, %v11010_v13  ;;  %v11020_v10 = vrot.slane %v4128_v29, 7  ;;  %v4225_v59 = vrot.slane %v10992_v49, 7  ;;  %vm13140_vm15 = vmmov %vm13129_vm5 }
 0x32c   : > { %v11024_v40 = vpack.c.bf16 %v4128_v29, %v10992_v49  ;;  %v11027_v34 = vpack.c.bf16 %v10971_v63, %v4277_v62  ;;  %vm13133_vm7 = vnez %v12922_v8  ;;  %v13136_v20 = vrot.slane %v10810_v3, 7  ;;  %vm13145_vm8 = vmmov %vm13137_vm9 }
 0x32d   : > { %13130 = vst [vmem:[#allocation24_spill] sm:$0xff] %v11018_v45  ;;  %v4279_v46 = vsel %vm13133_vm7, 0.0, %v11003_v36  ;;  %v4258_v5 = vsel %vm13134_vm13, %v11020_v10, %v12897_v25  ;;  %v13138_v62 = vrot.slane %v10881_v54, 7  ;;  %v13139_v51 = vrot.slane %v10860_v28, 7 }
 0x32e   : > { %13131 = vst [vmem:[#allocation28_spill] sm:$0xff] %v11024_v40  ;;  %13132 = vst [vmem:[#allocation80_spill] sm:$0xff] %v11027_v34  ;;  %v11037_v30 = vpack.c.bf16 %v10987_v6, %v4279_v46  ;;  %v11043_v52 = vsel %vm13137_vm9, %v13136_v20, %v4217_v9  ;;  %vm13141_vm11 = vcmask 64512   ;;  %vm13142_vm5 = vnez %v12769_v0 }
 0x32f   : > { %v11051_v2 = vsel %vm13140_vm15, %v13139_v51, %v13138_v62  ;;  %8349 = vmatmul.mubr.msk.bf16.gmra.mrb[28].mxu1 %vm13141_vm11, %v11024_v40  ;;  %v4259_v46 = vsel %vm13142_vm5, 0.0, %v4258_v5  ;;  %vm13143_vm13 = vnez %v12925_v16  ;;  %v13144_v9 = vmov %v13139_v51  ;;  %vm13149_vm11 = vmmov %vm13145_vm8 }
 0x330   : > { %13135 = vst [vmem:[#allocation31_spill] sm:$0xff] %v11037_v30  ;;  %v4281_v45 = vsel %vm13143_vm13, 0.0, %v11043_v52  ;;  %v11064_v20 = vsel %vm13137_vm9, %v4218_v35, %v13144_v9  ;;  %v11068_v51 = vsel %vm13145_vm8, %v4221_v61, %v4222_v37  ;;  %v4387_v62 = vpack.c.bf16 %v12897_v25, %v4259_v46  ;;  %vm13152_vm5 = vmmov %vm13137_vm9 }
 0x331   : > { %v11072_v40 = vpack.c.bf16 %v11007_v22, %v4281_v45  ;;  %vm13147_vm15 = vnez %v12927_v55  ;;  %v13148_v0 = vrot.slane %v10881_v54, 7  ;;  %vm13151_vm8 = vnez %v12800_v33 }
 0x332   : > { %v4283_v5 = vsel %vm13147_vm15, 0.0, %v11064_v20  ;;  %v11091_v45 = vsel %vm13137_vm9, %v4223_v58, %v4224_v23  ;;  %v11095_v9 = vsel %vm13152_vm5, %v4222_v37, %v4223_v58  ;;  %vm13153_vm15 = vcmask 64512   ;;  %vm13157_vm9 = vmmov %vm13152_vm5 }
 0x333   : > { %13146 = vst [vmem:[#allocation81_spill] sm:$0xff] %v11072_v40  ;;  %v11081_v30 = vsel %vm13149_vm11, %v13148_v0, %v4221_v61  ;;  %v11084_v35 = vpack.c.bf16 %v11051_v2, %v4283_v5  ;;  %8354 = vmatprep.mubr.msk.bf16.mxu1 %vm13153_vm15, %v4387_v62  ;;  %vm13155_vm11 = vnez %v12802_v32  ;;  %v11111_v25 = vsel %vm13157_vm9, %v4224_v23, %v4225_v59 }
 0x334   : > { %v4285_v46 = vsel %vm13151_vm8, 0.0, %v11081_v30  ;;  %v4287_v61 = vsel %vm13155_vm11, 0.0, %v11095_v9  ;;  %vm13156_vm8 = vmmov %vm13152_vm5  ;;  %v11114_v58 = vrot.slane %v4128_v29, 1  ;;  %v13161_v40 = vrot.slane %v10594_v14, 1 }
 0x335   : > { %13150 = vst [vmem:[#allocation29_spill] sm:$0xff] %v11084_v35  ;;  %v11099_v0 = vpack.c.bf16 %v11068_v51, %v4285_v46  ;;  %v11107_v5 = vsel %vm13156_vm8, %v4225_v59, %v11020_v10  ;;  %v11117_v62 = vpack.c.bf16 %v11091_v45, %v4287_v61  ;;  %v4289_v46 = vsel %vm12937_vm6, 0.0, %v11111_v25 }
 0x336   : > { %v13160_v35 = vrot.slane %v10655_v42, 1  ;;  %vm13162_vm5 = vcmp.lt.s32.totalorder %v9285_v19, 7  ;;  %v13164_v29 = vmov %v13161_v40  ;;  %v13167_v61 = vrot.slane %v10648_v53, 1 }
 0x337   : > { %13154 = vst [vmem:[#allocation82_spill] sm:$0xff] %v11099_v0  ;;  %13158 = vst [vmem:[#allocation83_spill] sm:$0xff] %v11117_v62  ;;  %v11123_v0 = vpack.c.bf16 %v11107_v5, %v4289_v46  ;;  %v13168_v46 = vrot.slane %v10652_v1, 1  ;;  %v13179_v62 = vrot.slane %v10704_v60, 1 }
 0x338   : > { %v11131_v23 = vsel %vm13162_vm5, %v13161_v40, %v13160_v35  ;;  %vm13165_vm15 = vmmov %vm13162_vm5 }
 0x339   : > { %13159 = vst [vmem:[#allocation46_spill] sm:$0xff] %v11123_v0  ;;  %13163 = vst [vmem:[#allocation48_spill] sm:$0xff] %v11131_v23  ;;  %v11138_v59 = vsel %vm13165_vm15, %v10664_v50, %v13164_v29  ;;  %v4360_v40 = vsel %vm12976_vm4, 0.0, %v11131_v23  ;;  %v5273_v14 = vsel %vm12843_vm3, 0.0, %v11131_v23  ;;  %v13170_v35 = vmov %v13168_v46  ;;  %v13229_v23 = vld [vmem:[#allocation34_spill] sm:$0xff] }
 0x33a   : > { %13166 = vst [vmem:[#allocation51_spill] sm:$0xff] %v11138_v59  ;;  %vm13169_vm8 = vmmov %vm13162_vm5  ;;  %v13171_v29 = vrot.slane %v10655_v42, 1  ;;  %v11171_v50 = vpack.c.bf16 %v4360_v40, %v11138_v59  ;;  %v11174_v1 = vpack.c.bf16 %v5273_v14, %v11138_v59  ;;  %v13180_v40 = vrot.slane %v10650_v43, 1 }
 0x33b   : > { %v11146_v37 = vsel %vm13169_vm8, %v13168_v46, %v13167_v61  ;;  %vm13172_vm9 = vmmov %vm13162_vm5  ;;  %v11168_v46 = vld [vmem:[%s12215_s3 + $0xc] sm:$0xf]  ;;  %vm13177_vm5 = vcmask 64512  }
 0x33c   : > { %v11160_v0 = vsel %vm13172_vm9, %v13171_v29, %v13170_v35  ;;  %v4362_v61 = vsel %vm12981_vm2, 0.0, %v11146_v37  ;;  %13173 = vst [vmem:[#allocation52_spill] sm:$0xff] %v11168_v46  ;;  %13174 = vst [vmem:[#allocation27_spill] sm:$0xff] %v11171_v50  ;;  %v6251_v35 = vsel %vm12843_vm3, 0.0, %v11146_v37  ;;  %8355 = vmatmul.mubr.msk.bf16.vlgmr.msra.gmra.mrb[0].mxu1 %vm13177_vm5, %v10674_v48  ;;  %v13184_v48 = vrot.slane %v10688_v31, 1  ;;  %v13218_v50 = vld [vmem:[#allocation61_spill] sm:$0xff] }
 0x33d   : > { %13175 = vst [vmem:[#allocation76_spill] sm:$0xff] %v11174_v1  ;;  %v11177_v42 = vpack.c.bf16 %v4362_v61, %v11160_v0  ;;  %v11185_v29 = vpack.c.bf16 %v6251_v35, %v11160_v0  ;;  %vm13181_vm15 = vmmov %vm13169_vm8  ;;  %v13182_v61 = vmov %v13180_v40  ;;  %v13183_v1 = vrot.slane %v10648_v53, 1  ;;  %8387 = vmatpush3.bf16.msra.mxu1 %v10662_v17  ;;  %8358 = vmatprep.mubr.msk.bf16.mxu1 %vm13177_vm5, %v10717_v21 }
 0x33e   : > { %v11193_v14 = vsel %vm13181_vm15, %v13180_v40, %v13179_v62  ;;  %v13185_v35 = vrot.slane %v10695_v24, 1  ;;  %vm13186_vm9 = vmmov %vm13169_vm8  ;;  %vm13187_vm15 = vnez %v12983_v41  ;;  %v13190_v17 = vrot.slane %v10766_v15, 1 }
 0x33f   : > { %13176 = vst [vmem:[#allocation89_spill] sm:$0xff] %v11177_v42  ;;  %13178 = vst [vmem:[#allocation90_spill] sm:$0xff] %v11185_v29  ;;  %v11201_v42 = vsel %vm13169_vm8, %v13183_v1, %v13182_v61  ;;  %v4364_v53 = vsel %vm13187_vm15, 0.0, %v11193_v14  ;;  %v13191_v21 = vrot.slane %v10693_v44, 1  ;;  %vm13193_vm3 = vcmask 1043456  }
 0x340   : > { %v11209_v29 = vsel %vm13186_vm9, %v13185_v35, %v13184_v48  ;;  %v13188_v43 = vmov %v13185_v35  ;;  %vm13189_vm9 = vnez %v12988_v4  ;;  %vm13192_vm5 = vmmov %vm13169_vm8  ;;  %9148 = vmatprep.subr.msk.bf16.mxu1 %vm13193_vm3, %v11168_v46  ;;  %v11239_v24 = vpack.c.bf16 %v4364_v53, %v11201_v42 }
 0x341   : > { %v11223_v1 = vsel %vm13169_vm8, %v13179_v62, %v13188_v43  ;;  %v4366_v40 = vsel %vm13189_vm9, 0.0, %v11209_v29  ;;  %v11234_v61 = vsel %vm13192_vm5, %v13191_v21, %v13190_v17  ;;  %v13196_v48 = vmov %v13191_v21  ;;  %vm13198_vm8 = vmmov %vm13192_vm5 }
 0x342   : > { %13194 = vst [vmem:[#allocation91_spill] sm:$0xff] %v11239_v24  ;;  %v11242_v60 = vpack.c.bf16 %v4366_v40, %v11223_v1  ;;  %v13197_v35 = vrot.slane %v10688_v31, 1  ;;  %vm13199_vm5 = vnez %v12990_v18  ;;  %v13201_v53 = vrot.slane %v10757_v12, 1  ;;  %vm13203_vm3 = vmmov %vm13198_vm8  ;;  %v13211_v24 = vld [vmem:[#allocation84_spill] sm:$0xff] }
 0x343   : > { %v4368_v62 = vsel %vm13199_vm5, 0.0, %v11234_v61  ;;  %v13202_v40 = vrot.slane %v10761_v56, 1  ;;  %v13205_v21 = vrot.slane %v10766_v15, 1  ;;  %vm13210_vm5 = vmmov %vm13203_vm3  ;;  %v13214_v15 = vrot.slane %v10757_v12, 1 }
 0x344   : > { %13195 = vst [vmem:[#allocation92_spill] sm:$0xff] %v11242_v60  ;;  %v11250_v43 = vsel %vm13198_vm8, %v13197_v35, %v13196_v48  ;;  %vm13206_vm8 = vmmov %vm13203_vm3  ;;  %v13207_v35 = vrot.slane %v10816_v38, 1  ;;  %v13219_v46 = vrot.slane %v13218_v50, 1 }
 0x345   : > { %v11256_v17 = vpack.c.bf16 %v4368_v62, %v11250_v43  ;;  %v11264_v44 = vsel %vm13203_vm3, %v13202_v40, %v13201_v53  ;;  %v13204_v31 = vmov %v13202_v40  ;;  %v13208_v62 = vld [vmem:[#allocation71_spill] sm:$0xff]  ;;  %vm13212_vm3 = vnez %v13211_v24  ;;  %vm13215_vm9 = vmmov %vm13210_vm5 }
 0x346   : > { %v11272_v48 = vsel %vm13206_vm8, %v13205_v21, %v13204_v31  ;;  %v4370_v53 = vsel %vm13212_vm3, 0.0, %v11264_v44  ;;  %v13216_v31 = vld [vmem:[#allocation85_spill] sm:$0xff] }
 0x347   : > { %13200 = vst [vmem:[#allocation93_spill] sm:$0xff] %v11256_v17  ;;  %v13209_v17 = vrot.slane %v13208_v62, 1  ;;  %vm13217_vm8 = vnez %v13216_v31  ;;  %v11305_v62 = vpack.c.bf16 %v4370_v53, %v11272_v48  ;;  %v13232_v53 = vld [vmem:[#allocation13_spill] sm:$0xff] }
 0x349   : > { %v11280_v60 = vsel %vm13210_vm5, %v13209_v17, %v13207_v35  ;;  %v13213_v56 = vmov %v13209_v17  ;;  %v13220_v17 = vld [vmem:[#allocation64_spill] sm:$0xff]  ;;  %13223 = vst [vmem:[#allocation61_spill] sm:$0xff] %v11305_v62 }
 0x34a   : > { %v11291_v40 = vsel %vm13215_vm9, %v13214_v15, %v13213_v56  ;;  %v4372_v21 = vsel %vm13217_vm8, 0.0, %v11280_v60  ;;  %v13221_v35 = vrot.slane %v13220_v17, 1  ;;  %v13226_v15 = vrot.slane %v10816_v38, 1  ;;  %vm13227_vm9 = vmmov %vm13210_vm5 }
 0x34b   : > { %v11308_v12 = vpack.c.bf16 %v4372_v21, %v11291_v40  ;;  %vm13230_vm8 = vnez %v13229_v23  ;;  %v13234_v21 = vrot.slane %v10810_v3, 1  ;;  %v13251_v23 = vld [vmem:[#allocation19_spill] sm:$0xff] }
 0x34c   : > { %v11302_v26 = vsel %vm13210_vm5, %v13221_v35, %v13219_v46  ;;  %v13225_v56 = vmov %v13221_v35  ;;  %v13233_v35 = vrot.slane %v13232_v53, 1  ;;  %v13252_v31 = vrot.slane %v13251_v23, 1 }
 0x34d   : > { %13222 = vst [vmem:[#allocation71_spill] sm:$0xff] %v11302_v26  ;;  %13224 = vst [vmem:[#allocation64_spill] sm:$0xff] %v11308_v12  ;;  %v11316_v59 = vsel %vm13227_vm9, %v13226_v15, %v13225_v56  ;;  %v4374_v34 = vsel %vm13230_vm8, 0.0, %v11302_v26  ;;  %v13236_v38 = vmov %v13234_v21  ;;  %v13237_v56 = vrot.slane %v13218_v50, 1 }
 0x34e   : > { %13228 = vst [vmem:[#allocation94_spill] sm:$0xff] %v11316_v59  ;;  %v11322_v46 = vpack.c.bf16 %v4374_v34, %v11316_v59  ;;  %v11330_v17 = vsel %vm13210_vm5, %v13234_v21, %v13233_v35  ;;  %vm13238_vm9 = vmmov %vm13210_vm5  ;;  %v13239_v12 = vrot.slane %v10860_v28, 1  ;;  %v13240_v34 = vld [vmem:[#allocation11_spill] sm:$0xff]  ;;  %v13244_v59 = vld [vmem:[#allocation86_spill] sm:$0xff]  ;;  %v13247_v50 = vrot.slane %v13232_v53, 1 }
 0x34f   : > { %13235 = vst [vmem:[#allocation13_spill] sm:$0xff] %v11330_v17  ;;  %v11338_v15 = vsel %vm13238_vm9, %v13237_v56, %v13236_v38  ;;  %vm13242_vm8 = vmmov %vm13210_vm5  ;;  %vm13245_vm5 = vnez %v13244_v59  ;;  %v13249_v38 = vld [vmem:[#allocation41_spill] sm:$0xff]  ;;  %v13256_v59 = vld [vmem:[#allocation18_spill] sm:$0xff] }
 0x350   : > { %13231 = vst [vmem:[#allocation95_spill] sm:$0xff] %v11322_v46  ;;  %v13241_v46 = vrot.slane %v13240_v34, 1  ;;  %v4376_v35 = vsel %vm13245_vm5, 0.0, %v11330_v17  ;;  %vm13248_vm3 = vmmov %vm13242_vm8  ;;  %vm13250_vm9 = vnez %v13249_v38  ;;  %vm13257_vm5 = vcmask 64512  }
 0x351   : > { %8359 = vmatmul.mubr.msk.bf16.gmra.mrb[4].mxu1 %vm13257_vm5, %v13256_v59  ;;  %v11373_v53 = vpack.c.bf16 %v4376_v35, %v11338_v15  ;;  %v13267_v35 = vld [vmem:[#allocation20_spill] sm:$0xff] }
 0x352   : > { %v11346_v62 = vsel %vm13242_vm8, %v13241_v46, %v13239_v12  ;;  %v13246_v3 = vmov %v13241_v46  ;;  %v13253_v12 = vrot.slane %v10881_v54, 1  ;;  %vm13254_vm8 = vmmov %vm13248_vm3  ;;  %v13269_v54 = vrot.slane %v10937_v39, 1 }
 0x353   : > { %13243 = vst [vmem:[#allocation11_spill] sm:$0xff] %v11346_v62  ;;  %v11357_v21 = vsel %vm13248_vm3, %v13247_v50, %v13246_v3  ;;  %v4378_v56 = vsel %vm13250_vm9, 0.0, %v11346_v62  ;;  %13258 = vst [vmem:[#allocation18_spill] sm:$0xff] %v11373_v53  ;;  %v13261_v50 = vrot.slane %v10860_v28, 1  ;;  %v13265_v62 = vld [vmem:[#allocation75_spill] sm:$0xff]  ;;  %v13279_v53 = vld [vmem:[#allocation42_spill] sm:$0xff] }
 0x354   : > { %v11368_v46 = vsel %vm13254_vm8, %v13253_v12, %v13252_v31  ;;  %v11376_v34 = vpack.c.bf16 %v4378_v56, %v11357_v21  ;;  %v13260_v3 = vmov %v13253_v12  ;;  %v13263_v31 = vld [vmem:[#allocation44_spill] sm:$0xff]  ;;  %8362 = vmatprep.mubr.msk.bf16.mxu1 %vm13257_vm5, %v13265_v62  ;;  %v13268_v56 = vrot.slane %v13267_v35, 1  ;;  %vm13270_vm9 = vmmov %vm13248_vm3 }
 0x355   : > { %13255 = vst [vmem:[#allocation19_spill] sm:$0xff] %v11368_v46  ;;  %v11384_v38 = vsel %vm13248_vm3, %v13261_v50, %v13260_v3  ;;  %vm13264_vm8 = vnez %v13263_v31  ;;  %v13272_v3 = vmov %v13269_v54  ;;  %v13273_v50 = vrot.slane %v13251_v23, 1  ;;  %vm13277_vm5 = vmmov %vm13248_vm3  ;;  %v13289_v31 = vld [vmem:[#allocation55_spill] sm:$0xff] }
 0x356   : > { %13259 = vst [vmem:[#allocation96_spill] sm:$0xff] %v11376_v34  ;;  %13262 = vst [vmem:[#allocation97_spill] sm:$0xff] %v11384_v38  ;;  %v4380_v12 = vsel %vm13264_vm8, 0.0, %v11368_v46  ;;  %v11400_v28 = vsel %vm13270_vm9, %v13269_v54, %v13268_v56  ;;  %v13275_v62 = vrot.slane %v10992_v49, 1  ;;  %vm13280_vm9 = vnez %v13279_v53  ;;  %v13288_v53 = vld [vmem:[#allocation65_spill] sm:$0xff]  ;;  %v13295_v49 = vld [vmem:[#allocation88_spill] sm:$0xff] }
 0x357   : > { %v11392_v59 = vpack.c.bf16 %v4380_v12, %v11384_v38  ;;  %13271 = vst [vmem:[#allocation20_spill] sm:$0xff] %v11400_v28  ;;  %v11408_v34 = vsel %vm13248_vm3, %v13273_v50, %v13272_v3  ;;  %v13276_v12 = vrot.slane %v10935_v7, 1  ;;  %v4382_v56 = vsel %vm13280_vm9, 0.0, %v11400_v28  ;;  %vm13283_vm8 = vmmov %vm13248_vm3  ;;  %v13285_v3 = vld [vmem:[#allocation87_spill] sm:$0xff]  ;;  %v13299_v46 = vld [vmem:[#allocation40_spill] sm:$0xff] }
 0x358   : > { %13274 = vst [vmem:[#allocation98_spill] sm:$0xff] %v11408_v34  ;;  %v13282_v23 = vrot.slane %v13267_v35, 1  ;;  %vm13286_vm3 = vnez %v13285_v3  ;;  %vm13290_vm9 = vnez %v13289_v31  ;;  %v11443_v35 = vpack.c.bf16 %v4382_v56, %v11408_v34  ;;  %v13305_v34 = vld [vmem:[#allocation6_spill] sm:$0xff] }
 0x359   : > { %13266 = vst [vmem:[#allocation75_spill] sm:$0xff] %v11392_v59  ;;  %v11416_v59 = vsel %vm13277_vm5, %v13276_v12, %v13275_v62  ;;  %v13281_v39 = vmov %v13276_v12  ;;  %v11437_v12 = vsel %vm13277_vm5, %v13275_v62, %v11114_v58  ;;  %v4269_v7 = vsel %vm13290_vm9, 0.0, %v13288_v53  ;;  %v13297_v62 = vld [vmem:[#allocation39_spill] sm:$0xff]  ;;  %v13318_v28 = vld [vmem:[#allocation78_spill] sm:$0xff] }
 0x35a   : > { %13278 = vst [vmem:[#allocation99_spill] sm:$0xff] %v11416_v59  ;;  %v11427_v54 = vsel %vm13283_vm8, %v13282_v23, %v13281_v39  ;;  %v4384_v50 = vsel %vm13286_vm3, 0.0, %v11416_v59  ;;  %13287 = vst [vmem:[#allocation101_spill] sm:$0xff] %v11437_v12  ;;  %v13293_v23 = vld [vmem:[#allocation72_spill] sm:$0xff]  ;;  %vm13296_vm3 = vnez %v13295_v49  ;;  %v5178_v38 = vsel %vm12904_vm14, 0.0, %v13297_v62 }
 0x35b   : > { %13284 = vst [vmem:[#allocation100_spill] sm:$0xff] %v11427_v54  ;;  %13291 = vst [vmem:[#allocation102_spill] sm:$0xff] %v11443_v35  ;;  %v11446_v39 = vpack.c.bf16 %v4384_v50, %v11427_v54  ;;  %v11458_v53 = vrot.slane %v13299_v46, 1  ;;  %v13302_v50 = vld [vmem:[#allocation33_spill] sm:$0xff]  ;;  %v5140_v35 = vrot.slane %v11010_v13, 7  ;;  %v13304_v54 = vld [vmem:[#allocation62_spill] sm:$0xff] }
 0x35c   : > { %vm13294_vm8 = vmmov %vm13277_vm5  ;;  %v13306_v49 = vld [vmem:[#allocation8_spill] sm:$0xff]  ;;  %v11475_v46 = vrot.slane %v11012_v11, 7  ;;  %vm13315_vm5 = vcmask 64512   ;;  %vm13332_vm14 = vcmp.lt.s32.totalorder %v9285_v19, 1 }
 0x35d   : > { %13292 = vst [vmem:[#allocation103_spill] sm:$0xff] %v11446_v39  ;;  %v4354_v3 = vsel %vm13294_vm8, %v11114_v58, %v13293_v23  ;;  %13300 = vst [vmem:[#allocation39_spill] sm:$0xff] %v11458_v53  ;;  %v11464_v39 = vpack.c.bf16 %v13302_v50, %v5178_v38  ;;  %v4392_v23 = vpack.c.bf16 %v13304_v54, %v4269_v7  ;;  %v5186_v62 = vsel %vm9700_vm10, 0.0, %v13306_v49  ;;  %v13311_v38 = vld [vmem:[#allocation7_spill] sm:$0xff]  ;;  %v13316_v54 = vld [vmem:[#allocation9_spill] sm:$0xff] }
 0x35e   : > { %v4386_v59 = vsel %vm13296_vm3, 0.0, %v4354_v3  ;;  %v5184_v3 = vsel %vm13290_vm9, 0.0, %v13305_v34  ;;  %13308 = vst [vmem:[#allocation104_spill] sm:$0xff] %v11475_v46  ;;  %v11481_v50 = vpack.c.bf16 %v13311_v38, %v5186_v62  ;;  %v5190_v34 = vsel %vm13110_vm1, 0.0, %v13318_v28  ;;  %vm13322_vm8 = vmmov %vm13315_vm5  ;;  %v13406_v49 = vld [vmem:[#allocation81_spill] sm:$0xff] }
 0x35f   : > { %v11461_v56 = vpack.c.bf16 %v4386_v59, %v11437_v12  ;;  %13303 = vst [vmem:[#allocation33_spill] sm:$0xff] %v11464_v39  ;;  %v13309_v59 = vld [vmem:[#allocation5_spill] sm:$0xff]  ;;  %v13313_v39 = vld [vmem:[#allocation32_spill] sm:$0xff]  ;;  %8363 = vmatmul.mubr.msk.bf16.gmra.mrb[8].mxu1 %vm13315_vm5, %v4392_v23  ;;  %v5194_v62 = vsel %vm13133_vm7, 0.0, %v11043_v52  ;;  %v11502_v23 = vpack.c.bf16 %v10971_v63, %v5190_v34  ;;  %vm13327_vm5 = vnez %v12927_v55 }
 0x360   : > { %13312 = vst [vmem:[#allocation7_spill] sm:$0xff] %v11481_v50  ;;  %v5188_v7 = vsel %vm13100_vm0, 0.0, %v13313_v39  ;;  %v13321_v50 = vld [vmem:[#allocation16_spill] sm:$0xff] }
 0x361   : > { %13301 = vst [vmem:[#allocation40_spill] sm:$0xff] %v11461_v56  ;;  %v11478_v56 = vpack.c.bf16 %v13309_v59, %v5184_v3  ;;  %v11488_v31 = vpack.c.bf16 %v13316_v54, %v5188_v7  ;;  %v5192_v3 = vsel %vm13126_vm12, 0.0, %v11003_v36  ;;  %8366 = vmatprep.mubr.msk.bf16.mxu1 %vm13322_vm8, %v13321_v50  ;;  %13323 = vst [vmem:[#allocation57_spill] sm:$0xff] %v11502_v23  ;;  %v5198_v50 = vsel %vm13327_vm5, 0.0, %v11081_v30 }
 0x362   : > { %v11505_v7 = vpack.c.bf16 %v10987_v6, %v5192_v3  ;;  %vm13328_vm8 = vnez %v12800_v33  ;;  %v5202_v3 = vsel %vm13155_vm11, 0.0, %v11111_v25 }
 0x363   : > { %13310 = vst [vmem:[#allocation5_spill] sm:$0xff] %v11478_v56  ;;  %13317 = vst [vmem:[#allocation32_spill] sm:$0xff] %v11488_v31  ;;  %v11508_v31 = vpack.c.bf16 %v11007_v22, %v5194_v62  ;;  %v5196_v56 = vsel %vm13143_vm13, 0.0, %v11064_v20  ;;  %v5200_v34 = vsel %vm13328_vm8, 0.0, %v11095_v9  ;;  %v11526_v62 = vpack.c.bf16 %v11068_v51, %v5198_v50 }
 0x364   : > { %13324 = vst [vmem:[#allocation9_spill] sm:$0xff] %v11505_v7  ;;  %v11514_v12 = vpack.c.bf16 %v11051_v2, %v5196_v56  ;;  %v11532_v56 = vpack.c.bf16 %v11107_v5, %v5202_v3  ;;  %v5236_v7 = vrot.slane %v11010_v13, 1  ;;  %vm13333_vm8 = vmmov %vm13332_vm14  ;;  %v5275_v50 = vsel %vm12976_vm4, 0.0, %v11146_v37 }
 0x365   : > { %13325 = vst [vmem:[#allocation78_spill] sm:$0xff] %v11508_v31  ;;  %13329 = vst [vmem:[#allocation16_spill] sm:$0xff] %v11526_v62  ;;  %v11529_v31 = vpack.c.bf16 %v11091_v45, %v5200_v34  ;;  %v5143_v23 = vsel %vm13333_vm8, %v11020_v10, %v5140_v35  ;;  %v5277_v34 = vsel %vm12981_vm2, 0.0, %v11193_v14  ;;  %v11548_v3 = vrot.slane %v11012_v11, 1  ;;  %v13355_v62 = vld [vmem:[#allocation94_spill] sm:$0xff] }
 0x366   : > { %13326 = vst [vmem:[#allocation58_spill] sm:$0xff] %v11514_v12  ;;  %13331 = vst [vmem:[#allocation106_spill] sm:$0xff] %v11532_v56  ;;  %v5142_v12 = vsel %vm13332_vm14, %v5140_v35, %v11475_v46  ;;  %v5204_v56 = vsel %vm12937_vm6, 0.0, %v5143_v23  ;;  %v11553_v13 = vpack.c.bf16 %v5275_v50, %v11160_v0  ;;  %v5279_v37 = vsel %vm13187_vm15, 0.0, %v11209_v29  ;;  %v13359_v46 = vld [vmem:[#allocation19_spill] sm:$0xff] }
 0x367   : > { %13330 = vst [vmem:[#allocation105_spill] sm:$0xff] %v11529_v31  ;;  %v11556_v31 = vpack.c.bf16 %v5277_v34, %v11201_v42  ;;  %v11558_v10 = vpack.c.bf16 %v5142_v12, %v5204_v56  ;;  %vm13337_vm14 = vnez %v12988_v4  ;;  %vm13338_vm8 = vnez %v12990_v18 }
 0x368   : > { %13334 = vst [vmem:[#allocation107_spill] sm:$0xff] %v11553_v13  ;;  %v5281_v11 = vsel %vm13337_vm14, 0.0, %v11234_v61  ;;  %v5283_v35 = vsel %vm13338_vm8, 0.0, %v11264_v44  ;;  %v11570_v0 = vpack.c.bf16 %v5279_v37, %v11223_v1  ;;  %vm13342_vm6 = vnez %v13211_v24  ;;  %v13346_v13 = vld [vmem:[#allocation85_spill] sm:$0xff] }
 0x369   : > { %13335 = vst [vmem:[#allocation108_spill] sm:$0xff] %v11556_v31  ;;  %13336 = vst [vmem:[#allocation109_spill] sm:$0xff] %v11558_v10  ;;  %v11573_v50 = vpack.c.bf16 %v5281_v11, %v11250_v43  ;;  %v11576_v56 = vpack.c.bf16 %v5283_v35, %v11272_v48  ;;  %v5285_v34 = vsel %vm13342_vm6, 0.0, %v11280_v60  ;;  %vm13344_vm15 = vcmask 64512   ;;  %v13348_v11 = vld [vmem:[#allocation34_spill] sm:$0xff]  ;;  %v13350_v35 = vld [vmem:[#allocation11_spill] sm:$0xff] }
 0x36a   : > { %13339 = vst [vmem:[#allocation110_spill] sm:$0xff] %v11570_v0  ;;  %8367 = vmatmul.mubr.msk.bf16.gmra.mrb[12].mxu1 %vm13344_vm15, %v13343_v57  ;;  %v11584_v31 = vpack.c.bf16 %v5285_v34, %v11291_v40  ;;  %vm13347_vm8 = vnez %v13346_v13  ;;  %vm13349_vm14 = vnez %v13348_v11  ;;  %v13353_v10 = vld [vmem:[#allocation25_spill] sm:$0xff]  ;;  %vm13354_vm6 = vmmov %vm13344_vm15 }
 0x36b   : > { %13340 = vst [vmem:[#allocation111_spill] sm:$0xff] %v11573_v50  ;;  %13341 = vst [vmem:[#allocation112_spill] sm:$0xff] %v11576_v56  ;;  %v5287_v37 = vsel %vm13347_vm8, 0.0, %v11302_v26  ;;  %v5289_v50 = vsel %vm13349_vm14, 0.0, %v11330_v17  ;;  %v13351_v56 = vld [vmem:[#allocation86_spill] sm:$0xff]  ;;  %8370 = vmatprep.mubr.msk.bf16.mxu1 %vm13354_vm6, %v13353_v10  ;;  %v13360_v13 = vld [vmem:[#allocation41_spill] sm:$0xff] }
 0x36c   : > { %13345 = vst [vmem:[#allocation21_spill] sm:$0xff] %v11584_v31  ;;  %vm13352_vm2 = vnez %v13351_v56  ;;  %v11598_v57 = vpack.c.bf16 %v5287_v37, %v13355_v62  ;;  %v11601_v34 = vpack.c.bf16 %v5289_v50, %v11338_v15  ;;  %vm13361_vm15 = vnez %v13360_v13  ;;  %v13362_v17 = vld [vmem:[#allocation97_spill] sm:$0xff]  ;;  %v13364_v56 = vld [vmem:[#allocation20_spill] sm:$0xff]  ;;  %v13367_v26 = vld [vmem:[#allocation99_spill] sm:$0xff] }
 0x36d   : > { %v5291_v0 = vsel %vm13352_vm2, 0.0, %v13350_v35  ;;  %v5293_v11 = vsel %vm13361_vm15, 0.0, %v13359_v46  ;;  %v13365_v35 = vld [vmem:[#allocation44_spill] sm:$0xff]  ;;  %v13368_v37 = vld [vmem:[#allocation42_spill] sm:$0xff]  ;;  %vm13370_vm14 = vcmp.lt.s32.totalorder %v9285_v19, 7 }
 0x36e   : > { %13356 = vst [vmem:[#allocation25_spill] sm:$0xff] %v11598_v57  ;;  %13357 = vst [vmem:[#allocation94_spill] sm:$0xff] %v11601_v34  ;;  %v11604_v31 = vpack.c.bf16 %v5291_v0, %v11357_v21  ;;  %v11610_v24 = vpack.c.bf16 %v5293_v11, %v13362_v17  ;;  %vm13366_vm2 = vnez %v13365_v35  ;;  %vm13369_vm6 = vnez %v13368_v37  ;;  %v13371_v50 = vld [vmem:[#allocation98_spill] sm:$0xff]  ;;  %v13373_v34 = vld [vmem:[#allocation100_spill] sm:$0xff] }
 0x36f   : > { %v5295_v10 = vsel %vm13366_vm2, 0.0, %v13364_v56  ;;  %v5297_v57 = vsel %vm13369_vm6, 0.0, %v13367_v26  ;;  %v5239_v0 = vsel %vm13370_vm14, %v11114_v58, %v5236_v7  ;;  %v13375_v11 = vld [vmem:[#allocation87_spill] sm:$0xff]  ;;  %vm13377_vm2 = vmmov %vm13370_vm14  ;;  %v13378_v56 = vld [vmem:[#allocation101_spill] sm:$0xff] }
 0x370   : > { %13358 = vst [vmem:[#allocation113_spill] sm:$0xff] %v11604_v31  ;;  %13363 = vst [vmem:[#allocation19_spill] sm:$0xff] %v11610_v24  ;;  %v11622_v31 = vpack.c.bf16 %v5295_v10, %v13371_v50  ;;  %v11625_v13 = vpack.c.bf16 %v5297_v57, %v13373_v34  ;;  %vm13376_vm15 = vnez %v13375_v11  ;;  %v5238_v35 = vsel %vm13377_vm2, %v5236_v7, %v11548_v3  ;;  %v13380_v26 = vld [vmem:[#allocation39_spill] sm:$0xff]  ;;  %v13384_v11 = vld [vmem:[#allocation49_spill] sm:$0xff] }
 0x371   : > { %v5299_v24 = vsel %vm13376_vm15, 0.0, %v5239_v0  ;;  %vm13381_vm14 = vmmov %vm13377_vm2  ;;  %vm13385_vm15 = vnez %v13384_v11  ;;  %v13386_v50 = vld [vmem:[#allocation8_spill] sm:$0xff]  ;;  %vm13390_vm2 = vcmask 64512   ;;  %v13508_v11 = vld [vmem:[#allocation9_spill] sm:$0xff] }
 0x372   : > { %13372 = vst [vmem:[#allocation114_spill] sm:$0xff] %v11622_v31  ;;  %13374 = vst [vmem:[#allocation115_spill] sm:$0xff] %v11625_v13  ;;  %v11633_v37 = vpack.c.bf16 %v5299_v24, %v13378_v56  ;;  %v5269_v58 = vsel %vm13381_vm14, %v11548_v3, %v13380_v26  ;;  %v13383_v13 = vld [vmem:[#allocation6_spill] sm:$0xff]  ;;  %v6162_v7 = vsel %vm13290_vm9, 0.0, %v13386_v50  ;;  %v13389_v10 = vld [vmem:[#allocation80_spill] sm:$0xff] }
 0x373   : > { %v5301_v31 = vsel %vm13296_vm3, 0.0, %v5269_v58  ;;  %v6160_v34 = vsel %vm13385_vm15, 0.0, %v13383_v13  ;;  %v6164_v58 = vsel %vm9700_vm10, 0.0, %v13313_v39  ;;  %8371 = vmatmul.mubr.msk.bf16.gmra.mrb[16].mxu1 %vm13390_vm2, %v13389_v10  ;;  %v6170_v39 = vsel %vm13126_vm12, 0.0, %v11043_v52  ;;  %v13392_v13 = vld [vmem:[#allocation31_spill] sm:$0xff]  ;;  %vm13393_vm10 = vmmov %vm13390_vm2  ;;  %v13415_v50 = vld [vmem:[#allocation29_spill] sm:$0xff] }
 0x374   : > { %13379 = vst [vmem:[#allocation101_spill] sm:$0xff] %v11633_v37  ;;  %v11641_v57 = vpack.c.bf16 %v5301_v31, %v5238_v35  ;;  %v11650_v24 = vpack.c.bf16 %v13309_v59, %v6160_v34  ;;  %v11653_v37 = vpack.c.bf16 %v13311_v38, %v6162_v7  ;;  %v6166_v31 = vsel %vm13100_vm0, 0.0, %v13318_v28  ;;  %8374 = vmatprep.mubr.msk.bf16.mxu1 %vm13393_vm10, %v13392_v13  ;;  %vm13407_vm9 = vmmov %vm13390_vm2  ;;  %v13416_v7 = vld [vmem:[#allocation97_spill] sm:$0xff] }
 0x375   : > { %v11664_v17 = vpack.c.bf16 %v13316_v54, %v6164_v58  ;;  %v11667_v59 = vpack.c.bf16 %v10971_v63, %v6166_v31  ;;  %v6168_v38 = vsel %vm13110_vm1, 0.0, %v11003_v36  ;;  %v11681_v28 = vpack.c.bf16 %v11007_v22, %v6170_v39  ;;  %v13417_v31 = vld [vmem:[#allocation20_spill] sm:$0xff]  ;;  %v13420_v39 = vld [vmem:[#allocation98_spill] sm:$0xff] }
 0x376   : > { %v11678_v53 = vpack.c.bf16 %v10987_v6, %v6168_v38  ;;  %v6172_v63 = vsel %vm13133_vm7, 0.0, %v11064_v20  ;;  %v6174_v36 = vsel %vm13143_vm13, 0.0, %v11081_v30  ;;  %v6176_v6 = vsel %vm13327_vm5, 0.0, %v11095_v9  ;;  %v13395_v20 = vld [vmem:[#allocation48_spill] sm:$0xff]  ;;  %v13418_v38 = vld [vmem:[#allocation41_spill] sm:$0xff] }
 0x377   : > { %v11690_v54 = vpack.c.bf16 %v11051_v2, %v6172_v63  ;;  %v11693_v52 = vpack.c.bf16 %v11068_v51, %v6174_v36  ;;  %vm13394_vm12 = vnez %v12800_v33  ;;  %v11702_v8 = vpack.c.bf16 %v11091_v45, %v6176_v6  ;;  %v13396_v51 = vld [vmem:[#allocation74_spill] sm:$0xff]  ;;  %v13422_v63 = vld [vmem:[#allocation44_spill] sm:$0xff]  ;;  %v13469_v6 = vld [vmem:[#allocation75_spill] sm:$0xff] }
 0x378   : > { %v6178_v22 = vsel %vm13394_vm12, 0.0, %v11111_v25  ;;  %v6180_v2 = vsel %vm13155_vm11, 0.0, %v5143_v23  ;;  %vm13397_vm0 = vnez %v13396_v51  ;;  %v6253_v33 = vsel %vm12976_vm4, 0.0, %v11193_v14  ;;  %v13398_v25 = vld [vmem:[#allocation51_spill] sm:$0xff]  ;;  %v13561_v51 = vld [vmem:[#allocation108_spill] sm:$0xff] }
 0x379   : > { %v11705_v16 = vpack.c.bf16 %v11107_v5, %v6178_v22  ;;  %v11709_v30 = vpack.c.bf16 %v5142_v12, %v6180_v2  ;;  %v6249_v55 = vsel %vm13397_vm0, 0.0, %v13395_v20  ;;  %v11721_v45 = vpack.c.bf16 %v6253_v33, %v11201_v42  ;;  %v13425_v22 = vld [vmem:[#allocation72_spill] sm:$0xff]  ;;  %v13428_v33 = vld [vmem:[#allocation87_spill] sm:$0xff] }
 0x37a   : > { %v11718_v9 = vpack.c.bf16 %v6249_v55, %v13398_v25  ;;  %vm13399_vm1 = vnez %v12980_v47  ;;  %vm13400_vm7 = vnez %v12983_v41  ;;  %vm13401_vm4 = vnez %v12988_v4  ;;  %v13404_v41 = vld [vmem:[#allocation84_spill] sm:$0xff] }
 0x37b   : > { %v6255_v32 = vsel %vm13399_vm1, 0.0, %v11209_v29  ;;  %v6257_v12 = vsel %vm13400_vm7, 0.0, %v11234_v61  ;;  %v6259_v27 = vsel %vm13401_vm4, 0.0, %v11264_v44  ;;  %vm13402_vm13 = vnez %v12990_v18  ;;  %8375 = vmatmul.mubr.msk.bf16.gmra.mrb[20].mxu1 %vm13407_vm9, %v13406_v49  ;;  %v13408_v18 = vld [vmem:[#allocation13_spill] sm:$0xff]  ;;  %v13410_v44 = vld [vmem:[#allocation11_spill] sm:$0xff]  ;;  %v13427_v2 = vld [vmem:[#allocation100_spill] sm:$0xff] }
 0x37c   : > { %v11727_v5 = vpack.c.bf16 %v6255_v32, %v11223_v1  ;;  %v6261_v42 = vsel %vm13402_vm13, 0.0, %v11280_v60  ;;  %v11739_v14 = vpack.c.bf16 %v6257_v12, %v11250_v43  ;;  %v11742_v47 = vpack.c.bf16 %v6259_v27, %v11272_v48  ;;  %v13403_v1 = vld [vmem:[#allocation71_spill] sm:$0xff]  ;;  %v13411_v48 = vld [vmem:[#allocation34_spill] sm:$0xff]  ;;  %8378 = vmatprep.mubr.msk.bf16.mxu1 %vm13390_vm2, %v13415_v50  ;;  %vm13431_vm7 = vmmov %vm13390_vm2 }
 0x37d   : > { %v11745_v29 = vpack.c.bf16 %v6261_v42, %v11291_v40  ;;  %vm13405_vm11 = vnez %v13404_v41  ;;  %v6265_v43 = vsel %vm13347_vm8, 0.0, %v13408_v18  ;;  %vm13412_vm5 = vnez %v13411_v48  ;;  %v13413_v40 = vld [vmem:[#allocation86_spill] sm:$0xff]  ;;  %v13434_v27 = vld [vmem:[#allocation39_spill] sm:$0xff]  ;;  %vm13441_vm9 = vmmov %vm13390_vm2 }
 0x37e   : > { %v6263_v61 = vsel %vm13405_vm11, 0.0, %v13403_v1  ;;  %v6267_v23 = vsel %vm13412_vm5, 0.0, %v13410_v44  ;;  %vm13414_vm14 = vnez %v13413_v40  ;;  %v11767_v10 = vpack.c.bf16 %v6265_v43, %v11338_v15  ;;  %v13430_v12 = vld [vmem:[#allocation82_spill] sm:$0xff]  ;;  %vm13440_vm11 = vmmov %vm13390_vm2  ;;  %v13443_v60 = vld [vmem:[#allocation77_spill] sm:$0xff] }
 0x37f   : > { %v11753_v4 = vpack.c.bf16 %v6263_v61, %v13355_v62  ;;  %v6269_v34 = vsel %vm13414_vm14, 0.0, %v13359_v46  ;;  %v11770_v62 = vpack.c.bf16 %v6267_v23, %v11357_v21  ;;  %vm13419_vm8 = vnez %v13418_v38  ;;  %v13421_v46 = vld [vmem:[#allocation99_spill] sm:$0xff]  ;;  %v13436_v42 = vld [vmem:[#allocation50_spill] sm:$0xff]  ;;  %v13445_v48 = vld [vmem:[#allocation52_spill] sm:$0xff] }
 0x380   : > { %v11773_v58 = vpack.c.bf16 %v6269_v34, %v13416_v7  ;;  %v6271_v26 = vsel %vm13419_vm8, 0.0, %v13417_v31  ;;  %vm13423_vm10 = vnez %v13422_v63  ;;  %v6275_v15 = vsel %vm13369_vm6, 0.0, %v5239_v0  ;;  %v13432_v0 = vld [vmem:[#allocation83_spill] sm:$0xff]  ;;  %vm13433_vm6 = vmmov %vm13390_vm2  ;;  %v13439_v49 = vld [vmem:[#allocation46_spill] sm:$0xff] }
 0x381   : > { %v11779_v13 = vpack.c.bf16 %v6271_v26, %v13420_v39  ;;  %v6273_v36 = vsel %vm13423_vm10, 0.0, %v13421_v46  ;;  %vm13426_vm12 = vcmp.lt.s32.totalorder %v9285_v19, 7  ;;  %v11794_v55 = vpack.c.bf16 %v6275_v15, %v13378_v56  ;;  %v7617_v40 = vld [vmem:[%s12215_s3 + $0x10] sm:$0xf]  ;;  %vm13447_vm8 = vmmov %vm13433_vm6  ;;  %v13448_v34 = vld [vmem:[#allocation27_spill] sm:$0xff] }
 0x382   : > { %v6217_v21 = vsel %vm13426_vm12, %v11548_v3, %v13425_v22  ;;  %v11791_v20 = vpack.c.bf16 %v6273_v36, %v13427_v2  ;;  %vm13429_vm1 = vnez %v13428_v33  ;;  %vm13435_vm4 = vmmov %vm13426_vm12  ;;  %v4294_v1 = vrot.slane %v13436_v42, 1  ;;  %v13451_v50 = vld [vmem:[#allocation89_spill] sm:$0xff]  ;;  %v13453_v7 = vld [vmem:[#allocation91_spill] sm:$0xff] }
 0x383   : > { %v6277_v25 = vsel %vm13429_vm1, 0.0, %v6217_v21  ;;  %8379 = vmatmul.mubr.msk.bf16.gmra.mrb[24].mxu1 %vm13431_vm7, %v13430_v12  ;;  %v4352_v3 = vsel %vm13435_vm4, %v13425_v22, %v13434_v27  ;;  %vm13438_vm13 = vmmov %vm13435_vm4  ;;  %vm13444_vm14 = vnez %v13443_v60  ;;  %vm13446_vm2 = vcmask 1043456   ;;  %v13455_v31 = vld [vmem:[#allocation92_spill] sm:$0xff]  ;;  %v13457_v38 = vld [vmem:[#allocation93_spill] sm:$0xff] }
 0x384   : > { %v11798_v32 = vpack.c.bf16 %v6277_v25, %v5238_v35  ;;  %8382 = vmatprep.mubr.msk.bf16.mxu1 %vm13433_vm6, %v13432_v0  ;;  %v4356_v56 = vsel %vm13397_vm0, 0.0, %v4352_v3  ;;  %v13437_v35 = vld [vmem:[#allocation3_spill] sm:$0xff]  ;;  %vm13442_vm5 = vmmov %vm13435_vm4  ;;  %v5369_v23 = vsel %vm13446_vm2, %v13445_v48, 0  ;;  %v13459_v26 = vld [vmem:[#allocation61_spill] sm:$0xff] }
 0x385   : > { %v4848_v41 = vpack.c.bf16 %v4356_v56, %v13425_v22  ;;  %v11815_v61 = vsel %vm13438_vm13, %v4294_v1, %v13437_v35  ;;  %v11823_v18 = vsel %vm13442_vm5, %v13434_v27, %v4294_v1  ;;  %vm13449_vm10 = vmmov %vm13433_vm6  ;;  %v13461_v39 = vld [vmem:[#allocation64_spill] sm:$0xff]  ;;  %v13463_v46 = vld [vmem:[#allocation95_spill] sm:$0xff] }
 0x386   : > { %v4358_v43 = vsel %vm13444_vm14, 0.0, %v11815_v61  ;;  %vm13450_vm12 = vmmov %vm13446_vm2  ;;  %v13465_v63 = vld [vmem:[#allocation18_spill] sm:$0xff]  ;;  %v13467_v36 = vld [vmem:[#allocation96_spill] sm:$0xff] }
 0x387   : > { %v4849_v44 = vpack.c.bf16 %v4358_v43, %v11823_v18  ;;  %vm13452_vm1 = vmmov %vm13433_vm6  ;;  %v13471_v15 = vld [vmem:[#allocation102_spill] sm:$0xff]  ;;  %v13473_v21 = vld [vmem:[#allocation103_spill] sm:$0xff] }
 0x388   : > { %vm13454_vm7 = vmmov %vm13452_vm1  ;;  %v13475_v2 = vld [vmem:[#allocation43_spill] sm:$0xff]  ;;  %v13476_v33 = vld [vmem:[#allocation104_spill] sm:$0xff] }
 0x389   : > { %vm13456_vm6 = vmmov %vm13452_vm1  ;;  %v13478_v12 = vld [vmem:[#allocation22_spill] sm:$0xff]  ;;  %v13480_v27 = vld [vmem:[#allocation69_spill] sm:$0xff] }
 0x38a   : > { %vm13458_vm4 = vmmov %vm13452_vm1  ;;  %v13481_v42 = vld [vmem:[#allocation40_spill] sm:$0xff]  ;;  %v13485_v56 = vld [vmem:[#allocation10_spill] sm:$0xff] }
 0x38b   : > { %8383 = vmatmul.mubr.msk.bf16.gmra.mrb[28].mxu1 %vm13440_vm11, %v13439_v49  ;;  %vm13460_vm13 = vmmov %vm13452_vm1  ;;  %v13484_v1 = vld [vmem:[#allocation68_spill] sm:$0xff]  ;;  %v13487_v49 = vld [vmem:[#allocation67_spill] sm:$0xff] }
 0x38c   : > { %8388 = vmatprep.mubr.msk.bf16.mxu1 %vm13441_vm9, %v4848_v41  ;;  %vm13462_vm11 = vmmov %vm13452_vm1  ;;  %v13490_v48 = vld [vmem:[#allocation33_spill] sm:$0xff] }
 0x38d   : > { %vm13464_vm9 = vmmov %vm13452_vm1 }
 0x38e   : > { %vm13466_vm5 = vmmov %vm13452_vm1 }
 0x38f   : > { %vm13468_vm14 = vmmov %vm13452_vm1 }
 0x390   : > { %vm13470_vm2 = vmmov %vm13452_vm1 }
 0x393   : > { %8389 = vmatmul.mubr.msk.bf16.vlgmr.msra.gmra.mrb[0].mxu1 %vm13447_vm8, %v4849_v44  ;;  %vm13472_vm8 = vmmov %vm13452_vm1  ;;  %v7634_v44 = vld [vmem:[%s12215_s3 + $0x14] sm:$0xf] }
 0x394   : > { %8421 = vmatpush3.bf16.msra.mxu1 %v5369_v23  ;;  %8392 = vmatprep.mubr.msk.bf16.mxu1 %vm13449_vm10, %v13448_v34  ;;  %vm13474_vm10 = vmmov %vm13452_vm1  ;;  %v13493_v23 = vld [vmem:[#allocation54_spill] sm:$0xff]  ;;  %v13494_v34 = vld [vmem:[#allocation47_spill] sm:$0xff] }
 0x395   : > { %9149 = vmatprep.subr.msk.bf16.mxu1 %vm13450_vm12, %v7617_v40  ;;  %vm13477_vm12 = vcmp.lt.s32.totalorder %v9285_v19, 1 }
 0x396   : > { %v5173_v25 = vsel %vm13477_vm12, %v13476_v33, %v13475_v2  ;;  %vm13503_vm12 = vmmov %vm13470_vm2  ;;  %v13514_v2 = vld [vmem:[#allocation16_spill] sm:$0xff] }
 0x39b   : > { %8393 = vmatmul.mubr.msk.bf16.gmra.mrb[4].mxu1 %vm13452_vm1, %v13451_v50  ;;  %vm13479_vm1 = vnez %v13478_v12  ;;  %v7684_v12 = vld [vmem:[%s12215_s3 + $0x20] sm:$0xf] }
 0x39c   : > { %8396 = vmatprep.mubr.msk.bf16.mxu1 %vm13454_vm7, %v13453_v7  ;;  %v5174_v0 = vsel %vm13479_vm1, 0.0, %v5173_v25  ;;  %vm13482_vm7 = vmmov %vm13470_vm2  ;;  %v13496_v7 = vld [vmem:[#allocation65_spill] sm:$0xff] }
 0x39d   : > { %v5302_v3 = vpack.c.bf16 %v13480_v27, %v5174_v0  ;;  %v13516_v25 = vld [vmem:[#allocation105_spill] sm:$0xff]  ;;  %v13518_v0 = vld [vmem:[#allocation106_spill] sm:$0xff] }
 0x39e   : > { %v13520_v27 = vld [vmem:[#allocation109_spill] sm:$0xff] }
 0x3a3   : > { %8397 = vmatmul.mubr.msk.bf16.gmra.mrb[8].mxu1 %vm13456_vm6, %v13455_v31  ;;  %vm13483_vm6 = vmmov %vm13470_vm2  ;;  %v13497_v31 = vld [vmem:[#allocation45_spill] sm:$0xff] }
 0x3a4   : > { %8400 = vmatprep.mubr.msk.bf16.mxu1 %vm13458_vm4, %v13457_v38  ;;  %vm13486_vm4 = vnez %v13485_v56  ;;  %v13524_v56 = vld [vmem:[#allocation38_spill] sm:$0xff] }
 0x3a5   : > { %v5176_v41 = vsel %vm13486_vm4, 0.0, %v13484_v1  ;;  %vm13511_vm4 = vmmov %vm13470_vm2  ;;  %v7651_v1 = vld [vmem:[%s12215_s3 + $0x18] sm:$0xf] }
 0x3a6   : > { %v5303_v60 = vpack.c.bf16 %v13487_v49, %v5176_v41  ;;  %v13526_v41 = vld [vmem:[#allocation26_spill] sm:$0xff] }
 0x3ab   : > { %8401 = vmatmul.mubr.msk.bf16.gmra.mrb[12].mxu1 %vm13460_vm13, %v13459_v26  ;;  %vm13488_vm13 = vcmask 1043456   ;;  %v13498_v26 = vld [vmem:[#allocation62_spill] sm:$0xff] }
 0x3ac   : > { %8404 = vmatprep.mubr.msk.bf16.mxu1 %vm13462_vm11, %v13461_v39  ;;  %v5631_v43 = vsel %vm13488_vm13, %v7617_v40, 0  ;;  %vm13489_vm11 = vmmov %vm13470_vm2  ;;  %v5182_v40 = vsel %vm13385_vm15, 0.0, %v13496_v7 }
 0x3ad   : > { %v5306_v39 = vpack.c.bf16 %v13498_v26, %v5182_v40  ;;  %vm13509_vm15 = vmmov %vm13470_vm2  ;;  %v13539_v40 = vld [vmem:[#allocation4_spill] sm:$0xff] }
 0x3b3   : > { %8405 = vmatmul.mubr.msk.bf16.gmra.mrb[16].mxu1 %vm13464_vm9, %v13463_v46  ;;  %vm13491_vm9 = vmmov %vm13470_vm2  ;;  %v13500_v46 = vld [vmem:[#allocation5_spill] sm:$0xff] }
 0x3b4   : > { %8408 = vmatprep.mubr.msk.bf16.mxu1 %vm13466_vm5, %v13465_v63  ;;  %vm13492_vm5 = vmmov %vm13488_vm13  ;;  %v13502_v63 = vld [vmem:[#allocation7_spill] sm:$0xff] }
 0x3b5   : > { %vm13513_vm13 = vmmov %vm13470_vm2 }
 0x3bb   : > { %8409 = vmatmul.mubr.msk.bf16.gmra.mrb[20].mxu1 %vm13468_vm14, %v13467_v36  ;;  %vm13495_vm14 = vnez %v13494_v34  ;;  %v13504_v36 = vld [vmem:[#allocation32_spill] sm:$0xff] }
 0x3bc   : > { %8412 = vmatprep.mubr.msk.bf16.mxu1 %vm13470_vm2, %v13469_v6  ;;  %v5180_v50 = vsel %vm13495_vm14, 0.0, %v13493_v23  ;;  %v13506_v6 = vld [vmem:[#allocation57_spill] sm:$0xff] }
 0x3bd   : > { %v5305_v38 = vpack.c.bf16 %v13497_v31, %v5180_v50  ;;  %v13537_v50 = vld [vmem:[#allocation30_spill] sm:$0xff] }
 0x3c3   : > { %8413 = vmatmul.mubr.msk.bf16.gmra.mrb[24].mxu1 %vm13472_vm8, %v13471_v15  ;;  %vm13499_vm8 = vmmov %vm13470_vm2  ;;  %v13510_v15 = vld [vmem:[#allocation78_spill] sm:$0xff] }
 0x3c4   : > { %8416 = vmatprep.mubr.msk.bf16.mxu1 %vm13474_vm10, %v13473_v21  ;;  %vm13501_vm10 = vmmov %vm13470_vm2  ;;  %v13512_v21 = vld [vmem:[#allocation58_spill] sm:$0xff] }
 0x3cb   : > { %8417 = vmatmul.mubr.msk.bf16.gmra.mrb[28].mxu1 %vm13482_vm7, %v13481_v42  ;;  %vm13505_vm7 = vmmov %vm13470_vm2 }
 0x3cc   : > { %8422 = vmatprep.mubr.msk.bf16.mxu1 %vm13483_vm6, %v5302_v3  ;;  %vm13507_vm6 = vmmov %vm13470_vm2  ;;  %v13521_v3 = vld [vmem:[#allocation59_spill] sm:$0xff] }
 0x3d3   : > { %8423 = vmatmul.mubr.msk.bf16.vlgmr.msra.gmra.mrb[0].mxu1 %vm13489_vm11, %v5303_v60  ;;  %vm13515_vm11 = vmmov %vm13470_vm2  ;;  %v13529_v60 = vld [vmem:[#allocation70_spill] sm:$0xff] }
 0x3d4   : > { %8455 = vmatpush3.bf16.msra.mxu1 %v5631_v43  ;;  %8426 = vmatprep.mubr.msk.bf16.mxu1 %vm13491_vm9, %v13490_v48  ;;  %vm13517_vm9 = vmmov %vm13470_vm2  ;;  %v13531_v43 = vld [vmem:[#allocation36_spill] sm:$0xff] }
 0x3d5   : > { %9150 = vmatprep.subr.msk.bf16.mxu1 %vm13492_vm5, %v7634_v44  ;;  %vm13519_vm5 = vmmov %vm13470_vm2  ;;  %v13535_v48 = vld [vmem:[#allocation12_spill] sm:$0xff] }
 0x3db   : > { %8427 = vmatmul.mubr.msk.bf16.gmra.mrb[4].mxu1 %vm13470_vm2, %v5305_v38  ;;  %v13541_v38 = vld [vmem:[#allocation66_spill] sm:$0xff] }
 0x3dc   : > { %8430 = vmatprep.mubr.msk.bf16.mxu1 %vm13499_vm8, %v5306_v39  ;;  %vm13522_vm8 = vmmov %vm13470_vm2  ;;  %v13542_v39 = vld [vmem:[#allocation15_spill] sm:$0xff] }
 0x3e3   : > { %8431 = vmatmul.mubr.msk.bf16.gmra.mrb[8].mxu1 %vm13501_vm10, %v13500_v46  ;;  %vm13523_vm10 = vcmask 1043456   ;;  %v13544_v46 = vld [vmem:[#allocation14_spill] sm:$0xff] }
 0x3e4   : > { %8434 = vmatprep.mubr.msk.bf16.mxu1 %vm13503_vm12, %v13502_v63  ;;  %v5893_v42 = vsel %vm13523_vm10, %v7634_v44, 0  ;;  %vm13525_vm12 = vmmov %vm13470_vm2  ;;  %v13533_v44 = vld [vmem:[#allocation35_spill] sm:$0xff] }
 0x3e5   : > { %v13546_v63 = vld [vmem:[#allocation23_spill] sm:$0xff] }
 0x3eb   : > { %8435 = vmatmul.mubr.msk.bf16.gmra.mrb[12].mxu1 %vm13505_vm7, %v13504_v36  ;;  %vm13527_vm7 = vmmov %vm13470_vm2  ;;  %v13548_v36 = vld [vmem:[#allocation79_spill] sm:$0xff] }
 0x3ec   : > { %8438 = vmatprep.mubr.msk.bf16.mxu1 %vm13507_vm6, %v13506_v6  ;;  %vm13528_vm6 = vmmov %vm13523_vm10  ;;  %v13550_v6 = vld [vmem:[#allocation28_spill] sm:$0xff] }
 0x3ed   : > { %vm13545_vm10 = vmmov %vm13470_vm2 }
 0x3f3   : > { %8439 = vmatmul.mubr.msk.bf16.gmra.mrb[16].mxu1 %vm13509_vm15, %v13508_v11  ;;  %vm13530_vm15 = vmmov %vm13470_vm2  ;;  %v5271_v11 = vsel %vm13397_vm0, 0.0, %v11815_v61  ;;  %v13563_v61 = vld [vmem:[#allocation110_spill] sm:$0xff] }
 0x3f4   : > { %8442 = vmatprep.mubr.msk.bf16.mxu1 %vm13511_vm4, %v13510_v15  ;;  %vm13532_vm4 = vmmov %vm13470_vm2  ;;  %v5826_v15 = vpack.c.bf16 %v5271_v11, %v11823_v18  ;;  %v13564_v18 = vld [vmem:[#allocation111_spill] sm:$0xff]  ;;  %v13572_v11 = vld [vmem:[#allocation94_spill] sm:$0xff] }
 0x3fb   : > { %8443 = vmatmul.mubr.msk.bf16.gmra.mrb[20].mxu1 %vm13513_vm13, %v13512_v21  ;;  %vm13534_vm13 = vmmov %vm13470_vm2  ;;  %v13552_v21 = vld [vmem:[#allocation24_spill] sm:$0xff] }
 0x3fc   : > { %8446 = vmatprep.mubr.msk.bf16.mxu1 %vm13515_vm11, %v13514_v2  ;;  %vm13536_vm11 = vmmov %vm13470_vm2 }
 0x403   : > { %8447 = vmatmul.mubr.msk.bf16.gmra.mrb[24].mxu1 %vm13517_vm9, %v13516_v25  ;;  %vm13538_vm9 = vmmov %vm13470_vm2  ;;  %v7668_v25 = vld [vmem:[%s12215_s3 + $0x1c] sm:$0xf] }
 0x404   : > { %8450 = vmatprep.mubr.msk.bf16.mxu1 %vm13519_vm5, %v13518_v0  ;;  %vm13540_vm5 = vmmov %vm13470_vm2  ;;  %v13556_v0 = vld [vmem:[#allocation76_spill] sm:$0xff] }
 0x40b   : > { %8451 = vmatmul.mubr.msk.bf16.gmra.mrb[28].mxu1 %vm13470_vm2, %v13520_v27  ;;  %v13558_v27 = vld [vmem:[#allocation107_spill] sm:$0xff] }
 0x40c   : > { %8456 = vmatprep.mubr.msk.bf16.mxu1 %vm13522_vm8, %v13521_v3  ;;  %vm13543_vm8 = vmmov %vm13470_vm2  ;;  %v13566_v3 = vld [vmem:[#allocation112_spill] sm:$0xff] }
 0x413   : > { %8457 = vmatmul.mubr.msk.bf16.vlgmr.msra.gmra.mrb[0].mxu1 %vm13525_vm12, %v13524_v56  ;;  %vm13547_vm12 = vmmov %vm13470_vm2 }
 0x414   : > { %8489 = vmatpush3.bf16.msra.mxu1 %v5893_v42  ;;  %8460 = vmatprep.mubr.msk.bf16.mxu1 %vm13527_vm7, %v13526_v41  ;;  %vm13549_vm7 = vmmov %vm13470_vm2  ;;  %v13568_v42 = vld [vmem:[#allocation21_spill] sm:$0xff] }
 0x415   : > { %9151 = vmatprep.subr.msk.bf16.mxu1 %vm13528_vm6, %v7651_v1  ;;  %vm13551_vm6 = vmmov %vm13470_vm2 }
 0x41b   : > { %8461 = vmatmul.mubr.msk.bf16.gmra.mrb[4].mxu1 %vm13530_vm15, %v13529_v60  ;;  %vm13553_vm15 = vmmov %vm13470_vm2 }
 0x41c   : > { %8464 = vmatprep.mubr.msk.bf16.mxu1 %vm13532_vm4, %v13531_v43  ;;  %vm13554_vm4 = vmmov %vm13470_vm2 }
 0x423   : > { %8465 = vmatmul.mubr.msk.bf16.gmra.mrb[8].mxu1 %vm13534_vm13, %v13533_v44  ;;  %vm13555_vm13 = vcmask 1043456  }
 0x424   : > { %8468 = vmatprep.mubr.msk.bf16.mxu1 %vm13536_vm11, %v13535_v48  ;;  %v6347_v2 = vsel %vm13555_vm13, %v7651_v1, 0  ;;  %vm13557_vm11 = vmmov %vm13470_vm2  ;;  %v13570_v1 = vld [vmem:[#allocation25_spill] sm:$0xff] }
 0x425   : > { %vm13560_vm0 = vmmov %vm13555_vm13 }
 0x426   : > { %vm13579_vm13 = vmmov %vm13470_vm2 }
 0x42b   : > { %8469 = vmatmul.mubr.msk.bf16.gmra.mrb[12].mxu1 %vm13538_vm9, %v13537_v50  ;;  %vm13559_vm9 = vmmov %vm13470_vm2 }
 0x42c   : > { %8472 = vmatprep.mubr.msk.bf16.mxu1 %vm13540_vm5, %v13539_v40  ;;  %vm13562_vm5 = vmmov %vm13470_vm2 }
 0x433   : > { %8473 = vmatmul.mubr.msk.bf16.gmra.mrb[16].mxu1 %vm13470_vm2, %v13541_v38 }
 0x434   : > { %8476 = vmatprep.mubr.msk.bf16.mxu1 %vm13543_vm8, %v13542_v39  ;;  %vm13565_vm8 = vmmov %vm13470_vm2 }
 0x43b   : > { %8477 = vmatmul.mubr.msk.bf16.gmra.mrb[20].mxu1 %vm13545_vm10, %v13544_v46  ;;  %vm13567_vm10 = vmmov %vm13470_vm2 }
 0x43c   : > { %8480 = vmatprep.mubr.msk.bf16.mxu1 %vm13547_vm12, %v13546_v63  ;;  %vm13569_vm12 = vmmov %vm13470_vm2 }
 0x443   : > { %8481 = vmatmul.mubr.msk.bf16.gmra.mrb[24].mxu1 %vm13549_vm7, %v13548_v36  ;;  %vm13571_vm7 = vmmov %vm13470_vm2 }
 0x444   : > { %8484 = vmatprep.mubr.msk.bf16.mxu1 %vm13551_vm6, %v13550_v6  ;;  %vm13573_vm6 = vmmov %vm13470_vm2 }
 0x44b   : > { %8485 = vmatmul.mubr.msk.bf16.gmra.mrb[28].mxu1 %vm13553_vm15, %v13552_v21  ;;  %vm13575_vm15 = vmmov %vm13470_vm2 }
 0x44c   : > { %8490 = vmatprep.mubr.msk.bf16.mxu1 %vm13554_vm4, %v5826_v15  ;;  %v13574_v15 = vld [vmem:[#allocation113_spill] sm:$0xff]  ;;  %vm13577_vm4 = vmmov %vm13470_vm2 }
 0x453   : > { %8491 = vmatmul.mubr.msk.bf16.vlgmr.msra.gmra.mrb[0].mxu1 %vm13557_vm11, %v13556_v0  ;;  %v13578_v0 = vld [vmem:[#allocation114_spill] sm:$0xff]  ;;  %vm13581_vm11 = vmmov %vm13470_vm2 }
 0x454   : > { %8523 = vmatpush3.bf16.msra.mxu1 %v6347_v2  ;;  %8494 = vmatprep.mubr.msk.bf16.mxu1 %vm13559_vm9, %v13558_v27  ;;  %v13576_v2 = vld [vmem:[#allocation19_spill] sm:$0xff]  ;;  %vm13583_vm9 = vmmov %vm13470_vm2 }
 0x455   : > { %9152 = vmatprep.subr.msk.bf16.mxu1 %vm13560_vm0, %v7668_v25  ;;  %v13580_v27 = vld [vmem:[#allocation115_spill] sm:$0xff]  ;;  %vm13586_vm0 = vcmp.lt.s32.totalorder %v9285_v19, 1 }
 0x45b   : > { %8495 = vmatmul.mubr.msk.bf16.gmra.mrb[4].mxu1 %vm13562_vm5, %v13561_v51  ;;  %v13582_v51 = vld [vmem:[#allocation101_spill] sm:$0xff]  ;;  %vm13587_vm5 = vmmov %vm13470_vm2 }
 0x45c   : > { %8498 = vmatprep.mubr.msk.bf16.mxu1 %vm13470_vm2, %v13563_v61  ;;  %v13584_v61 = vld [vmem:[#allocation63_spill] sm:$0xff] }
 0x463   : > { %8499 = vmatmul.mubr.msk.bf16.gmra.mrb[8].mxu1 %vm13565_vm8, %v13564_v18  ;;  %v13585_v18 = vld [vmem:[#allocation17_spill] sm:$0xff] }
 0x464   : > { %8502 = vmatprep.mubr.msk.bf16.mxu1 %vm13567_vm10, %v13566_v3  ;;  %v6151_v3 = vsel %vm13586_vm0, %v13585_v18, %v13584_v61  ;;  %vm13590_vm10 = vcmask 1043456  }
 0x46b   : > { %8503 = vmatmul.mubr.msk.bf16.gmra.mrb[12].mxu1 %vm13569_vm12, %v13568_v42  ;;  %v6152_v42 = vsel %vm13479_vm1, 0.0, %v6151_v3  ;;  %vm13592_vm1 = vmmov %vm13470_vm2 }
 0x46c   : > { %8506 = vmatprep.mubr.msk.bf16.mxu1 %vm13571_vm7, %v13570_v1  ;;  %v6280_v1 = vpack.c.bf16 %v13487_v49, %v6152_v42  ;;  %vm13593_vm12 = vmmov %vm13592_vm1 }
 0x46d   : > { %vm13594_vm7 = vmmov %vm13590_vm10 }
 0x46e   : > { %vm13602_vm0 = vmmov %vm13592_vm1 }
 0x473   : > { %8507 = vmatmul.mubr.msk.bf16.gmra.mrb[16].mxu1 %vm13573_vm6, %v13572_v11  ;;  %v13588_v11 = vld [vmem:[#allocation37_spill] sm:$0xff]  ;;  %vm13595_vm6 = vmmov %vm13592_vm1 }
 0x474   : > { %8510 = vmatprep.mubr.msk.bf16.mxu1 %vm13575_vm15, %v13574_v15  ;;  %vm13589_vm8 = vnez %v13588_v11  ;;  %vm13596_vm15 = vmmov %vm13592_vm1 }
 0x475   : > { %v6156_v15 = vsel %vm13589_vm8, 0.0, %v13493_v23  ;;  %vm13605_vm8 = vmmov %vm13602_vm0 }
 0x47b   : > { %8511 = vmatmul.mubr.msk.bf16.gmra.mrb[20].mxu1 %vm13577_vm4, %v13576_v2  ;;  %v6609_v2 = vsel %vm13590_vm10, %v7668_v25, 0  ;;  %vm13597_vm4 = vmmov %vm13592_vm1  ;;  %vm13606_vm10 = vcmp.lt.s32.totalorder %v9285_v19, 1 }
 0x47c   : > { %8514 = vmatprep.mubr.msk.bf16.mxu1 %vm13579_vm13, %v13578_v0  ;;  %v6282_v0 = vpack.c.bf16 %v13497_v31, %v6156_v15  ;;  %vm13598_vm13 = vmmov %vm13592_vm1 }
 0x483   : > { %8515 = vmatmul.mubr.msk.bf16.gmra.mrb[24].mxu1 %vm13581_vm11, %v13580_v27  ;;  %v13591_v27 = vld [vmem:[#allocation53_spill] sm:$0xff]  ;;  %vm13599_vm11 = vmmov %vm13592_vm1 }
 0x484   : > { %8518 = vmatprep.mubr.msk.bf16.mxu1 %vm13583_vm9, %v13582_v51  ;;  %vm13600_vm9 = vmmov %vm13592_vm1 }
 0x48b   : > { %8519 = vmatmul.mubr.msk.bf16.gmra.mrb[28].mxu1 %vm13587_vm5, %v11641_v57  ;;  %v6158_v57 = vsel %vm13495_vm14, 0.0, %v13496_v7  ;;  %vm13601_vm14 = vmmov %vm13592_vm1 }
 0x48c   : > { %8524 = vmatprep.mubr.msk.bf16.mxu1 %vm13470_vm2, %v6280_v1  ;;  %v6283_v49 = vpack.c.bf16 %v13498_v26, %v6158_v57  ;;  %vm13603_vm5 = vmmov %vm13602_vm0 }
 0x48d   : > { %vm13604_vm2 = vmmov %vm13602_vm0 }
 0x493   : > { %8525 = vmatmul.mubr.msk.bf16.vlgmr.msra.gmra.mrb[0].mxu1 %vm13592_vm1, %v13591_v27  ;;  %vm13607_vm1 = vmmov %vm13602_vm0 }
 0x494   : > { %8557 = vmatpush3.bf16.msra.mxu1 %v6609_v2  ;;  %8528 = vmatprep.mubr.msk.bf16.mxu1 %vm13593_vm12, %v6282_v0 }
 0x495   : > { %9153 = vmatprep.subr.msk.bf16.mxu1 %vm13594_vm7, %v7684_v12  ;;  %vm13610_vm7 = vmmov %vm13602_vm0 }
 0x49b   : > { %8529 = vmatmul.mubr.msk.bf16.gmra.mrb[4].mxu1 %vm13595_vm6, %v6283_v49  ;;  %vm13611_vm6 = vmmov %vm13602_vm0 }
 0x49c   : > { %8532 = vmatprep.mubr.msk.bf16.mxu1 %vm13596_vm15, %v11650_v24  ;;  %v13608_v24 = vld [vmem:[#allocation73_spill] sm:$0xff]  ;;  %vm13612_vm15 = vcmask 1043456  }
 0x49d   : > { %vm13609_vm12 = vnez %v13608_v24 }
 0x4a3   : > { %8533 = vmatmul.mubr.msk.bf16.gmra.mrb[8].mxu1 %vm13597_vm4, %v11653_v37  ;;  %v6121_v37 = vsel %vm13606_vm10, %v13476_v33, %v13585_v18  ;;  %vm13613_vm4 = vmmov %vm13602_vm0 }
 0x4a4   : > { %8536 = vmatprep.mubr.msk.bf16.mxu1 %vm13598_vm13, %v11664_v17  ;;  %v6182_v17 = vsel %vm13609_vm12, 0.0, %v6121_v37  ;;  %vm13614_vm13 = vmmov %vm13602_vm0 }
 0x4a5   : > { %vm13621_vm10 = vmmov %vm13602_vm0 }
 0x4a6   : > { %vm13623_vm12 = vmmov %vm13602_vm0 }
 0x4ab   : > { %8537 = vmatmul.mubr.msk.bf16.gmra.mrb[12].mxu1 %vm13599_vm11, %v11667_v59  ;;  %v6295_v59 = vpack.c.bf16 %v13585_v18, %v6182_v17  ;;  %vm13615_vm11 = vmmov %vm13602_vm0 }
 0x4ac   : > { %8540 = vmatprep.mubr.msk.bf16.mxu1 %vm13600_vm9, %v11678_v53  ;;  %v6871_v53 = vsel %vm13612_vm15, %v7684_v12, 0  ;;  %vm13616_vm9 = vmmov %vm13602_vm0 }
 0x4ad   : > { %vm13627_vm15 = vmmov %vm13602_vm0 }
 0x4b3   : > { %8541 = vmatmul.mubr.msk.bf16.gmra.mrb[16].mxu1 %vm13601_vm14, %v11681_v28  ;;  %vm13617_vm14 = vmmov %vm13602_vm0  ;;  %v13626_v28 = vmov 0.0|0.0  }
 0x4b4   : > { %8544 = vmatprep.mubr.msk.bf16.mxu1 %vm13602_vm0, %v11690_v54  ;;  %v13628_v54 = vld [vmem:[#allocation90_spill] sm:$0xff] }
 0x4bb   : > { %8545 = vmatmul.mubr.msk.bf16.gmra.mrb[20].mxu1 %vm13603_vm5, %v11693_v52  ;;  %vm13618_vm5 = vmmov %vm13602_vm0 }
 0x4bc   : > { %8548 = vmatprep.mubr.msk.bf16.mxu1 %vm13604_vm2, %v11702_v8  ;;  %vm13619_vm2 = vmmov %vm13602_vm0 }
 0x4c3   : > { %8549 = vmatmul.mubr.msk.bf16.gmra.mrb[24].mxu1 %vm13605_vm8, %v11705_v16  ;;  %vm13620_vm8 = vmmov %vm13602_vm0 }
 0x4c4   : > { %8552 = vmatprep.mubr.msk.bf16.mxu1 %vm13607_vm1, %v11709_v30  ;;  %vm13622_vm1 = vmmov %vm13602_vm0 }
 0x4cb   : > { %8553 = vmatmul.mubr.msk.bf16.gmra.mrb[28].mxu1 %vm13610_vm7, %v6295_v59  ;;  %vm13624_vm7 = vmmov %vm13602_vm0 }
 0x4cc   : > { %8558 = vmatprep.mubr.msk.bf16.mxu1 %vm13611_vm6, %v13524_v56  ;;  %vm13625_vm6 = vmmov %vm13602_vm0 }
 0x4d3   : > { %8559 = vmatmul.mubr.msk.bf16.vlgmr.msra.gmra.mrb[0].mxu1 %vm13613_vm4, %v13526_v41  ;;  %vm13629_vm4 = vmmov %vm13602_vm0 }
 0x4d4   : > { %8591 = vmatpush3.bf16.msra.mxu1 %v6871_v53  ;;  %8562 = vmatprep.mubr.msk.bf16.mxu1 %vm13614_vm13, %v13529_v60  ;;  %vm13630_vm13 = vmmov %vm13602_vm0 }
 0x4db   : > { %8563 = vmatmul.mubr.msk.bf16.gmra.mrb[4].mxu1 %vm13615_vm11, %v13531_v43  ;;  %vm13631_vm11 = vmmov %vm13602_vm0 }
 0x4dc   : > { %8566 = vmatprep.mubr.msk.bf16.mxu1 %vm13616_vm9, %v13533_v44  ;;  %vm13632_vm9 = vmmov %vm13602_vm0 }
 0x4e3   : > { %8567 = vmatmul.mubr.msk.bf16.gmra.mrb[8].mxu1 %vm13617_vm14, %v13535_v48  ;;  %vm13633_vm14 = vmmov %vm13602_vm0 }
 0x4e4   : > { %8570 = vmatprep.mubr.msk.bf16.mxu1 %vm13602_vm0, %v13537_v50 }
 0x4eb   : > { %8571 = vmatmul.mubr.msk.bf16.gmra.mrb[12].mxu1 %vm13618_vm5, %v13539_v40  ;;  %vm13634_vm5 = vmmov %vm13602_vm0 }
 0x4ec   : > { %8574 = vmatprep.mubr.msk.bf16.mxu1 %vm13619_vm2, %v13541_v38  ;;  %vm13635_vm2 = vmmov %vm13602_vm0 }
 0x4f3   : > { %8575 = vmatmul.mubr.msk.bf16.gmra.mrb[16].mxu1 %vm13620_vm8, %v13542_v39  ;;  %vm13636_vm8 = vmmov %vm13602_vm0 }
 0x4f4   : > { %8578 = vmatprep.mubr.msk.bf16.mxu1 %vm13621_vm10, %v13544_v46  ;;  %vm13637_vm10 = vmmov %vm13602_vm0 }
 0x4fb   : > { %8579 = vmatmul.mubr.msk.bf16.gmra.mrb[20].mxu1 %vm13622_vm1, %v13546_v63  ;;  %vm13638_vm1 = vmmov %vm13602_vm0 }
 0x4fc   : > { %8582 = vmatprep.mubr.msk.bf16.mxu1 %vm13623_vm12, %v13548_v36  ;;  %vm13639_vm12 = vmmov %vm13602_vm0 }
 0x503   : > { %8583 = vmatmul.mubr.msk.bf16.gmra.mrb[24].mxu1 %vm13624_vm7, %v13550_v6  ;;  %vm13640_vm7 = vmmov %vm13602_vm0 }
 0x504   : > { %8586 = vmatprep.mubr.msk.bf16.mxu1 %vm13625_vm6, %v13552_v21  ;;  %vm13641_vm6 = vcmp.lt.s32.totalorder %v9285_v19, 7 }
 0x505   : > { %v6247_v52 = vsel %vm13641_vm6, %v13425_v22, %v13437_v35  ;;  %vm13649_vm6 = vmmov %vm13602_vm0 }
 0x506   : > { %v6279_v16 = vsel %vm13296_vm3, 0.0, %v6247_v52 }
 0x507   : > { %v6819_v30 = vpack.c.bf16 %v6279_v16, %v13425_v22 }
 0x50b   : > { %8587 = vmatmul.mubr.bf16.gmra.mrb[28].mxu1 %v13626_v28 }
 0x50c   : > { %8592 = vmatprep.mubr.msk.bf16.mxu1 %vm13627_vm15, %v11718_v9  ;;  %vm13642_vm15 = vmmov %vm13602_vm0  ;;  %v12121_v9 = vld [vmem:[%s12216_s4] ss:$0 sm:$0xff] }
 0x513   : > { %8593 = vmatmul.mubr.msk.bf16.vlgmr.msra.gmra.mrb[0].mxu1 %vm13629_vm4, %v13628_v54  ;;  %vm13644_vm4 = vmmov %vm13602_vm0 }
 0x514   : > { %8596 = vmatprep.mubr.msk.bf16.mxu1 %vm13630_vm13, %v11721_v45 }
 0x51b   : > { %8597 = vmatmul.mubr.msk.bf16.gmra.mrb[4].mxu1 %vm13631_vm11, %v11727_v5 }
 0x51c   : > { %8600 = vmatprep.mubr.msk.bf16.mxu1 %vm13632_vm9, %v11739_v14  ;;  %vm13645_vm9 = vmmov %vm13602_vm0 }
 0x523   : > { %8601 = vmatmul.mubr.msk.bf16.gmra.mrb[8].mxu1 %vm13633_vm14, %v11742_v47 }
 0x524   : > { %8604 = vmatprep.mubr.msk.bf16.mxu1 %vm13602_vm0, %v11745_v29 }
 0x52b   : > { %8605 = vmatmul.mubr.msk.bf16.gmra.mrb[12].mxu1 %vm13634_vm5, %v11753_v4  ;;  %vm13646_vm5 = vmmov %vm13602_vm0 }
 0x52c   : > { %8608 = vmatprep.mubr.msk.bf16.mxu1 %vm13635_vm2, %v11767_v10  ;;  %vm13647_vm2 = vmmov %vm13602_vm0 }
 0x533   : > { %8609 = vmatmul.mubr.msk.bf16.gmra.mrb[16].mxu1 %vm13636_vm8, %v11770_v62 }
 0x534   : > { %8612 = vmatprep.mubr.msk.bf16.mxu1 %vm13637_vm10, %v11773_v58 }
 0x53b   : > { %8613 = vmatmul.mubr.msk.bf16.gmra.mrb[20].mxu1 %vm13638_vm1, %v11779_v13 }
 0x53c   : > { %8616 = vmatprep.mubr.msk.bf16.mxu1 %vm13639_vm12, %v11791_v20  ;;  %vm13648_vm12 = vmmov %vm13602_vm0 }
 0x543   : > { %8617 = vmatmul.mubr.msk.bf16.gmra.mrb[24].mxu1 %vm13640_vm7, %v11794_v55 }
 0x544   : > { %8620 = vmatprep.mubr.msk.bf16.mxu1 %vm13642_vm15, %v11798_v32  ;;  %vm13650_vm15 = vmmov %vm13602_vm0 }
 0x54b   : > { %8621 = vmatmul.mubr.msk.bf16.gmra.mrb[28].mxu1 %vm13644_vm4, %v6819_v30  ;;  %vm13651_vm4 = vmmov %vm13602_vm0 }
 0x5e6   : > { %v8594_v45 = vpop.f32.mrb[0].mxu1 }
 0x5e7   : > { %v7075_v5 = vadd.f32 %v8594_v45, %v12121_v9  ;;  %v6907_v19 = vpop.f32.mrb[1].mxu1 }
 0x5e8   : > { %v7073_v14 = vadd.f32 %v12121_v9, %v6907_v19  ;;  %v8595_v47 = vpop.f32.mrb[2].mxu1 }
 0x5e9   : > { %vm7107_vm13 = vcmp.ge.f32.partialorder %v7075_v5, 0.0  ;;  %v7139_v29 = vmul.f32 0.2, %v7075_v5  ;;  %v7076_v4 = vadd.f32 %v8595_v47, %v12121_v9  ;;  %v6910_v10 = vpop.f32.mrb[3].mxu1 }
 0x5ea   : > { %vm7105_vm3 = vcmp.ge.f32.partialorder %v7073_v14, 0.0  ;;  %v7137_v62 = vmul.f32 0.2, %v7073_v14  ;;  %v7074_v58 = vadd.f32 %v12121_v9, %v6910_v10 }
 0x5eb   : > { %v7171_v13 = vsel %vm7107_vm13, %v7075_v5, %v7139_v29  ;;  %vm7108_vm11 = vcmp.ge.f32.partialorder %v7076_v4, 0.0  ;;  %v7140_v22 = vmul.f32 0.2, %v7076_v4 }
 0x5ec   : > { %7203 = vst.msk [vmem:[#allocation2 + $0x10] sm:$0xff] %vm13645_vm9, %v7171_v13  ;;  %v7169_v20 = vsel %vm7105_vm3, %v7073_v14, %v7137_v62  ;;  %vm7106_vm14 = vcmp.ge.f32.partialorder %v7074_v58, 0.0  ;;  %v7138_v55 = vmul.f32 0.2, %v7074_v58  ;;  %vm13652_vm9 = vmmov %vm13602_vm0 }
 0x5ed   : > { %7201 = vst.msk [vmem:[#allocation2] sm:$0xff] %vm13602_vm0, %v7169_v20  ;;  %v7172_v32 = vsel %vm7108_vm11, %v7076_v4, %v7140_v22 }
 0x5ee   : > { %7204 = vst.msk [vmem:[#allocation2 + $0x18] sm:$0xff] %vm13646_vm5, %v7172_v32  ;;  %v7170_v35 = vsel %vm7106_vm14, %v7074_v58, %v7138_v55  ;;  %v8598_v33 = vpop.f32.mrb[4].mxu1  ;;  %vm13653_vm5 = vmmov %vm13602_vm0 }
 0x5ef   : > { %7202 = vst.msk [vmem:[#allocation2 + $0x8] sm:$0xff] %vm13647_vm2, %v7170_v35  ;;  %v7079_v23 = vadd.f32 %v8598_v33, %v12121_v9  ;;  %v6923_v34 = vpop.f32.mrb[5].mxu1  ;;  %vm13654_vm2 = vmmov %vm13602_vm0 }
 0x5f0   : > { %v7077_v7 = vadd.f32 %v12121_v9, %v6923_v34  ;;  %v8599_v31 = vpop.f32.mrb[6].mxu1 }
 0x5f1   : > { %vm7111_vm8 = vcmp.ge.f32.partialorder %v7079_v23, 0.0  ;;  %v7143_v26 = vmul.f32 0.2, %v7079_v23  ;;  %v7080_v56 = vadd.f32 %v8599_v31, %v12121_v9  ;;  %v6926_v41 = vpop.f32.mrb[7].mxu1 }
 0x5f2   : > { %vm7109_vm10 = vcmp.ge.f32.partialorder %v7077_v7, 0.0  ;;  %v7141_v60 = vmul.f32 0.2, %v7077_v7  ;;  %v7078_v43 = vadd.f32 %v12121_v9, %v6926_v41 }
 0x5f3   : > { %v7175_v44 = vsel %vm7111_vm8, %v7079_v23, %v7143_v26  ;;  %vm7112_vm1 = vcmp.ge.f32.partialorder %v7080_v56, 0.0  ;;  %v7144_v48 = vmul.f32 0.2, %v7080_v56  ;;  %vm13655_vm8 = vmmov %vm13602_vm0 }
 0x5f4   : > { %7207 = vst.msk [vmem:[#allocation2 + $0x30] sm:$0xff] %vm13648_vm12, %v7175_v44  ;;  %v7173_v50 = vsel %vm7109_vm10, %v7077_v7, %v7141_v60  ;;  %vm7110_vm7 = vcmp.ge.f32.partialorder %v7078_v43, 0.0  ;;  %v7142_v40 = vmul.f32 0.2, %v7078_v43 }
 0x5f5   : > { %v7235_v38 = vld [vmem:[#allocation2 + $0x10] ss:$2 sm:$0xff]  ;;  %v7267_v39 = vld [vmem:[#allocation2 + $0x11] ss:$2 sm:$0xff]  ;;  %7205 = vst.msk [vmem:[#allocation2 + $0x20] sm:$0xff] %vm13649_vm6, %v7173_v50  ;;  %v7176_v46 = vsel %vm7112_vm1, %v7080_v56, %v7144_v48 }
 0x5f6   : > { %v7297_v63 = vadd.f32 %v7267_v39, %v7235_v38  ;;  %v7233_v36 = vld [vmem:[#allocation2] ss:$2 sm:$0xff]  ;;  %v7265_v6 = vld [vmem:[#allocation2 + $0x1] ss:$2 sm:$0xff]  ;;  %7208 = vst.msk [vmem:[#allocation2 + $0x38] sm:$0xff] %vm13650_vm15, %v7176_v46  ;;  %v7174_v21 = vsel %vm7110_vm7, %v7078_v43, %v7142_v40  ;;  %v8602_v25 = vpop.f32.mrb[8].mxu1  ;;  %vm13656_vm7 = vmmov %vm13602_vm0 }
 0x5f7   : > { %v7296_v51 = vadd.f32 %v7265_v6, %v7233_v36  ;;  %7206 = vst.msk [vmem:[#allocation2 + $0x28] sm:$0xff] %vm13651_vm4, %v7174_v21  ;;  %v7083_v61 = vadd.f32 %v8602_v25, %v12121_v9  ;;  %v6939_v18 = vpop.f32.mrb[9].mxu1  ;;  %vm13657_vm15 = vmmov %vm13602_vm0 }
 0x5f8   : > { %v7081_v3 = vadd.f32 %v12121_v9, %v6939_v18  ;;  %v8603_v42 = vpop.f32.mrb[10].mxu1  ;;  %vm13658_vm4 = vmmov %vm13602_vm0 }
 0x5f9   : > { %v7312_v1 = vadd.f32 %v7297_v63, %v7296_v51  ;;  %vm7115_vm13 = vcmp.ge.f32.partialorder %v7083_v61, 0.0  ;;  %v7147_v11 = vmul.f32 0.2, %v7083_v61  ;;  %v7084_v15 = vadd.f32 %v8603_v42, %v12121_v9  ;;  %v6942_v2 = vpop.f32.mrb[11].mxu1 }
 0x5fa   : > { %vm7113_vm3 = vcmp.ge.f32.partialorder %v7081_v3, 0.0  ;;  %v7145_v0 = vmul.f32 0.2, %v7081_v3  ;;  %v7082_v12 = vadd.f32 %v12121_v9, %v6942_v2 }
 0x5fb   : > { %v7313_v27 = vmul.f32 0.25, %v7312_v1  ;;  %v7179_v57 = vsel %vm7115_vm13, %v7083_v61, %v7147_v11  ;;  %vm7116_vm11 = vcmp.ge.f32.partialorder %v7084_v15, 0.0  ;;  %v7148_v49 = vmul.f32 0.2, %v7084_v15  ;;  %vm13659_vm13 = vmmov %vm13602_vm0 }
 0x5fc   : > { %7211 = vst.msk [vmem:[#allocation2 + $0x50] sm:$0xff] %vm13652_vm9, %v7179_v57  ;;  %v7177_v37 = vsel %vm7113_vm3, %v7081_v3, %v7145_v0  ;;  %vm7114_vm14 = vcmp.ge.f32.partialorder %v7082_v12, 0.0  ;;  %v7146_v24 = vmul.f32 0.2, %v7082_v12  ;;  %vm13660_vm3 = vmmov %vm13602_vm0 }
 0x5fd   : > { %7314 = vst.msk [vmem:[%s12146_s21] sm:$0xff] %vm13602_vm0, %v7313_v27  ;;  %v7239_v17 = vld [vmem:[#allocation2 + $0x30] ss:$2 sm:$0xff]  ;;  %v7271_v59 = vld [vmem:[#allocation2 + $0x31] ss:$2 sm:$0xff]  ;;  %v7180_v53 = vsel %vm7116_vm11, %v7084_v15, %v7148_v49 }
 0x5fe   : > { %7209 = vst.msk [vmem:[#allocation2 + $0x40] sm:$0xff] %vm13653_vm5, %v7177_v37  ;;  %v7299_v28 = vadd.f32 %v7271_v59, %v7239_v17  ;;  %v7237_v54 = vld [vmem:[#allocation2 + $0x20] ss:$2 sm:$0xff]  ;;  %v7269_v52 = vld [vmem:[#allocation2 + $0x21] ss:$2 sm:$0xff]  ;;  %v7178_v8 = vsel %vm7114_vm14, %v7082_v12, %v7146_v24  ;;  %v8606_v16 = vpop.f32.mrb[12].mxu1 }
 0x5ff   : > { %7212 = vst.msk [vmem:[#allocation2 + $0x58] sm:$0xff] %vm13654_vm2, %v7180_v53  ;;  %v7298_v30 = vadd.f32 %v7269_v52, %v7237_v54  ;;  %v7087_v45 = vadd.f32 %v8606_v16, %v12121_v9  ;;  %v6955_v5 = vpop.f32.mrb[13].mxu1  ;;  %vm13661_vm2 = vmmov %vm13602_vm0 }
 0x600   : > { %7210 = vst.msk [vmem:[#allocation2 + $0x48] sm:$0xff] %vm13655_vm8, %v7178_v8  ;;  %v7085_v19 = vadd.f32 %v12121_v9, %v6955_v5  ;;  %v8607_v14 = vpop.f32.mrb[14].mxu1  ;;  %vm13662_vm8 = vmmov %vm13602_vm0 }
 0x601   : > { %v7315_v47 = vadd.f32 %v7299_v28, %v7298_v30  ;;  %vm7119_vm10 = vcmp.ge.f32.partialorder %v7087_v45, 0.0  ;;  %v7151_v29 = vmul.f32 0.2, %v7087_v45  ;;  %v7088_v4 = vadd.f32 %v8607_v14, %v12121_v9  ;;  %v6958_v10 = vpop.f32.mrb[15].mxu1 }
 0x602   : > { %vm7117_vm1 = vcmp.ge.f32.partialorder %v7085_v19, 0.0  ;;  %v7149_v62 = vmul.f32 0.2, %v7085_v19  ;;  %v7086_v58 = vadd.f32 %v12121_v9, %v6958_v10 }
 0x603   : > { %v7316_v13 = vmul.f32 0.25, %v7315_v47  ;;  %v7183_v22 = vsel %vm7119_vm10, %v7087_v45, %v7151_v29  ;;  %vm7120_vm12 = vcmp.ge.f32.partialorder %v7088_v4, 0.0  ;;  %v7152_v20 = vmul.f32 0.2, %v7088_v4  ;;  %vm13663_vm10 = vmmov %vm13602_vm0 }
 0x604   : > { %7215 = vst.msk [vmem:[#allocation2 + $0x70] sm:$0xff] %vm13656_vm7, %v7183_v22  ;;  %v7181_v55 = vsel %vm7117_vm1, %v7085_v19, %v7149_v62  ;;  %vm7118_vm6 = vcmp.ge.f32.partialorder %v7086_v58, 0.0  ;;  %v7150_v32 = vmul.f32 0.2, %v7086_v58  ;;  %vm13664_vm1 = vmmov %vm13602_vm0 }
 0x605   : > { %7317 = vst.msk [vmem:[%s12146_s21 + $0x8] sm:$0xff] %vm13657_vm15, %v7316_v13  ;;  %v7184_v23 = vsel %vm7120_vm12, %v7088_v4, %v7152_v20  ;;  %vm13665_vm15 = vmmov %vm13602_vm0 }
 0x606   : > { %v7243_v35 = vld [vmem:[#allocation2 + $0x50] ss:$2 sm:$0xff]  ;;  %v7275_v33 = vld [vmem:[#allocation2 + $0x51] ss:$2 sm:$0xff]  ;;  %7213 = vst.msk [vmem:[#allocation2 + $0x60] sm:$0xff] %vm13658_vm4, %v7181_v55  ;;  %v7182_v26 = vsel %vm7118_vm6, %v7086_v58, %v7150_v32  ;;  %v8610_v56 = vpop.f32.mrb[16].mxu1 }
 0x607   : > { %v7301_v34 = vadd.f32 %v7275_v33, %v7243_v35  ;;  %v7241_v7 = vld [vmem:[#allocation2 + $0x40] ss:$2 sm:$0xff]  ;;  %v7273_v31 = vld [vmem:[#allocation2 + $0x41] ss:$2 sm:$0xff]  ;;  %7216 = vst.msk [vmem:[#allocation2 + $0x78] sm:$0xff] %vm13659_vm13, %v7184_v23  ;;  %v7091_v60 = vadd.f32 %v8610_v56, %v12121_v9  ;;  %v6971_v43 = vpop.f32.mrb[17].mxu1  ;;  %vm13666_vm13 = vmmov %vm13602_vm0 }
 0x608   : > { %v7300_v41 = vadd.f32 %v7273_v31, %v7241_v7  ;;  %7214 = vst.msk [vmem:[#allocation2 + $0x68] sm:$0xff] %vm13660_vm3, %v7182_v26  ;;  %v7089_v44 = vadd.f32 %v12121_v9, %v6971_v43  ;;  %v8611_v48 = vpop.f32.mrb[18].mxu1  ;;  %vm13667_vm3 = vmmov %vm13602_vm0 }
 0x609   : > { %vm7123_vm11 = vcmp.ge.f32.partialorder %v7091_v60, 0.0  ;;  %v7155_v40 = vmul.f32 0.2, %v7091_v60  ;;  %v7092_v38 = vadd.f32 %v8611_v48, %v12121_v9  ;;  %v6974_v39 = vpop.f32.mrb[19].mxu1 }
 0x60a   : > { %v7318_v50 = vadd.f32 %v7301_v34, %v7300_v41  ;;  %vm7121_vm9 = vcmp.ge.f32.partialorder %v7089_v44, 0.0  ;;  %v7153_v46 = vmul.f32 0.2, %v7089_v44  ;;  %v7090_v63 = vadd.f32 %v12121_v9, %v6974_v39 }
 0x60b   : > { %v7187_v6 = vsel %vm7123_vm11, %v7091_v60, %v7155_v40  ;;  %vm7124_vm14 = vcmp.ge.f32.partialorder %v7092_v38, 0.0  ;;  %v7156_v21 = vmul.f32 0.2, %v7092_v38  ;;  %vm13668_vm11 = vmmov %vm13602_vm0 }
 0x60c   : > { %v7319_v36 = vmul.f32 0.25, %v7318_v50  ;;  %7219 = vst.msk [vmem:[#allocation2 + $0x90] sm:$0xff] %vm13602_vm0, %v7187_v6  ;;  %v7185_v25 = vsel %vm7121_vm9, %v7089_v44, %v7153_v46  ;;  %vm7122_vm5 = vcmp.ge.f32.partialorder %v7090_v63, 0.0  ;;  %v7154_v51 = vmul.f32 0.2, %v7090_v63  ;;  %vm13669_vm9 = vmmov %vm13602_vm0 }
 0x60d   : > { %7217 = vst.msk [vmem:[#allocation2 + $0x80] sm:$0xff] %vm13662_vm8, %v7185_v25  ;;  %v7188_v3 = vsel %vm7124_vm14, %v7092_v38, %v7156_v21 }
 0x60e   : > { %7320 = vst.msk [vmem:[%s12146_s21 + $0x10] sm:$0xff] %vm13661_vm2, %v7319_v36  ;;  %v7247_v61 = vld [vmem:[#allocation2 + $0x70] ss:$2 sm:$0xff]  ;;  %v7279_v18 = vld [vmem:[#allocation2 + $0x71] ss:$2 sm:$0xff]  ;;  %v7186_v15 = vsel %vm7122_vm5, %v7090_v63, %v7154_v51  ;;  %v8614_v2 = vpop.f32.mrb[20].mxu1  ;;  %vm13670_vm2 = vmmov %vm13664_vm1 }
 0x60f   : > { %v7303_v42 = vadd.f32 %v7279_v18, %v7247_v61  ;;  %v7245_v1 = vld [vmem:[#allocation2 + $0x60] ss:$2 sm:$0xff]  ;;  %v7277_v11 = vld [vmem:[#allocation2 + $0x61] ss:$2 sm:$0xff]  ;;  %7220 = vst.msk [vmem:[#allocation2 + $0x98] sm:$0xff] %vm13663_vm10, %v7188_v3  ;;  %v7095_v12 = vadd.f32 %v8614_v2, %v12121_v9  ;;  %v6987_v27 = vpop.f32.mrb[21].mxu1  ;;  %vm13671_vm10 = vmmov %vm13664_vm1 }
 0x610   : > { %v7302_v0 = vadd.f32 %v7277_v11, %v7245_v1  ;;  %7218 = vst.msk [vmem:[#allocation2 + $0x88] sm:$0xff] %vm13664_vm1, %v7186_v15  ;;  %v7093_v57 = vadd.f32 %v12121_v9, %v6987_v27  ;;  %v8615_v49 = vpop.f32.mrb[22].mxu1 }
 0x611   : > { %vm7127_vm12 = vcmp.ge.f32.partialorder %v7095_v12, 0.0  ;;  %v7159_v24 = vmul.f32 0.2, %v7095_v12  ;;  %v7096_v17 = vadd.f32 %v8615_v49, %v12121_v9  ;;  %v6990_v59 = vpop.f32.mrb[23].mxu1 }
 0x612   : > { %v7321_v37 = vadd.f32 %v7303_v42, %v7302_v0  ;;  %vm7125_vm7 = vcmp.ge.f32.partialorder %v7093_v57, 0.0  ;;  %v7157_v53 = vmul.f32 0.2, %v7093_v57  ;;  %v7094_v28 = vadd.f32 %v12121_v9, %v6990_v59 }
 0x613   : > { %v7191_v52 = vsel %vm7127_vm12, %v7095_v12, %v7159_v24  ;;  %vm7128_vm6 = vcmp.ge.f32.partialorder %v7096_v17, 0.0  ;;  %v7160_v8 = vmul.f32 0.2, %v7096_v17  ;;  %vm13672_vm12 = vmmov %vm13664_vm1 }
 0x614   : > { %v7322_v54 = vmul.f32 0.25, %v7321_v37  ;;  %7223 = vst.msk [vmem:[#allocation2 + $0xb0] sm:$0xff] %vm13665_vm15, %v7191_v52  ;;  %v7189_v16 = vsel %vm7125_vm7, %v7093_v57, %v7157_v53  ;;  %vm7126_vm4 = vcmp.ge.f32.partialorder %v7094_v28, 0.0  ;;  %v7158_v30 = vmul.f32 0.2, %v7094_v28  ;;  %vm13673_vm7 = vmmov %vm13664_vm1 }
 0x615   : > { %7221 = vst.msk [vmem:[#allocation2 + $0xa0] sm:$0xff] %vm13667_vm3, %v7189_v16  ;;  %v7192_v19 = vsel %vm7128_vm6, %v7096_v17, %v7160_v8 }
 0x616   : > { %7323 = vst.msk [vmem:[%s12146_s21 + $0x18] sm:$0xff] %vm13666_vm13, %v7322_v54  ;;  %v7251_v45 = vld [vmem:[#allocation2 + $0x90] ss:$2 sm:$0xff]  ;;  %v7283_v5 = vld [vmem:[#allocation2 + $0x91] ss:$2 sm:$0xff]  ;;  %v7190_v4 = vsel %vm7126_vm4, %v7094_v28, %v7158_v30  ;;  %v8618_v10 = vpop.f32.mrb[24].mxu1  ;;  %vm13674_vm13 = vmmov %vm13664_vm1 }
 0x617   : > { %v7305_v14 = vadd.f32 %v7283_v5, %v7251_v45  ;;  %v7249_v47 = vld [vmem:[#allocation2 + $0x80] ss:$2 sm:$0xff]  ;;  %v7281_v29 = vld [vmem:[#allocation2 + $0x81] ss:$2 sm:$0xff]  ;;  %7224 = vst.msk [vmem:[#allocation2 + $0xb8] sm:$0xff] %vm13668_vm11, %v7192_v19  ;;  %v7099_v58 = vadd.f32 %v8618_v10, %v12121_v9  ;;  %v7003_v13 = vpop.f32.mrb[25].mxu1  ;;  %vm13675_vm11 = vmmov %vm13664_vm1 }
 0x618   : > { %v7304_v62 = vadd.f32 %v7281_v29, %v7249_v47  ;;  %7222 = vst.msk [vmem:[#allocation2 + $0xa8] sm:$0xff] %vm13669_vm9, %v7190_v4  ;;  %v7097_v22 = vadd.f32 %v12121_v9, %v7003_v13  ;;  %v8619_v20 = vpop.f32.mrb[26].mxu1  ;;  %vm13676_vm9 = vmmov %vm13664_vm1 }
 0x619   : > { %vm7131_vm14 = vcmp.ge.f32.partialorder %v7099_v58, 0.0  ;;  %v7163_v32 = vmul.f32 0.2, %v7099_v58  ;;  %v7100_v35 = vadd.f32 %v8619_v20, %v12121_v9  ;;  %v7006_v33 = vpop.f32.mrb[27].mxu1 }
 0x61a   : > { %v7324_v55 = vadd.f32 %v7305_v14, %v7304_v62  ;;  %vm7129_vm0 = vcmp.ge.f32.partialorder %v7097_v22, 0.0  ;;  %v7161_v23 = vmul.f32 0.2, %v7097_v22  ;;  %v7098_v34 = vadd.f32 %v12121_v9, %v7006_v33 }
 0x61b   : > { %v7195_v31 = vsel %vm7131_vm14, %v7099_v58, %v7163_v32  ;;  %vm7132_vm5 = vcmp.ge.f32.partialorder %v7100_v35, 0.0  ;;  %v7164_v26 = vmul.f32 0.2, %v7100_v35  ;;  %vm13677_vm14 = vmmov %vm13664_vm1 }
 0x61c   : > { %v7325_v7 = vmul.f32 0.25, %v7324_v55  ;;  %7227 = vst.msk [vmem:[#allocation2 + $0xd0] sm:$0xff] %vm13670_vm2, %v7195_v31  ;;  %v7193_v56 = vsel %vm7129_vm0, %v7097_v22, %v7161_v23  ;;  %vm7130_vm8 = vcmp.ge.f32.partialorder %v7098_v34, 0.0  ;;  %v7162_v41 = vmul.f32 0.2, %v7098_v34  ;;  %vm13678_vm0 = vmmov %vm13664_vm1 }
 0x61d   : > { %7225 = vst.msk [vmem:[#allocation2 + $0xc0] sm:$0xff] %vm13664_vm1, %v7193_v56  ;;  %v7196_v44 = vsel %vm7132_vm5, %v7100_v35, %v7164_v26  ;;  %vm13679_vm5 = vmmov %vm13678_vm0 }
 0x61e   : > { %7326 = vst.msk [vmem:[%s12146_s21 + $0x20] sm:$0xff] %vm13671_vm10, %v7325_v7  ;;  %v7255_v60 = vld [vmem:[#allocation2 + $0xb0] ss:$2 sm:$0xff]  ;;  %v7287_v43 = vld [vmem:[#allocation2 + $0xb1] ss:$2 sm:$0xff]  ;;  %v7194_v38 = vsel %vm7130_vm8, %v7098_v34, %v7162_v41  ;;  %v8622_v39 = vpop.f32.mrb[28].mxu1  ;;  %vm13680_vm2 = vmmov %vm13678_vm0 }
 0x61f   : > { %v7307_v48 = vadd.f32 %v7287_v43, %v7255_v60  ;;  %v7253_v50 = vld [vmem:[#allocation2 + $0xa0] ss:$2 sm:$0xff]  ;;  %v7285_v40 = vld [vmem:[#allocation2 + $0xa1] ss:$2 sm:$0xff]  ;;  %7228 = vst.msk [vmem:[#allocation2 + $0xd8] sm:$0xff] %vm13672_vm12, %v7196_v44  ;;  %v7103_v63 = vadd.f32 %v8622_v39, %v12121_v9  ;;  %v7019_v36 = vpop.f32.mrb[29].mxu1 }
 0x620   : > { %v7306_v46 = vadd.f32 %v7285_v40, %v7253_v50  ;;  %7226 = vst.msk [vmem:[#allocation2 + $0xc8] sm:$0xff] %vm13673_vm7, %v7194_v38  ;;  %v7101_v6 = vadd.f32 %v12121_v9, %v7019_v36  ;;  %v8623_v21 = vpop.f32.mrb[30].mxu1 }
 0x621   : > { %vm7135_vm6 = vcmp.ge.f32.partialorder %v7103_v63, 0.0  ;;  %v7167_v51 = vmul.f32 0.2, %v7103_v63  ;;  %v7104_v61 = vadd.f32 %v8623_v21, %v12121_v9  ;;  %v7022_v18 = vpop.f32.mrb[31].mxu1 }
 0x622   : > { %v7327_v25 = vadd.f32 %v7307_v48, %v7306_v46  ;;  %vm7133_vm15 = vcmp.ge.f32.partialorder %v7101_v6, 0.0  ;;  %v7165_v3 = vmul.f32 0.2, %v7101_v6  ;;  %v7102_v42 = vadd.f32 %v12121_v9, %v7022_v18 }
 0x623   : > { %v7199_v11 = vsel %vm7135_vm6, %v7103_v63, %v7167_v51  ;;  %vm7136_vm4 = vcmp.ge.f32.partialorder %v7104_v61, 0.0  ;;  %v7168_v15 = vmul.f32 0.2, %v7104_v61 }
 0x624   : > { %v7328_v1 = vmul.f32 0.25, %v7327_v25  ;;  %7231 = vst.msk [vmem:[#allocation2 + $0xf0] sm:$0xff] %vm13674_vm13, %v7199_v11  ;;  %v7197_v2 = vsel %vm7133_vm15, %v7101_v6, %v7165_v3  ;;  %vm7134_vm3 = vcmp.ge.f32.partialorder %v7102_v42, 0.0  ;;  %v7166_v0 = vmul.f32 0.2, %v7102_v42 }
 0x625   : > { %7229 = vst.msk [vmem:[#allocation2 + $0xe0] sm:$0xff] %vm13676_vm9, %v7197_v2  ;;  %v7200_v57 = vsel %vm7136_vm4, %v7104_v61, %v7168_v15 }
 0x626   : > { %7329 = vst.msk [vmem:[%s12146_s21 + $0x28] sm:$0xff] %vm13675_vm11, %v7328_v1  ;;  %v7259_v12 = vld [vmem:[#allocation2 + $0xd0] ss:$2 sm:$0xff]  ;;  %v7291_v27 = vld [vmem:[#allocation2 + $0xd1] ss:$2 sm:$0xff]  ;;  %v7198_v24 = vsel %vm7134_vm3, %v7102_v42, %v7166_v0 }
 0x627   : > { %v7309_v49 = vadd.f32 %v7291_v27, %v7259_v12  ;;  %v7257_v37 = vld [vmem:[#allocation2 + $0xc0] ss:$2 sm:$0xff]  ;;  %v7289_v9 = vld [vmem:[#allocation2 + $0xc1] ss:$2 sm:$0xff]  ;;  %7232 = vst.msk [vmem:[#allocation2 + $0xf8] sm:$0xff] %vm13677_vm14, %v7200_v57 }
 0x628   : > { %v7308_v17 = vadd.f32 %v7289_v9, %v7257_v37  ;;  %7230 = vst.msk [vmem:[#allocation2 + $0xe8] sm:$0xff] %vm13678_vm0, %v7198_v24 }
 0x62a   : > { %v7330_v59 = vadd.f32 %v7309_v49, %v7308_v17 }
 0x62c   : > { %v7331_v53 = vmul.f32 0.25, %v7330_v59 }
 0x62e   : > { %7332 = vst.msk [vmem:[%s12146_s21 + $0x30] sm:$0xff] %vm13679_vm5, %v7331_v53  ;;  %v7263_v28 = vld [vmem:[#allocation2 + $0xf0] ss:$2 sm:$0xff]  ;;  %v7295_v54 = vld [vmem:[#allocation2 + $0xf1] ss:$2 sm:$0xff] }
 0x62f   : > { %v7311_v52 = vadd.f32 %v7295_v54, %v7263_v28  ;;  %v7261_v8 = vld [vmem:[#allocation2 + $0xe0] ss:$2 sm:$0xff]  ;;  %v7293_v16 = vld [vmem:[#allocation2 + $0xe1] ss:$2 sm:$0xff] }
 0x630   : > { %v7310_v30 = vadd.f32 %v7293_v16, %v7261_v8 }
 0x632   : > { %v7333_v45 = vadd.f32 %v7311_v52, %v7310_v30 }
 0x634   : > { %v7334_v5 = vmul.f32 0.25, %v7333_v45 }
 0x636   : > { %7335 = vst.msk [vmem:[%s12146_s21 + $0x38] sm:$0xff] %vm13680_vm2, %v7334_v5 }
 0x637 PF: > { %s15_s18 = sadd.s32 1, %s9170_s18  }
 0x638   : > { %p12_p4 = scmp.ge.s32.totalorder %s15_s18, 4  }
 0x63a   :  { %14 = sbr.rel (!%p12_p4) target bundleno = 1 (0x1), region = 117 }

</bundles_post_ra>
